<compile_context>
chip_gen: v7x
topology: tpu7x:2x2x1
jax: 0.10.0
libtpu: 0.0.40
codegen_flags: <defaults>
</compile_context>

<pallas_src>
import functools
import math

import jax
import jax.numpy as jnp
import numpy as np
from jax.experimental import pallas as pl
from jax.experimental.pallas import tpu as pltpu


# ----------------------------------------------------------------------------
# Kernel 1: input projection, hoisted out of the serial recurrence.
# Parallel grid over time blocks; one wide matmul covers both directions:
#   gi[:, 0:3H]  = x @ W_ih_f + b_ih_f      (forward direction)
#   gi[:, 3H:6H] = x @ W_ih_b + b_ih_b      (backward direction)
# x and W are bf16 (MXU-native), accumulation and gi are f32.
# ----------------------------------------------------------------------------
def _input_proj_kernel(emb_ref, w_ref, b_ref, gi_ref):
    x = emb_ref[...]                                           # (rows, H) bf16
    gi_ref[...] = jnp.dot(x, w_ref[...],
                          preferred_element_type=jnp.float32) + b_ref[...]


# ----------------------------------------------------------------------------
# Kernel 2/3: one GRU direction over the (serial) time-block grid.
# Each grid step handles block_T timesteps (unrolled at trace time); the
# hidden state is carried in the constant-index (B, H) output block h_ref.
# Packed-sequence semantics: a row is updated only while t < length[b];
# padded output positions are written as 0 (matches pad_packed_sequence).
# The forward pass (fuse_add=True) also adds the precomputed backward
# output tile so the fwd+bwd sum never needs a separate pass.
# ----------------------------------------------------------------------------
def _gru_dir_kernel(lens_ref, gi_ref, whh_ref, bhh_ref, *rest,
                    hidden_size, batch, block_T, reverse, fuse_add):
    if fuse_add:
        add_ref, out_ref, h_ref = rest
    else:
        out_ref, h_ref = rest
        add_ref = None

    H, B, TT = hidden_size, batch, block_T
    c = pl.program_id(0)
    nc = pl.num_programs(0)

    @pl.when(c == 0)
    def _init():
        h_ref[...] = jnp.zeros_like(h_ref)      # hidden=None -> zero init

    lens = lens_ref[...]                        # (B, 1) int32
    w_hh = whh_ref[...]                         # (H, 3H) bf16 (hoisted load)
    b_hh = bhh_ref[...]                         # (1, 3H) f32
    base = (nc - 1 - c) * TT if reverse else c * TT

    h = h_ref[...]                              # (B, H) f32 carry
    for i in range(TT):                         # compile-time unrolled block
        j = TT - 1 - i if reverse else i        # row group inside the block
        t = base + j                            # global timestep
        mask = lens > t                         # (B, 1) packed-sequence mask

        gi = gi_ref[j * B:(j + 1) * B, :]       # (B, 3H) precomputed x@W_ih+b
        gh = jnp.dot(h.astype(jnp.bfloat16), w_hh,
                     preferred_element_type=jnp.float32) + b_hh
        # PyTorch gate order: r, z, n   (gate math kept in f32)
        r = jax.nn.sigmoid(gi[:, 0:H] + gh[:, 0:H])
        z = jax.nn.sigmoid(gi[:, H:2 * H] + gh[:, H:2 * H])
        n = jnp.tanh(gi[:, 2 * H:] + r * gh[:, 2 * H:])
        h = jnp.where(mask, (1.0 - z) * n + z * h, h)

        o = jnp.where(mask, h, 0.0)
        if fuse_add:
            o = o + add_ref[j * B:(j + 1) * B, :]
        out_ref[j * B:(j + 1) * B, :] = o

    h_ref[...] = h                              # carry persists across grid


# ----------------------------------------------------------------------------
# Wrapper = EncoderRNN.forward
# ----------------------------------------------------------------------------
def encoder_rnn_forward(params, input_seq, input_lengths, *,
                        block_T=None, single_buffer_weights=True):
    """input_seq: (T, B) int32, input_lengths: (B,) int32 (max == T)."""
    H = params["hidden_size"]
    T, B = input_seq.shape
    if block_T is None:
        block_T = next(tt for tt in (8, 4, 2, 1) if T % tt == 0)
    assert T % block_T == 0
    nc = T // block_T
    rows = block_T * B

    # ---- plain-JAX glue: embedding gather + dtype casts + weight concat ----
    emb = jnp.take(params["embedding"], input_seq.reshape(T * B), axis=0)
    emb = emb.astype(jnp.bfloat16)                           # (T*B, H) bf16

    lens2d = input_lengths.astype(jnp.int32).reshape(B, 1)

    bf16 = lambda k: params[k].astype(jnp.bfloat16)
    w_ih_cat = jnp.concatenate([bf16("w_ih_f"), bf16("w_ih_b")], axis=1)
    b_ih_cat = jnp.concatenate([params["b_ih_f"], params["b_ih_b"]], axis=1)
    w_hh_f, w_hh_b = bf16("w_hh_f"), bf16("w_hh_b")
    b_hh_f, b_hh_b = params["b_hh_f"], params["b_hh_b"]

    def cparams(sem):
        return pltpu.CompilerParams(
            dimension_semantics=(sem,),
            vmem_limit_bytes=48 * 1024 * 1024)   # v7x-safe (< 64 MiB physical)

    def const_spec(shape):
        # Loop-invariant operand: constant block index; single-buffered when
        # supported (no point double-buffering data that never changes).
        idx = lambda c, _n=len(shape): (0,) * _n
        if single_buffer_weights:
            return pl.BlockSpec(shape, idx, pipeline_mode=pl.Buffered(1))
        return pl.BlockSpec(shape, idx)

    # ---- 1) hoisted input projection (parallel grid, both directions) -----
    # One (T*B, 6H) buffer: columns [0,3H) = forward gi, [3H,6H) = backward gi.
    gi = pl.pallas_call(
        _input_proj_kernel,
        out_shape=jax.ShapeDtypeStruct((T * B, 6 * H), jnp.float32),
        grid_spec=pltpu.PrefetchScalarGridSpec(
            num_scalar_prefetch=0, grid=(nc,),
            in_specs=[pl.BlockSpec((rows, H), lambda c: (c, 0)),
                      const_spec((H, 6 * H)), const_spec((1, 6 * H))],
            out_specs=pl.BlockSpec((rows, 6 * H), lambda c: (c, 0))),
        compiler_params=cparams("parallel"),
    )(emb, w_ih_cat, b_ih_cat)

    seq_spec_fwd = pl.BlockSpec((rows, H), lambda c: (c, 0))
    seq_spec_bwd = pl.BlockSpec((rows, H), lambda c: (nc - 1 - c, 0))
    # Column-block index selects the direction inside the shared gi buffer.
    gi_spec_fwd = pl.BlockSpec((rows, 3 * H), lambda c: (c, 0))
    gi_spec_bwd = pl.BlockSpec((rows, 3 * H), lambda c: (nc - 1 - c, 1))
    h_spec = pl.BlockSpec((B, H), lambda c: (0, 0))
    rec_out = (jax.ShapeDtypeStruct((T * B, H), jnp.float32),
               jax.ShapeDtypeStruct((B, H), jnp.float32))

    # ---- 2) backward direction (serial over reversed time blocks) ---------
    bwd_kernel = functools.partial(_gru_dir_kernel, hidden_size=H, batch=B,
                                   block_T=block_T, reverse=True,
                                   fuse_add=False)
    out_b, h_b = pl.pallas_call(
        bwd_kernel, out_shape=rec_out,
        grid_spec=pltpu.PrefetchScalarGridSpec(
            num_scalar_prefetch=0, grid=(nc,),
            in_specs=[const_spec((B, 1)), gi_spec_bwd,
                      const_spec((H, 3 * H)), const_spec((1, 3 * H))],
            out_specs=[seq_spec_bwd, h_spec]),
        compiler_params=cparams("arbitrary"),
    )(lens2d, gi, w_hh_b, b_hh_b)

    # ---- 3) forward direction with the fwd+bwd output sum fused in --------
    fwd_kernel = functools.partial(_gru_dir_kernel, hidden_size=H, batch=B,
                                   block_T=block_T, reverse=False,
                                   fuse_add=True)
    out_sum, h_f = pl.pallas_call(
        fwd_kernel, out_shape=rec_out,
        grid_spec=pltpu.PrefetchScalarGridSpec(
            num_scalar_prefetch=0, grid=(nc,),
            in_specs=[const_spec((B, 1)), gi_spec_fwd,
                      const_spec((H, 3 * H)), const_spec((1, 3 * H)),
                      seq_spec_fwd],                         # out_b tile to add
            out_specs=[seq_spec_fwd, h_spec]),
        compiler_params=cparams("arbitrary"),
    )(lens2d, gi, w_hh_f, b_hh_f, out_b)

    outputs = out_sum.reshape(T, B, H)
    hidden = jnp.stack([h_f, h_b])               # (2, B, H)
    return outputs, hidden


# ----------------------------------------------------------------------------
# Deterministic parameter init (PyTorch-style uniform(-1/sqrt(H), 1/sqrt(H)))
# ----------------------------------------------------------------------------
def init_params(key, vocab, hidden_size):
    H = hidden_size
    k = 1.0 / math.sqrt(H)
    keys = jax.random.split(key, 9)
    u = lambda kk, shape: jax.random.uniform(kk, shape, jnp.float32, -k, k)
    return {
        "hidden_size": H,
        "embedding": jax.random.normal(keys[0], (vocab, H), jnp.float32),
        # stored pre-transposed: (H, 3H), gate order [r | z | n]
        "w_ih_f": u(keys[1], (H, 3 * H)), "w_hh_f": u(keys[2], (H, 3 * H)),
        "b_ih_f": u(keys[3], (1, 3 * H)), "b_hh_f": u(keys[4], (1, 3 * H)),
        "w_ih_b": u(keys[5], (H, 3 * H)), "w_hh_b": u(keys[6], (H, 3 * H)),
        "b_ih_b": u(keys[7], (1, 3 * H)), "b_hh_b": u(keys[8], (1, 3 * H)),
    }


# ----------------------------------------------------------------------------
# Pure-JAX f32 reference (same packed-GRU semantics) for the correctness check
# ----------------------------------------------------------------------------
def _ref_cell(x, h, w_ih, w_hh, b_ih, b_hh, H):
    hi = jax.lax.Precision.HIGHEST
    gi = jnp.dot(x, w_ih, precision=hi) + b_ih
    gh = jnp.dot(h, w_hh, precision=hi) + b_hh
    r = jax.nn.sigmoid(gi[:, 0:H] + gh[:, 0:H])
    z = jax.nn.sigmoid(gi[:, H:2 * H] + gh[:, H:2 * H])
    n = jnp.tanh(gi[:, 2 * H:] + r * gh[:, 2 * H:])
    return (1.0 - z) * n + z * h


def reference_forward(params, input_seq, input_lengths):
    H = params["hidden_size"]
    emb = jnp.take(params["embedding"], input_seq, axis=0)
    T, B, _ = emb.shape
    lens = input_lengths.astype(jnp.int32)

    h_f = jnp.zeros((B, H), jnp.float32)
    h_b = jnp.zeros((B, H), jnp.float32)
    out_f, out_b = [], [None] * T
    for t in range(T):
        m = (lens > t)[:, None]
        hn = _ref_cell(emb[t], h_f, params["w_ih_f"], params["w_hh_f"],
                       params["b_ih_f"], params["b_hh_f"], H)
        h_f = jnp.where(m, hn, h_f)
        out_f.append(jnp.where(m, h_f, 0.0))
    for t in range(T - 1, -1, -1):
        m = (lens > t)[:, None]
        hn = _ref_cell(emb[t], h_b, params["w_ih_b"], params["w_hh_b"],
                       params["b_ih_b"], params["b_hh_b"], H)
        h_b = jnp.where(m, hn, h_b)
        out_b[t] = jnp.where(m, h_b, 0.0)
    outputs = jnp.stack(out_f) + jnp.stack(out_b)
    hidden = jnp.stack([h_f, h_b])
    return outputs, hidden


if __name__ == "__main__":
    # hardware-tile-friendly demo shapes: B multiple of 8, H / 3H lane-dense
    T, B, H, VOCAB = 16, 8, 128, 32
    key = jax.random.PRNGKey(0)
    k_p, k_tok = jax.random.split(key)

    params = init_params(k_p, VOCAB, H)
    input_seq = jax.random.randint(k_tok, (T, B), 0, VOCAB, dtype=jnp.int32)
    # pack_padded_sequence expects descending lengths; max length == T
    input_lengths = jnp.array([16, 15, 12, 9, 7, 5, 3, 1], dtype=jnp.int32)

    run = jax.jit(lambda s, l: encoder_rnn_forward(params, s, l))
    try:
        outputs, hidden = run(input_seq, input_lengths)
        jax.block_until_ready((outputs, hidden))
    except Exception:
        # Fallback if pl.Buffered(1) single-buffering of loop-invariant
        # operands is not supported by this jax/libtpu combination.
        run = jax.jit(lambda s, l: encoder_rnn_forward(
            params, s, l, single_buffer_weights=False))
        outputs, hidden = run(input_seq, input_lengths)
        jax.block_until_ready((outputs, hidden))

    ref_out, ref_hid = reference_forward(params, input_seq, input_lengths)
    # bf16 MXU operands (f32 accumulation) vs. a HIGHEST-precision f32
    # reference across a 16-step recurrence -> modest tolerance.
    np.testing.assert_allclose(np.asarray(outputs), np.asarray(ref_out),
                               rtol=3e-2, atol=3e-2)
    np.testing.assert_allclose(np.asarray(hidden), np.asarray(ref_hid),
                               rtol=3e-2, atol=3e-2)

    assert outputs.shape == (T, B, H) and hidden.shape == (2, B, H)
    print("KERNEL_OK")
</pallas_src>

<mosaic_0001>
module attributes {stable_mosaic.version = 11 : i64} {
  func.func @_input_proj_kernel(%arg0: i32, %arg1: memref<64x128xbf16, #tpu.memory_space<vmem>>, %arg2: memref<128x768xbf16, #tpu.memory_space<vmem>>, %arg3: memref<1x768xf32, #tpu.memory_space<vmem>>, %arg4: memref<64x768xf32, #tpu.memory_space<vmem>>) attributes {dimension_semantics = [#tpu.dimension_semantics<parallel>], iteration_bounds = array<i64: 2>, scalar_prefetch = 0 : i64, scratch_operands = 0 : i64, tpu.core_type = #tpu.core_type<tc>, window_params = [{transform_indices = @transform_0, window_bounds = array<i64: 64, 128>}, {pipeline_mode = #tpu.pipeline_mode<synchronous>, transform_indices = @transform_1, window_bounds = array<i64: 128, 768>}, {pipeline_mode = #tpu.pipeline_mode<synchronous>, transform_indices = @transform_2, window_bounds = array<i64: 1, 768>}, {transform_indices = @transform_3, window_bounds = array<i64: 64, 768>}]} {
    %c0 = arith.constant 0 : index
    %c0_0 = arith.constant 0 : index
    %0 = vector.load %arg1[%c0, %c0_0] : memref<64x128xbf16, #tpu.memory_space<vmem>>, vector<64x128xbf16>
    %c0_1 = arith.constant 0 : index
    %c0_2 = arith.constant 0 : index
    %1 = vector.load %arg2[%c0_1, %c0_2] : memref<128x768xbf16, #tpu.memory_space<vmem>>, vector<128x768xbf16>
    %cst = arith.constant dense<0.000000e+00> : vector<64x768xf32>
    %2 = tpu.matmul %0, %1, %cst {dimension_numbers = #tpu.dot_dimension_numbers<[1], [0], [0], [1], [0, 0, 1, 1], [], []>} : vector<64x128xbf16>, vector<128x768xbf16>, vector<64x768xf32> -> vector<64x768xf32>
    %c0_3 = arith.constant 0 : index
    %c0_4 = arith.constant 0 : index
    %3 = vector.load %arg3[%c0_3, %c0_4] : memref<1x768xf32, #tpu.memory_space<vmem>>, vector<1x768xf32>
    %4 = vector.broadcast %3 : vector<1x768xf32> to vector<64x768xf32>
    %5 = arith.addf %2, %4 : vector<64x768xf32>
    %c0_5 = arith.constant 0 : index
    %c0_6 = arith.constant 0 : index
    %6 = vector.load %arg4[%c0_5, %c0_6] : memref<64x768xf32, #tpu.memory_space<vmem>>, vector<64x768xf32>
    tpu.vector_store %arg4[%c0_5, %c0_6], %5 {strides = array<i32>} : memref<64x768xf32, #tpu.memory_space<vmem>>, vector<64x768xf32>,
    return
  }
  func.func @transform_0(%arg0: i32) -> (i32, i32) {
    %c0_i32 = arith.constant 0 : i32
    %c0_i32_0 = arith.constant 0 : i32
    return %arg0, %c0_i32 : i32, i32
  }
  func.func @transform_1(%arg0: i32) -> (i32, i32) {
    %c0_i32 = arith.constant 0 : i32
    %c0_i32_0 = arith.constant 0 : i32
    %c0_i32_1 = arith.constant 0 : i32
    return %c0_i32, %c0_i32_0 : i32, i32
  }
  func.func @transform_2(%arg0: i32) -> (i32, i32) {
    %c0_i32 = arith.constant 0 : i32
    %c0_i32_0 = arith.constant 0 : i32
    %c0_i32_1 = arith.constant 0 : i32
    return %c0_i32, %c0_i32_0 : i32, i32
  }
  func.func @transform_3(%arg0: i32) -> (i32, i32) {
    %c0_i32 = arith.constant 0 : i32
    %c0_i32_0 = arith.constant 0 : i32
    return %arg0, %c0_i32 : i32, i32
  }
}

module attributes {stable_mosaic.version = 11 : i64} {
  func.func @_gru_dir_kernel(%arg0: i32, %arg1: memref<8x1xi32, #tpu.memory_space<vmem>>, %arg2: memref<64x384xf32, #tpu.memory_space<vmem>>, %arg3: memref<128x384xbf16, #tpu.memory_space<vmem>>, %arg4: memref<1x384xf32, #tpu.memory_space<vmem>>, %arg5: memref<64x128xf32, #tpu.memory_space<vmem>>, %arg6: memref<8x128xf32, #tpu.memory_space<vmem>>) attributes {dimension_semantics = [#tpu.dimension_semantics<arbitrary>], iteration_bounds = array<i64: 2>, scalar_prefetch = 0 : i64, scratch_operands = 0 : i64, tpu.core_type = #tpu.core_type<tc>, window_params = [{pipeline_mode = #tpu.pipeline_mode<synchronous>, transform_indices = @transform_0, window_bounds = array<i64: 8, 1>}, {transform_indices = @transform_1, window_bounds = array<i64: 64, 384>}, {pipeline_mode = #tpu.pipeline_mode<synchronous>, transform_indices = @transform_2, window_bounds = array<i64: 128, 384>}, {pipeline_mode = #tpu.pipeline_mode<synchronous>, transform_indices = @transform_3, window_bounds = array<i64: 1, 384>}, {transform_indices = @transform_4, window_bounds = array<i64: 64, 128>}, {pipeline_mode = #tpu.pipeline_mode<synchronous>, transform_indices = @transform_5, window_bounds = array<i64: 8, 128>}]} {
    %c0_i32 = arith.constant 0 : i32
    %0 = arith.cmpi eq, %arg0, %c0_i32 : i32
    %1 = arith.extui %0 : i1 to i32
    %c0_i32_0 = arith.constant 0 : i32
    %2 = arith.cmpi ne, %1, %c0_i32_0 : i32
    scf.if %2 {
      %cst_76 = arith.constant 0.000000e+00 : f32
      %346 = vector.broadcast %cst_76 : f32 to vector<8x128xf32>
      %c0_77 = arith.constant 0 : index
      %c0_78 = arith.constant 0 : index
      %347 = vector.load %arg6[%c0_77, %c0_78] : memref<8x128xf32, #tpu.memory_space<vmem>>, vector<8x128xf32>
      tpu.vector_store %arg6[%c0_77, %c0_78], %346 {strides = array<i32>} : memref<8x128xf32, #tpu.memory_space<vmem>>, vector<8x128xf32>,
    } else {
    }
    %c0 = arith.constant 0 : index
    %c0_1 = arith.constant 0 : index
    %3 = vector.load %arg1[%c0, %c0_1] : memref<8x1xi32, #tpu.memory_space<vmem>>, vector<8x1xi32>
    %c0_2 = arith.constant 0 : index
    %c0_3 = arith.constant 0 : index
    %4 = vector.load %arg3[%c0_2, %c0_3] : memref<128x384xbf16, #tpu.memory_space<vmem>>, vector<128x384xbf16>
    %c0_4 = arith.constant 0 : index
    %c0_5 = arith.constant 0 : index
    %5 = vector.load %arg4[%c0_4, %c0_5] : memref<1x384xf32, #tpu.memory_space<vmem>>, vector<1x384xf32>
    %c1_i32 = arith.constant 1 : i32
    %6 = arith.subi %c1_i32, %arg0 : i32
    %c8_i32 = arith.constant 8 : i32
    %7 = arith.muli %6, %c8_i32 : i32
    %c0_6 = arith.constant 0 : index
    %c0_7 = arith.constant 0 : index
    %8 = vector.load %arg6[%c0_6, %c0_7] : memref<8x128xf32, #tpu.memory_space<vmem>>, vector<8x128xf32>
    %c7_i32 = arith.constant 7 : i32
    %9 = arith.addi %7, %c7_i32 : i32
    %10 = vector.broadcast %9 : i32 to vector<8x1xi32>
    %11 = arith.cmpi sgt, %3, %10 : vector<8x1xi32>
    %c56 = arith.constant 56 : index
    %c0_8 = arith.constant 0 : index
    %12 = vector.load %arg2[%c56, %c0_8] : memref<64x384xf32, #tpu.memory_space<vmem>>, vector<8x384xf32>
    %13 = arith.truncf %8 : vector<8x128xf32> to vector<8x128xbf16>
    %cst = arith.constant dense<0.000000e+00> : vector<8x384xf32>
    %14 = tpu.matmul %13, %4, %cst {dimension_numbers = #tpu.dot_dimension_numbers<[1], [0], [0], [1], [0, 0, 1, 1], [], []>} : vector<8x128xbf16>, vector<128x384xbf16>, vector<8x384xf32> -> vector<8x384xf32>
    %15 = vector.broadcast %5 : vector<1x384xf32> to vector<8x384xf32>
    %16 = arith.addf %14, %15 : vector<8x384xf32>
    %17 = vector.extract_strided_slice %12 {offsets = [0, 0], sizes = [8, 128], strides = [1, 1]} : vector<8x384xf32> to vector<8x128xf32>
    %18 = vector.extract_strided_slice %16 {offsets = [0, 0], sizes = [8, 128], strides = [1, 1]} : vector<8x384xf32> to vector<8x128xf32>
    %19 = arith.addf %17, %18 : vector<8x128xf32>
    %20 = arith.negf %19 : vector<8x128xf32>
    %21 = math.exp %20 : vector<8x128xf32>
    %cst_9 = arith.constant 1.000000e+00 : f32
    %22 = vector.broadcast %cst_9 : f32 to vector<8x128xf32>
    %23 = arith.addf %22, %21 : vector<8x128xf32>
    %24 = arith.divf %22, %23 : vector<8x128xf32>
    %25 = vector.extract_strided_slice %12 {offsets = [0, 128], sizes = [8, 128], strides = [1, 1]} : vector<8x384xf32> to vector<8x128xf32>
    %26 = vector.extract_strided_slice %16 {offsets = [0, 128], sizes = [8, 128], strides = [1, 1]} : vector<8x384xf32> to vector<8x128xf32>
    %27 = arith.addf %25, %26 : vector<8x128xf32>
    %28 = arith.negf %27 : vector<8x128xf32>
    %29 = math.exp %28 : vector<8x128xf32>
    %cst_10 = arith.constant 1.000000e+00 : f32
    %30 = vector.broadcast %cst_10 : f32 to vector<8x128xf32>
    %31 = arith.addf %30, %29 : vector<8x128xf32>
    %32 = arith.divf %30, %31 : vector<8x128xf32>
    %33 = vector.extract_strided_slice %12 {offsets = [0, 256], sizes = [8, 128], strides = [1, 1]} : vector<8x384xf32> to vector<8x128xf32>
    %34 = vector.extract_strided_slice %16 {offsets = [0, 256], sizes = [8, 128], strides = [1, 1]} : vector<8x384xf32> to vector<8x128xf32>
    %35 = arith.mulf %24, %34 : vector<8x128xf32>
    %36 = arith.addf %33, %35 : vector<8x128xf32>
    %37 = math.tanh %36 : vector<8x128xf32>
    %cst_11 = arith.constant 1.000000e+00 : f32
    %38 = vector.broadcast %cst_11 : f32 to vector<8x128xf32>
    %39 = arith.subf %38, %32 : vector<8x128xf32>
    %40 = arith.mulf %39, %37 : vector<8x128xf32>
    %41 = arith.mulf %32, %8 : vector<8x128xf32>
    %42 = arith.addf %40, %41 : vector<8x128xf32>
    %43 = vector.shape_cast %11 : vector<8x1xi1> to vector<8x1xi1>
    %44 = vector.broadcast %43 : vector<8x1xi1> to vector<8x128xi1>
    %45 = arith.select %44, %42, %8 : vector<8x128xi1>, vector<8x128xf32>
    %cst_12 = arith.constant 0.000000e+00 : f32
    %46 = vector.shape_cast %11 : vector<8x1xi1> to vector<8x1xi1>
    %47 = vector.broadcast %46 : vector<8x1xi1> to vector<8x128xi1>
    %48 = vector.broadcast %cst_12 : f32 to vector<8x128xf32>
    %49 = arith.select %47, %45, %48 : vector<8x128xi1>, vector<8x128xf32>
    %c56_13 = arith.constant 56 : index
    %c0_14 = arith.constant 0 : index
    %50 = vector.load %arg5[%c56_13, %c0_14] : memref<64x128xf32, #tpu.memory_space<vmem>>, vector<8x128xf32>
    tpu.vector_store %arg5[%c56_13, %c0_14], %49 {strides = array<i32>} : memref<64x128xf32, #tpu.memory_space<vmem>>, vector<8x128xf32>,
    %c6_i32 = arith.constant 6 : i32
    %51 = arith.addi %7, %c6_i32 : i32
    %52 = vector.broadcast %51 : i32 to vector<8x1xi32>
    %53 = arith.cmpi sgt, %3, %52 : vector<8x1xi32>
    %c48 = arith.constant 48 : index
    %c0_15 = arith.constant 0 : index
    %54 = vector.load %arg2[%c48, %c0_15] : memref<64x384xf32, #tpu.memory_space<vmem>>, vector<8x384xf32>
    %55 = arith.truncf %45 : vector<8x128xf32> to vector<8x128xbf16>
    %cst_16 = arith.constant dense<0.000000e+00> : vector<8x384xf32>
    %56 = tpu.matmul %55, %4, %cst_16 {dimension_numbers = #tpu.dot_dimension_numbers<[1], [0], [0], [1], [0, 0, 1, 1], [], []>} : vector<8x128xbf16>, vector<128x384xbf16>, vector<8x384xf32> -> vector<8x384xf32>
    %57 = vector.broadcast %5 : vector<1x384xf32> to vector<8x384xf32>
    %58 = arith.addf %56, %57 : vector<8x384xf32>
    %59 = vector.extract_strided_slice %54 {offsets = [0, 0], sizes = [8, 128], strides = [1, 1]} : vector<8x384xf32> to vector<8x128xf32>
    %60 = vector.extract_strided_slice %58 {offsets = [0, 0], sizes = [8, 128], strides = [1, 1]} : vector<8x384xf32> to vector<8x128xf32>
    %61 = arith.addf %59, %60 : vector<8x128xf32>
    %62 = arith.negf %61 : vector<8x128xf32>
    %63 = math.exp %62 : vector<8x128xf32>
    %cst_17 = arith.constant 1.000000e+00 : f32
    %64 = vector.broadcast %cst_17 : f32 to vector<8x128xf32>
    %65 = arith.addf %64, %63 : vector<8x128xf32>
    %66 = arith.divf %64, %65 : vector<8x128xf32>
    %67 = vector.extract_strided_slice %54 {offsets = [0, 128], sizes = [8, 128], strides = [1, 1]} : vector<8x384xf32> to vector<8x128xf32>
    %68 = vector.extract_strided_slice %58 {offsets = [0, 128], sizes = [8, 128], strides = [1, 1]} : vector<8x384xf32> to vector<8x128xf32>
    %69 = arith.addf %67, %68 : vector<8x128xf32>
    %70 = arith.negf %69 : vector<8x128xf32>
    %71 = math.exp %70 : vector<8x128xf32>
    %cst_18 = arith.constant 1.000000e+00 : f32
    %72 = vector.broadcast %cst_18 : f32 to vector<8x128xf32>
    %73 = arith.addf %72, %71 : vector<8x128xf32>
    %74 = arith.divf %72, %73 : vector<8x128xf32>
    %75 = vector.extract_strided_slice %54 {offsets = [0, 256], sizes = [8, 128], strides = [1, 1]} : vector<8x384xf32> to vector<8x128xf32>
    %76 = vector.extract_strided_slice %58 {offsets = [0, 256], sizes = [8, 128], strides = [1, 1]} : vector<8x384xf32> to vector<8x128xf32>
    %77 = arith.mulf %66, %76 : vector<8x128xf32>
    %78 = arith.addf %75, %77 : vector<8x128xf32>
    %79 = math.tanh %78 : vector<8x128xf32>
    %cst_19 = arith.constant 1.000000e+00 : f32
    %80 = vector.broadcast %cst_19 : f32 to vector<8x128xf32>
    %81 = arith.subf %80, %74 : vector<8x128xf32>
    %82 = arith.mulf %81, %79 : vector<8x128xf32>
    %83 = arith.mulf %74, %45 : vector<8x128xf32>
    %84 = arith.addf %82, %83 : vector<8x128xf32>
    %85 = vector.shape_cast %53 : vector<8x1xi1> to vector<8x1xi1>
    %86 = vector.broadcast %85 : vector<8x1xi1> to vector<8x128xi1>
    %87 = arith.select %86, %84, %45 : vector<8x128xi1>, vector<8x128xf32>
    %cst_20 = arith.constant 0.000000e+00 : f32
    %88 = vector.shape_cast %53 : vector<8x1xi1> to vector<8x1xi1>
    %89 = vector.broadcast %88 : vector<8x1xi1> to vector<8x128xi1>
    %90 = vector.broadcast %cst_20 : f32 to vector<8x128xf32>
    %91 = arith.select %89, %87, %90 : vector<8x128xi1>, vector<8x128xf32>
    %c48_21 = arith.constant 48 : index
    %c0_22 = arith.constant 0 : index
    %92 = vector.load %arg5[%c48_21, %c0_22] : memref<64x128xf32, #tpu.memory_space<vmem>>, vector<8x128xf32>
    tpu.vector_store %arg5[%c48_21, %c0_22], %91 {strides = array<i32>} : memref<64x128xf32, #tpu.memory_space<vmem>>, vector<8x128xf32>,
    %c5_i32 = arith.constant 5 : i32
    %93 = arith.addi %7, %c5_i32 : i32
    %94 = vector.broadcast %93 : i32 to vector<8x1xi32>
    %95 = arith.cmpi sgt, %3, %94 : vector<8x1xi32>
    %c40 = arith.constant 40 : index
    %c0_23 = arith.constant 0 : index
    %96 = vector.load %arg2[%c40, %c0_23] : memref<64x384xf32, #tpu.memory_space<vmem>>, vector<8x384xf32>
    %97 = arith.truncf %87 : vector<8x128xf32> to vector<8x128xbf16>
    %cst_24 = arith.constant dense<0.000000e+00> : vector<8x384xf32>
    %98 = tpu.matmul %97, %4, %cst_24 {dimension_numbers = #tpu.dot_dimension_numbers<[1], [0], [0], [1], [0, 0, 1, 1], [], []>} : vector<8x128xbf16>, vector<128x384xbf16>, vector<8x384xf32> -> vector<8x384xf32>
    %99 = vector.broadcast %5 : vector<1x384xf32> to vector<8x384xf32>
    %100 = arith.addf %98, %99 : vector<8x384xf32>
    %101 = vector.extract_strided_slice %96 {offsets = [0, 0], sizes = [8, 128], strides = [1, 1]} : vector<8x384xf32> to vector<8x128xf32>
    %102 = vector.extract_strided_slice %100 {offsets = [0, 0], sizes = [8, 128], strides = [1, 1]} : vector<8x384xf32> to vector<8x128xf32>
    %103 = arith.addf %101, %102 : vector<8x128xf32>
    %104 = arith.negf %103 : vector<8x128xf32>
    %105 = math.exp %104 : vector<8x128xf32>
    %cst_25 = arith.constant 1.000000e+00 : f32
    %106 = vector.broadcast %cst_25 : f32 to vector<8x128xf32>
    %107 = arith.addf %106, %105 : vector<8x128xf32>
    %108 = arith.divf %106, %107 : vector<8x128xf32>
    %109 = vector.extract_strided_slice %96 {offsets = [0, 128], sizes = [8, 128], strides = [1, 1]} : vector<8x384xf32> to vector<8x128xf32>
    %110 = vector.extract_strided_slice %100 {offsets = [0, 128], sizes = [8, 128], strides = [1, 1]} : vector<8x384xf32> to vector<8x128xf32>
    %111 = arith.addf %109, %110 : vector<8x128xf32>
    %112 = arith.negf %111 : vector<8x128xf32>
    %113 = math.exp %112 : vector<8x128xf32>
    %cst_26 = arith.constant 1.000000e+00 : f32
    %114 = vector.broadcast %cst_26 : f32 to vector<8x128xf32>
    %115 = arith.addf %114, %113 : vector<8x128xf32>
    %116 = arith.divf %114, %115 : vector<8x128xf32>
    %117 = vector.extract_strided_slice %96 {offsets = [0, 256], sizes = [8, 128], strides = [1, 1]} : vector<8x384xf32> to vector<8x128xf32>
    %118 = vector.extract_strided_slice %100 {offsets = [0, 256], sizes = [8, 128], strides = [1, 1]} : vector<8x384xf32> to vector<8x128xf32>
    %119 = arith.mulf %108, %118 : vector<8x128xf32>
    %120 = arith.addf %117, %119 : vector<8x128xf32>
    %121 = math.tanh %120 : vector<8x128xf32>
    %cst_27 = arith.constant 1.000000e+00 : f32
    %122 = vector.broadcast %cst_27 : f32 to vector<8x128xf32>
    %123 = arith.subf %122, %116 : vector<8x128xf32>
    %124 = arith.mulf %123, %121 : vector<8x128xf32>
    %125 = arith.mulf %116, %87 : vector<8x128xf32>
    %126 = arith.addf %124, %125 : vector<8x128xf32>
    %127 = vector.shape_cast %95 : vector<8x1xi1> to vector<8x1xi1>
    %128 = vector.broadcast %127 : vector<8x1xi1> to vector<8x128xi1>
    %129 = arith.select %128, %126, %87 : vector<8x128xi1>, vector<8x128xf32>
    %cst_28 = arith.constant 0.000000e+00 : f32
    %130 = vector.shape_cast %95 : vector<8x1xi1> to vector<8x1xi1>
    %131 = vector.broadcast %130 : vector<8x1xi1> to vector<8x128xi1>
    %132 = vector.broadcast %cst_28 : f32 to vector<8x128xf32>
    %133 = arith.select %131, %129, %132 : vector<8x128xi1>, vector<8x128xf32>
    %c40_29 = arith.constant 40 : index
    %c0_30 = arith.constant 0 : index
    %134 = vector.load %arg5[%c40_29, %c0_30] : memref<64x128xf32, #tpu.memory_space<vmem>>, vector<8x128xf32>
    tpu.vector_store %arg5[%c40_29, %c0_30], %133 {strides = array<i32>} : memref<64x128xf32, #tpu.memory_space<vmem>>, vector<8x128xf32>,
    %c4_i32 = arith.constant 4 : i32
    %135 = arith.addi %7, %c4_i32 : i32
    %136 = vector.broadcast %135 : i32 to vector<8x1xi32>
    %137 = arith.cmpi sgt, %3, %136 : vector<8x1xi32>
    %c32 = arith.constant 32 : index
    %c0_31 = arith.constant 0 : index
    %138 = vector.load %arg2[%c32, %c0_31] : memref<64x384xf32, #tpu.memory_space<vmem>>, vector<8x384xf32>
    %139 = arith.truncf %129 : vector<8x128xf32> to vector<8x128xbf16>
    %cst_32 = arith.constant dense<0.000000e+00> : vector<8x384xf32>
    %140 = tpu.matmul %139, %4, %cst_32 {dimension_numbers = #tpu.dot_dimension_numbers<[1], [0], [0], [1], [0, 0, 1, 1], [], []>} : vector<8x128xbf16>, vector<128x384xbf16>, vector<8x384xf32> -> vector<8x384xf32>
    %141 = vector.broadcast %5 : vector<1x384xf32> to vector<8x384xf32>
    %142 = arith.addf %140, %141 : vector<8x384xf32>
    %143 = vector.extract_strided_slice %138 {offsets = [0, 0], sizes = [8, 128], strides = [1, 1]} : vector<8x384xf32> to vector<8x128xf32>
    %144 = vector.extract_strided_slice %142 {offsets = [0, 0], sizes = [8, 128], strides = [1, 1]} : vector<8x384xf32> to vector<8x128xf32>
    %145 = arith.addf %143, %144 : vector<8x128xf32>
    %146 = arith.negf %145 : vector<8x128xf32>
    %147 = math.exp %146 : vector<8x128xf32>
    %cst_33 = arith.constant 1.000000e+00 : f32
    %148 = vector.broadcast %cst_33 : f32 to vector<8x128xf32>
    %149 = arith.addf %148, %147 : vector<8x128xf32>
    %150 = arith.divf %148, %149 : vector<8x128xf32>
    %151 = vector.extract_strided_slice %138 {offsets = [0, 128], sizes = [8, 128], strides = [1, 1]} : vector<8x384xf32> to vector<8x128xf32>
    %152 = vector.extract_strided_slice %142 {offsets = [0, 128], sizes = [8, 128], strides = [1, 1]} : vector<8x384xf32> to vector<8x128xf32>
    %153 = arith.addf %151, %152 : vector<8x128xf32>
    %154 = arith.negf %153 : vector<8x128xf32>
    %155 = math.exp %154 : vector<8x128xf32>
    %cst_34 = arith.constant 1.000000e+00 : f32
    %156 = vector.broadcast %cst_34 : f32 to vector<8x128xf32>
    %157 = arith.addf %156, %155 : vector<8x128xf32>
    %158 = arith.divf %156, %157 : vector<8x128xf32>
    %159 = vector.extract_strided_slice %138 {offsets = [0, 256], sizes = [8, 128], strides = [1, 1]} : vector<8x384xf32> to vector<8x128xf32>
    %160 = vector.extract_strided_slice %142 {offsets = [0, 256], sizes = [8, 128], strides = [1, 1]} : vector<8x384xf32> to vector<8x128xf32>
    %161 = arith.mulf %150, %160 : vector<8x128xf32>
    %162 = arith.addf %159, %161 : vector<8x128xf32>
    %163 = math.tanh %162 : vector<8x128xf32>
    %cst_35 = arith.constant 1.000000e+00 : f32
    %164 = vector.broadcast %cst_35 : f32 to vector<8x128xf32>
    %165 = arith.subf %164, %158 : vector<8x128xf32>
    %166 = arith.mulf %165, %163 : vector<8x128xf32>
    %167 = arith.mulf %158, %129 : vector<8x128xf32>
    %168 = arith.addf %166, %167 : vector<8x128xf32>
    %169 = vector.shape_cast %137 : vector<8x1xi1> to vector<8x1xi1>
    %170 = vector.broadcast %169 : vector<8x1xi1> to vector<8x128xi1>
    %171 = arith.select %170, %168, %129 : vector<8x128xi1>, vector<8x128xf32>
    %cst_36 = arith.constant 0.000000e+00 : f32
    %172 = vector.shape_cast %137 : vector<8x1xi1> to vector<8x1xi1>
    %173 = vector.broadcast %172 : vector<8x1xi1> to vector<8x128xi1>
    %174 = vector.broadcast %cst_36 : f32 to vector<8x128xf32>
    %175 = arith.select %173, %171, %174 : vector<8x128xi1>, vector<8x128xf32>
    %c32_37 = arith.constant 32 : index
    %c0_38 = arith.constant 0 : index
    %176 = vector.load %arg5[%c32_37, %c0_38] : memref<64x128xf32, #tpu.memory_space<vmem>>, vector<8x128xf32>
    tpu.vector_store %arg5[%c32_37, %c0_38], %175 {strides = array<i32>} : memref<64x128xf32, #tpu.memory_space<vmem>>, vector<8x128xf32>,
    %c3_i32 = arith.constant 3 : i32
    %177 = arith.addi %7, %c3_i32 : i32
    %178 = vector.broadcast %177 : i32 to vector<8x1xi32>
    %179 = arith.cmpi sgt, %3, %178 : vector<8x1xi32>
    %c24 = arith.constant 24 : index
    %c0_39 = arith.constant 0 : index
    %180 = vector.load %arg2[%c24, %c0_39] : memref<64x384xf32, #tpu.memory_space<vmem>>, vector<8x384xf32>
    %181 = arith.truncf %171 : vector<8x128xf32> to vector<8x128xbf16>
    %cst_40 = arith.constant dense<0.000000e+00> : vector<8x384xf32>
    %182 = tpu.matmul %181, %4, %cst_40 {dimension_numbers = #tpu.dot_dimension_numbers<[1], [0], [0], [1], [0, 0, 1, 1], [], []>} : vector<8x128xbf16>, vector<128x384xbf16>, vector<8x384xf32> -> vector<8x384xf32>
    %183 = vector.broadcast %5 : vector<1x384xf32> to vector<8x384xf32>
    %184 = arith.addf %182, %183 : vector<8x384xf32>
    %185 = vector.extract_strided_slice %180 {offsets = [0, 0], sizes = [8, 128], strides = [1, 1]} : vector<8x384xf32> to vector<8x128xf32>
    %186 = vector.extract_strided_slice %184 {offsets = [0, 0], sizes = [8, 128], strides = [1, 1]} : vector<8x384xf32> to vector<8x128xf32>
    %187 = arith.addf %185, %186 : vector<8x128xf32>
    %188 = arith.negf %187 : vector<8x128xf32>
    %189 = math.exp %188 : vector<8x128xf32>
    %cst_41 = arith.constant 1.000000e+00 : f32
    %190 = vector.broadcast %cst_41 : f32 to vector<8x128xf32>
    %191 = arith.addf %190, %189 : vector<8x128xf32>
    %192 = arith.divf %190, %191 : vector<8x128xf32>
    %193 = vector.extract_strided_slice %180 {offsets = [0, 128], sizes = [8, 128], strides = [1, 1]} : vector<8x384xf32> to vector<8x128xf32>
    %194 = vector.extract_strided_slice %184 {offsets = [0, 128], sizes = [8, 128], strides = [1, 1]} : vector<8x384xf32> to vector<8x128xf32>
    %195 = arith.addf %193, %194 : vector<8x128xf32>
    %196 = arith.negf %195 : vector<8x128xf32>
    %197 = math.exp %196 : vector<8x128xf32>
    %cst_42 = arith.constant 1.000000e+00 : f32
    %198 = vector.broadcast %cst_42 : f32 to vector<8x128xf32>
    %199 = arith.addf %198, %197 : vector<8x128xf32>
    %200 = arith.divf %198, %199 : vector<8x128xf32>
    %201 = vector.extract_strided_slice %180 {offsets = [0, 256], sizes = [8, 128], strides = [1, 1]} : vector<8x384xf32> to vector<8x128xf32>
    %202 = vector.extract_strided_slice %184 {offsets = [0, 256], sizes = [8, 128], strides = [1, 1]} : vector<8x384xf32> to vector<8x128xf32>
    %203 = arith.mulf %192, %202 : vector<8x128xf32>
    %204 = arith.addf %201, %203 : vector<8x128xf32>
    %205 = math.tanh %204 : vector<8x128xf32>
    %cst_43 = arith.constant 1.000000e+00 : f32
    %206 = vector.broadcast %cst_43 : f32 to vector<8x128xf32>
    %207 = arith.subf %206, %200 : vector<8x128xf32>
    %208 = arith.mulf %207, %205 : vector<8x128xf32>
    %209 = arith.mulf %200, %171 : vector<8x128xf32>
    %210 = arith.addf %208, %209 : vector<8x128xf32>
    %211 = vector.shape_cast %179 : vector<8x1xi1> to vector<8x1xi1>
    %212 = vector.broadcast %211 : vector<8x1xi1> to vector<8x128xi1>
    %213 = arith.select %212, %210, %171 : vector<8x128xi1>, vector<8x128xf32>
    %cst_44 = arith.constant 0.000000e+00 : f32
    %214 = vector.shape_cast %179 : vector<8x1xi1> to vector<8x1xi1>
    %215 = vector.broadcast %214 : vector<8x1xi1> to vector<8x128xi1>
    %216 = vector.broadcast %cst_44 : f32 to vector<8x128xf32>
    %217 = arith.select %215, %213, %216 : vector<8x128xi1>, vector<8x128xf32>
    %c24_45 = arith.constant 24 : index
    %c0_46 = arith.constant 0 : index
    %218 = vector.load %arg5[%c24_45, %c0_46] : memref<64x128xf32, #tpu.memory_space<vmem>>, vector<8x128xf32>
    tpu.vector_store %arg5[%c24_45, %c0_46], %217 {strides = array<i32>} : memref<64x128xf32, #tpu.memory_space<vmem>>, vector<8x128xf32>,
    %c2_i32 = arith.constant 2 : i32
    %219 = arith.addi %7, %c2_i32 : i32
    %220 = vector.broadcast %219 : i32 to vector<8x1xi32>
    %221 = arith.cmpi sgt, %3, %220 : vector<8x1xi32>
    %c16 = arith.constant 16 : index
    %c0_47 = arith.constant 0 : index
    %222 = vector.load %arg2[%c16, %c0_47] : memref<64x384xf32, #tpu.memory_space<vmem>>, vector<8x384xf32>
    %223 = arith.truncf %213 : vector<8x128xf32> to vector<8x128xbf16>
    %cst_48 = arith.constant dense<0.000000e+00> : vector<8x384xf32>
    %224 = tpu.matmul %223, %4, %cst_48 {dimension_numbers = #tpu.dot_dimension_numbers<[1], [0], [0], [1], [0, 0, 1, 1], [], []>} : vector<8x128xbf16>, vector<128x384xbf16>, vector<8x384xf32> -> vector<8x384xf32>
    %225 = vector.broadcast %5 : vector<1x384xf32> to vector<8x384xf32>
    %226 = arith.addf %224, %225 : vector<8x384xf32>
    %227 = vector.extract_strided_slice %222 {offsets = [0, 0], sizes = [8, 128], strides = [1, 1]} : vector<8x384xf32> to vector<8x128xf32>
    %228 = vector.extract_strided_slice %226 {offsets = [0, 0], sizes = [8, 128], strides = [1, 1]} : vector<8x384xf32> to vector<8x128xf32>
    %229 = arith.addf %227, %228 : vector<8x128xf32>
    %230 = arith.negf %229 : vector<8x128xf32>
    %231 = math.exp %230 : vector<8x128xf32>
    %cst_49 = arith.constant 1.000000e+00 : f32
    %232 = vector.broadcast %cst_49 : f32 to vector<8x128xf32>
    %233 = arith.addf %232, %231 : vector<8x128xf32>
    %234 = arith.divf %232, %233 : vector<8x128xf32>
    %235 = vector.extract_strided_slice %222 {offsets = [0, 128], sizes = [8, 128], strides = [1, 1]} : vector<8x384xf32> to vector<8x128xf32>
    %236 = vector.extract_strided_slice %226 {offsets = [0, 128], sizes = [8, 128], strides = [1, 1]} : vector<8x384xf32> to vector<8x128xf32>
    %237 = arith.addf %235, %236 : vector<8x128xf32>
    %238 = arith.negf %237 : vector<8x128xf32>
    %239 = math.exp %238 : vector<8x128xf32>
    %cst_50 = arith.constant 1.000000e+00 : f32
    %240 = vector.broadcast %cst_50 : f32 to vector<8x128xf32>
    %241 = arith.addf %240, %239 : vector<8x128xf32>
    %242 = arith.divf %240, %241 : vector<8x128xf32>
    %243 = vector.extract_strided_slice %222 {offsets = [0, 256], sizes = [8, 128], strides = [1, 1]} : vector<8x384xf32> to vector<8x128xf32>
    %244 = vector.extract_strided_slice %226 {offsets = [0, 256], sizes = [8, 128], strides = [1, 1]} : vector<8x384xf32> to vector<8x128xf32>
    %245 = arith.mulf %234, %244 : vector<8x128xf32>
    %246 = arith.addf %243, %245 : vector<8x128xf32>
    %247 = math.tanh %246 : vector<8x128xf32>
    %cst_51 = arith.constant 1.000000e+00 : f32
    %248 = vector.broadcast %cst_51 : f32 to vector<8x128xf32>
    %249 = arith.subf %248, %242 : vector<8x128xf32>
    %250 = arith.mulf %249, %247 : vector<8x128xf32>
    %251 = arith.mulf %242, %213 : vector<8x128xf32>
    %252 = arith.addf %250, %251 : vector<8x128xf32>
    %253 = vector.shape_cast %221 : vector<8x1xi1> to vector<8x1xi1>
    %254 = vector.broadcast %253 : vector<8x1xi1> to vector<8x128xi1>
    %255 = arith.select %254, %252, %213 : vector<8x128xi1>, vector<8x128xf32>
    %cst_52 = arith.constant 0.000000e+00 : f32
    %256 = vector.shape_cast %221 : vector<8x1xi1> to vector<8x1xi1>
    %257 = vector.broadcast %256 : vector<8x1xi1> to vector<8x128xi1>
    %258 = vector.broadcast %cst_52 : f32 to vector<8x128xf32>
    %259 = arith.select %257, %255, %258 : vector<8x128xi1>, vector<8x128xf32>
    %c16_53 = arith.constant 16 : index
    %c0_54 = arith.constant 0 : index
    %260 = vector.load %arg5[%c16_53, %c0_54] : memref<64x128xf32, #tpu.memory_space<vmem>>, vector<8x128xf32>
    tpu.vector_store %arg5[%c16_53, %c0_54], %259 {strides = array<i32>} : memref<64x128xf32, #tpu.memory_space<vmem>>, vector<8x128xf32>,
    %c1_i32_55 = arith.constant 1 : i32
    %261 = arith.addi %7, %c1_i32_55 : i32
    %262 = vector.broadcast %261 : i32 to vector<8x1xi32>
    %263 = arith.cmpi sgt, %3, %262 : vector<8x1xi32>
    %c8 = arith.constant 8 : index
    %c0_56 = arith.constant 0 : index
    %264 = vector.load %arg2[%c8, %c0_56] : memref<64x384xf32, #tpu.memory_space<vmem>>, vector<8x384xf32>
    %265 = arith.truncf %255 : vector<8x128xf32> to vector<8x128xbf16>
    %cst_57 = arith.constant dense<0.000000e+00> : vector<8x384xf32>
    %266 = tpu.matmul %265, %4, %cst_57 {dimension_numbers = #tpu.dot_dimension_numbers<[1], [0], [0], [1], [0, 0, 1, 1], [], []>} : vector<8x128xbf16>, vector<128x384xbf16>, vector<8x384xf32> -> vector<8x384xf32>
    %267 = vector.broadcast %5 : vector<1x384xf32> to vector<8x384xf32>
    %268 = arith.addf %266, %267 : vector<8x384xf32>
    %269 = vector.extract_strided_slice %264 {offsets = [0, 0], sizes = [8, 128], strides = [1, 1]} : vector<8x384xf32> to vector<8x128xf32>
    %270 = vector.extract_strided_slice %268 {offsets = [0, 0], sizes = [8, 128], strides = [1, 1]} : vector<8x384xf32> to vector<8x128xf32>
    %271 = arith.addf %269, %270 : vector<8x128xf32>
    %272 = arith.negf %271 : vector<8x128xf32>
    %273 = math.exp %272 : vector<8x128xf32>
    %cst_58 = arith.constant 1.000000e+00 : f32
    %274 = vector.broadcast %cst_58 : f32 to vector<8x128xf32>
    %275 = arith.addf %274, %273 : vector<8x128xf32>
    %276 = arith.divf %274, %275 : vector<8x128xf32>
    %277 = vector.extract_strided_slice %264 {offsets = [0, 128], sizes = [8, 128], strides = [1, 1]} : vector<8x384xf32> to vector<8x128xf32>
    %278 = vector.extract_strided_slice %268 {offsets = [0, 128], sizes = [8, 128], strides = [1, 1]} : vector<8x384xf32> to vector<8x128xf32>
    %279 = arith.addf %277, %278 : vector<8x128xf32>
    %280 = arith.negf %279 : vector<8x128xf32>
    %281 = math.exp %280 : vector<8x128xf32>
    %cst_59 = arith.constant 1.000000e+00 : f32
    %282 = vector.broadcast %cst_59 : f32 to vector<8x128xf32>
    %283 = arith.addf %282, %281 : vector<8x128xf32>
    %284 = arith.divf %282, %283 : vector<8x128xf32>
    %285 = vector.extract_strided_slice %264 {offsets = [0, 256], sizes = [8, 128], strides = [1, 1]} : vector<8x384xf32> to vector<8x128xf32>
    %286 = vector.extract_strided_slice %268 {offsets = [0, 256], sizes = [8, 128], strides = [1, 1]} : vector<8x384xf32> to vector<8x128xf32>
    %287 = arith.mulf %276, %286 : vector<8x128xf32>
    %288 = arith.addf %285, %287 : vector<8x128xf32>
    %289 = math.tanh %288 : vector<8x128xf32>
    %cst_60 = arith.constant 1.000000e+00 : f32
    %290 = vector.broadcast %cst_60 : f32 to vector<8x128xf32>
    %291 = arith.subf %290, %284 : vector<8x128xf32>
    %292 = arith.mulf %291, %289 : vector<8x128xf32>
    %293 = arith.mulf %284, %255 : vector<8x128xf32>
    %294 = arith.addf %292, %293 : vector<8x128xf32>
    %295 = vector.shape_cast %263 : vector<8x1xi1> to vector<8x1xi1>
    %296 = vector.broadcast %295 : vector<8x1xi1> to vector<8x128xi1>
    %297 = arith.select %296, %294, %255 : vector<8x128xi1>, vector<8x128xf32>
    %cst_61 = arith.constant 0.000000e+00 : f32
    %298 = vector.shape_cast %263 : vector<8x1xi1> to vector<8x1xi1>
    %299 = vector.broadcast %298 : vector<8x1xi1> to vector<8x128xi1>
    %300 = vector.broadcast %cst_61 : f32 to vector<8x128xf32>
    %301 = arith.select %299, %297, %300 : vector<8x128xi1>, vector<8x128xf32>
    %c8_62 = arith.constant 8 : index
    %c0_63 = arith.constant 0 : index
    %302 = vector.load %arg5[%c8_62, %c0_63] : memref<64x128xf32, #tpu.memory_space<vmem>>, vector<8x128xf32>
    tpu.vector_store %arg5[%c8_62, %c0_63], %301 {strides = array<i32>} : memref<64x128xf32, #tpu.memory_space<vmem>>, vector<8x128xf32>,
    %c0_i32_64 = arith.constant 0 : i32
    %303 = arith.addi %7, %c0_i32_64 : i32
    %304 = vector.broadcast %303 : i32 to vector<8x1xi32>
    %305 = arith.cmpi sgt, %3, %304 : vector<8x1xi32>
    %c0_65 = arith.constant 0 : index
    %c0_66 = arith.constant 0 : index
    %306 = vector.load %arg2[%c0_65, %c0_66] : memref<64x384xf32, #tpu.memory_space<vmem>>, vector<8x384xf32>
    %307 = arith.truncf %297 : vector<8x128xf32> to vector<8x128xbf16>
    %cst_67 = arith.constant dense<0.000000e+00> : vector<8x384xf32>
    %308 = tpu.matmul %307, %4, %cst_67 {dimension_numbers = #tpu.dot_dimension_numbers<[1], [0], [0], [1], [0, 0, 1, 1], [], []>} : vector<8x128xbf16>, vector<128x384xbf16>, vector<8x384xf32> -> vector<8x384xf32>
    %309 = vector.broadcast %5 : vector<1x384xf32> to vector<8x384xf32>
    %310 = arith.addf %308, %309 : vector<8x384xf32>
    %311 = vector.extract_strided_slice %306 {offsets = [0, 0], sizes = [8, 128], strides = [1, 1]} : vector<8x384xf32> to vector<8x128xf32>
    %312 = vector.extract_strided_slice %310 {offsets = [0, 0], sizes = [8, 128], strides = [1, 1]} : vector<8x384xf32> to vector<8x128xf32>
    %313 = arith.addf %311, %312 : vector<8x128xf32>
    %314 = arith.negf %313 : vector<8x128xf32>
    %315 = math.exp %314 : vector<8x128xf32>
    %cst_68 = arith.constant 1.000000e+00 : f32
    %316 = vector.broadcast %cst_68 : f32 to vector<8x128xf32>
    %317 = arith.addf %316, %315 : vector<8x128xf32>
    %318 = arith.divf %316, %317 : vector<8x128xf32>
    %319 = vector.extract_strided_slice %306 {offsets = [0, 128], sizes = [8, 128], strides = [1, 1]} : vector<8x384xf32> to vector<8x128xf32>
    %320 = vector.extract_strided_slice %310 {offsets = [0, 128], sizes = [8, 128], strides = [1, 1]} : vector<8x384xf32> to vector<8x128xf32>
    %321 = arith.addf %319, %320 : vector<8x128xf32>
    %322 = arith.negf %321 : vector<8x128xf32>
    %323 = math.exp %322 : vector<8x128xf32>
    %cst_69 = arith.constant 1.000000e+00 : f32
    %324 = vector.broadcast %cst_69 : f32 to vector<8x128xf32>
    %325 = arith.addf %324, %323 : vector<8x128xf32>
    %326 = arith.divf %324, %325 : vector<8x128xf32>
    %327 = vector.extract_strided_slice %306 {offsets = [0, 256], sizes = [8, 128], strides = [1, 1]} : vector<8x384xf32> to vector<8x128xf32>
    %328 = vector.extract_strided_slice %310 {offsets = [0, 256], sizes = [8, 128], strides = [1, 1]} : vector<8x384xf32> to vector<8x128xf32>
    %329 = arith.mulf %318, %328 : vector<8x128xf32>
    %330 = arith.addf %327, %329 : vector<8x128xf32>
    %331 = math.tanh %330 : vector<8x128xf32>
    %cst_70 = arith.constant 1.000000e+00 : f32
    %332 = vector.broadcast %cst_70 : f32 to vector<8x128xf32>
    %333 = arith.subf %332, %326 : vector<8x128xf32>
    %334 = arith.mulf %333, %331 : vector<8x128xf32>
    %335 = arith.mulf %326, %297 : vector<8x128xf32>
    %336 = arith.addf %334, %335 : vector<8x128xf32>
    %337 = vector.shape_cast %305 : vector<8x1xi1> to vector<8x1xi1>
    %338 = vector.broadcast %337 : vector<8x1xi1> to vector<8x128xi1>
    %339 = arith.select %338, %336, %297 : vector<8x128xi1>, vector<8x128xf32>
    %cst_71 = arith.constant 0.000000e+00 : f32
    %340 = vector.shape_cast %305 : vector<8x1xi1> to vector<8x1xi1>
    %341 = vector.broadcast %340 : vector<8x1xi1> to vector<8x128xi1>
    %342 = vector.broadcast %cst_71 : f32 to vector<8x128xf32>
    %343 = arith.select %341, %339, %342 : vector<8x128xi1>, vector<8x128xf32>
    %c0_72 = arith.constant 0 : index
    %c0_73 = arith.constant 0 : index
    %344 = vector.load %arg5[%c0_72, %c0_73] : memref<64x128xf32, #tpu.memory_space<vmem>>, vector<8x128xf32>
    tpu.vector_store %arg5[%c0_72, %c0_73], %343 {strides = array<i32>} : memref<64x128xf32, #tpu.memory_space<vmem>>, vector<8x128xf32>,
    %c0_74 = arith.constant 0 : index
    %c0_75 = arith.constant 0 : index
    %345 = vector.load %arg6[%c0_74, %c0_75] : memref<8x128xf32, #tpu.memory_space<vmem>>, vector<8x128xf32>
    tpu.vector_store %arg6[%c0_74, %c0_75], %339 {strides = array<i32>} : memref<8x128xf32, #tpu.memory_space<vmem>>, vector<8x128xf32>,
    return
  }
  func.func @transform_0(%arg0: i32) -> (i32, i32) {
    %c0_i32 = arith.constant 0 : i32
    %c0_i32_0 = arith.constant 0 : i32
    %c0_i32_1 = arith.constant 0 : i32
    return %c0_i32, %c0_i32_0 : i32, i32
  }
  func.func @transform_1(%arg0: i32) -> (i32, i32) {
    %c1_i32 = arith.constant 1 : i32
    %0 = arith.subi %c1_i32, %arg0 : i32
    %c1_i32_0 = arith.constant 1 : i32
    %c0_i32 = arith.constant 0 : i32
    return %0, %c1_i32_0 : i32, i32
  }
  func.func @transform_2(%arg0: i32) -> (i32, i32) {
    %c0_i32 = arith.constant 0 : i32
    %c0_i32_0 = arith.constant 0 : i32
    %c0_i32_1 = arith.constant 0 : i32
    return %c0_i32, %c0_i32_0 : i32, i32
  }
  func.func @transform_3(%arg0: i32) -> (i32, i32) {
    %c0_i32 = arith.constant 0 : i32
    %c0_i32_0 = arith.constant 0 : i32
    %c0_i32_1 = arith.constant 0 : i32
    return %c0_i32, %c0_i32_0 : i32, i32
  }
  func.func @transform_4(%arg0: i32) -> (i32, i32) {
    %c1_i32 = arith.constant 1 : i32
    %0 = arith.subi %c1_i32, %arg0 : i32
    %c0_i32 = arith.constant 0 : i32
    %c0_i32_0 = arith.constant 0 : i32
    return %0, %c0_i32 : i32, i32
  }
  func.func @transform_5(%arg0: i32) -> (i32, i32) {
    %c0_i32 = arith.constant 0 : i32
    %c0_i32_0 = arith.constant 0 : i32
    %c0_i32_1 = arith.constant 0 : i32
    return %c0_i32, %c0_i32_0 : i32, i32
  }
}

module attributes {stable_mosaic.version = 11 : i64} {
  func.func @_gru_dir_kernel(%arg0: i32, %arg1: memref<8x1xi32, #tpu.memory_space<vmem>>, %arg2: memref<64x384xf32, #tpu.memory_space<vmem>>, %arg3: memref<128x384xbf16, #tpu.memory_space<vmem>>, %arg4: memref<1x384xf32, #tpu.memory_space<vmem>>, %arg5: memref<64x128xf32, #tpu.memory_space<vmem>>, %arg6: memref<64x128xf32, #tpu.memory_space<vmem>>, %arg7: memref<8x128xf32, #tpu.memory_space<vmem>>) attributes {dimension_semantics = [#tpu.dimension_semantics<arbitrary>], iteration_bounds = array<i64: 2>, scalar_prefetch = 0 : i64, scratch_operands = 0 : i64, tpu.core_type = #tpu.core_type<tc>, window_params = [{pipeline_mode = #tpu.pipeline_mode<synchronous>, transform_indices = @transform_0, window_bounds = array<i64: 8, 1>}, {transform_indices = @transform_1, window_bounds = array<i64: 64, 384>}, {pipeline_mode = #tpu.pipeline_mode<synchronous>, transform_indices = @transform_2, window_bounds = array<i64: 128, 384>}, {pipeline_mode = #tpu.pipeline_mode<synchronous>, transform_indices = @transform_3, window_bounds = array<i64: 1, 384>}, {transform_indices = @transform_4, window_bounds = array<i64: 64, 128>}, {transform_indices = @transform_5, window_bounds = array<i64: 64, 128>}, {pipeline_mode = #tpu.pipeline_mode<synchronous>, transform_indices = @transform_6, window_bounds = array<i64: 8, 128>}]} {
    %c0_i32 = arith.constant 0 : i32
    %0 = arith.cmpi eq, %arg0, %c0_i32 : i32
    %1 = arith.extui %0 : i1 to i32
    %c0_i32_0 = arith.constant 0 : i32
    %2 = arith.cmpi ne, %1, %c0_i32_0 : i32
    scf.if %2 {
      %cst_91 = arith.constant 0.000000e+00 : f32
      %361 = vector.broadcast %cst_91 : f32 to vector<8x128xf32>
      %c0_92 = arith.constant 0 : index
      %c0_93 = arith.constant 0 : index
      %362 = vector.load %arg7[%c0_92, %c0_93] : memref<8x128xf32, #tpu.memory_space<vmem>>, vector<8x128xf32>
      tpu.vector_store %arg7[%c0_92, %c0_93], %361 {strides = array<i32>} : memref<8x128xf32, #tpu.memory_space<vmem>>, vector<8x128xf32>,
    } else {
    }
    %c0 = arith.constant 0 : index
    %c0_1 = arith.constant 0 : index
    %3 = vector.load %arg1[%c0, %c0_1] : memref<8x1xi32, #tpu.memory_space<vmem>>, vector<8x1xi32>
    %c0_2 = arith.constant 0 : index
    %c0_3 = arith.constant 0 : index
    %4 = vector.load %arg3[%c0_2, %c0_3] : memref<128x384xbf16, #tpu.memory_space<vmem>>, vector<128x384xbf16>
    %c0_4 = arith.constant 0 : index
    %c0_5 = arith.constant 0 : index
    %5 = vector.load %arg4[%c0_4, %c0_5] : memref<1x384xf32, #tpu.memory_space<vmem>>, vector<1x384xf32>
    %c8_i32 = arith.constant 8 : i32
    %6 = arith.muli %arg0, %c8_i32 : i32
    %c0_6 = arith.constant 0 : index
    %c0_7 = arith.constant 0 : index
    %7 = vector.load %arg7[%c0_6, %c0_7] : memref<8x128xf32, #tpu.memory_space<vmem>>, vector<8x128xf32>
    %c0_i32_8 = arith.constant 0 : i32
    %8 = arith.addi %6, %c0_i32_8 : i32
    %9 = vector.broadcast %8 : i32 to vector<8x1xi32>
    %10 = arith.cmpi sgt, %3, %9 : vector<8x1xi32>
    %c0_9 = arith.constant 0 : index
    %c0_10 = arith.constant 0 : index
    %11 = vector.load %arg2[%c0_9, %c0_10] : memref<64x384xf32, #tpu.memory_space<vmem>>, vector<8x384xf32>
    %12 = arith.truncf %7 : vector<8x128xf32> to vector<8x128xbf16>
    %cst = arith.constant dense<0.000000e+00> : vector<8x384xf32>
    %13 = tpu.matmul %12, %4, %cst {dimension_numbers = #tpu.dot_dimension_numbers<[1], [0], [0], [1], [0, 0, 1, 1], [], []>} : vector<8x128xbf16>, vector<128x384xbf16>, vector<8x384xf32> -> vector<8x384xf32>
    %14 = vector.broadcast %5 : vector<1x384xf32> to vector<8x384xf32>
    %15 = arith.addf %13, %14 : vector<8x384xf32>
    %16 = vector.extract_strided_slice %11 {offsets = [0, 0], sizes = [8, 128], strides = [1, 1]} : vector<8x384xf32> to vector<8x128xf32>
    %17 = vector.extract_strided_slice %15 {offsets = [0, 0], sizes = [8, 128], strides = [1, 1]} : vector<8x384xf32> to vector<8x128xf32>
    %18 = arith.addf %16, %17 : vector<8x128xf32>
    %19 = arith.negf %18 : vector<8x128xf32>
    %20 = math.exp %19 : vector<8x128xf32>
    %cst_11 = arith.constant 1.000000e+00 : f32
    %21 = vector.broadcast %cst_11 : f32 to vector<8x128xf32>
    %22 = arith.addf %21, %20 : vector<8x128xf32>
    %23 = arith.divf %21, %22 : vector<8x128xf32>
    %24 = vector.extract_strided_slice %11 {offsets = [0, 128], sizes = [8, 128], strides = [1, 1]} : vector<8x384xf32> to vector<8x128xf32>
    %25 = vector.extract_strided_slice %15 {offsets = [0, 128], sizes = [8, 128], strides = [1, 1]} : vector<8x384xf32> to vector<8x128xf32>
    %26 = arith.addf %24, %25 : vector<8x128xf32>
    %27 = arith.negf %26 : vector<8x128xf32>
    %28 = math.exp %27 : vector<8x128xf32>
    %cst_12 = arith.constant 1.000000e+00 : f32
    %29 = vector.broadcast %cst_12 : f32 to vector<8x128xf32>
    %30 = arith.addf %29, %28 : vector<8x128xf32>
    %31 = arith.divf %29, %30 : vector<8x128xf32>
    %32 = vector.extract_strided_slice %11 {offsets = [0, 256], sizes = [8, 128], strides = [1, 1]} : vector<8x384xf32> to vector<8x128xf32>
    %33 = vector.extract_strided_slice %15 {offsets = [0, 256], sizes = [8, 128], strides = [1, 1]} : vector<8x384xf32> to vector<8x128xf32>
    %34 = arith.mulf %23, %33 : vector<8x128xf32>
    %35 = arith.addf %32, %34 : vector<8x128xf32>
    %36 = math.tanh %35 : vector<8x128xf32>
    %cst_13 = arith.constant 1.000000e+00 : f32
    %37 = vector.broadcast %cst_13 : f32 to vector<8x128xf32>
    %38 = arith.subf %37, %31 : vector<8x128xf32>
    %39 = arith.mulf %38, %36 : vector<8x128xf32>
    %40 = arith.mulf %31, %7 : vector<8x128xf32>
    %41 = arith.addf %39, %40 : vector<8x128xf32>
    %42 = vector.shape_cast %10 : vector<8x1xi1> to vector<8x1xi1>
    %43 = vector.broadcast %42 : vector<8x1xi1> to vector<8x128xi1>
    %44 = arith.select %43, %41, %7 : vector<8x128xi1>, vector<8x128xf32>
    %cst_14 = arith.constant 0.000000e+00 : f32
    %45 = vector.shape_cast %10 : vector<8x1xi1> to vector<8x1xi1>
    %46 = vector.broadcast %45 : vector<8x1xi1> to vector<8x128xi1>
    %47 = vector.broadcast %cst_14 : f32 to vector<8x128xf32>
    %48 = arith.select %46, %44, %47 : vector<8x128xi1>, vector<8x128xf32>
    %c0_15 = arith.constant 0 : index
    %c0_16 = arith.constant 0 : index
    %49 = vector.load %arg5[%c0_15, %c0_16] : memref<64x128xf32, #tpu.memory_space<vmem>>, vector<8x128xf32>
    %50 = arith.addf %48, %49 : vector<8x128xf32>
    %c0_17 = arith.constant 0 : index
    %c0_18 = arith.constant 0 : index
    %51 = vector.load %arg6[%c0_17, %c0_18] : memref<64x128xf32, #tpu.memory_space<vmem>>, vector<8x128xf32>
    tpu.vector_store %arg6[%c0_17, %c0_18], %50 {strides = array<i32>} : memref<64x128xf32, #tpu.memory_space<vmem>>, vector<8x128xf32>,
    %c1_i32 = arith.constant 1 : i32
    %52 = arith.addi %6, %c1_i32 : i32
    %53 = vector.broadcast %52 : i32 to vector<8x1xi32>
    %54 = arith.cmpi sgt, %3, %53 : vector<8x1xi32>
    %c8 = arith.constant 8 : index
    %c0_19 = arith.constant 0 : index
    %55 = vector.load %arg2[%c8, %c0_19] : memref<64x384xf32, #tpu.memory_space<vmem>>, vector<8x384xf32>
    %56 = arith.truncf %44 : vector<8x128xf32> to vector<8x128xbf16>
    %cst_20 = arith.constant dense<0.000000e+00> : vector<8x384xf32>
    %57 = tpu.matmul %56, %4, %cst_20 {dimension_numbers = #tpu.dot_dimension_numbers<[1], [0], [0], [1], [0, 0, 1, 1], [], []>} : vector<8x128xbf16>, vector<128x384xbf16>, vector<8x384xf32> -> vector<8x384xf32>
    %58 = vector.broadcast %5 : vector<1x384xf32> to vector<8x384xf32>
    %59 = arith.addf %57, %58 : vector<8x384xf32>
    %60 = vector.extract_strided_slice %55 {offsets = [0, 0], sizes = [8, 128], strides = [1, 1]} : vector<8x384xf32> to vector<8x128xf32>
    %61 = vector.extract_strided_slice %59 {offsets = [0, 0], sizes = [8, 128], strides = [1, 1]} : vector<8x384xf32> to vector<8x128xf32>
    %62 = arith.addf %60, %61 : vector<8x128xf32>
    %63 = arith.negf %62 : vector<8x128xf32>
    %64 = math.exp %63 : vector<8x128xf32>
    %cst_21 = arith.constant 1.000000e+00 : f32
    %65 = vector.broadcast %cst_21 : f32 to vector<8x128xf32>
    %66 = arith.addf %65, %64 : vector<8x128xf32>
    %67 = arith.divf %65, %66 : vector<8x128xf32>
    %68 = vector.extract_strided_slice %55 {offsets = [0, 128], sizes = [8, 128], strides = [1, 1]} : vector<8x384xf32> to vector<8x128xf32>
    %69 = vector.extract_strided_slice %59 {offsets = [0, 128], sizes = [8, 128], strides = [1, 1]} : vector<8x384xf32> to vector<8x128xf32>
    %70 = arith.addf %68, %69 : vector<8x128xf32>
    %71 = arith.negf %70 : vector<8x128xf32>
    %72 = math.exp %71 : vector<8x128xf32>
    %cst_22 = arith.constant 1.000000e+00 : f32
    %73 = vector.broadcast %cst_22 : f32 to vector<8x128xf32>
    %74 = arith.addf %73, %72 : vector<8x128xf32>
    %75 = arith.divf %73, %74 : vector<8x128xf32>
    %76 = vector.extract_strided_slice %55 {offsets = [0, 256], sizes = [8, 128], strides = [1, 1]} : vector<8x384xf32> to vector<8x128xf32>
    %77 = vector.extract_strided_slice %59 {offsets = [0, 256], sizes = [8, 128], strides = [1, 1]} : vector<8x384xf32> to vector<8x128xf32>
    %78 = arith.mulf %67, %77 : vector<8x128xf32>
    %79 = arith.addf %76, %78 : vector<8x128xf32>
    %80 = math.tanh %79 : vector<8x128xf32>
    %cst_23 = arith.constant 1.000000e+00 : f32
    %81 = vector.broadcast %cst_23 : f32 to vector<8x128xf32>
    %82 = arith.subf %81, %75 : vector<8x128xf32>
    %83 = arith.mulf %82, %80 : vector<8x128xf32>
    %84 = arith.mulf %75, %44 : vector<8x128xf32>
    %85 = arith.addf %83, %84 : vector<8x128xf32>
    %86 = vector.shape_cast %54 : vector<8x1xi1> to vector<8x1xi1>
    %87 = vector.broadcast %86 : vector<8x1xi1> to vector<8x128xi1>
    %88 = arith.select %87, %85, %44 : vector<8x128xi1>, vector<8x128xf32>
    %cst_24 = arith.constant 0.000000e+00 : f32
    %89 = vector.shape_cast %54 : vector<8x1xi1> to vector<8x1xi1>
    %90 = vector.broadcast %89 : vector<8x1xi1> to vector<8x128xi1>
    %91 = vector.broadcast %cst_24 : f32 to vector<8x128xf32>
    %92 = arith.select %90, %88, %91 : vector<8x128xi1>, vector<8x128xf32>
    %c8_25 = arith.constant 8 : index
    %c0_26 = arith.constant 0 : index
    %93 = vector.load %arg5[%c8_25, %c0_26] : memref<64x128xf32, #tpu.memory_space<vmem>>, vector<8x128xf32>
    %94 = arith.addf %92, %93 : vector<8x128xf32>
    %c8_27 = arith.constant 8 : index
    %c0_28 = arith.constant 0 : index
    %95 = vector.load %arg6[%c8_27, %c0_28] : memref<64x128xf32, #tpu.memory_space<vmem>>, vector<8x128xf32>
    tpu.vector_store %arg6[%c8_27, %c0_28], %94 {strides = array<i32>} : memref<64x128xf32, #tpu.memory_space<vmem>>, vector<8x128xf32>,
    %c2_i32 = arith.constant 2 : i32
    %96 = arith.addi %6, %c2_i32 : i32
    %97 = vector.broadcast %96 : i32 to vector<8x1xi32>
    %98 = arith.cmpi sgt, %3, %97 : vector<8x1xi32>
    %c16 = arith.constant 16 : index
    %c0_29 = arith.constant 0 : index
    %99 = vector.load %arg2[%c16, %c0_29] : memref<64x384xf32, #tpu.memory_space<vmem>>, vector<8x384xf32>
    %100 = arith.truncf %88 : vector<8x128xf32> to vector<8x128xbf16>
    %cst_30 = arith.constant dense<0.000000e+00> : vector<8x384xf32>
    %101 = tpu.matmul %100, %4, %cst_30 {dimension_numbers = #tpu.dot_dimension_numbers<[1], [0], [0], [1], [0, 0, 1, 1], [], []>} : vector<8x128xbf16>, vector<128x384xbf16>, vector<8x384xf32> -> vector<8x384xf32>
    %102 = vector.broadcast %5 : vector<1x384xf32> to vector<8x384xf32>
    %103 = arith.addf %101, %102 : vector<8x384xf32>
    %104 = vector.extract_strided_slice %99 {offsets = [0, 0], sizes = [8, 128], strides = [1, 1]} : vector<8x384xf32> to vector<8x128xf32>
    %105 = vector.extract_strided_slice %103 {offsets = [0, 0], sizes = [8, 128], strides = [1, 1]} : vector<8x384xf32> to vector<8x128xf32>
    %106 = arith.addf %104, %105 : vector<8x128xf32>
    %107 = arith.negf %106 : vector<8x128xf32>
    %108 = math.exp %107 : vector<8x128xf32>
    %cst_31 = arith.constant 1.000000e+00 : f32
    %109 = vector.broadcast %cst_31 : f32 to vector<8x128xf32>
    %110 = arith.addf %109, %108 : vector<8x128xf32>
    %111 = arith.divf %109, %110 : vector<8x128xf32>
    %112 = vector.extract_strided_slice %99 {offsets = [0, 128], sizes = [8, 128], strides = [1, 1]} : vector<8x384xf32> to vector<8x128xf32>
    %113 = vector.extract_strided_slice %103 {offsets = [0, 128], sizes = [8, 128], strides = [1, 1]} : vector<8x384xf32> to vector<8x128xf32>
    %114 = arith.addf %112, %113 : vector<8x128xf32>
    %115 = arith.negf %114 : vector<8x128xf32>
    %116 = math.exp %115 : vector<8x128xf32>
    %cst_32 = arith.constant 1.000000e+00 : f32
    %117 = vector.broadcast %cst_32 : f32 to vector<8x128xf32>
    %118 = arith.addf %117, %116 : vector<8x128xf32>
    %119 = arith.divf %117, %118 : vector<8x128xf32>
    %120 = vector.extract_strided_slice %99 {offsets = [0, 256], sizes = [8, 128], strides = [1, 1]} : vector<8x384xf32> to vector<8x128xf32>
    %121 = vector.extract_strided_slice %103 {offsets = [0, 256], sizes = [8, 128], strides = [1, 1]} : vector<8x384xf32> to vector<8x128xf32>
    %122 = arith.mulf %111, %121 : vector<8x128xf32>
    %123 = arith.addf %120, %122 : vector<8x128xf32>
    %124 = math.tanh %123 : vector<8x128xf32>
    %cst_33 = arith.constant 1.000000e+00 : f32
    %125 = vector.broadcast %cst_33 : f32 to vector<8x128xf32>
    %126 = arith.subf %125, %119 : vector<8x128xf32>
    %127 = arith.mulf %126, %124 : vector<8x128xf32>
    %128 = arith.mulf %119, %88 : vector<8x128xf32>
    %129 = arith.addf %127, %128 : vector<8x128xf32>
    %130 = vector.shape_cast %98 : vector<8x1xi1> to vector<8x1xi1>
    %131 = vector.broadcast %130 : vector<8x1xi1> to vector<8x128xi1>
    %132 = arith.select %131, %129, %88 : vector<8x128xi1>, vector<8x128xf32>
    %cst_34 = arith.constant 0.000000e+00 : f32
    %133 = vector.shape_cast %98 : vector<8x1xi1> to vector<8x1xi1>
    %134 = vector.broadcast %133 : vector<8x1xi1> to vector<8x128xi1>
    %135 = vector.broadcast %cst_34 : f32 to vector<8x128xf32>
    %136 = arith.select %134, %132, %135 : vector<8x128xi1>, vector<8x128xf32>
    %c16_35 = arith.constant 16 : index
    %c0_36 = arith.constant 0 : index
    %137 = vector.load %arg5[%c16_35, %c0_36] : memref<64x128xf32, #tpu.memory_space<vmem>>, vector<8x128xf32>
    %138 = arith.addf %136, %137 : vector<8x128xf32>
    %c16_37 = arith.constant 16 : index
    %c0_38 = arith.constant 0 : index
    %139 = vector.load %arg6[%c16_37, %c0_38] : memref<64x128xf32, #tpu.memory_space<vmem>>, vector<8x128xf32>
    tpu.vector_store %arg6[%c16_37, %c0_38], %138 {strides = array<i32>} : memref<64x128xf32, #tpu.memory_space<vmem>>, vector<8x128xf32>,
    %c3_i32 = arith.constant 3 : i32
    %140 = arith.addi %6, %c3_i32 : i32
    %141 = vector.broadcast %140 : i32 to vector<8x1xi32>
    %142 = arith.cmpi sgt, %3, %141 : vector<8x1xi32>
    %c24 = arith.constant 24 : index
    %c0_39 = arith.constant 0 : index
    %143 = vector.load %arg2[%c24, %c0_39] : memref<64x384xf32, #tpu.memory_space<vmem>>, vector<8x384xf32>
    %144 = arith.truncf %132 : vector<8x128xf32> to vector<8x128xbf16>
    %cst_40 = arith.constant dense<0.000000e+00> : vector<8x384xf32>
    %145 = tpu.matmul %144, %4, %cst_40 {dimension_numbers = #tpu.dot_dimension_numbers<[1], [0], [0], [1], [0, 0, 1, 1], [], []>} : vector<8x128xbf16>, vector<128x384xbf16>, vector<8x384xf32> -> vector<8x384xf32>
    %146 = vector.broadcast %5 : vector<1x384xf32> to vector<8x384xf32>
    %147 = arith.addf %145, %146 : vector<8x384xf32>
    %148 = vector.extract_strided_slice %143 {offsets = [0, 0], sizes = [8, 128], strides = [1, 1]} : vector<8x384xf32> to vector<8x128xf32>
    %149 = vector.extract_strided_slice %147 {offsets = [0, 0], sizes = [8, 128], strides = [1, 1]} : vector<8x384xf32> to vector<8x128xf32>
    %150 = arith.addf %148, %149 : vector<8x128xf32>
    %151 = arith.negf %150 : vector<8x128xf32>
    %152 = math.exp %151 : vector<8x128xf32>
    %cst_41 = arith.constant 1.000000e+00 : f32
    %153 = vector.broadcast %cst_41 : f32 to vector<8x128xf32>
    %154 = arith.addf %153, %152 : vector<8x128xf32>
    %155 = arith.divf %153, %154 : vector<8x128xf32>
    %156 = vector.extract_strided_slice %143 {offsets = [0, 128], sizes = [8, 128], strides = [1, 1]} : vector<8x384xf32> to vector<8x128xf32>
    %157 = vector.extract_strided_slice %147 {offsets = [0, 128], sizes = [8, 128], strides = [1, 1]} : vector<8x384xf32> to vector<8x128xf32>
    %158 = arith.addf %156, %157 : vector<8x128xf32>
    %159 = arith.negf %158 : vector<8x128xf32>
    %160 = math.exp %159 : vector<8x128xf32>
    %cst_42 = arith.constant 1.000000e+00 : f32
    %161 = vector.broadcast %cst_42 : f32 to vector<8x128xf32>
    %162 = arith.addf %161, %160 : vector<8x128xf32>
    %163 = arith.divf %161, %162 : vector<8x128xf32>
    %164 = vector.extract_strided_slice %143 {offsets = [0, 256], sizes = [8, 128], strides = [1, 1]} : vector<8x384xf32> to vector<8x128xf32>
    %165 = vector.extract_strided_slice %147 {offsets = [0, 256], sizes = [8, 128], strides = [1, 1]} : vector<8x384xf32> to vector<8x128xf32>
    %166 = arith.mulf %155, %165 : vector<8x128xf32>
    %167 = arith.addf %164, %166 : vector<8x128xf32>
    %168 = math.tanh %167 : vector<8x128xf32>
    %cst_43 = arith.constant 1.000000e+00 : f32
    %169 = vector.broadcast %cst_43 : f32 to vector<8x128xf32>
    %170 = arith.subf %169, %163 : vector<8x128xf32>
    %171 = arith.mulf %170, %168 : vector<8x128xf32>
    %172 = arith.mulf %163, %132 : vector<8x128xf32>
    %173 = arith.addf %171, %172 : vector<8x128xf32>
    %174 = vector.shape_cast %142 : vector<8x1xi1> to vector<8x1xi1>
    %175 = vector.broadcast %174 : vector<8x1xi1> to vector<8x128xi1>
    %176 = arith.select %175, %173, %132 : vector<8x128xi1>, vector<8x128xf32>
    %cst_44 = arith.constant 0.000000e+00 : f32
    %177 = vector.shape_cast %142 : vector<8x1xi1> to vector<8x1xi1>
    %178 = vector.broadcast %177 : vector<8x1xi1> to vector<8x128xi1>
    %179 = vector.broadcast %cst_44 : f32 to vector<8x128xf32>
    %180 = arith.select %178, %176, %179 : vector<8x128xi1>, vector<8x128xf32>
    %c24_45 = arith.constant 24 : index
    %c0_46 = arith.constant 0 : index
    %181 = vector.load %arg5[%c24_45, %c0_46] : memref<64x128xf32, #tpu.memory_space<vmem>>, vector<8x128xf32>
    %182 = arith.addf %180, %181 : vector<8x128xf32>
    %c24_47 = arith.constant 24 : index
    %c0_48 = arith.constant 0 : index
    %183 = vector.load %arg6[%c24_47, %c0_48] : memref<64x128xf32, #tpu.memory_space<vmem>>, vector<8x128xf32>
    tpu.vector_store %arg6[%c24_47, %c0_48], %182 {strides = array<i32>} : memref<64x128xf32, #tpu.memory_space<vmem>>, vector<8x128xf32>,
    %c4_i32 = arith.constant 4 : i32
    %184 = arith.addi %6, %c4_i32 : i32
    %185 = vector.broadcast %184 : i32 to vector<8x1xi32>
    %186 = arith.cmpi sgt, %3, %185 : vector<8x1xi32>
    %c32 = arith.constant 32 : index
    %c0_49 = arith.constant 0 : index
    %187 = vector.load %arg2[%c32, %c0_49] : memref<64x384xf32, #tpu.memory_space<vmem>>, vector<8x384xf32>
    %188 = arith.truncf %176 : vector<8x128xf32> to vector<8x128xbf16>
    %cst_50 = arith.constant dense<0.000000e+00> : vector<8x384xf32>
    %189 = tpu.matmul %188, %4, %cst_50 {dimension_numbers = #tpu.dot_dimension_numbers<[1], [0], [0], [1], [0, 0, 1, 1], [], []>} : vector<8x128xbf16>, vector<128x384xbf16>, vector<8x384xf32> -> vector<8x384xf32>
    %190 = vector.broadcast %5 : vector<1x384xf32> to vector<8x384xf32>
    %191 = arith.addf %189, %190 : vector<8x384xf32>
    %192 = vector.extract_strided_slice %187 {offsets = [0, 0], sizes = [8, 128], strides = [1, 1]} : vector<8x384xf32> to vector<8x128xf32>
    %193 = vector.extract_strided_slice %191 {offsets = [0, 0], sizes = [8, 128], strides = [1, 1]} : vector<8x384xf32> to vector<8x128xf32>
    %194 = arith.addf %192, %193 : vector<8x128xf32>
    %195 = arith.negf %194 : vector<8x128xf32>
    %196 = math.exp %195 : vector<8x128xf32>
    %cst_51 = arith.constant 1.000000e+00 : f32
    %197 = vector.broadcast %cst_51 : f32 to vector<8x128xf32>
    %198 = arith.addf %197, %196 : vector<8x128xf32>
    %199 = arith.divf %197, %198 : vector<8x128xf32>
    %200 = vector.extract_strided_slice %187 {offsets = [0, 128], sizes = [8, 128], strides = [1, 1]} : vector<8x384xf32> to vector<8x128xf32>
    %201 = vector.extract_strided_slice %191 {offsets = [0, 128], sizes = [8, 128], strides = [1, 1]} : vector<8x384xf32> to vector<8x128xf32>
    %202 = arith.addf %200, %201 : vector<8x128xf32>
    %203 = arith.negf %202 : vector<8x128xf32>
    %204 = math.exp %203 : vector<8x128xf32>
    %cst_52 = arith.constant 1.000000e+00 : f32
    %205 = vector.broadcast %cst_52 : f32 to vector<8x128xf32>
    %206 = arith.addf %205, %204 : vector<8x128xf32>
    %207 = arith.divf %205, %206 : vector<8x128xf32>
    %208 = vector.extract_strided_slice %187 {offsets = [0, 256], sizes = [8, 128], strides = [1, 1]} : vector<8x384xf32> to vector<8x128xf32>
    %209 = vector.extract_strided_slice %191 {offsets = [0, 256], sizes = [8, 128], strides = [1, 1]} : vector<8x384xf32> to vector<8x128xf32>
    %210 = arith.mulf %199, %209 : vector<8x128xf32>
    %211 = arith.addf %208, %210 : vector<8x128xf32>
    %212 = math.tanh %211 : vector<8x128xf32>
    %cst_53 = arith.constant 1.000000e+00 : f32
    %213 = vector.broadcast %cst_53 : f32 to vector<8x128xf32>
    %214 = arith.subf %213, %207 : vector<8x128xf32>
    %215 = arith.mulf %214, %212 : vector<8x128xf32>
    %216 = arith.mulf %207, %176 : vector<8x128xf32>
    %217 = arith.addf %215, %216 : vector<8x128xf32>
    %218 = vector.shape_cast %186 : vector<8x1xi1> to vector<8x1xi1>
    %219 = vector.broadcast %218 : vector<8x1xi1> to vector<8x128xi1>
    %220 = arith.select %219, %217, %176 : vector<8x128xi1>, vector<8x128xf32>
    %cst_54 = arith.constant 0.000000e+00 : f32
    %221 = vector.shape_cast %186 : vector<8x1xi1> to vector<8x1xi1>
    %222 = vector.broadcast %221 : vector<8x1xi1> to vector<8x128xi1>
    %223 = vector.broadcast %cst_54 : f32 to vector<8x128xf32>
    %224 = arith.select %222, %220, %223 : vector<8x128xi1>, vector<8x128xf32>
    %c32_55 = arith.constant 32 : index
    %c0_56 = arith.constant 0 : index
    %225 = vector.load %arg5[%c32_55, %c0_56] : memref<64x128xf32, #tpu.memory_space<vmem>>, vector<8x128xf32>
    %226 = arith.addf %224, %225 : vector<8x128xf32>
    %c32_57 = arith.constant 32 : index
    %c0_58 = arith.constant 0 : index
    %227 = vector.load %arg6[%c32_57, %c0_58] : memref<64x128xf32, #tpu.memory_space<vmem>>, vector<8x128xf32>
    tpu.vector_store %arg6[%c32_57, %c0_58], %226 {strides = array<i32>} : memref<64x128xf32, #tpu.memory_space<vmem>>, vector<8x128xf32>,
    %c5_i32 = arith.constant 5 : i32
    %228 = arith.addi %6, %c5_i32 : i32
    %229 = vector.broadcast %228 : i32 to vector<8x1xi32>
    %230 = arith.cmpi sgt, %3, %229 : vector<8x1xi32>
    %c40 = arith.constant 40 : index
    %c0_59 = arith.constant 0 : index
    %231 = vector.load %arg2[%c40, %c0_59] : memref<64x384xf32, #tpu.memory_space<vmem>>, vector<8x384xf32>
    %232 = arith.truncf %220 : vector<8x128xf32> to vector<8x128xbf16>
    %cst_60 = arith.constant dense<0.000000e+00> : vector<8x384xf32>
    %233 = tpu.matmul %232, %4, %cst_60 {dimension_numbers = #tpu.dot_dimension_numbers<[1], [0], [0], [1], [0, 0, 1, 1], [], []>} : vector<8x128xbf16>, vector<128x384xbf16>, vector<8x384xf32> -> vector<8x384xf32>
    %234 = vector.broadcast %5 : vector<1x384xf32> to vector<8x384xf32>
    %235 = arith.addf %233, %234 : vector<8x384xf32>
    %236 = vector.extract_strided_slice %231 {offsets = [0, 0], sizes = [8, 128], strides = [1, 1]} : vector<8x384xf32> to vector<8x128xf32>
    %237 = vector.extract_strided_slice %235 {offsets = [0, 0], sizes = [8, 128], strides = [1, 1]} : vector<8x384xf32> to vector<8x128xf32>
    %238 = arith.addf %236, %237 : vector<8x128xf32>
    %239 = arith.negf %238 : vector<8x128xf32>
    %240 = math.exp %239 : vector<8x128xf32>
    %cst_61 = arith.constant 1.000000e+00 : f32
    %241 = vector.broadcast %cst_61 : f32 to vector<8x128xf32>
    %242 = arith.addf %241, %240 : vector<8x128xf32>
    %243 = arith.divf %241, %242 : vector<8x128xf32>
    %244 = vector.extract_strided_slice %231 {offsets = [0, 128], sizes = [8, 128], strides = [1, 1]} : vector<8x384xf32> to vector<8x128xf32>
    %245 = vector.extract_strided_slice %235 {offsets = [0, 128], sizes = [8, 128], strides = [1, 1]} : vector<8x384xf32> to vector<8x128xf32>
    %246 = arith.addf %244, %245 : vector<8x128xf32>
    %247 = arith.negf %246 : vector<8x128xf32>
    %248 = math.exp %247 : vector<8x128xf32>
    %cst_62 = arith.constant 1.000000e+00 : f32
    %249 = vector.broadcast %cst_62 : f32 to vector<8x128xf32>
    %250 = arith.addf %249, %248 : vector<8x128xf32>
    %251 = arith.divf %249, %250 : vector<8x128xf32>
    %252 = vector.extract_strided_slice %231 {offsets = [0, 256], sizes = [8, 128], strides = [1, 1]} : vector<8x384xf32> to vector<8x128xf32>
    %253 = vector.extract_strided_slice %235 {offsets = [0, 256], sizes = [8, 128], strides = [1, 1]} : vector<8x384xf32> to vector<8x128xf32>
    %254 = arith.mulf %243, %253 : vector<8x128xf32>
    %255 = arith.addf %252, %254 : vector<8x128xf32>
    %256 = math.tanh %255 : vector<8x128xf32>
    %cst_63 = arith.constant 1.000000e+00 : f32
    %257 = vector.broadcast %cst_63 : f32 to vector<8x128xf32>
    %258 = arith.subf %257, %251 : vector<8x128xf32>
    %259 = arith.mulf %258, %256 : vector<8x128xf32>
    %260 = arith.mulf %251, %220 : vector<8x128xf32>
    %261 = arith.addf %259, %260 : vector<8x128xf32>
    %262 = vector.shape_cast %230 : vector<8x1xi1> to vector<8x1xi1>
    %263 = vector.broadcast %262 : vector<8x1xi1> to vector<8x128xi1>
    %264 = arith.select %263, %261, %220 : vector<8x128xi1>, vector<8x128xf32>
    %cst_64 = arith.constant 0.000000e+00 : f32
    %265 = vector.shape_cast %230 : vector<8x1xi1> to vector<8x1xi1>
    %266 = vector.broadcast %265 : vector<8x1xi1> to vector<8x128xi1>
    %267 = vector.broadcast %cst_64 : f32 to vector<8x128xf32>
    %268 = arith.select %266, %264, %267 : vector<8x128xi1>, vector<8x128xf32>
    %c40_65 = arith.constant 40 : index
    %c0_66 = arith.constant 0 : index
    %269 = vector.load %arg5[%c40_65, %c0_66] : memref<64x128xf32, #tpu.memory_space<vmem>>, vector<8x128xf32>
    %270 = arith.addf %268, %269 : vector<8x128xf32>
    %c40_67 = arith.constant 40 : index
    %c0_68 = arith.constant 0 : index
    %271 = vector.load %arg6[%c40_67, %c0_68] : memref<64x128xf32, #tpu.memory_space<vmem>>, vector<8x128xf32>
    tpu.vector_store %arg6[%c40_67, %c0_68], %270 {strides = array<i32>} : memref<64x128xf32, #tpu.memory_space<vmem>>, vector<8x128xf32>,
    %c6_i32 = arith.constant 6 : i32
    %272 = arith.addi %6, %c6_i32 : i32
    %273 = vector.broadcast %272 : i32 to vector<8x1xi32>
    %274 = arith.cmpi sgt, %3, %273 : vector<8x1xi32>
    %c48 = arith.constant 48 : index
    %c0_69 = arith.constant 0 : index
    %275 = vector.load %arg2[%c48, %c0_69] : memref<64x384xf32, #tpu.memory_space<vmem>>, vector<8x384xf32>
    %276 = arith.truncf %264 : vector<8x128xf32> to vector<8x128xbf16>
    %cst_70 = arith.constant dense<0.000000e+00> : vector<8x384xf32>
    %277 = tpu.matmul %276, %4, %cst_70 {dimension_numbers = #tpu.dot_dimension_numbers<[1], [0], [0], [1], [0, 0, 1, 1], [], []>} : vector<8x128xbf16>, vector<128x384xbf16>, vector<8x384xf32> -> vector<8x384xf32>
    %278 = vector.broadcast %5 : vector<1x384xf32> to vector<8x384xf32>
    %279 = arith.addf %277, %278 : vector<8x384xf32>
    %280 = vector.extract_strided_slice %275 {offsets = [0, 0], sizes = [8, 128], strides = [1, 1]} : vector<8x384xf32> to vector<8x128xf32>
    %281 = vector.extract_strided_slice %279 {offsets = [0, 0], sizes = [8, 128], strides = [1, 1]} : vector<8x384xf32> to vector<8x128xf32>
    %282 = arith.addf %280, %281 : vector<8x128xf32>
    %283 = arith.negf %282 : vector<8x128xf32>
    %284 = math.exp %283 : vector<8x128xf32>
    %cst_71 = arith.constant 1.000000e+00 : f32
    %285 = vector.broadcast %cst_71 : f32 to vector<8x128xf32>
    %286 = arith.addf %285, %284 : vector<8x128xf32>
    %287 = arith.divf %285, %286 : vector<8x128xf32>
    %288 = vector.extract_strided_slice %275 {offsets = [0, 128], sizes = [8, 128], strides = [1, 1]} : vector<8x384xf32> to vector<8x128xf32>
    %289 = vector.extract_strided_slice %279 {offsets = [0, 128], sizes = [8, 128], strides = [1, 1]} : vector<8x384xf32> to vector<8x128xf32>
    %290 = arith.addf %288, %289 : vector<8x128xf32>
    %291 = arith.negf %290 : vector<8x128xf32>
    %292 = math.exp %291 : vector<8x128xf32>
    %cst_72 = arith.constant 1.000000e+00 : f32
    %293 = vector.broadcast %cst_72 : f32 to vector<8x128xf32>
    %294 = arith.addf %293, %292 : vector<8x128xf32>
    %295 = arith.divf %293, %294 : vector<8x128xf32>
    %296 = vector.extract_strided_slice %275 {offsets = [0, 256], sizes = [8, 128], strides = [1, 1]} : vector<8x384xf32> to vector<8x128xf32>
    %297 = vector.extract_strided_slice %279 {offsets = [0, 256], sizes = [8, 128], strides = [1, 1]} : vector<8x384xf32> to vector<8x128xf32>
    %298 = arith.mulf %287, %297 : vector<8x128xf32>
    %299 = arith.addf %296, %298 : vector<8x128xf32>
    %300 = math.tanh %299 : vector<8x128xf32>
    %cst_73 = arith.constant 1.000000e+00 : f32
    %301 = vector.broadcast %cst_73 : f32 to vector<8x128xf32>
    %302 = arith.subf %301, %295 : vector<8x128xf32>
    %303 = arith.mulf %302, %300 : vector<8x128xf32>
    %304 = arith.mulf %295, %264 : vector<8x128xf32>
    %305 = arith.addf %303, %304 : vector<8x128xf32>
    %306 = vector.shape_cast %274 : vector<8x1xi1> to vector<8x1xi1>
    %307 = vector.broadcast %306 : vector<8x1xi1> to vector<8x128xi1>
    %308 = arith.select %307, %305, %264 : vector<8x128xi1>, vector<8x128xf32>
    %cst_74 = arith.constant 0.000000e+00 : f32
    %309 = vector.shape_cast %274 : vector<8x1xi1> to vector<8x1xi1>
    %310 = vector.broadcast %309 : vector<8x1xi1> to vector<8x128xi1>
    %311 = vector.broadcast %cst_74 : f32 to vector<8x128xf32>
    %312 = arith.select %310, %308, %311 : vector<8x128xi1>, vector<8x128xf32>
    %c48_75 = arith.constant 48 : index
    %c0_76 = arith.constant 0 : index
    %313 = vector.load %arg5[%c48_75, %c0_76] : memref<64x128xf32, #tpu.memory_space<vmem>>, vector<8x128xf32>
    %314 = arith.addf %312, %313 : vector<8x128xf32>
    %c48_77 = arith.constant 48 : index
    %c0_78 = arith.constant 0 : index
    %315 = vector.load %arg6[%c48_77, %c0_78] : memref<64x128xf32, #tpu.memory_space<vmem>>, vector<8x128xf32>
    tpu.vector_store %arg6[%c48_77, %c0_78], %314 {strides = array<i32>} : memref<64x128xf32, #tpu.memory_space<vmem>>, vector<8x128xf32>,
    %c7_i32 = arith.constant 7 : i32
    %316 = arith.addi %6, %c7_i32 : i32
    %317 = vector.broadcast %316 : i32 to vector<8x1xi32>
    %318 = arith.cmpi sgt, %3, %317 : vector<8x1xi32>
    %c56 = arith.constant 56 : index
    %c0_79 = arith.constant 0 : index
    %319 = vector.load %arg2[%c56, %c0_79] : memref<64x384xf32, #tpu.memory_space<vmem>>, vector<8x384xf32>
    %320 = arith.truncf %308 : vector<8x128xf32> to vector<8x128xbf16>
    %cst_80 = arith.constant dense<0.000000e+00> : vector<8x384xf32>
    %321 = tpu.matmul %320, %4, %cst_80 {dimension_numbers = #tpu.dot_dimension_numbers<[1], [0], [0], [1], [0, 0, 1, 1], [], []>} : vector<8x128xbf16>, vector<128x384xbf16>, vector<8x384xf32> -> vector<8x384xf32>
    %322 = vector.broadcast %5 : vector<1x384xf32> to vector<8x384xf32>
    %323 = arith.addf %321, %322 : vector<8x384xf32>
    %324 = vector.extract_strided_slice %319 {offsets = [0, 0], sizes = [8, 128], strides = [1, 1]} : vector<8x384xf32> to vector<8x128xf32>
    %325 = vector.extract_strided_slice %323 {offsets = [0, 0], sizes = [8, 128], strides = [1, 1]} : vector<8x384xf32> to vector<8x128xf32>
    %326 = arith.addf %324, %325 : vector<8x128xf32>
    %327 = arith.negf %326 : vector<8x128xf32>
    %328 = math.exp %327 : vector<8x128xf32>
    %cst_81 = arith.constant 1.000000e+00 : f32
    %329 = vector.broadcast %cst_81 : f32 to vector<8x128xf32>
    %330 = arith.addf %329, %328 : vector<8x128xf32>
    %331 = arith.divf %329, %330 : vector<8x128xf32>
    %332 = vector.extract_strided_slice %319 {offsets = [0, 128], sizes = [8, 128], strides = [1, 1]} : vector<8x384xf32> to vector<8x128xf32>
    %333 = vector.extract_strided_slice %323 {offsets = [0, 128], sizes = [8, 128], strides = [1, 1]} : vector<8x384xf32> to vector<8x128xf32>
    %334 = arith.addf %332, %333 : vector<8x128xf32>
    %335 = arith.negf %334 : vector<8x128xf32>
    %336 = math.exp %335 : vector<8x128xf32>
    %cst_82 = arith.constant 1.000000e+00 : f32
    %337 = vector.broadcast %cst_82 : f32 to vector<8x128xf32>
    %338 = arith.addf %337, %336 : vector<8x128xf32>
    %339 = arith.divf %337, %338 : vector<8x128xf32>
    %340 = vector.extract_strided_slice %319 {offsets = [0, 256], sizes = [8, 128], strides = [1, 1]} : vector<8x384xf32> to vector<8x128xf32>
    %341 = vector.extract_strided_slice %323 {offsets = [0, 256], sizes = [8, 128], strides = [1, 1]} : vector<8x384xf32> to vector<8x128xf32>
    %342 = arith.mulf %331, %341 : vector<8x128xf32>
    %343 = arith.addf %340, %342 : vector<8x128xf32>
    %344 = math.tanh %343 : vector<8x128xf32>
    %cst_83 = arith.constant 1.000000e+00 : f32
    %345 = vector.broadcast %cst_83 : f32 to vector<8x128xf32>
    %346 = arith.subf %345, %339 : vector<8x128xf32>
    %347 = arith.mulf %346, %344 : vector<8x128xf32>
    %348 = arith.mulf %339, %308 : vector<8x128xf32>
    %349 = arith.addf %347, %348 : vector<8x128xf32>
    %350 = vector.shape_cast %318 : vector<8x1xi1> to vector<8x1xi1>
    %351 = vector.broadcast %350 : vector<8x1xi1> to vector<8x128xi1>
    %352 = arith.select %351, %349, %308 : vector<8x128xi1>, vector<8x128xf32>
    %cst_84 = arith.constant 0.000000e+00 : f32
    %353 = vector.shape_cast %318 : vector<8x1xi1> to vector<8x1xi1>
    %354 = vector.broadcast %353 : vector<8x1xi1> to vector<8x128xi1>
    %355 = vector.broadcast %cst_84 : f32 to vector<8x128xf32>
    %356 = arith.select %354, %352, %355 : vector<8x128xi1>, vector<8x128xf32>
    %c56_85 = arith.constant 56 : index
    %c0_86 = arith.constant 0 : index
    %357 = vector.load %arg5[%c56_85, %c0_86] : memref<64x128xf32, #tpu.memory_space<vmem>>, vector<8x128xf32>
    %358 = arith.addf %356, %357 : vector<8x128xf32>
    %c56_87 = arith.constant 56 : index
    %c0_88 = arith.constant 0 : index
    %359 = vector.load %arg6[%c56_87, %c0_88] : memref<64x128xf32, #tpu.memory_space<vmem>>, vector<8x128xf32>
    tpu.vector_store %arg6[%c56_87, %c0_88], %358 {strides = array<i32>} : memref<64x128xf32, #tpu.memory_space<vmem>>, vector<8x128xf32>,
    %c0_89 = arith.constant 0 : index
    %c0_90 = arith.constant 0 : index
    %360 = vector.load %arg7[%c0_89, %c0_90] : memref<8x128xf32, #tpu.memory_space<vmem>>, vector<8x128xf32>
    tpu.vector_store %arg7[%c0_89, %c0_90], %352 {strides = array<i32>} : memref<8x128xf32, #tpu.memory_space<vmem>>, vector<8x128xf32>,
    return
  }
  func.func @transform_0(%arg0: i32) -> (i32, i32) {
    %c0_i32 = arith.constant 0 : i32
    %c0_i32_0 = arith.constant 0 : i32
    %c0_i32_1 = arith.constant 0 : i32
    return %c0_i32, %c0_i32_0 : i32, i32
  }
  func.func @transform_1(%arg0: i32) -> (i32, i32) {
    %c0_i32 = arith.constant 0 : i32
    %c0_i32_0 = arith.constant 0 : i32
    return %arg0, %c0_i32 : i32, i32
  }
  func.func @transform_2(%arg0: i32) -> (i32, i32) {
    %c0_i32 = arith.constant 0 : i32
    %c0_i32_0 = arith.constant 0 : i32
    %c0_i32_1 = arith.constant 0 : i32
    return %c0_i32, %c0_i32_0 : i32, i32
  }
  func.func @transform_3(%arg0: i32) -> (i32, i32) {
    %c0_i32 = arith.constant 0 : i32
    %c0_i32_0 = arith.constant 0 : i32
    %c0_i32_1 = arith.constant 0 : i32
    return %c0_i32, %c0_i32_0 : i32, i32
  }
  func.func @transform_4(%arg0: i32) -> (i32, i32) {
    %c0_i32 = arith.constant 0 : i32
    %c0_i32_0 = arith.constant 0 : i32
    return %arg0, %c0_i32 : i32, i32
  }
  func.func @transform_5(%arg0: i32) -> (i32, i32) {
    %c0_i32 = arith.constant 0 : i32
    %c0_i32_0 = arith.constant 0 : i32
    return %arg0, %c0_i32 : i32, i32
  }
  func.func @transform_6(%arg0: i32) -> (i32, i32) {
    %c0_i32 = arith.constant 0 : i32
    %c0_i32_0 = arith.constant 0 : i32
    %c0_i32_1 = arith.constant 0 : i32
    return %c0_i32, %c0_i32_0 : i32, i32
  }
}

module attributes {stable_mosaic.version = 11 : i64} {
  func.func @_input_proj_kernel(%arg0: i32, %arg1: memref<64x128xbf16, #tpu.memory_space<vmem>>, %arg2: memref<128x768xbf16, #tpu.memory_space<vmem>>, %arg3: memref<1x768xf32, #tpu.memory_space<vmem>>, %arg4: memref<64x768xf32, #tpu.memory_space<vmem>>) attributes {dimension_semantics = [#tpu.dimension_semantics<parallel>], iteration_bounds = array<i64: 2>, scalar_prefetch = 0 : i64, scratch_operands = 0 : i64, tpu.core_type = #tpu.core_type<tc>, window_params = [{transform_indices = @transform_0, window_bounds = array<i64: 64, 128>}, {pipeline_mode = #tpu.pipeline_mode<synchronous>, transform_indices = @transform_1, window_bounds = array<i64: 128, 768>}, {pipeline_mode = #tpu.pipeline_mode<synchronous>, transform_indices = @transform_2, window_bounds = array<i64: 1, 768>}, {transform_indices = @transform_3, window_bounds = array<i64: 64, 768>}]} {
    %c0 = arith.constant 0 : index
    %c0_0 = arith.constant 0 : index
    %0 = vector.load %arg1[%c0, %c0_0] : memref<64x128xbf16, #tpu.memory_space<vmem>>, vector<64x128xbf16>
    %c0_1 = arith.constant 0 : index
    %c0_2 = arith.constant 0 : index
    %1 = vector.load %arg2[%c0_1, %c0_2] : memref<128x768xbf16, #tpu.memory_space<vmem>>, vector<128x768xbf16>
    %cst = arith.constant dense<0.000000e+00> : vector<64x768xf32>
    %2 = tpu.matmul %0, %1, %cst {dimension_numbers = #tpu.dot_dimension_numbers<[1], [0], [0], [1], [0, 0, 1, 1], [], []>} : vector<64x128xbf16>, vector<128x768xbf16>, vector<64x768xf32> -> vector<64x768xf32>
    %c0_3 = arith.constant 0 : index
    %c0_4 = arith.constant 0 : index
    %3 = vector.load %arg3[%c0_3, %c0_4] : memref<1x768xf32, #tpu.memory_space<vmem>>, vector<1x768xf32>
    %4 = vector.broadcast %3 : vector<1x768xf32> to vector<64x768xf32>
    %5 = arith.addf %2, %4 : vector<64x768xf32>
    %c0_5 = arith.constant 0 : index
    %c0_6 = arith.constant 0 : index
    %6 = vector.load %arg4[%c0_5, %c0_6] : memref<64x768xf32, #tpu.memory_space<vmem>>, vector<64x768xf32>
    tpu.vector_store %arg4[%c0_5, %c0_6], %5 {strides = array<i32>} : memref<64x768xf32, #tpu.memory_space<vmem>>, vector<64x768xf32>,
    return
  }
  func.func @transform_0(%arg0: i32) -> (i32, i32) {
    %c0_i32 = arith.constant 0 : i32
    %c0_i32_0 = arith.constant 0 : i32
    return %arg0, %c0_i32 : i32, i32
  }
  func.func @transform_1(%arg0: i32) -> (i32, i32) {
    %c0_i32 = arith.constant 0 : i32
    %c0_i32_0 = arith.constant 0 : i32
    %c0_i32_1 = arith.constant 0 : i32
    return %c0_i32, %c0_i32_0 : i32, i32
  }
  func.func @transform_2(%arg0: i32) -> (i32, i32) {
    %c0_i32 = arith.constant 0 : i32
    %c0_i32_0 = arith.constant 0 : i32
    %c0_i32_1 = arith.constant 0 : i32
    return %c0_i32, %c0_i32_0 : i32, i32
  }
  func.func @transform_3(%arg0: i32) -> (i32, i32) {
    %c0_i32 = arith.constant 0 : i32
    %c0_i32_0 = arith.constant 0 : i32
    return %arg0, %c0_i32 : i32, i32
  }
}

module attributes {stable_mosaic.version = 11 : i64} {
  func.func @_gru_dir_kernel(%arg0: i32, %arg1: memref<8x1xi32, #tpu.memory_space<vmem>>, %arg2: memref<64x384xf32, #tpu.memory_space<vmem>>, %arg3: memref<128x384xbf16, #tpu.memory_space<vmem>>, %arg4: memref<1x384xf32, #tpu.memory_space<vmem>>, %arg5: memref<64x128xf32, #tpu.memory_space<vmem>>, %arg6: memref<8x128xf32, #tpu.memory_space<vmem>>) attributes {dimension_semantics = [#tpu.dimension_semantics<arbitrary>], iteration_bounds = array<i64: 2>, scalar_prefetch = 0 : i64, scratch_operands = 0 : i64, tpu.core_type = #tpu.core_type<tc>, window_params = [{pipeline_mode = #tpu.pipeline_mode<synchronous>, transform_indices = @transform_0, window_bounds = array<i64: 8, 1>}, {transform_indices = @transform_1, window_bounds = array<i64: 64, 384>}, {pipeline_mode = #tpu.pipeline_mode<synchronous>, transform_indices = @transform_2, window_bounds = array<i64: 128, 384>}, {pipeline_mode = #tpu.pipeline_mode<synchronous>, transform_indices = @transform_3, window_bounds = array<i64: 1, 384>}, {transform_indices = @transform_4, window_bounds = array<i64: 64, 128>}, {pipeline_mode = #tpu.pipeline_mode<synchronous>, transform_indices = @transform_5, window_bounds = array<i64: 8, 128>}]} {
    %c0_i32 = arith.constant 0 : i32
    %0 = arith.cmpi eq, %arg0, %c0_i32 : i32
    %1 = arith.extui %0 : i1 to i32
    %c0_i32_0 = arith.constant 0 : i32
    %2 = arith.cmpi ne, %1, %c0_i32_0 : i32
    scf.if %2 {
      %cst_76 = arith.constant 0.000000e+00 : f32
      %346 = vector.broadcast %cst_76 : f32 to vector<8x128xf32>
      %c0_77 = arith.constant 0 : index
      %c0_78 = arith.constant 0 : index
      %347 = vector.load %arg6[%c0_77, %c0_78] : memref<8x128xf32, #tpu.memory_space<vmem>>, vector<8x128xf32>
      tpu.vector_store %arg6[%c0_77, %c0_78], %346 {strides = array<i32>} : memref<8x128xf32, #tpu.memory_space<vmem>>, vector<8x128xf32>,
    } else {
    }
    %c0 = arith.constant 0 : index
    %c0_1 = arith.constant 0 : index
    %3 = vector.load %arg1[%c0, %c0_1] : memref<8x1xi32, #tpu.memory_space<vmem>>, vector<8x1xi32>
    %c0_2 = arith.constant 0 : index
    %c0_3 = arith.constant 0 : index
    %4 = vector.load %arg3[%c0_2, %c0_3] : memref<128x384xbf16, #tpu.memory_space<vmem>>, vector<128x384xbf16>
    %c0_4 = arith.constant 0 : index
    %c0_5 = arith.constant 0 : index
    %5 = vector.load %arg4[%c0_4, %c0_5] : memref<1x384xf32, #tpu.memory_space<vmem>>, vector<1x384xf32>
    %c1_i32 = arith.constant 1 : i32
    %6 = arith.subi %c1_i32, %arg0 : i32
    %c8_i32 = arith.constant 8 : i32
    %7 = arith.muli %6, %c8_i32 : i32
    %c0_6 = arith.constant 0 : index
    %c0_7 = arith.constant 0 : index
    %8 = vector.load %arg6[%c0_6, %c0_7] : memref<8x128xf32, #tpu.memory_space<vmem>>, vector<8x128xf32>
    %c7_i32 = arith.constant 7 : i32
    %9 = arith.addi %7, %c7_i32 : i32
    %10 = vector.broadcast %9 : i32 to vector<8x1xi32>
    %11 = arith.cmpi sgt, %3, %10 : vector<8x1xi32>
    %c56 = arith.constant 56 : index
    %c0_8 = arith.constant 0 : index
    %12 = vector.load %arg2[%c56, %c0_8] : memref<64x384xf32, #tpu.memory_space<vmem>>, vector<8x384xf32>
    %13 = arith.truncf %8 : vector<8x128xf32> to vector<8x128xbf16>
    %cst = arith.constant dense<0.000000e+00> : vector<8x384xf32>
    %14 = tpu.matmul %13, %4, %cst {dimension_numbers = #tpu.dot_dimension_numbers<[1], [0], [0], [1], [0, 0, 1, 1], [], []>} : vector<8x128xbf16>, vector<128x384xbf16>, vector<8x384xf32> -> vector<8x384xf32>
    %15 = vector.broadcast %5 : vector<1x384xf32> to vector<8x384xf32>
    %16 = arith.addf %14, %15 : vector<8x384xf32>
    %17 = vector.extract_strided_slice %12 {offsets = [0, 0], sizes = [8, 128], strides = [1, 1]} : vector<8x384xf32> to vector<8x128xf32>
    %18 = vector.extract_strided_slice %16 {offsets = [0, 0], sizes = [8, 128], strides = [1, 1]} : vector<8x384xf32> to vector<8x128xf32>
    %19 = arith.addf %17, %18 : vector<8x128xf32>
    %20 = arith.negf %19 : vector<8x128xf32>
    %21 = math.exp %20 : vector<8x128xf32>
    %cst_9 = arith.constant 1.000000e+00 : f32
    %22 = vector.broadcast %cst_9 : f32 to vector<8x128xf32>
    %23 = arith.addf %22, %21 : vector<8x128xf32>
    %24 = arith.divf %22, %23 : vector<8x128xf32>
    %25 = vector.extract_strided_slice %12 {offsets = [0, 128], sizes = [8, 128], strides = [1, 1]} : vector<8x384xf32> to vector<8x128xf32>
    %26 = vector.extract_strided_slice %16 {offsets = [0, 128], sizes = [8, 128], strides = [1, 1]} : vector<8x384xf32> to vector<8x128xf32>
    %27 = arith.addf %25, %26 : vector<8x128xf32>
    %28 = arith.negf %27 : vector<8x128xf32>
    %29 = math.exp %28 : vector<8x128xf32>
    %cst_10 = arith.constant 1.000000e+00 : f32
    %30 = vector.broadcast %cst_10 : f32 to vector<8x128xf32>
    %31 = arith.addf %30, %29 : vector<8x128xf32>
    %32 = arith.divf %30, %31 : vector<8x128xf32>
    %33 = vector.extract_strided_slice %12 {offsets = [0, 256], sizes = [8, 128], strides = [1, 1]} : vector<8x384xf32> to vector<8x128xf32>
    %34 = vector.extract_strided_slice %16 {offsets = [0, 256], sizes = [8, 128], strides = [1, 1]} : vector<8x384xf32> to vector<8x128xf32>
    %35 = arith.mulf %24, %34 : vector<8x128xf32>
    %36 = arith.addf %33, %35 : vector<8x128xf32>
    %37 = math.tanh %36 : vector<8x128xf32>
    %cst_11 = arith.constant 1.000000e+00 : f32
    %38 = vector.broadcast %cst_11 : f32 to vector<8x128xf32>
    %39 = arith.subf %38, %32 : vector<8x128xf32>
    %40 = arith.mulf %39, %37 : vector<8x128xf32>
    %41 = arith.mulf %32, %8 : vector<8x128xf32>
    %42 = arith.addf %40, %41 : vector<8x128xf32>
    %43 = vector.shape_cast %11 : vector<8x1xi1> to vector<8x1xi1>
    %44 = vector.broadcast %43 : vector<8x1xi1> to vector<8x128xi1>
    %45 = arith.select %44, %42, %8 : vector<8x128xi1>, vector<8x128xf32>
    %cst_12 = arith.constant 0.000000e+00 : f32
    %46 = vector.shape_cast %11 : vector<8x1xi1> to vector<8x1xi1>
    %47 = vector.broadcast %46 : vector<8x1xi1> to vector<8x128xi1>
    %48 = vector.broadcast %cst_12 : f32 to vector<8x128xf32>
    %49 = arith.select %47, %45, %48 : vector<8x128xi1>, vector<8x128xf32>
    %c56_13 = arith.constant 56 : index
    %c0_14 = arith.constant 0 : index
    %50 = vector.load %arg5[%c56_13, %c0_14] : memref<64x128xf32, #tpu.memory_space<vmem>>, vector<8x128xf32>
    tpu.vector_store %arg5[%c56_13, %c0_14], %49 {strides = array<i32>} : memref<64x128xf32, #tpu.memory_space<vmem>>, vector<8x128xf32>,
    %c6_i32 = arith.constant 6 : i32
    %51 = arith.addi %7, %c6_i32 : i32
    %52 = vector.broadcast %51 : i32 to vector<8x1xi32>
    %53 = arith.cmpi sgt, %3, %52 : vector<8x1xi32>
    %c48 = arith.constant 48 : index
    %c0_15 = arith.constant 0 : index
    %54 = vector.load %arg2[%c48, %c0_15] : memref<64x384xf32, #tpu.memory_space<vmem>>, vector<8x384xf32>
    %55 = arith.truncf %45 : vector<8x128xf32> to vector<8x128xbf16>
    %cst_16 = arith.constant dense<0.000000e+00> : vector<8x384xf32>
    %56 = tpu.matmul %55, %4, %cst_16 {dimension_numbers = #tpu.dot_dimension_numbers<[1], [0], [0], [1], [0, 0, 1, 1], [], []>} : vector<8x128xbf16>, vector<128x384xbf16>, vector<8x384xf32> -> vector<8x384xf32>
    %57 = vector.broadcast %5 : vector<1x384xf32> to vector<8x384xf32>
    %58 = arith.addf %56, %57 : vector<8x384xf32>
    %59 = vector.extract_strided_slice %54 {offsets = [0, 0], sizes = [8, 128], strides = [1, 1]} : vector<8x384xf32> to vector<8x128xf32>
    %60 = vector.extract_strided_slice %58 {offsets = [0, 0], sizes = [8, 128], strides = [1, 1]} : vector<8x384xf32> to vector<8x128xf32>
    %61 = arith.addf %59, %60 : vector<8x128xf32>
    %62 = arith.negf %61 : vector<8x128xf32>
    %63 = math.exp %62 : vector<8x128xf32>
    %cst_17 = arith.constant 1.000000e+00 : f32
    %64 = vector.broadcast %cst_17 : f32 to vector<8x128xf32>
    %65 = arith.addf %64, %63 : vector<8x128xf32>
    %66 = arith.divf %64, %65 : vector<8x128xf32>
    %67 = vector.extract_strided_slice %54 {offsets = [0, 128], sizes = [8, 128], strides = [1, 1]} : vector<8x384xf32> to vector<8x128xf32>
    %68 = vector.extract_strided_slice %58 {offsets = [0, 128], sizes = [8, 128], strides = [1, 1]} : vector<8x384xf32> to vector<8x128xf32>
    %69 = arith.addf %67, %68 : vector<8x128xf32>
    %70 = arith.negf %69 : vector<8x128xf32>
    %71 = math.exp %70 : vector<8x128xf32>
    %cst_18 = arith.constant 1.000000e+00 : f32
    %72 = vector.broadcast %cst_18 : f32 to vector<8x128xf32>
    %73 = arith.addf %72, %71 : vector<8x128xf32>
    %74 = arith.divf %72, %73 : vector<8x128xf32>
    %75 = vector.extract_strided_slice %54 {offsets = [0, 256], sizes = [8, 128], strides = [1, 1]} : vector<8x384xf32> to vector<8x128xf32>
    %76 = vector.extract_strided_slice %58 {offsets = [0, 256], sizes = [8, 128], strides = [1, 1]} : vector<8x384xf32> to vector<8x128xf32>
    %77 = arith.mulf %66, %76 : vector<8x128xf32>
    %78 = arith.addf %75, %77 : vector<8x128xf32>
    %79 = math.tanh %78 : vector<8x128xf32>
    %cst_19 = arith.constant 1.000000e+00 : f32
    %80 = vector.broadcast %cst_19 : f32 to vector<8x128xf32>
    %81 = arith.subf %80, %74 : vector<8x128xf32>
    %82 = arith.mulf %81, %79 : vector<8x128xf32>
    %83 = arith.mulf %74, %45 : vector<8x128xf32>
    %84 = arith.addf %82, %83 : vector<8x128xf32>
    %85 = vector.shape_cast %53 : vector<8x1xi1> to vector<8x1xi1>
    %86 = vector.broadcast %85 : vector<8x1xi1> to vector<8x128xi1>
    %87 = arith.select %86, %84, %45 : vector<8x128xi1>, vector<8x128xf32>
    %cst_20 = arith.constant 0.000000e+00 : f32
    %88 = vector.shape_cast %53 : vector<8x1xi1> to vector<8x1xi1>
    %89 = vector.broadcast %88 : vector<8x1xi1> to vector<8x128xi1>
    %90 = vector.broadcast %cst_20 : f32 to vector<8x128xf32>
    %91 = arith.select %89, %87, %90 : vector<8x128xi1>, vector<8x128xf32>
    %c48_21 = arith.constant 48 : index
    %c0_22 = arith.constant 0 : index
    %92 = vector.load %arg5[%c48_21, %c0_22] : memref<64x128xf32, #tpu.memory_space<vmem>>, vector<8x128xf32>
    tpu.vector_store %arg5[%c48_21, %c0_22], %91 {strides = array<i32>} : memref<64x128xf32, #tpu.memory_space<vmem>>, vector<8x128xf32>,
    %c5_i32 = arith.constant 5 : i32
    %93 = arith.addi %7, %c5_i32 : i32
    %94 = vector.broadcast %93 : i32 to vector<8x1xi32>
    %95 = arith.cmpi sgt, %3, %94 : vector<8x1xi32>
    %c40 = arith.constant 40 : index
    %c0_23 = arith.constant 0 : index
    %96 = vector.load %arg2[%c40, %c0_23] : memref<64x384xf32, #tpu.memory_space<vmem>>, vector<8x384xf32>
    %97 = arith.truncf %87 : vector<8x128xf32> to vector<8x128xbf16>
    %cst_24 = arith.constant dense<0.000000e+00> : vector<8x384xf32>
    %98 = tpu.matmul %97, %4, %cst_24 {dimension_numbers = #tpu.dot_dimension_numbers<[1], [0], [0], [1], [0, 0, 1, 1], [], []>} : vector<8x128xbf16>, vector<128x384xbf16>, vector<8x384xf32> -> vector<8x384xf32>
    %99 = vector.broadcast %5 : vector<1x384xf32> to vector<8x384xf32>
    %100 = arith.addf %98, %99 : vector<8x384xf32>
    %101 = vector.extract_strided_slice %96 {offsets = [0, 0], sizes = [8, 128], strides = [1, 1]} : vector<8x384xf32> to vector<8x128xf32>
    %102 = vector.extract_strided_slice %100 {offsets = [0, 0], sizes = [8, 128], strides = [1, 1]} : vector<8x384xf32> to vector<8x128xf32>
    %103 = arith.addf %101, %102 : vector<8x128xf32>
    %104 = arith.negf %103 : vector<8x128xf32>
    %105 = math.exp %104 : vector<8x128xf32>
    %cst_25 = arith.constant 1.000000e+00 : f32
    %106 = vector.broadcast %cst_25 : f32 to vector<8x128xf32>
    %107 = arith.addf %106, %105 : vector<8x128xf32>
    %108 = arith.divf %106, %107 : vector<8x128xf32>
    %109 = vector.extract_strided_slice %96 {offsets = [0, 128], sizes = [8, 128], strides = [1, 1]} : vector<8x384xf32> to vector<8x128xf32>
    %110 = vector.extract_strided_slice %100 {offsets = [0, 128], sizes = [8, 128], strides = [1, 1]} : vector<8x384xf32> to vector<8x128xf32>
    %111 = arith.addf %109, %110 : vector<8x128xf32>
    %112 = arith.negf %111 : vector<8x128xf32>
    %113 = math.exp %112 : vector<8x128xf32>
    %cst_26 = arith.constant 1.000000e+00 : f32
    %114 = vector.broadcast %cst_26 : f32 to vector<8x128xf32>
    %115 = arith.addf %114, %113 : vector<8x128xf32>
    %116 = arith.divf %114, %115 : vector<8x128xf32>
    %117 = vector.extract_strided_slice %96 {offsets = [0, 256], sizes = [8, 128], strides = [1, 1]} : vector<8x384xf32> to vector<8x128xf32>
    %118 = vector.extract_strided_slice %100 {offsets = [0, 256], sizes = [8, 128], strides = [1, 1]} : vector<8x384xf32> to vector<8x128xf32>
    %119 = arith.mulf %108, %118 : vector<8x128xf32>
    %120 = arith.addf %117, %119 : vector<8x128xf32>
    %121 = math.tanh %120 : vector<8x128xf32>
    %cst_27 = arith.constant 1.000000e+00 : f32
    %122 = vector.broadcast %cst_27 : f32 to vector<8x128xf32>
    %123 = arith.subf %122, %116 : vector<8x128xf32>
    %124 = arith.mulf %123, %121 : vector<8x128xf32>
    %125 = arith.mulf %116, %87 : vector<8x128xf32>
    %126 = arith.addf %124, %125 : vector<8x128xf32>
    %127 = vector.shape_cast %95 : vector<8x1xi1> to vector<8x1xi1>
    %128 = vector.broadcast %127 : vector<8x1xi1> to vector<8x128xi1>
    %129 = arith.select %128, %126, %87 : vector<8x128xi1>, vector<8x128xf32>
    %cst_28 = arith.constant 0.000000e+00 : f32
    %130 = vector.shape_cast %95 : vector<8x1xi1> to vector<8x1xi1>
    %131 = vector.broadcast %130 : vector<8x1xi1> to vector<8x128xi1>
    %132 = vector.broadcast %cst_28 : f32 to vector<8x128xf32>
    %133 = arith.select %131, %129, %132 : vector<8x128xi1>, vector<8x128xf32>
    %c40_29 = arith.constant 40 : index
    %c0_30 = arith.constant 0 : index
    %134 = vector.load %arg5[%c40_29, %c0_30] : memref<64x128xf32, #tpu.memory_space<vmem>>, vector<8x128xf32>
    tpu.vector_store %arg5[%c40_29, %c0_30], %133 {strides = array<i32>} : memref<64x128xf32, #tpu.memory_space<vmem>>, vector<8x128xf32>,
    %c4_i32 = arith.constant 4 : i32
    %135 = arith.addi %7, %c4_i32 : i32
    %136 = vector.broadcast %135 : i32 to vector<8x1xi32>
    %137 = arith.cmpi sgt, %3, %136 : vector<8x1xi32>
    %c32 = arith.constant 32 : index
    %c0_31 = arith.constant 0 : index
    %138 = vector.load %arg2[%c32, %c0_31] : memref<64x384xf32, #tpu.memory_space<vmem>>, vector<8x384xf32>
    %139 = arith.truncf %129 : vector<8x128xf32> to vector<8x128xbf16>
    %cst_32 = arith.constant dense<0.000000e+00> : vector<8x384xf32>
    %140 = tpu.matmul %139, %4, %cst_32 {dimension_numbers = #tpu.dot_dimension_numbers<[1], [0], [0], [1], [0, 0, 1, 1], [], []>} : vector<8x128xbf16>, vector<128x384xbf16>, vector<8x384xf32> -> vector<8x384xf32>
    %141 = vector.broadcast %5 : vector<1x384xf32> to vector<8x384xf32>
    %142 = arith.addf %140, %141 : vector<8x384xf32>
    %143 = vector.extract_strided_slice %138 {offsets = [0, 0], sizes = [8, 128], strides = [1, 1]} : vector<8x384xf32> to vector<8x128xf32>
    %144 = vector.extract_strided_slice %142 {offsets = [0, 0], sizes = [8, 128], strides = [1, 1]} : vector<8x384xf32> to vector<8x128xf32>
    %145 = arith.addf %143, %144 : vector<8x128xf32>
    %146 = arith.negf %145 : vector<8x128xf32>
    %147 = math.exp %146 : vector<8x128xf32>
    %cst_33 = arith.constant 1.000000e+00 : f32
    %148 = vector.broadcast %cst_33 : f32 to vector<8x128xf32>
    %149 = arith.addf %148, %147 : vector<8x128xf32>
    %150 = arith.divf %148, %149 : vector<8x128xf32>
    %151 = vector.extract_strided_slice %138 {offsets = [0, 128], sizes = [8, 128], strides = [1, 1]} : vector<8x384xf32> to vector<8x128xf32>
    %152 = vector.extract_strided_slice %142 {offsets = [0, 128], sizes = [8, 128], strides = [1, 1]} : vector<8x384xf32> to vector<8x128xf32>
    %153 = arith.addf %151, %152 : vector<8x128xf32>
    %154 = arith.negf %153 : vector<8x128xf32>
    %155 = math.exp %154 : vector<8x128xf32>
    %cst_34 = arith.constant 1.000000e+00 : f32
    %156 = vector.broadcast %cst_34 : f32 to vector<8x128xf32>
    %157 = arith.addf %156, %155 : vector<8x128xf32>
    %158 = arith.divf %156, %157 : vector<8x128xf32>
    %159 = vector.extract_strided_slice %138 {offsets = [0, 256], sizes = [8, 128], strides = [1, 1]} : vector<8x384xf32> to vector<8x128xf32>
    %160 = vector.extract_strided_slice %142 {offsets = [0, 256], sizes = [8, 128], strides = [1, 1]} : vector<8x384xf32> to vector<8x128xf32>
    %161 = arith.mulf %150, %160 : vector<8x128xf32>
    %162 = arith.addf %159, %161 : vector<8x128xf32>
    %163 = math.tanh %162 : vector<8x128xf32>
    %cst_35 = arith.constant 1.000000e+00 : f32
    %164 = vector.broadcast %cst_35 : f32 to vector<8x128xf32>
    %165 = arith.subf %164, %158 : vector<8x128xf32>
    %166 = arith.mulf %165, %163 : vector<8x128xf32>
    %167 = arith.mulf %158, %129 : vector<8x128xf32>
    %168 = arith.addf %166, %167 : vector<8x128xf32>
    %169 = vector.shape_cast %137 : vector<8x1xi1> to vector<8x1xi1>
    %170 = vector.broadcast %169 : vector<8x1xi1> to vector<8x128xi1>
    %171 = arith.select %170, %168, %129 : vector<8x128xi1>, vector<8x128xf32>
    %cst_36 = arith.constant 0.000000e+00 : f32
    %172 = vector.shape_cast %137 : vector<8x1xi1> to vector<8x1xi1>
    %173 = vector.broadcast %172 : vector<8x1xi1> to vector<8x128xi1>
    %174 = vector.broadcast %cst_36 : f32 to vector<8x128xf32>
    %175 = arith.select %173, %171, %174 : vector<8x128xi1>, vector<8x128xf32>
    %c32_37 = arith.constant 32 : index
    %c0_38 = arith.constant 0 : index
    %176 = vector.load %arg5[%c32_37, %c0_38] : memref<64x128xf32, #tpu.memory_space<vmem>>, vector<8x128xf32>
    tpu.vector_store %arg5[%c32_37, %c0_38], %175 {strides = array<i32>} : memref<64x128xf32, #tpu.memory_space<vmem>>, vector<8x128xf32>,
    %c3_i32 = arith.constant 3 : i32
    %177 = arith.addi %7, %c3_i32 : i32
    %178 = vector.broadcast %177 : i32 to vector<8x1xi32>
    %179 = arith.cmpi sgt, %3, %178 : vector<8x1xi32>
    %c24 = arith.constant 24 : index
    %c0_39 = arith.constant 0 : index
    %180 = vector.load %arg2[%c24, %c0_39] : memref<64x384xf32, #tpu.memory_space<vmem>>, vector<8x384xf32>
    %181 = arith.truncf %171 : vector<8x128xf32> to vector<8x128xbf16>
    %cst_40 = arith.constant dense<0.000000e+00> : vector<8x384xf32>
    %182 = tpu.matmul %181, %4, %cst_40 {dimension_numbers = #tpu.dot_dimension_numbers<[1], [0], [0], [1], [0, 0, 1, 1], [], []>} : vector<8x128xbf16>, vector<128x384xbf16>, vector<8x384xf32> -> vector<8x384xf32>
    %183 = vector.broadcast %5 : vector<1x384xf32> to vector<8x384xf32>
    %184 = arith.addf %182, %183 : vector<8x384xf32>
    %185 = vector.extract_strided_slice %180 {offsets = [0, 0], sizes = [8, 128], strides = [1, 1]} : vector<8x384xf32> to vector<8x128xf32>
    %186 = vector.extract_strided_slice %184 {offsets = [0, 0], sizes = [8, 128], strides = [1, 1]} : vector<8x384xf32> to vector<8x128xf32>
    %187 = arith.addf %185, %186 : vector<8x128xf32>
    %188 = arith.negf %187 : vector<8x128xf32>
    %189 = math.exp %188 : vector<8x128xf32>
    %cst_41 = arith.constant 1.000000e+00 : f32
    %190 = vector.broadcast %cst_41 : f32 to vector<8x128xf32>
    %191 = arith.addf %190, %189 : vector<8x128xf32>
    %192 = arith.divf %190, %191 : vector<8x128xf32>
    %193 = vector.extract_strided_slice %180 {offsets = [0, 128], sizes = [8, 128], strides = [1, 1]} : vector<8x384xf32> to vector<8x128xf32>
    %194 = vector.extract_strided_slice %184 {offsets = [0, 128], sizes = [8, 128], strides = [1, 1]} : vector<8x384xf32> to vector<8x128xf32>
    %195 = arith.addf %193, %194 : vector<8x128xf32>
    %196 = arith.negf %195 : vector<8x128xf32>
    %197 = math.exp %196 : vector<8x128xf32>
    %cst_42 = arith.constant 1.000000e+00 : f32
    %198 = vector.broadcast %cst_42 : f32 to vector<8x128xf32>
    %199 = arith.addf %198, %197 : vector<8x128xf32>
    %200 = arith.divf %198, %199 : vector<8x128xf32>
    %201 = vector.extract_strided_slice %180 {offsets = [0, 256], sizes = [8, 128], strides = [1, 1]} : vector<8x384xf32> to vector<8x128xf32>
    %202 = vector.extract_strided_slice %184 {offsets = [0, 256], sizes = [8, 128], strides = [1, 1]} : vector<8x384xf32> to vector<8x128xf32>
    %203 = arith.mulf %192, %202 : vector<8x128xf32>
    %204 = arith.addf %201, %203 : vector<8x128xf32>
    %205 = math.tanh %204 : vector<8x128xf32>
    %cst_43 = arith.constant 1.000000e+00 : f32
    %206 = vector.broadcast %cst_43 : f32 to vector<8x128xf32>
    %207 = arith.subf %206, %200 : vector<8x128xf32>
    %208 = arith.mulf %207, %205 : vector<8x128xf32>
    %209 = arith.mulf %200, %171 : vector<8x128xf32>
    %210 = arith.addf %208, %209 : vector<8x128xf32>
    %211 = vector.shape_cast %179 : vector<8x1xi1> to vector<8x1xi1>
    %212 = vector.broadcast %211 : vector<8x1xi1> to vector<8x128xi1>
    %213 = arith.select %212, %210, %171 : vector<8x128xi1>, vector<8x128xf32>
    %cst_44 = arith.constant 0.000000e+00 : f32
    %214 = vector.shape_cast %179 : vector<8x1xi1> to vector<8x1xi1>
    %215 = vector.broadcast %214 : vector<8x1xi1> to vector<8x128xi1>
    %216 = vector.broadcast %cst_44 : f32 to vector<8x128xf32>
    %217 = arith.select %215, %213, %216 : vector<8x128xi1>, vector<8x128xf32>
    %c24_45 = arith.constant 24 : index
    %c0_46 = arith.constant 0 : index
    %218 = vector.load %arg5[%c24_45, %c0_46] : memref<64x128xf32, #tpu.memory_space<vmem>>, vector<8x128xf32>
    tpu.vector_store %arg5[%c24_45, %c0_46], %217 {strides = array<i32>} : memref<64x128xf32, #tpu.memory_space<vmem>>, vector<8x128xf32>,
    %c2_i32 = arith.constant 2 : i32
    %219 = arith.addi %7, %c2_i32 : i32
    %220 = vector.broadcast %219 : i32 to vector<8x1xi32>
    %221 = arith.cmpi sgt, %3, %220 : vector<8x1xi32>
    %c16 = arith.constant 16 : index
    %c0_47 = arith.constant 0 : index
    %222 = vector.load %arg2[%c16, %c0_47] : memref<64x384xf32, #tpu.memory_space<vmem>>, vector<8x384xf32>
    %223 = arith.truncf %213 : vector<8x128xf32> to vector<8x128xbf16>
    %cst_48 = arith.constant dense<0.000000e+00> : vector<8x384xf32>
    %224 = tpu.matmul %223, %4, %cst_48 {dimension_numbers = #tpu.dot_dimension_numbers<[1], [0], [0], [1], [0, 0, 1, 1], [], []>} : vector<8x128xbf16>, vector<128x384xbf16>, vector<8x384xf32> -> vector<8x384xf32>
    %225 = vector.broadcast %5 : vector<1x384xf32> to vector<8x384xf32>
    %226 = arith.addf %224, %225 : vector<8x384xf32>
    %227 = vector.extract_strided_slice %222 {offsets = [0, 0], sizes = [8, 128], strides = [1, 1]} : vector<8x384xf32> to vector<8x128xf32>
    %228 = vector.extract_strided_slice %226 {offsets = [0, 0], sizes = [8, 128], strides = [1, 1]} : vector<8x384xf32> to vector<8x128xf32>
    %229 = arith.addf %227, %228 : vector<8x128xf32>
    %230 = arith.negf %229 : vector<8x128xf32>
    %231 = math.exp %230 : vector<8x128xf32>
    %cst_49 = arith.constant 1.000000e+00 : f32
    %232 = vector.broadcast %cst_49 : f32 to vector<8x128xf32>
    %233 = arith.addf %232, %231 : vector<8x128xf32>
    %234 = arith.divf %232, %233 : vector<8x128xf32>
    %235 = vector.extract_strided_slice %222 {offsets = [0, 128], sizes = [8, 128], strides = [1, 1]} : vector<8x384xf32> to vector<8x128xf32>
    %236 = vector.extract_strided_slice %226 {offsets = [0, 128], sizes = [8, 128], strides = [1, 1]} : vector<8x384xf32> to vector<8x128xf32>
    %237 = arith.addf %235, %236 : vector<8x128xf32>
    %238 = arith.negf %237 : vector<8x128xf32>
    %239 = math.exp %238 : vector<8x128xf32>
    %cst_50 = arith.constant 1.000000e+00 : f32
    %240 = vector.broadcast %cst_50 : f32 to vector<8x128xf32>
    %241 = arith.addf %240, %239 : vector<8x128xf32>
    %242 = arith.divf %240, %241 : vector<8x128xf32>
    %243 = vector.extract_strided_slice %222 {offsets = [0, 256], sizes = [8, 128], strides = [1, 1]} : vector<8x384xf32> to vector<8x128xf32>
    %244 = vector.extract_strided_slice %226 {offsets = [0, 256], sizes = [8, 128], strides = [1, 1]} : vector<8x384xf32> to vector<8x128xf32>
    %245 = arith.mulf %234, %244 : vector<8x128xf32>
    %246 = arith.addf %243, %245 : vector<8x128xf32>
    %247 = math.tanh %246 : vector<8x128xf32>
    %cst_51 = arith.constant 1.000000e+00 : f32
    %248 = vector.broadcast %cst_51 : f32 to vector<8x128xf32>
    %249 = arith.subf %248, %242 : vector<8x128xf32>
    %250 = arith.mulf %249, %247 : vector<8x128xf32>
    %251 = arith.mulf %242, %213 : vector<8x128xf32>
    %252 = arith.addf %250, %251 : vector<8x128xf32>
    %253 = vector.shape_cast %221 : vector<8x1xi1> to vector<8x1xi1>
    %254 = vector.broadcast %253 : vector<8x1xi1> to vector<8x128xi1>
    %255 = arith.select %254, %252, %213 : vector<8x128xi1>, vector<8x128xf32>
    %cst_52 = arith.constant 0.000000e+00 : f32
    %256 = vector.shape_cast %221 : vector<8x1xi1> to vector<8x1xi1>
    %257 = vector.broadcast %256 : vector<8x1xi1> to vector<8x128xi1>
    %258 = vector.broadcast %cst_52 : f32 to vector<8x128xf32>
    %259 = arith.select %257, %255, %258 : vector<8x128xi1>, vector<8x128xf32>
    %c16_53 = arith.constant 16 : index
    %c0_54 = arith.constant 0 : index
    %260 = vector.load %arg5[%c16_53, %c0_54] : memref<64x128xf32, #tpu.memory_space<vmem>>, vector<8x128xf32>
    tpu.vector_store %arg5[%c16_53, %c0_54], %259 {strides = array<i32>} : memref<64x128xf32, #tpu.memory_space<vmem>>, vector<8x128xf32>,
    %c1_i32_55 = arith.constant 1 : i32
    %261 = arith.addi %7, %c1_i32_55 : i32
    %262 = vector.broadcast %261 : i32 to vector<8x1xi32>
    %263 = arith.cmpi sgt, %3, %262 : vector<8x1xi32>
    %c8 = arith.constant 8 : index
    %c0_56 = arith.constant 0 : index
    %264 = vector.load %arg2[%c8, %c0_56] : memref<64x384xf32, #tpu.memory_space<vmem>>, vector<8x384xf32>
    %265 = arith.truncf %255 : vector<8x128xf32> to vector<8x128xbf16>
    %cst_57 = arith.constant dense<0.000000e+00> : vector<8x384xf32>
    %266 = tpu.matmul %265, %4, %cst_57 {dimension_numbers = #tpu.dot_dimension_numbers<[1], [0], [0], [1], [0, 0, 1, 1], [], []>} : vector<8x128xbf16>, vector<128x384xbf16>, vector<8x384xf32> -> vector<8x384xf32>
    %267 = vector.broadcast %5 : vector<1x384xf32> to vector<8x384xf32>
    %268 = arith.addf %266, %267 : vector<8x384xf32>
    %269 = vector.extract_strided_slice %264 {offsets = [0, 0], sizes = [8, 128], strides = [1, 1]} : vector<8x384xf32> to vector<8x128xf32>
    %270 = vector.extract_strided_slice %268 {offsets = [0, 0], sizes = [8, 128], strides = [1, 1]} : vector<8x384xf32> to vector<8x128xf32>
    %271 = arith.addf %269, %270 : vector<8x128xf32>
    %272 = arith.negf %271 : vector<8x128xf32>
    %273 = math.exp %272 : vector<8x128xf32>
    %cst_58 = arith.constant 1.000000e+00 : f32
    %274 = vector.broadcast %cst_58 : f32 to vector<8x128xf32>
    %275 = arith.addf %274, %273 : vector<8x128xf32>
    %276 = arith.divf %274, %275 : vector<8x128xf32>
    %277 = vector.extract_strided_slice %264 {offsets = [0, 128], sizes = [8, 128], strides = [1, 1]} : vector<8x384xf32> to vector<8x128xf32>
    %278 = vector.extract_strided_slice %268 {offsets = [0, 128], sizes = [8, 128], strides = [1, 1]} : vector<8x384xf32> to vector<8x128xf32>
    %279 = arith.addf %277, %278 : vector<8x128xf32>
    %280 = arith.negf %279 : vector<8x128xf32>
    %281 = math.exp %280 : vector<8x128xf32>
    %cst_59 = arith.constant 1.000000e+00 : f32
    %282 = vector.broadcast %cst_59 : f32 to vector<8x128xf32>
    %283 = arith.addf %282, %281 : vector<8x128xf32>
    %284 = arith.divf %282, %283 : vector<8x128xf32>
    %285 = vector.extract_strided_slice %264 {offsets = [0, 256], sizes = [8, 128], strides = [1, 1]} : vector<8x384xf32> to vector<8x128xf32>
    %286 = vector.extract_strided_slice %268 {offsets = [0, 256], sizes = [8, 128], strides = [1, 1]} : vector<8x384xf32> to vector<8x128xf32>
    %287 = arith.mulf %276, %286 : vector<8x128xf32>
    %288 = arith.addf %285, %287 : vector<8x128xf32>
    %289 = math.tanh %288 : vector<8x128xf32>
    %cst_60 = arith.constant 1.000000e+00 : f32
    %290 = vector.broadcast %cst_60 : f32 to vector<8x128xf32>
    %291 = arith.subf %290, %284 : vector<8x128xf32>
    %292 = arith.mulf %291, %289 : vector<8x128xf32>
    %293 = arith.mulf %284, %255 : vector<8x128xf32>
    %294 = arith.addf %292, %293 : vector<8x128xf32>
    %295 = vector.shape_cast %263 : vector<8x1xi1> to vector<8x1xi1>
    %296 = vector.broadcast %295 : vector<8x1xi1> to vector<8x128xi1>
    %297 = arith.select %296, %294, %255 : vector<8x128xi1>, vector<8x128xf32>
    %cst_61 = arith.constant 0.000000e+00 : f32
    %298 = vector.shape_cast %263 : vector<8x1xi1> to vector<8x1xi1>
    %299 = vector.broadcast %298 : vector<8x1xi1> to vector<8x128xi1>
    %300 = vector.broadcast %cst_61 : f32 to vector<8x128xf32>
    %301 = arith.select %299, %297, %300 : vector<8x128xi1>, vector<8x128xf32>
    %c8_62 = arith.constant 8 : index
    %c0_63 = arith.constant 0 : index
    %302 = vector.load %arg5[%c8_62, %c0_63] : memref<64x128xf32, #tpu.memory_space<vmem>>, vector<8x128xf32>
    tpu.vector_store %arg5[%c8_62, %c0_63], %301 {strides = array<i32>} : memref<64x128xf32, #tpu.memory_space<vmem>>, vector<8x128xf32>,
    %c0_i32_64 = arith.constant 0 : i32
    %303 = arith.addi %7, %c0_i32_64 : i32
    %304 = vector.broadcast %303 : i32 to vector<8x1xi32>
    %305 = arith.cmpi sgt, %3, %304 : vector<8x1xi32>
    %c0_65 = arith.constant 0 : index
    %c0_66 = arith.constant 0 : index
    %306 = vector.load %arg2[%c0_65, %c0_66] : memref<64x384xf32, #tpu.memory_space<vmem>>, vector<8x384xf32>
    %307 = arith.truncf %297 : vector<8x128xf32> to vector<8x128xbf16>
    %cst_67 = arith.constant dense<0.000000e+00> : vector<8x384xf32>
    %308 = tpu.matmul %307, %4, %cst_67 {dimension_numbers = #tpu.dot_dimension_numbers<[1], [0], [0], [1], [0, 0, 1, 1], [], []>} : vector<8x128xbf16>, vector<128x384xbf16>, vector<8x384xf32> -> vector<8x384xf32>
    %309 = vector.broadcast %5 : vector<1x384xf32> to vector<8x384xf32>
    %310 = arith.addf %308, %309 : vector<8x384xf32>
    %311 = vector.extract_strided_slice %306 {offsets = [0, 0], sizes = [8, 128], strides = [1, 1]} : vector<8x384xf32> to vector<8x128xf32>
    %312 = vector.extract_strided_slice %310 {offsets = [0, 0], sizes = [8, 128], strides = [1, 1]} : vector<8x384xf32> to vector<8x128xf32>
    %313 = arith.addf %311, %312 : vector<8x128xf32>
    %314 = arith.negf %313 : vector<8x128xf32>
    %315 = math.exp %314 : vector<8x128xf32>
    %cst_68 = arith.constant 1.000000e+00 : f32
    %316 = vector.broadcast %cst_68 : f32 to vector<8x128xf32>
    %317 = arith.addf %316, %315 : vector<8x128xf32>
    %318 = arith.divf %316, %317 : vector<8x128xf32>
    %319 = vector.extract_strided_slice %306 {offsets = [0, 128], sizes = [8, 128], strides = [1, 1]} : vector<8x384xf32> to vector<8x128xf32>
    %320 = vector.extract_strided_slice %310 {offsets = [0, 128], sizes = [8, 128], strides = [1, 1]} : vector<8x384xf32> to vector<8x128xf32>
    %321 = arith.addf %319, %320 : vector<8x128xf32>
    %322 = arith.negf %321 : vector<8x128xf32>
    %323 = math.exp %322 : vector<8x128xf32>
    %cst_69 = arith.constant 1.000000e+00 : f32
    %324 = vector.broadcast %cst_69 : f32 to vector<8x128xf32>
    %325 = arith.addf %324, %323 : vector<8x128xf32>
    %326 = arith.divf %324, %325 : vector<8x128xf32>
    %327 = vector.extract_strided_slice %306 {offsets = [0, 256], sizes = [8, 128], strides = [1, 1]} : vector<8x384xf32> to vector<8x128xf32>
    %328 = vector.extract_strided_slice %310 {offsets = [0, 256], sizes = [8, 128], strides = [1, 1]} : vector<8x384xf32> to vector<8x128xf32>
    %329 = arith.mulf %318, %328 : vector<8x128xf32>
    %330 = arith.addf %327, %329 : vector<8x128xf32>
    %331 = math.tanh %330 : vector<8x128xf32>
    %cst_70 = arith.constant 1.000000e+00 : f32
    %332 = vector.broadcast %cst_70 : f32 to vector<8x128xf32>
    %333 = arith.subf %332, %326 : vector<8x128xf32>
    %334 = arith.mulf %333, %331 : vector<8x128xf32>
    %335 = arith.mulf %326, %297 : vector<8x128xf32>
    %336 = arith.addf %334, %335 : vector<8x128xf32>
    %337 = vector.shape_cast %305 : vector<8x1xi1> to vector<8x1xi1>
    %338 = vector.broadcast %337 : vector<8x1xi1> to vector<8x128xi1>
    %339 = arith.select %338, %336, %297 : vector<8x128xi1>, vector<8x128xf32>
    %cst_71 = arith.constant 0.000000e+00 : f32
    %340 = vector.shape_cast %305 : vector<8x1xi1> to vector<8x1xi1>
    %341 = vector.broadcast %340 : vector<8x1xi1> to vector<8x128xi1>
    %342 = vector.broadcast %cst_71 : f32 to vector<8x128xf32>
    %343 = arith.select %341, %339, %342 : vector<8x128xi1>, vector<8x128xf32>
    %c0_72 = arith.constant 0 : index
    %c0_73 = arith.constant 0 : index
    %344 = vector.load %arg5[%c0_72, %c0_73] : memref<64x128xf32, #tpu.memory_space<vmem>>, vector<8x128xf32>
    tpu.vector_store %arg5[%c0_72, %c0_73], %343 {strides = array<i32>} : memref<64x128xf32, #tpu.memory_space<vmem>>, vector<8x128xf32>,
    %c0_74 = arith.constant 0 : index
    %c0_75 = arith.constant 0 : index
    %345 = vector.load %arg6[%c0_74, %c0_75] : memref<8x128xf32, #tpu.memory_space<vmem>>, vector<8x128xf32>
    tpu.vector_store %arg6[%c0_74, %c0_75], %339 {strides = array<i32>} : memref<8x128xf32, #tpu.memory_space<vmem>>, vector<8x128xf32>,
    return
  }
  func.func @transform_0(%arg0: i32) -> (i32, i32) {
    %c0_i32 = arith.constant 0 : i32
    %c0_i32_0 = arith.constant 0 : i32
    %c0_i32_1 = arith.constant 0 : i32
    return %c0_i32, %c0_i32_0 : i32, i32
  }
  func.func @transform_1(%arg0: i32) -> (i32, i32) {
    %c1_i32 = arith.constant 1 : i32
    %0 = arith.subi %c1_i32, %arg0 : i32
    %c1_i32_0 = arith.constant 1 : i32
    %c0_i32 = arith.constant 0 : i32
    return %0, %c1_i32_0 : i32, i32
  }
  func.func @transform_2(%arg0: i32) -> (i32, i32) {
    %c0_i32 = arith.constant 0 : i32
    %c0_i32_0 = arith.constant 0 : i32
    %c0_i32_1 = arith.constant 0 : i32
    return %c0_i32, %c0_i32_0 : i32, i32
  }
  func.func @transform_3(%arg0: i32) -> (i32, i32) {
    %c0_i32 = arith.constant 0 : i32
    %c0_i32_0 = arith.constant 0 : i32
    %c0_i32_1 = arith.constant 0 : i32
    return %c0_i32, %c0_i32_0 : i32, i32
  }
  func.func @transform_4(%arg0: i32) -> (i32, i32) {
    %c1_i32 = arith.constant 1 : i32
    %0 = arith.subi %c1_i32, %arg0 : i32
    %c0_i32 = arith.constant 0 : i32
    %c0_i32_0 = arith.constant 0 : i32
    return %0, %c0_i32 : i32, i32
  }
  func.func @transform_5(%arg0: i32) -> (i32, i32) {
    %c0_i32 = arith.constant 0 : i32
    %c0_i32_0 = arith.constant 0 : i32
    %c0_i32_1 = arith.constant 0 : i32
    return %c0_i32, %c0_i32_0 : i32, i32
  }
}

module attributes {stable_mosaic.version = 11 : i64} {
  func.func @_gru_dir_kernel(%arg0: i32, %arg1: memref<8x1xi32, #tpu.memory_space<vmem>>, %arg2: memref<64x384xf32, #tpu.memory_space<vmem>>, %arg3: memref<128x384xbf16, #tpu.memory_space<vmem>>, %arg4: memref<1x384xf32, #tpu.memory_space<vmem>>, %arg5: memref<64x128xf32, #tpu.memory_space<vmem>>, %arg6: memref<64x128xf32, #tpu.memory_space<vmem>>, %arg7: memref<8x128xf32, #tpu.memory_space<vmem>>) attributes {dimension_semantics = [#tpu.dimension_semantics<arbitrary>], iteration_bounds = array<i64: 2>, scalar_prefetch = 0 : i64, scratch_operands = 0 : i64, tpu.core_type = #tpu.core_type<tc>, window_params = [{pipeline_mode = #tpu.pipeline_mode<synchronous>, transform_indices = @transform_0, window_bounds = array<i64: 8, 1>}, {transform_indices = @transform_1, window_bounds = array<i64: 64, 384>}, {pipeline_mode = #tpu.pipeline_mode<synchronous>, transform_indices = @transform_2, window_bounds = array<i64: 128, 384>}, {pipeline_mode = #tpu.pipeline_mode<synchronous>, transform_indices = @transform_3, window_bounds = array<i64: 1, 384>}, {transform_indices = @transform_4, window_bounds = array<i64: 64, 128>}, {transform_indices = @transform_5, window_bounds = array<i64: 64, 128>}, {pipeline_mode = #tpu.pipeline_mode<synchronous>, transform_indices = @transform_6, window_bounds = array<i64: 8, 128>}]} {
    %c0_i32 = arith.constant 0 : i32
    %0 = arith.cmpi eq, %arg0, %c0_i32 : i32
    %1 = arith.extui %0 : i1 to i32
    %c0_i32_0 = arith.constant 0 : i32
    %2 = arith.cmpi ne, %1, %c0_i32_0 : i32
    scf.if %2 {
      %cst_91 = arith.constant 0.000000e+00 : f32
      %361 = vector.broadcast %cst_91 : f32 to vector<8x128xf32>
      %c0_92 = arith.constant 0 : index
      %c0_93 = arith.constant 0 : index
      %362 = vector.load %arg7[%c0_92, %c0_93] : memref<8x128xf32, #tpu.memory_space<vmem>>, vector<8x128xf32>
      tpu.vector_store %arg7[%c0_92, %c0_93], %361 {strides = array<i32>} : memref<8x128xf32, #tpu.memory_space<vmem>>, vector<8x128xf32>,
    } else {
    }
    %c0 = arith.constant 0 : index
    %c0_1 = arith.constant 0 : index
    %3 = vector.load %arg1[%c0, %c0_1] : memref<8x1xi32, #tpu.memory_space<vmem>>, vector<8x1xi32>
    %c0_2 = arith.constant 0 : index
    %c0_3 = arith.constant 0 : index
    %4 = vector.load %arg3[%c0_2, %c0_3] : memref<128x384xbf16, #tpu.memory_space<vmem>>, vector<128x384xbf16>
    %c0_4 = arith.constant 0 : index
    %c0_5 = arith.constant 0 : index
    %5 = vector.load %arg4[%c0_4, %c0_5] : memref<1x384xf32, #tpu.memory_space<vmem>>, vector<1x384xf32>
    %c8_i32 = arith.constant 8 : i32
    %6 = arith.muli %arg0, %c8_i32 : i32
    %c0_6 = arith.constant 0 : index
    %c0_7 = arith.constant 0 : index
    %7 = vector.load %arg7[%c0_6, %c0_7] : memref<8x128xf32, #tpu.memory_space<vmem>>, vector<8x128xf32>
    %c0_i32_8 = arith.constant 0 : i32
    %8 = arith.addi %6, %c0_i32_8 : i32
    %9 = vector.broadcast %8 : i32 to vector<8x1xi32>
    %10 = arith.cmpi sgt, %3, %9 : vector<8x1xi32>
    %c0_9 = arith.constant 0 : index
    %c0_10 = arith.constant 0 : index
    %11 = vector.load %arg2[%c0_9, %c0_10] : memref<64x384xf32, #tpu.memory_space<vmem>>, vector<8x384xf32>
    %12 = arith.truncf %7 : vector<8x128xf32> to vector<8x128xbf16>
    %cst = arith.constant dense<0.000000e+00> : vector<8x384xf32>
    %13 = tpu.matmul %12, %4, %cst {dimension_numbers = #tpu.dot_dimension_numbers<[1], [0], [0], [1], [0, 0, 1, 1], [], []>} : vector<8x128xbf16>, vector<128x384xbf16>, vector<8x384xf32> -> vector<8x384xf32>
    %14 = vector.broadcast %5 : vector<1x384xf32> to vector<8x384xf32>
    %15 = arith.addf %13, %14 : vector<8x384xf32>
    %16 = vector.extract_strided_slice %11 {offsets = [0, 0], sizes = [8, 128], strides = [1, 1]} : vector<8x384xf32> to vector<8x128xf32>
    %17 = vector.extract_strided_slice %15 {offsets = [0, 0], sizes = [8, 128], strides = [1, 1]} : vector<8x384xf32> to vector<8x128xf32>
    %18 = arith.addf %16, %17 : vector<8x128xf32>
    %19 = arith.negf %18 : vector<8x128xf32>
    %20 = math.exp %19 : vector<8x128xf32>
    %cst_11 = arith.constant 1.000000e+00 : f32
    %21 = vector.broadcast %cst_11 : f32 to vector<8x128xf32>
    %22 = arith.addf %21, %20 : vector<8x128xf32>
    %23 = arith.divf %21, %22 : vector<8x128xf32>
    %24 = vector.extract_strided_slice %11 {offsets = [0, 128], sizes = [8, 128], strides = [1, 1]} : vector<8x384xf32> to vector<8x128xf32>
    %25 = vector.extract_strided_slice %15 {offsets = [0, 128], sizes = [8, 128], strides = [1, 1]} : vector<8x384xf32> to vector<8x128xf32>
    %26 = arith.addf %24, %25 : vector<8x128xf32>
    %27 = arith.negf %26 : vector<8x128xf32>
    %28 = math.exp %27 : vector<8x128xf32>
    %cst_12 = arith.constant 1.000000e+00 : f32
    %29 = vector.broadcast %cst_12 : f32 to vector<8x128xf32>
    %30 = arith.addf %29, %28 : vector<8x128xf32>
    %31 = arith.divf %29, %30 : vector<8x128xf32>
    %32 = vector.extract_strided_slice %11 {offsets = [0, 256], sizes = [8, 128], strides = [1, 1]} : vector<8x384xf32> to vector<8x128xf32>
    %33 = vector.extract_strided_slice %15 {offsets = [0, 256], sizes = [8, 128], strides = [1, 1]} : vector<8x384xf32> to vector<8x128xf32>
    %34 = arith.mulf %23, %33 : vector<8x128xf32>
    %35 = arith.addf %32, %34 : vector<8x128xf32>
    %36 = math.tanh %35 : vector<8x128xf32>
    %cst_13 = arith.constant 1.000000e+00 : f32
    %37 = vector.broadcast %cst_13 : f32 to vector<8x128xf32>
    %38 = arith.subf %37, %31 : vector<8x128xf32>
    %39 = arith.mulf %38, %36 : vector<8x128xf32>
    %40 = arith.mulf %31, %7 : vector<8x128xf32>
    %41 = arith.addf %39, %40 : vector<8x128xf32>
    %42 = vector.shape_cast %10 : vector<8x1xi1> to vector<8x1xi1>
    %43 = vector.broadcast %42 : vector<8x1xi1> to vector<8x128xi1>
    %44 = arith.select %43, %41, %7 : vector<8x128xi1>, vector<8x128xf32>
    %cst_14 = arith.constant 0.000000e+00 : f32
    %45 = vector.shape_cast %10 : vector<8x1xi1> to vector<8x1xi1>
    %46 = vector.broadcast %45 : vector<8x1xi1> to vector<8x128xi1>
    %47 = vector.broadcast %cst_14 : f32 to vector<8x128xf32>
    %48 = arith.select %46, %44, %47 : vector<8x128xi1>, vector<8x128xf32>
    %c0_15 = arith.constant 0 : index
    %c0_16 = arith.constant 0 : index
    %49 = vector.load %arg5[%c0_15, %c0_16] : memref<64x128xf32, #tpu.memory_space<vmem>>, vector<8x128xf32>
    %50 = arith.addf %48, %49 : vector<8x128xf32>
    %c0_17 = arith.constant 0 : index
    %c0_18 = arith.constant 0 : index
    %51 = vector.load %arg6[%c0_17, %c0_18] : memref<64x128xf32, #tpu.memory_space<vmem>>, vector<8x128xf32>
    tpu.vector_store %arg6[%c0_17, %c0_18], %50 {strides = array<i32>} : memref<64x128xf32, #tpu.memory_space<vmem>>, vector<8x128xf32>,
    %c1_i32 = arith.constant 1 : i32
    %52 = arith.addi %6, %c1_i32 : i32
    %53 = vector.broadcast %52 : i32 to vector<8x1xi32>
    %54 = arith.cmpi sgt, %3, %53 : vector<8x1xi32>
    %c8 = arith.constant 8 : index
    %c0_19 = arith.constant 0 : index
    %55 = vector.load %arg2[%c8, %c0_19] : memref<64x384xf32, #tpu.memory_space<vmem>>, vector<8x384xf32>
    %56 = arith.truncf %44 : vector<8x128xf32> to vector<8x128xbf16>
    %cst_20 = arith.constant dense<0.000000e+00> : vector<8x384xf32>
    %57 = tpu.matmul %56, %4, %cst_20 {dimension_numbers = #tpu.dot_dimension_numbers<[1], [0], [0], [1], [0, 0, 1, 1], [], []>} : vector<8x128xbf16>, vector<128x384xbf16>, vector<8x384xf32> -> vector<8x384xf32>
    %58 = vector.broadcast %5 : vector<1x384xf32> to vector<8x384xf32>
    %59 = arith.addf %57, %58 : vector<8x384xf32>
    %60 = vector.extract_strided_slice %55 {offsets = [0, 0], sizes = [8, 128], strides = [1, 1]} : vector<8x384xf32> to vector<8x128xf32>
    %61 = vector.extract_strided_slice %59 {offsets = [0, 0], sizes = [8, 128], strides = [1, 1]} : vector<8x384xf32> to vector<8x128xf32>
    %62 = arith.addf %60, %61 : vector<8x128xf32>
    %63 = arith.negf %62 : vector<8x128xf32>
    %64 = math.exp %63 : vector<8x128xf32>
    %cst_21 = arith.constant 1.000000e+00 : f32
    %65 = vector.broadcast %cst_21 : f32 to vector<8x128xf32>
    %66 = arith.addf %65, %64 : vector<8x128xf32>
    %67 = arith.divf %65, %66 : vector<8x128xf32>
    %68 = vector.extract_strided_slice %55 {offsets = [0, 128], sizes = [8, 128], strides = [1, 1]} : vector<8x384xf32> to vector<8x128xf32>
    %69 = vector.extract_strided_slice %59 {offsets = [0, 128], sizes = [8, 128], strides = [1, 1]} : vector<8x384xf32> to vector<8x128xf32>
    %70 = arith.addf %68, %69 : vector<8x128xf32>
    %71 = arith.negf %70 : vector<8x128xf32>
    %72 = math.exp %71 : vector<8x128xf32>
    %cst_22 = arith.constant 1.000000e+00 : f32
    %73 = vector.broadcast %cst_22 : f32 to vector<8x128xf32>
    %74 = arith.addf %73, %72 : vector<8x128xf32>
    %75 = arith.divf %73, %74 : vector<8x128xf32>
    %76 = vector.extract_strided_slice %55 {offsets = [0, 256], sizes = [8, 128], strides = [1, 1]} : vector<8x384xf32> to vector<8x128xf32>
    %77 = vector.extract_strided_slice %59 {offsets = [0, 256], sizes = [8, 128], strides = [1, 1]} : vector<8x384xf32> to vector<8x128xf32>
    %78 = arith.mulf %67, %77 : vector<8x128xf32>
    %79 = arith.addf %76, %78 : vector<8x128xf32>
    %80 = math.tanh %79 : vector<8x128xf32>
    %cst_23 = arith.constant 1.000000e+00 : f32
    %81 = vector.broadcast %cst_23 : f32 to vector<8x128xf32>
    %82 = arith.subf %81, %75 : vector<8x128xf32>
    %83 = arith.mulf %82, %80 : vector<8x128xf32>
    %84 = arith.mulf %75, %44 : vector<8x128xf32>
    %85 = arith.addf %83, %84 : vector<8x128xf32>
    %86 = vector.shape_cast %54 : vector<8x1xi1> to vector<8x1xi1>
    %87 = vector.broadcast %86 : vector<8x1xi1> to vector<8x128xi1>
    %88 = arith.select %87, %85, %44 : vector<8x128xi1>, vector<8x128xf32>
    %cst_24 = arith.constant 0.000000e+00 : f32
    %89 = vector.shape_cast %54 : vector<8x1xi1> to vector<8x1xi1>
    %90 = vector.broadcast %89 : vector<8x1xi1> to vector<8x128xi1>
    %91 = vector.broadcast %cst_24 : f32 to vector<8x128xf32>
    %92 = arith.select %90, %88, %91 : vector<8x128xi1>, vector<8x128xf32>
    %c8_25 = arith.constant 8 : index
    %c0_26 = arith.constant 0 : index
    %93 = vector.load %arg5[%c8_25, %c0_26] : memref<64x128xf32, #tpu.memory_space<vmem>>, vector<8x128xf32>
    %94 = arith.addf %92, %93 : vector<8x128xf32>
    %c8_27 = arith.constant 8 : index
    %c0_28 = arith.constant 0 : index
    %95 = vector.load %arg6[%c8_27, %c0_28] : memref<64x128xf32, #tpu.memory_space<vmem>>, vector<8x128xf32>
    tpu.vector_store %arg6[%c8_27, %c0_28], %94 {strides = array<i32>} : memref<64x128xf32, #tpu.memory_space<vmem>>, vector<8x128xf32>,
    %c2_i32 = arith.constant 2 : i32
    %96 = arith.addi %6, %c2_i32 : i32
    %97 = vector.broadcast %96 : i32 to vector<8x1xi32>
    %98 = arith.cmpi sgt, %3, %97 : vector<8x1xi32>
    %c16 = arith.constant 16 : index
    %c0_29 = arith.constant 0 : index
    %99 = vector.load %arg2[%c16, %c0_29] : memref<64x384xf32, #tpu.memory_space<vmem>>, vector<8x384xf32>
    %100 = arith.truncf %88 : vector<8x128xf32> to vector<8x128xbf16>
    %cst_30 = arith.constant dense<0.000000e+00> : vector<8x384xf32>
    %101 = tpu.matmul %100, %4, %cst_30 {dimension_numbers = #tpu.dot_dimension_numbers<[1], [0], [0], [1], [0, 0, 1, 1], [], []>} : vector<8x128xbf16>, vector<128x384xbf16>, vector<8x384xf32> -> vector<8x384xf32>
    %102 = vector.broadcast %5 : vector<1x384xf32> to vector<8x384xf32>
    %103 = arith.addf %101, %102 : vector<8x384xf32>
    %104 = vector.extract_strided_slice %99 {offsets = [0, 0], sizes = [8, 128], strides = [1, 1]} : vector<8x384xf32> to vector<8x128xf32>
    %105 = vector.extract_strided_slice %103 {offsets = [0, 0], sizes = [8, 128], strides = [1, 1]} : vector<8x384xf32> to vector<8x128xf32>
    %106 = arith.addf %104, %105 : vector<8x128xf32>
    %107 = arith.negf %106 : vector<8x128xf32>
    %108 = math.exp %107 : vector<8x128xf32>
    %cst_31 = arith.constant 1.000000e+00 : f32
    %109 = vector.broadcast %cst_31 : f32 to vector<8x128xf32>
    %110 = arith.addf %109, %108 : vector<8x128xf32>
    %111 = arith.divf %109, %110 : vector<8x128xf32>
    %112 = vector.extract_strided_slice %99 {offsets = [0, 128], sizes = [8, 128], strides = [1, 1]} : vector<8x384xf32> to vector<8x128xf32>
    %113 = vector.extract_strided_slice %103 {offsets = [0, 128], sizes = [8, 128], strides = [1, 1]} : vector<8x384xf32> to vector<8x128xf32>
    %114 = arith.addf %112, %113 : vector<8x128xf32>
    %115 = arith.negf %114 : vector<8x128xf32>
    %116 = math.exp %115 : vector<8x128xf32>
    %cst_32 = arith.constant 1.000000e+00 : f32
    %117 = vector.broadcast %cst_32 : f32 to vector<8x128xf32>
    %118 = arith.addf %117, %116 : vector<8x128xf32>
    %119 = arith.divf %117, %118 : vector<8x128xf32>
    %120 = vector.extract_strided_slice %99 {offsets = [0, 256], sizes = [8, 128], strides = [1, 1]} : vector<8x384xf32> to vector<8x128xf32>
    %121 = vector.extract_strided_slice %103 {offsets = [0, 256], sizes = [8, 128], strides = [1, 1]} : vector<8x384xf32> to vector<8x128xf32>
    %122 = arith.mulf %111, %121 : vector<8x128xf32>
    %123 = arith.addf %120, %122 : vector<8x128xf32>
    %124 = math.tanh %123 : vector<8x128xf32>
    %cst_33 = arith.constant 1.000000e+00 : f32
    %125 = vector.broadcast %cst_33 : f32 to vector<8x128xf32>
    %126 = arith.subf %125, %119 : vector<8x128xf32>
    %127 = arith.mulf %126, %124 : vector<8x128xf32>
    %128 = arith.mulf %119, %88 : vector<8x128xf32>
    %129 = arith.addf %127, %128 : vector<8x128xf32>
    %130 = vector.shape_cast %98 : vector<8x1xi1> to vector<8x1xi1>
    %131 = vector.broadcast %130 : vector<8x1xi1> to vector<8x128xi1>
    %132 = arith.select %131, %129, %88 : vector<8x128xi1>, vector<8x128xf32>
    %cst_34 = arith.constant 0.000000e+00 : f32
    %133 = vector.shape_cast %98 : vector<8x1xi1> to vector<8x1xi1>
    %134 = vector.broadcast %133 : vector<8x1xi1> to vector<8x128xi1>
    %135 = vector.broadcast %cst_34 : f32 to vector<8x128xf32>
    %136 = arith.select %134, %132, %135 : vector<8x128xi1>, vector<8x128xf32>
    %c16_35 = arith.constant 16 : index
    %c0_36 = arith.constant 0 : index
    %137 = vector.load %arg5[%c16_35, %c0_36] : memref<64x128xf32, #tpu.memory_space<vmem>>, vector<8x128xf32>
    %138 = arith.addf %136, %137 : vector<8x128xf32>
    %c16_37 = arith.constant 16 : index
    %c0_38 = arith.constant 0 : index
    %139 = vector.load %arg6[%c16_37, %c0_38] : memref<64x128xf32, #tpu.memory_space<vmem>>, vector<8x128xf32>
    tpu.vector_store %arg6[%c16_37, %c0_38], %138 {strides = array<i32>} : memref<64x128xf32, #tpu.memory_space<vmem>>, vector<8x128xf32>,
    %c3_i32 = arith.constant 3 : i32
    %140 = arith.addi %6, %c3_i32 : i32
    %141 = vector.broadcast %140 : i32 to vector<8x1xi32>
    %142 = arith.cmpi sgt, %3, %141 : vector<8x1xi32>
    %c24 = arith.constant 24 : index
    %c0_39 = arith.constant 0 : index
    %143 = vector.load %arg2[%c24, %c0_39] : memref<64x384xf32, #tpu.memory_space<vmem>>, vector<8x384xf32>
    %144 = arith.truncf %132 : vector<8x128xf32> to vector<8x128xbf16>
    %cst_40 = arith.constant dense<0.000000e+00> : vector<8x384xf32>
    %145 = tpu.matmul %144, %4, %cst_40 {dimension_numbers = #tpu.dot_dimension_numbers<[1], [0], [0], [1], [0, 0, 1, 1], [], []>} : vector<8x128xbf16>, vector<128x384xbf16>, vector<8x384xf32> -> vector<8x384xf32>
    %146 = vector.broadcast %5 : vector<1x384xf32> to vector<8x384xf32>
    %147 = arith.addf %145, %146 : vector<8x384xf32>
    %148 = vector.extract_strided_slice %143 {offsets = [0, 0], sizes = [8, 128], strides = [1, 1]} : vector<8x384xf32> to vector<8x128xf32>
    %149 = vector.extract_strided_slice %147 {offsets = [0, 0], sizes = [8, 128], strides = [1, 1]} : vector<8x384xf32> to vector<8x128xf32>
    %150 = arith.addf %148, %149 : vector<8x128xf32>
    %151 = arith.negf %150 : vector<8x128xf32>
    %152 = math.exp %151 : vector<8x128xf32>
    %cst_41 = arith.constant 1.000000e+00 : f32
    %153 = vector.broadcast %cst_41 : f32 to vector<8x128xf32>
    %154 = arith.addf %153, %152 : vector<8x128xf32>
    %155 = arith.divf %153, %154 : vector<8x128xf32>
    %156 = vector.extract_strided_slice %143 {offsets = [0, 128], sizes = [8, 128], strides = [1, 1]} : vector<8x384xf32> to vector<8x128xf32>
    %157 = vector.extract_strided_slice %147 {offsets = [0, 128], sizes = [8, 128], strides = [1, 1]} : vector<8x384xf32> to vector<8x128xf32>
    %158 = arith.addf %156, %157 : vector<8x128xf32>
    %159 = arith.negf %158 : vector<8x128xf32>
    %160 = math.exp %159 : vector<8x128xf32>
    %cst_42 = arith.constant 1.000000e+00 : f32
    %161 = vector.broadcast %cst_42 : f32 to vector<8x128xf32>
    %162 = arith.addf %161, %160 : vector<8x128xf32>
    %163 = arith.divf %161, %162 : vector<8x128xf32>
    %164 = vector.extract_strided_slice %143 {offsets = [0, 256], sizes = [8, 128], strides = [1, 1]} : vector<8x384xf32> to vector<8x128xf32>
    %165 = vector.extract_strided_slice %147 {offsets = [0, 256], sizes = [8, 128], strides = [1, 1]} : vector<8x384xf32> to vector<8x128xf32>
    %166 = arith.mulf %155, %165 : vector<8x128xf32>
    %167 = arith.addf %164, %166 : vector<8x128xf32>
    %168 = math.tanh %167 : vector<8x128xf32>
    %cst_43 = arith.constant 1.000000e+00 : f32
    %169 = vector.broadcast %cst_43 : f32 to vector<8x128xf32>
    %170 = arith.subf %169, %163 : vector<8x128xf32>
    %171 = arith.mulf %170, %168 : vector<8x128xf32>
    %172 = arith.mulf %163, %132 : vector<8x128xf32>
    %173 = arith.addf %171, %172 : vector<8x128xf32>
    %174 = vector.shape_cast %142 : vector<8x1xi1> to vector<8x1xi1>
    %175 = vector.broadcast %174 : vector<8x1xi1> to vector<8x128xi1>
    %176 = arith.select %175, %173, %132 : vector<8x128xi1>, vector<8x128xf32>
    %cst_44 = arith.constant 0.000000e+00 : f32
    %177 = vector.shape_cast %142 : vector<8x1xi1> to vector<8x1xi1>
    %178 = vector.broadcast %177 : vector<8x1xi1> to vector<8x128xi1>
    %179 = vector.broadcast %cst_44 : f32 to vector<8x128xf32>
    %180 = arith.select %178, %176, %179 : vector<8x128xi1>, vector<8x128xf32>
    %c24_45 = arith.constant 24 : index
    %c0_46 = arith.constant 0 : index
    %181 = vector.load %arg5[%c24_45, %c0_46] : memref<64x128xf32, #tpu.memory_space<vmem>>, vector<8x128xf32>
    %182 = arith.addf %180, %181 : vector<8x128xf32>
    %c24_47 = arith.constant 24 : index
    %c0_48 = arith.constant 0 : index
    %183 = vector.load %arg6[%c24_47, %c0_48] : memref<64x128xf32, #tpu.memory_space<vmem>>, vector<8x128xf32>
    tpu.vector_store %arg6[%c24_47, %c0_48], %182 {strides = array<i32>} : memref<64x128xf32, #tpu.memory_space<vmem>>, vector<8x128xf32>,
    %c4_i32 = arith.constant 4 : i32
    %184 = arith.addi %6, %c4_i32 : i32
    %185 = vector.broadcast %184 : i32 to vector<8x1xi32>
    %186 = arith.cmpi sgt, %3, %185 : vector<8x1xi32>
    %c32 = arith.constant 32 : index
    %c0_49 = arith.constant 0 : index
    %187 = vector.load %arg2[%c32, %c0_49] : memref<64x384xf32, #tpu.memory_space<vmem>>, vector<8x384xf32>
    %188 = arith.truncf %176 : vector<8x128xf32> to vector<8x128xbf16>
    %cst_50 = arith.constant dense<0.000000e+00> : vector<8x384xf32>
    %189 = tpu.matmul %188, %4, %cst_50 {dimension_numbers = #tpu.dot_dimension_numbers<[1], [0], [0], [1], [0, 0, 1, 1], [], []>} : vector<8x128xbf16>, vector<128x384xbf16>, vector<8x384xf32> -> vector<8x384xf32>
    %190 = vector.broadcast %5 : vector<1x384xf32> to vector<8x384xf32>
    %191 = arith.addf %189, %190 : vector<8x384xf32>
    %192 = vector.extract_strided_slice %187 {offsets = [0, 0], sizes = [8, 128], strides = [1, 1]} : vector<8x384xf32> to vector<8x128xf32>
    %193 = vector.extract_strided_slice %191 {offsets = [0, 0], sizes = [8, 128], strides = [1, 1]} : vector<8x384xf32> to vector<8x128xf32>
    %194 = arith.addf %192, %193 : vector<8x128xf32>
    %195 = arith.negf %194 : vector<8x128xf32>
    %196 = math.exp %195 : vector<8x128xf32>
    %cst_51 = arith.constant 1.000000e+00 : f32
    %197 = vector.broadcast %cst_51 : f32 to vector<8x128xf32>
    %198 = arith.addf %197, %196 : vector<8x128xf32>
    %199 = arith.divf %197, %198 : vector<8x128xf32>
    %200 = vector.extract_strided_slice %187 {offsets = [0, 128], sizes = [8, 128], strides = [1, 1]} : vector<8x384xf32> to vector<8x128xf32>
    %201 = vector.extract_strided_slice %191 {offsets = [0, 128], sizes = [8, 128], strides = [1, 1]} : vector<8x384xf32> to vector<8x128xf32>
    %202 = arith.addf %200, %201 : vector<8x128xf32>
    %203 = arith.negf %202 : vector<8x128xf32>
    %204 = math.exp %203 : vector<8x128xf32>
    %cst_52 = arith.constant 1.000000e+00 : f32
    %205 = vector.broadcast %cst_52 : f32 to vector<8x128xf32>
    %206 = arith.addf %205, %204 : vector<8x128xf32>
    %207 = arith.divf %205, %206 : vector<8x128xf32>
    %208 = vector.extract_strided_slice %187 {offsets = [0, 256], sizes = [8, 128], strides = [1, 1]} : vector<8x384xf32> to vector<8x128xf32>
    %209 = vector.extract_strided_slice %191 {offsets = [0, 256], sizes = [8, 128], strides = [1, 1]} : vector<8x384xf32> to vector<8x128xf32>
    %210 = arith.mulf %199, %209 : vector<8x128xf32>
    %211 = arith.addf %208, %210 : vector<8x128xf32>
    %212 = math.tanh %211 : vector<8x128xf32>
    %cst_53 = arith.constant 1.000000e+00 : f32
    %213 = vector.broadcast %cst_53 : f32 to vector<8x128xf32>
    %214 = arith.subf %213, %207 : vector<8x128xf32>
    %215 = arith.mulf %214, %212 : vector<8x128xf32>
    %216 = arith.mulf %207, %176 : vector<8x128xf32>
    %217 = arith.addf %215, %216 : vector<8x128xf32>
    %218 = vector.shape_cast %186 : vector<8x1xi1> to vector<8x1xi1>
    %219 = vector.broadcast %218 : vector<8x1xi1> to vector<8x128xi1>
    %220 = arith.select %219, %217, %176 : vector<8x128xi1>, vector<8x128xf32>
    %cst_54 = arith.constant 0.000000e+00 : f32
    %221 = vector.shape_cast %186 : vector<8x1xi1> to vector<8x1xi1>
    %222 = vector.broadcast %221 : vector<8x1xi1> to vector<8x128xi1>
    %223 = vector.broadcast %cst_54 : f32 to vector<8x128xf32>
    %224 = arith.select %222, %220, %223 : vector<8x128xi1>, vector<8x128xf32>
    %c32_55 = arith.constant 32 : index
    %c0_56 = arith.constant 0 : index
    %225 = vector.load %arg5[%c32_55, %c0_56] : memref<64x128xf32, #tpu.memory_space<vmem>>, vector<8x128xf32>
    %226 = arith.addf %224, %225 : vector<8x128xf32>
    %c32_57 = arith.constant 32 : index
    %c0_58 = arith.constant 0 : index
    %227 = vector.load %arg6[%c32_57, %c0_58] : memref<64x128xf32, #tpu.memory_space<vmem>>, vector<8x128xf32>
    tpu.vector_store %arg6[%c32_57, %c0_58], %226 {strides = array<i32>} : memref<64x128xf32, #tpu.memory_space<vmem>>, vector<8x128xf32>,
    %c5_i32 = arith.constant 5 : i32
    %228 = arith.addi %6, %c5_i32 : i32
    %229 = vector.broadcast %228 : i32 to vector<8x1xi32>
    %230 = arith.cmpi sgt, %3, %229 : vector<8x1xi32>
    %c40 = arith.constant 40 : index
    %c0_59 = arith.constant 0 : index
    %231 = vector.load %arg2[%c40, %c0_59] : memref<64x384xf32, #tpu.memory_space<vmem>>, vector<8x384xf32>
    %232 = arith.truncf %220 : vector<8x128xf32> to vector<8x128xbf16>
    %cst_60 = arith.constant dense<0.000000e+00> : vector<8x384xf32>
    %233 = tpu.matmul %232, %4, %cst_60 {dimension_numbers = #tpu.dot_dimension_numbers<[1], [0], [0], [1], [0, 0, 1, 1], [], []>} : vector<8x128xbf16>, vector<128x384xbf16>, vector<8x384xf32> -> vector<8x384xf32>
    %234 = vector.broadcast %5 : vector<1x384xf32> to vector<8x384xf32>
    %235 = arith.addf %233, %234 : vector<8x384xf32>
    %236 = vector.extract_strided_slice %231 {offsets = [0, 0], sizes = [8, 128], strides = [1, 1]} : vector<8x384xf32> to vector<8x128xf32>
    %237 = vector.extract_strided_slice %235 {offsets = [0, 0], sizes = [8, 128], strides = [1, 1]} : vector<8x384xf32> to vector<8x128xf32>
    %238 = arith.addf %236, %237 : vector<8x128xf32>
    %239 = arith.negf %238 : vector<8x128xf32>
    %240 = math.exp %239 : vector<8x128xf32>
    %cst_61 = arith.constant 1.000000e+00 : f32
    %241 = vector.broadcast %cst_61 : f32 to vector<8x128xf32>
    %242 = arith.addf %241, %240 : vector<8x128xf32>
    %243 = arith.divf %241, %242 : vector<8x128xf32>
    %244 = vector.extract_strided_slice %231 {offsets = [0, 128], sizes = [8, 128], strides = [1, 1]} : vector<8x384xf32> to vector<8x128xf32>
    %245 = vector.extract_strided_slice %235 {offsets = [0, 128], sizes = [8, 128], strides = [1, 1]} : vector<8x384xf32> to vector<8x128xf32>
    %246 = arith.addf %244, %245 : vector<8x128xf32>
    %247 = arith.negf %246 : vector<8x128xf32>
    %248 = math.exp %247 : vector<8x128xf32>
    %cst_62 = arith.constant 1.000000e+00 : f32
    %249 = vector.broadcast %cst_62 : f32 to vector<8x128xf32>
    %250 = arith.addf %249, %248 : vector<8x128xf32>
    %251 = arith.divf %249, %250 : vector<8x128xf32>
    %252 = vector.extract_strided_slice %231 {offsets = [0, 256], sizes = [8, 128], strides = [1, 1]} : vector<8x384xf32> to vector<8x128xf32>
    %253 = vector.extract_strided_slice %235 {offsets = [0, 256], sizes = [8, 128], strides = [1, 1]} : vector<8x384xf32> to vector<8x128xf32>
    %254 = arith.mulf %243, %253 : vector<8x128xf32>
    %255 = arith.addf %252, %254 : vector<8x128xf32>
    %256 = math.tanh %255 : vector<8x128xf32>
    %cst_63 = arith.constant 1.000000e+00 : f32
    %257 = vector.broadcast %cst_63 : f32 to vector<8x128xf32>
    %258 = arith.subf %257, %251 : vector<8x128xf32>
    %259 = arith.mulf %258, %256 : vector<8x128xf32>
    %260 = arith.mulf %251, %220 : vector<8x128xf32>
    %261 = arith.addf %259, %260 : vector<8x128xf32>
    %262 = vector.shape_cast %230 : vector<8x1xi1> to vector<8x1xi1>
    %263 = vector.broadcast %262 : vector<8x1xi1> to vector<8x128xi1>
    %264 = arith.select %263, %261, %220 : vector<8x128xi1>, vector<8x128xf32>
    %cst_64 = arith.constant 0.000000e+00 : f32
    %265 = vector.shape_cast %230 : vector<8x1xi1> to vector<8x1xi1>
    %266 = vector.broadcast %265 : vector<8x1xi1> to vector<8x128xi1>
    %267 = vector.broadcast %cst_64 : f32 to vector<8x128xf32>
    %268 = arith.select %266, %264, %267 : vector<8x128xi1>, vector<8x128xf32>
    %c40_65 = arith.constant 40 : index
    %c0_66 = arith.constant 0 : index
    %269 = vector.load %arg5[%c40_65, %c0_66] : memref<64x128xf32, #tpu.memory_space<vmem>>, vector<8x128xf32>
    %270 = arith.addf %268, %269 : vector<8x128xf32>
    %c40_67 = arith.constant 40 : index
    %c0_68 = arith.constant 0 : index
    %271 = vector.load %arg6[%c40_67, %c0_68] : memref<64x128xf32, #tpu.memory_space<vmem>>, vector<8x128xf32>
    tpu.vector_store %arg6[%c40_67, %c0_68], %270 {strides = array<i32>} : memref<64x128xf32, #tpu.memory_space<vmem>>, vector<8x128xf32>,
    %c6_i32 = arith.constant 6 : i32
    %272 = arith.addi %6, %c6_i32 : i32
    %273 = vector.broadcast %272 : i32 to vector<8x1xi32>
    %274 = arith.cmpi sgt, %3, %273 : vector<8x1xi32>
    %c48 = arith.constant 48 : index
    %c0_69 = arith.constant 0 : index
    %275 = vector.load %arg2[%c48, %c0_69] : memref<64x384xf32, #tpu.memory_space<vmem>>, vector<8x384xf32>
    %276 = arith.truncf %264 : vector<8x128xf32> to vector<8x128xbf16>
    %cst_70 = arith.constant dense<0.000000e+00> : vector<8x384xf32>
    %277 = tpu.matmul %276, %4, %cst_70 {dimension_numbers = #tpu.dot_dimension_numbers<[1], [0], [0], [1], [0, 0, 1, 1], [], []>} : vector<8x128xbf16>, vector<128x384xbf16>, vector<8x384xf32> -> vector<8x384xf32>
    %278 = vector.broadcast %5 : vector<1x384xf32> to vector<8x384xf32>
    %279 = arith.addf %277, %278 : vector<8x384xf32>
    %280 = vector.extract_strided_slice %275 {offsets = [0, 0], sizes = [8, 128], strides = [1, 1]} : vector<8x384xf32> to vector<8x128xf32>
    %281 = vector.extract_strided_slice %279 {offsets = [0, 0], sizes = [8, 128], strides = [1, 1]} : vector<8x384xf32> to vector<8x128xf32>
    %282 = arith.addf %280, %281 : vector<8x128xf32>
    %283 = arith.negf %282 : vector<8x128xf32>
    %284 = math.exp %283 : vector<8x128xf32>
    %cst_71 = arith.constant 1.000000e+00 : f32
    %285 = vector.broadcast %cst_71 : f32 to vector<8x128xf32>
    %286 = arith.addf %285, %284 : vector<8x128xf32>
    %287 = arith.divf %285, %286 : vector<8x128xf32>
    %288 = vector.extract_strided_slice %275 {offsets = [0, 128], sizes = [8, 128], strides = [1, 1]} : vector<8x384xf32> to vector<8x128xf32>
    %289 = vector.extract_strided_slice %279 {offsets = [0, 128], sizes = [8, 128], strides = [1, 1]} : vector<8x384xf32> to vector<8x128xf32>
    %290 = arith.addf %288, %289 : vector<8x128xf32>
    %291 = arith.negf %290 : vector<8x128xf32>
    %292 = math.exp %291 : vector<8x128xf32>
    %cst_72 = arith.constant 1.000000e+00 : f32
    %293 = vector.broadcast %cst_72 : f32 to vector<8x128xf32>
    %294 = arith.addf %293, %292 : vector<8x128xf32>
    %295 = arith.divf %293, %294 : vector<8x128xf32>
    %296 = vector.extract_strided_slice %275 {offsets = [0, 256], sizes = [8, 128], strides = [1, 1]} : vector<8x384xf32> to vector<8x128xf32>
    %297 = vector.extract_strided_slice %279 {offsets = [0, 256], sizes = [8, 128], strides = [1, 1]} : vector<8x384xf32> to vector<8x128xf32>
    %298 = arith.mulf %287, %297 : vector<8x128xf32>
    %299 = arith.addf %296, %298 : vector<8x128xf32>
    %300 = math.tanh %299 : vector<8x128xf32>
    %cst_73 = arith.constant 1.000000e+00 : f32
    %301 = vector.broadcast %cst_73 : f32 to vector<8x128xf32>
    %302 = arith.subf %301, %295 : vector<8x128xf32>
    %303 = arith.mulf %302, %300 : vector<8x128xf32>
    %304 = arith.mulf %295, %264 : vector<8x128xf32>
    %305 = arith.addf %303, %304 : vector<8x128xf32>
    %306 = vector.shape_cast %274 : vector<8x1xi1> to vector<8x1xi1>
    %307 = vector.broadcast %306 : vector<8x1xi1> to vector<8x128xi1>
    %308 = arith.select %307, %305, %264 : vector<8x128xi1>, vector<8x128xf32>
    %cst_74 = arith.constant 0.000000e+00 : f32
    %309 = vector.shape_cast %274 : vector<8x1xi1> to vector<8x1xi1>
    %310 = vector.broadcast %309 : vector<8x1xi1> to vector<8x128xi1>
    %311 = vector.broadcast %cst_74 : f32 to vector<8x128xf32>
    %312 = arith.select %310, %308, %311 : vector<8x128xi1>, vector<8x128xf32>
    %c48_75 = arith.constant 48 : index
    %c0_76 = arith.constant 0 : index
    %313 = vector.load %arg5[%c48_75, %c0_76] : memref<64x128xf32, #tpu.memory_space<vmem>>, vector<8x128xf32>
    %314 = arith.addf %312, %313 : vector<8x128xf32>
    %c48_77 = arith.constant 48 : index
    %c0_78 = arith.constant 0 : index
    %315 = vector.load %arg6[%c48_77, %c0_78] : memref<64x128xf32, #tpu.memory_space<vmem>>, vector<8x128xf32>
    tpu.vector_store %arg6[%c48_77, %c0_78], %314 {strides = array<i32>} : memref<64x128xf32, #tpu.memory_space<vmem>>, vector<8x128xf32>,
    %c7_i32 = arith.constant 7 : i32
    %316 = arith.addi %6, %c7_i32 : i32
    %317 = vector.broadcast %316 : i32 to vector<8x1xi32>
    %318 = arith.cmpi sgt, %3, %317 : vector<8x1xi32>
    %c56 = arith.constant 56 : index
    %c0_79 = arith.constant 0 : index
    %319 = vector.load %arg2[%c56, %c0_79] : memref<64x384xf32, #tpu.memory_space<vmem>>, vector<8x384xf32>
    %320 = arith.truncf %308 : vector<8x128xf32> to vector<8x128xbf16>
    %cst_80 = arith.constant dense<0.000000e+00> : vector<8x384xf32>
    %321 = tpu.matmul %320, %4, %cst_80 {dimension_numbers = #tpu.dot_dimension_numbers<[1], [0], [0], [1], [0, 0, 1, 1], [], []>} : vector<8x128xbf16>, vector<128x384xbf16>, vector<8x384xf32> -> vector<8x384xf32>
    %322 = vector.broadcast %5 : vector<1x384xf32> to vector<8x384xf32>
    %323 = arith.addf %321, %322 : vector<8x384xf32>
    %324 = vector.extract_strided_slice %319 {offsets = [0, 0], sizes = [8, 128], strides = [1, 1]} : vector<8x384xf32> to vector<8x128xf32>
    %325 = vector.extract_strided_slice %323 {offsets = [0, 0], sizes = [8, 128], strides = [1, 1]} : vector<8x384xf32> to vector<8x128xf32>
    %326 = arith.addf %324, %325 : vector<8x128xf32>
    %327 = arith.negf %326 : vector<8x128xf32>
    %328 = math.exp %327 : vector<8x128xf32>
    %cst_81 = arith.constant 1.000000e+00 : f32
    %329 = vector.broadcast %cst_81 : f32 to vector<8x128xf32>
    %330 = arith.addf %329, %328 : vector<8x128xf32>
    %331 = arith.divf %329, %330 : vector<8x128xf32>
    %332 = vector.extract_strided_slice %319 {offsets = [0, 128], sizes = [8, 128], strides = [1, 1]} : vector<8x384xf32> to vector<8x128xf32>
    %333 = vector.extract_strided_slice %323 {offsets = [0, 128], sizes = [8, 128], strides = [1, 1]} : vector<8x384xf32> to vector<8x128xf32>
    %334 = arith.addf %332, %333 : vector<8x128xf32>
    %335 = arith.negf %334 : vector<8x128xf32>
    %336 = math.exp %335 : vector<8x128xf32>
    %cst_82 = arith.constant 1.000000e+00 : f32
    %337 = vector.broadcast %cst_82 : f32 to vector<8x128xf32>
    %338 = arith.addf %337, %336 : vector<8x128xf32>
    %339 = arith.divf %337, %338 : vector<8x128xf32>
    %340 = vector.extract_strided_slice %319 {offsets = [0, 256], sizes = [8, 128], strides = [1, 1]} : vector<8x384xf32> to vector<8x128xf32>
    %341 = vector.extract_strided_slice %323 {offsets = [0, 256], sizes = [8, 128], strides = [1, 1]} : vector<8x384xf32> to vector<8x128xf32>
    %342 = arith.mulf %331, %341 : vector<8x128xf32>
    %343 = arith.addf %340, %342 : vector<8x128xf32>
    %344 = math.tanh %343 : vector<8x128xf32>
    %cst_83 = arith.constant 1.000000e+00 : f32
    %345 = vector.broadcast %cst_83 : f32 to vector<8x128xf32>
    %346 = arith.subf %345, %339 : vector<8x128xf32>
    %347 = arith.mulf %346, %344 : vector<8x128xf32>
    %348 = arith.mulf %339, %308 : vector<8x128xf32>
    %349 = arith.addf %347, %348 : vector<8x128xf32>
    %350 = vector.shape_cast %318 : vector<8x1xi1> to vector<8x1xi1>
    %351 = vector.broadcast %350 : vector<8x1xi1> to vector<8x128xi1>
    %352 = arith.select %351, %349, %308 : vector<8x128xi1>, vector<8x128xf32>
    %cst_84 = arith.constant 0.000000e+00 : f32
    %353 = vector.shape_cast %318 : vector<8x1xi1> to vector<8x1xi1>
    %354 = vector.broadcast %353 : vector<8x1xi1> to vector<8x128xi1>
    %355 = vector.broadcast %cst_84 : f32 to vector<8x128xf32>
    %356 = arith.select %354, %352, %355 : vector<8x128xi1>, vector<8x128xf32>
    %c56_85 = arith.constant 56 : index
    %c0_86 = arith.constant 0 : index
    %357 = vector.load %arg5[%c56_85, %c0_86] : memref<64x128xf32, #tpu.memory_space<vmem>>, vector<8x128xf32>
    %358 = arith.addf %356, %357 : vector<8x128xf32>
    %c56_87 = arith.constant 56 : index
    %c0_88 = arith.constant 0 : index
    %359 = vector.load %arg6[%c56_87, %c0_88] : memref<64x128xf32, #tpu.memory_space<vmem>>, vector<8x128xf32>
    tpu.vector_store %arg6[%c56_87, %c0_88], %358 {strides = array<i32>} : memref<64x128xf32, #tpu.memory_space<vmem>>, vector<8x128xf32>,
    %c0_89 = arith.constant 0 : index
    %c0_90 = arith.constant 0 : index
    %360 = vector.load %arg7[%c0_89, %c0_90] : memref<8x128xf32, #tpu.memory_space<vmem>>, vector<8x128xf32>
    tpu.vector_store %arg7[%c0_89, %c0_90], %352 {strides = array<i32>} : memref<8x128xf32, #tpu.memory_space<vmem>>, vector<8x128xf32>,
    return
  }
  func.func @transform_0(%arg0: i32) -> (i32, i32) {
    %c0_i32 = arith.constant 0 : i32
    %c0_i32_0 = arith.constant 0 : i32
    %c0_i32_1 = arith.constant 0 : i32
    return %c0_i32, %c0_i32_0 : i32, i32
  }
  func.func @transform_1(%arg0: i32) -> (i32, i32) {
    %c0_i32 = arith.constant 0 : i32
    %c0_i32_0 = arith.constant 0 : i32
    return %arg0, %c0_i32 : i32, i32
  }
  func.func @transform_2(%arg0: i32) -> (i32, i32) {
    %c0_i32 = arith.constant 0 : i32
    %c0_i32_0 = arith.constant 0 : i32
    %c0_i32_1 = arith.constant 0 : i32
    return %c0_i32, %c0_i32_0 : i32, i32
  }
  func.func @transform_3(%arg0: i32) -> (i32, i32) {
    %c0_i32 = arith.constant 0 : i32
    %c0_i32_0 = arith.constant 0 : i32
    %c0_i32_1 = arith.constant 0 : i32
    return %c0_i32, %c0_i32_0 : i32, i32
  }
  func.func @transform_4(%arg0: i32) -> (i32, i32) {
    %c0_i32 = arith.constant 0 : i32
    %c0_i32_0 = arith.constant 0 : i32
    return %arg0, %c0_i32 : i32, i32
  }
  func.func @transform_5(%arg0: i32) -> (i32, i32) {
    %c0_i32 = arith.constant 0 : i32
    %c0_i32_0 = arith.constant 0 : i32
    return %arg0, %c0_i32 : i32, i32
  }
  func.func @transform_6(%arg0: i32) -> (i32, i32) {
    %c0_i32 = arith.constant 0 : i32
    %c0_i32_0 = arith.constant 0 : i32
    %c0_i32_1 = arith.constant 0 : i32
    return %c0_i32, %c0_i32_0 : i32, i32
  }
}

</mosaic_0001>

<bundles_post_ra>
// kernel: _lambda_.3
= control target key start
LH: loop header
LB: loop body
LE: loop exit
PB: predicated region body
PF: predicated region fallthrough
CT: control target
= control target key end

     0   :  { %s1048_s12 = smov 0   ;;  %s1345_s0 = inlined_call_operand.vmem [shape: bf16[128,128], index: 0, kind: input, shape index: {}]   ;;  %s1346_s1 = inlined_call_operand.vmem [shape: bf16[128,768], index: 1, kind: input, shape index: {}]   ;;  %s1347_s2 = inlined_call_operand.vmem [shape: f32[1,768], index: 2, kind: input, shape index: {}]   ;;  %s1348_s3 = inlined_call_operand.vmem [shape: f32[128,768], index: 3, kind: output, shape index: {}]  }
   0x1 LB: > { %s854_s13 = sadd.s32 4294967295, %s1025_s12   ;;  %p858_p0 = scmp.ge.s32.totalorder %s1025_s12, 1  ;;  %s1025_s12 = sphi %s1048_s12, %s13_s12  }
   0x2   : > { %p138_p1 = scmp.lt.s32.totalorder %s1025_s12, 3 }
   0x4   : > { %p139_p2 = pnand %p858_p0, %p138_p1 }
   0x5   : > { %v943_v0 = vld [vmem:[%s1346_s1 + $0x4] ss:$24 sps:$4 sm:$0xff] (!%p139_p2)   ;;  %v1027_v2 = vmov (!%p139_p2), 0   ;;  %v947_v3 = vld [vmem:[%s1346_s1] ss:$24 sps:$4 sm:$0xff] (!%p139_p2)   ;;  %s859_s5 = sshll.u32 (!%p139_p2), %s854_s13, 3  ;;  %v235_v53 = vlaneseq (!%p139_p2) }
   0x6   : > { %142 = sbr.rel (%p139_p2) target bundleno = 297 (0x129), region = 32  ;;  %v945_v1 = vld [vmem:[%s1346_s1 + $0xc] ss:$24 sps:$4 sm:$0xff] (!%p139_p2)   ;;  %561 = vmatprep.mubr.bf16.mxu0 (!%p139_p2), %v1027_v2  ;;  %634 = vmatprep.mubr.bf16.mxu1 (!%p139_p2), %v1027_v2  ;;  %v948_v4 = vld [vmem:[%s1346_s1 + $0x8] ss:$24 sps:$4 sm:$0xff] (!%p139_p2)   ;;  %p164_p3 = scmp.lt.s32.totalorder (!%p139_p2), %s859_s5, 15 }
   0x7   : > { %529 = vmatprep.subr.bf16.mxu0 (!%p139_p2), %v943_v0  ;;  %602 = vmatprep.subr.bf16.mxu1 (!%p139_p2), %v945_v1  ;;  %v949_v5 = vld [vmem:[%s1346_s1 + $0x34] ss:$24 sps:$4 sm:$0xff] (!%p139_p2)   ;;  %v953_v7 = vld [vmem:[%s1346_s1 + $0x30] ss:$24 sps:$4 sm:$0xff] (!%p139_p2)   ;;  %v955_v9 = vld [vmem:[%s1346_s1 + $0x64] ss:$24 sps:$4 sm:$0xff] (!%p139_p2)  }
   0x8   : > { %530 = vmatpush1.bf16.msra.mxu0 (!%p139_p2), %v947_v3  ;;  %603 = vmatpush1.bf16.msra.mxu1 (!%p139_p2), %v948_v4  ;;  %v951_v6 = vld [vmem:[%s1346_s1 + $0x3c] ss:$24 sps:$4 sm:$0xff] (!%p139_p2)   ;;  %v954_v8 = vld [vmem:[%s1346_s1 + $0x38] ss:$24 sps:$4 sm:$0xff] (!%p139_p2)   ;;  %v957_v10 = vld [vmem:[%s1346_s1 + $0x6c] ss:$24 sps:$4 sm:$0xff] (!%p139_p2)  }
   0x9   : > { %531 = vmatprep.subr.bf16.mxu0 (!%p139_p2), %v949_v5  ;;  %604 = vmatprep.subr.bf16.mxu1 (!%p139_p2), %v951_v6  ;;  %v959_v11 = vld [vmem:[%s1346_s1 + $0x60] ss:$24 sps:$4 sm:$0xff] (!%p139_p2)   ;;  %v961_v13 = vld [vmem:[%s1346_s1 + $0x94] ss:$24 sps:$4 sm:$0xff] (!%p139_p2)   ;;  %v965_v15 = vld [vmem:[%s1346_s1 + $0x90] ss:$24 sps:$4 sm:$0xff] (!%p139_p2)  }
   0xa   : > { %v960_v12 = vld [vmem:[%s1346_s1 + $0x68] ss:$24 sps:$4 sm:$0xff] (!%p139_p2)   ;;  %v963_v14 = vld [vmem:[%s1346_s1 + $0x9c] ss:$24 sps:$4 sm:$0xff] (!%p139_p2)   ;;  %v966_v16 = vld [vmem:[%s1346_s1 + $0x98] ss:$24 sps:$4 sm:$0xff] (!%p139_p2)  }
   0xb   : > { %v967_v17 = vld [vmem:[%s1346_s1 + $0xc4] ss:$24 sps:$4 sm:$0xff] (!%p139_p2)   ;;  %v971_v19 = vld [vmem:[%s1346_s1 + $0xc0] ss:$24 sps:$4 sm:$0xff] (!%p139_p2)   ;;  %v973_v21 = vld [vmem:[%s1346_s1 + $0xf4] ss:$24 sps:$4 sm:$0xff] (!%p139_p2)  }
   0xc   : > { %532 = vmatpush1.bf16.msra.mxu0 (!%p139_p2), %v953_v7  ;;  %605 = vmatpush1.bf16.msra.mxu1 (!%p139_p2), %v954_v8  ;;  %v969_v18 = vld [vmem:[%s1346_s1 + $0xcc] ss:$24 sps:$4 sm:$0xff] (!%p139_p2)   ;;  %v972_v20 = vld [vmem:[%s1346_s1 + $0xc8] ss:$24 sps:$4 sm:$0xff] (!%p139_p2)   ;;  %v975_v22 = vld [vmem:[%s1346_s1 + $0xfc] ss:$24 sps:$4 sm:$0xff] (!%p139_p2)  }
   0xd   : > { %533 = vmatprep.subr.bf16.mxu0 %v955_v9  ;;  %606 = vmatprep.subr.bf16.mxu1 %v957_v10  ;;  %s1350_s5 = smov (!%p164_p3, %s859_s5), 15  ;;  %v977_v23 = vld [vmem:[%s1346_s1 + $0xf0] ss:$24 sps:$4 sm:$0xff]   ;;  %v979_v25 = vld [vmem:[%s1346_s1 + $0x124] ss:$24 sps:$4 sm:$0xff]   ;;  %v1229_v54 = vshrl.u32 %v235_v53, 7 }
   0xe   : > { %s860_s7 = sshll.u32 %s1350_s5, 2  ;;  %v978_v24 = vld [vmem:[%s1346_s1 + $0xf8] ss:$24 sps:$4 sm:$0xff]   ;;  %v981_v26 = vld [vmem:[%s1346_s1 + $0x12c] ss:$24 sps:$4 sm:$0xff]   ;;  %s933_s16 = smul.u32 48, %s1350_s5 }
   0xf   : > { %s1139_s17 = scalar_lea.vmem %s1345_s0, %s860_s7  ;;  %v983_v27 = vld [vmem:[%s1346_s1 + $0x120] ss:$24 sps:$4 sm:$0xff]   ;;  %v985_v29 = vld [vmem:[%s1346_s1 + $0x154] ss:$24 sps:$4 sm:$0xff]   ;;  %v989_v31 = vld [vmem:[%s1346_s1 + $0x150] ss:$24 sps:$4 sm:$0xff]  }
  0x10   : > { %534 = vmatpush1.bf16.msra.mxu0 %v959_v11  ;;  %607 = vmatpush1.bf16.msra.mxu1 %v960_v12  ;;  %v984_v28 = vld [vmem:[%s1346_s1 + $0x128] ss:$24 sps:$4 sm:$0xff]   ;;  %v987_v30 = vld [vmem:[%s1346_s1 + $0x15c] ss:$24 sps:$4 sm:$0xff]   ;;  %v990_v32 = vld [vmem:[%s1346_s1 + $0x158] ss:$24 sps:$4 sm:$0xff]   ;;  %s1256_s20 = scalar_lea.vmem %s1348_s3, %s933_s16 }
  0x11   : > { %535 = vmatprep.subr.bf16.mxu0 %v961_v13  ;;  %608 = vmatprep.subr.bf16.mxu1 %v963_v14  ;;  %v994_v33 = vld [vmem:[%s1346_s1 + $0x14] ss:$24 sps:$4 sm:$0xff]   ;;  %v1166_v34 = vld [vmem:[%s1139_s17] sm:$0xff]   ;;  %v992_v35 = vld [vmem:[%s1346_s1 + $0x10] ss:$24 sps:$4 sm:$0xff]   ;;  %v237_v55 = vsub.s32 0, %v1229_v54 }
  0x12   : > { %v997_v36 = vld [vmem:[%s1346_s1 + $0x44] ss:$24 sps:$4 sm:$0xff]   ;;  %v995_v37 = vld [vmem:[%s1346_s1 + $0x40] ss:$24 sps:$4 sm:$0xff]   ;;  %v1001_v38 = vld [vmem:[%s1346_s1 + $0x74] ss:$24 sps:$4 sm:$0xff]  }
  0x13   : > { %v998_v39 = vld [vmem:[%s1139_s17 + $0x8] sm:$0xff]   ;;  %v1004_v41 = vld [vmem:[%s1346_s1 + $0xa4] ss:$24 sps:$4 sm:$0xff]   ;;  %v1002_v42 = vld [vmem:[%s1346_s1 + $0xa0] ss:$24 sps:$4 sm:$0xff]   ;;  %v245_v56 = vsub.s32 2, %v1229_v54 }
  0x14   : > { %536 = vmatpush1.bf16.msra.mxu0 %v965_v15  ;;  %609 = vmatpush1.bf16.msra.mxu1 %v966_v16  ;;  %v999_v40 = vld [vmem:[%s1346_s1 + $0x70] ss:$24 sps:$4 sm:$0xff]   ;;  %v1008_v43 = vld [vmem:[%s1346_s1 + $0xd4] ss:$24 sps:$4 sm:$0xff]   ;;  %v1011_v46 = vld [vmem:[%s1346_s1 + $0x104] ss:$24 sps:$4 sm:$0xff]  }
  0x15   : > { %537 = vmatprep.subr.bf16.mxu0 %v967_v17  ;;  %610 = vmatprep.subr.bf16.mxu1 %v969_v18  ;;  %v1005_v44 = vld [vmem:[%s1139_s17 + $0x10] sm:$0xff]   ;;  %v1009_v47 = vld [vmem:[%s1346_s1 + $0x100] ss:$24 sps:$4 sm:$0xff]   ;;  %v1018_v51 = vld [vmem:[%s1346_s1 + $0x164] ss:$24 sps:$4 sm:$0xff]   ;;  %v241_v58 = vsub.s32 1, %v1229_v54 }
  0x16   : > { %v1006_v45 = vld [vmem:[%s1346_s1 + $0xd0] ss:$24 sps:$4 sm:$0xff]   ;;  %v1015_v48 = vld [vmem:[%s1346_s1 + $0x134] ss:$24 sps:$4 sm:$0xff]   ;;  %v1012_v49 = vld [vmem:[%s1139_s17 + $0x18] sm:$0xff]   ;;  %v249_v59 = vsub.s32 3, %v1229_v54 }
  0x17   : > { %v1013_v50 = vld [vmem:[%s1346_s1 + $0x130] ss:$24 sps:$4 sm:$0xff]   ;;  %v1016_v52 = vld [vmem:[%s1346_s1 + $0x160] ss:$24 sps:$4 sm:$0xff]  }
  0x18   : > { %538 = vmatpush1.bf16.msra.mxu0 %v971_v19  ;;  %611 = vmatpush1.bf16.msra.mxu1 %v972_v20  ;;  %v1236_v57 = vld [vmem:[%s1347_s2] sm:$0x3f] }
  0x19   : > { %539 = vmatprep.subr.bf16.mxu0 %v973_v21  ;;  %612 = vmatprep.subr.bf16.mxu1 %v975_v22  ;;  %v1242_v60 = vrot.slane %v1236_v57, %v237_v55  ;;  %v1245_v61 = vrot.slane %v1236_v57, %v245_v56  ;;  %v1248_v62 = vrot.slane %v1236_v57, %v241_v58  ;;  %v253_v55 = vsub.s32 4, %v1229_v54 }
  0x1a   : > { %v1251_v63 = vrot.slane %v1236_v57, %v249_v59 }
  0x1c   : > { %540 = vmatpush1.bf16.msra.mxu0 %v977_v23  ;;  %613 = vmatpush1.bf16.msra.mxu1 %v978_v24 }
  0x1d   : > { %541 = vmatprep.subr.bf16.mxu0 %v979_v25  ;;  %614 = vmatprep.subr.bf16.mxu1 %v981_v26 }
  0x20   : > { %542 = vmatpush1.bf16.msra.mxu0 %v983_v27  ;;  %615 = vmatpush1.bf16.msra.mxu1 %v984_v28 }
  0x21   : > { %543 = vmatprep.subr.bf16.mxu0 %v985_v29  ;;  %616 = vmatprep.subr.bf16.mxu1 %v987_v30 }
  0x24   : > { %544 = vmatpush1.bf16.msra.mxu0 %v989_v31  ;;  %617 = vmatpush1.bf16.msra.mxu1 %v990_v32 }
  0x25   : > { %675 = vmatprep.subr.bf16.mxu0 %v994_v33  ;;  %917 = vmatprep.subr.bf16.mxu1 %v994_v33 }
  0x27   : > { %562 = vmatmul.mubr.bf16.vlgmr.msra.gmra.mrb[0].mxu0 %v1166_v34  ;;  %635 = vmatmul.mubr.bf16.vlgmr.msra.gmra.mrb[0].mxu1 %v1166_v34 }
  0x28   : > { %676 = vmatpush1.bf16.msra.mxu0 %v992_v35  ;;  %925 = vmatpush1.bf16.msra.mxu1 %v992_v35 }
  0x29   : > { %677 = vmatprep.subr.bf16.mxu0 %v997_v36  ;;  %918 = vmatprep.subr.bf16.mxu1 %v997_v36 }
  0x2a   : > { %571 = vmatprep.mubr.bf16.mxu0 %v1027_v2  ;;  %644 = vmatprep.mubr.bf16.mxu1 %v1027_v2 }
  0x2c   : > { %678 = vmatpush1.bf16.msra.mxu0 %v995_v37  ;;  %926 = vmatpush1.bf16.msra.mxu1 %v995_v37 }
  0x2d   : > { %679 = vmatprep.subr.bf16.mxu0 %v1001_v38  ;;  %919 = vmatprep.subr.bf16.mxu1 %v1001_v38 }
  0x2f   : > { %572 = vmatmul.mubr.bf16.gmra.mrb[4].mxu0 %v998_v39  ;;  %645 = vmatmul.mubr.bf16.gmra.mrb[4].mxu1 %v998_v39 }
  0x30   : > { %680 = vmatpush1.bf16.msra.mxu0 %v999_v40  ;;  %927 = vmatpush1.bf16.msra.mxu1 %v999_v40 }
  0x31   : > { %681 = vmatprep.subr.bf16.mxu0 %v1004_v41  ;;  %920 = vmatprep.subr.bf16.mxu1 %v1004_v41 }
  0x32   : > { %581 = vmatprep.mubr.bf16.mxu0 %v1027_v2  ;;  %654 = vmatprep.mubr.bf16.mxu1 %v1027_v2 }
  0x34   : > { %682 = vmatpush1.bf16.msra.mxu0 %v1002_v42  ;;  %928 = vmatpush1.bf16.msra.mxu1 %v1002_v42 }
  0x35   : > { %683 = vmatprep.subr.bf16.mxu0 %v1008_v43  ;;  %921 = vmatprep.subr.bf16.mxu1 %v1008_v43 }
  0x37   : > { %582 = vmatmul.mubr.bf16.gmra.mrb[8].mxu0 %v1005_v44  ;;  %655 = vmatmul.mubr.bf16.gmra.mrb[8].mxu1 %v1005_v44 }
  0x38   : > { %684 = vmatpush1.bf16.msra.mxu0 %v1006_v45  ;;  %929 = vmatpush1.bf16.msra.mxu1 %v1006_v45 }
  0x39   : > { %685 = vmatprep.subr.bf16.mxu0 %v1011_v46  ;;  %922 = vmatprep.subr.bf16.mxu1 %v1011_v46 }
  0x3a   : > { %591 = vmatprep.mubr.bf16.mxu0 %v1027_v2  ;;  %664 = vmatprep.mubr.bf16.mxu1 %v1027_v2 }
  0x3c   : > { %686 = vmatpush1.bf16.msra.mxu0 %v1009_v47  ;;  %930 = vmatpush1.bf16.msra.mxu1 %v1009_v47 }
  0x3d   : > { %687 = vmatprep.subr.bf16.mxu0 %v1015_v48  ;;  %923 = vmatprep.subr.bf16.mxu1 %v1015_v48 }
  0x3f   : > { %592 = vmatmul.mubr.bf16.gmra.mrb[12].mxu0 %v1012_v49  ;;  %665 = vmatmul.mubr.bf16.gmra.mrb[12].mxu1 %v1012_v49 }
  0x40   : > { %688 = vmatpush1.bf16.msra.mxu0 %v1013_v50  ;;  %931 = vmatpush1.bf16.msra.mxu1 %v1013_v50 }
  0x41   : > { %689 = vmatprep.subr.bf16.mxu0 %v1018_v51  ;;  %924 = vmatprep.subr.bf16.mxu1 %v1018_v51 }
  0x42   : > { %707 = vmatprep.mubr.bf16.mxu0 %v1027_v2  ;;  %727 = vmatprep.mubr.bf16.mxu1 %v1027_v2 }
  0x44   : > { %690 = vmatpush1.bf16.msra.mxu0 %v1016_v52  ;;  %932 = vmatpush1.bf16.msra.mxu1 %v1016_v52 }
  0x47   : > { %708 = vmatmul.mubr.bf16.vlgmr.msra.gmra.mrb[16].mxu0 %v1166_v34  ;;  %728 = vmatmul.mubr.bf16.vlgmr.msra.gmra.mrb[16].mxu1 %v1005_v44 }
  0x48   : > { %717 = vmatprep.mubr.bf16.mxu0 %v1027_v2  ;;  %737 = vmatprep.mubr.bf16.mxu1 %v1027_v2 }
  0x4f   : > { %718 = vmatmul.mubr.bf16.gmra.mrb[20].mxu0 %v998_v39  ;;  %738 = vmatmul.mubr.bf16.gmra.mrb[20].mxu1 %v1012_v49 }
  0xfa   : > { %v563_v0 = vpop.f32.mrb[0].mxu0  ;;  %v636_v1 = vpop.f32.mrb[0].mxu1 }
  0xfb   : > { %v564_v2 = vadd.f32 %v563_v0, %v1242_v60  ;;  %v637_v3 = vadd.f32 %v636_v1, %v1245_v61  ;;  %v565_v4 = vpop.f32.mrb[1].mxu0  ;;  %v638_v5 = vpop.f32.mrb[1].mxu1  ;;  %v257_v1 = vsub.s32 5, %v1229_v54  ;;  %v254_v54 = vrot.slane %v1236_v57, %v253_v55 }
  0xfc   : > { %v566_v6 = vadd.f32 %v565_v4, %v1248_v62  ;;  %v639_v7 = vadd.f32 %v638_v5, %v1251_v63  ;;  %v567_v8 = vpop.f32.mrb[2].mxu0  ;;  %v640_v9 = vpop.f32.mrb[2].mxu1 }
  0xfd   : > { %748 = vst [vmem:[%s1256_s20] sm:$0xff] %v564_v2  ;;  %750 = vst [vmem:[%s1256_s20 + $0x10] sm:$0xff] %v637_v3  ;;  %v568_v10 = vadd.f32 %v567_v8, %v1242_v60  ;;  %v641_v11 = vadd.f32 %v640_v9, %v1245_v61  ;;  %v569_v12 = vpop.f32.mrb[3].mxu0  ;;  %v642_v13 = vpop.f32.mrb[3].mxu1 }
  0xfe   : > { %749 = vst [vmem:[%s1256_s20 + $0x8] sm:$0xff] %v566_v6  ;;  %751 = vst [vmem:[%s1256_s20 + $0x18] sm:$0xff] %v639_v7  ;;  %v570_v14 = vadd.f32 %v569_v12, %v1248_v62  ;;  %v643_v15 = vadd.f32 %v642_v13, %v1251_v63 }
  0xff   : > { %754 = vst [vmem:[%s1256_s20 + $0x30] sm:$0xff] %v568_v10  ;;  %756 = vst [vmem:[%s1256_s20 + $0x40] sm:$0xff] %v641_v11 }
 0x100   : > { %755 = vst [vmem:[%s1256_s20 + $0x38] sm:$0xff] %v570_v14  ;;  %757 = vst [vmem:[%s1256_s20 + $0x48] sm:$0xff] %v643_v15 }
 0x102   : > { %v573_v16 = vpop.f32.mrb[4].mxu0  ;;  %v646_v17 = vpop.f32.mrb[4].mxu1 }
 0x103   : > { %v574_v18 = vadd.f32 %v573_v16, %v1242_v60  ;;  %v647_v19 = vadd.f32 %v646_v17, %v1245_v61  ;;  %v575_v20 = vpop.f32.mrb[5].mxu0  ;;  %v648_v21 = vpop.f32.mrb[5].mxu1 }
 0x104   : > { %v576_v22 = vadd.f32 %v575_v20, %v1248_v62  ;;  %v649_v23 = vadd.f32 %v648_v21, %v1251_v63  ;;  %v577_v24 = vpop.f32.mrb[6].mxu0  ;;  %v650_v25 = vpop.f32.mrb[6].mxu1 }
 0x105   : > { %760 = vst [vmem:[%s1256_s20 + $0x60] sm:$0xff] %v574_v18  ;;  %762 = vst [vmem:[%s1256_s20 + $0x70] sm:$0xff] %v647_v19  ;;  %v578_v26 = vadd.f32 %v577_v24, %v1242_v60  ;;  %v651_v27 = vadd.f32 %v650_v25, %v1245_v61  ;;  %v579_v28 = vpop.f32.mrb[7].mxu0  ;;  %v652_v29 = vpop.f32.mrb[7].mxu1 }
 0x106   : > { %761 = vst [vmem:[%s1256_s20 + $0x68] sm:$0xff] %v576_v22  ;;  %763 = vst [vmem:[%s1256_s20 + $0x78] sm:$0xff] %v649_v23  ;;  %v580_v30 = vadd.f32 %v579_v28, %v1248_v62  ;;  %v653_v31 = vadd.f32 %v652_v29, %v1251_v63 }
 0x107   : > { %766 = vst [vmem:[%s1256_s20 + $0x90] sm:$0xff] %v578_v26  ;;  %768 = vst [vmem:[%s1256_s20 + $0xa0] sm:$0xff] %v651_v27 }
 0x108   : > { %767 = vst [vmem:[%s1256_s20 + $0x98] sm:$0xff] %v580_v30  ;;  %769 = vst [vmem:[%s1256_s20 + $0xa8] sm:$0xff] %v653_v31 }
 0x10a   : > { %v583_v32 = vpop.f32.mrb[8].mxu0  ;;  %v656_v33 = vpop.f32.mrb[8].mxu1 }
 0x10b   : > { %v584_v34 = vadd.f32 %v583_v32, %v1242_v60  ;;  %v657_v35 = vadd.f32 %v656_v33, %v1245_v61  ;;  %v585_v36 = vpop.f32.mrb[9].mxu0  ;;  %v658_v37 = vpop.f32.mrb[9].mxu1 }
 0x10c   : > { %v586_v38 = vadd.f32 %v585_v36, %v1248_v62  ;;  %v659_v39 = vadd.f32 %v658_v37, %v1251_v63  ;;  %v587_v40 = vpop.f32.mrb[10].mxu0  ;;  %v660_v41 = vpop.f32.mrb[10].mxu1 }
 0x10d   : > { %772 = vst [vmem:[%s1256_s20 + $0xc0] sm:$0xff] %v584_v34  ;;  %774 = vst [vmem:[%s1256_s20 + $0xd0] sm:$0xff] %v657_v35  ;;  %v588_v42 = vadd.f32 %v587_v40, %v1242_v60  ;;  %v661_v43 = vadd.f32 %v660_v41, %v1245_v61  ;;  %v589_v44 = vpop.f32.mrb[11].mxu0  ;;  %v662_v45 = vpop.f32.mrb[11].mxu1 }
 0x10e   : > { %773 = vst [vmem:[%s1256_s20 + $0xc8] sm:$0xff] %v586_v38  ;;  %775 = vst [vmem:[%s1256_s20 + $0xd8] sm:$0xff] %v659_v39  ;;  %v590_v46 = vadd.f32 %v589_v44, %v1248_v62  ;;  %v663_v47 = vadd.f32 %v662_v45, %v1251_v63 }
 0x10f   : > { %778 = vst [vmem:[%s1256_s20 + $0xf0] sm:$0xff] %v588_v42  ;;  %780 = vst [vmem:[%s1256_s20 + $0x100] sm:$0xff] %v661_v43 }
 0x110   : > { %779 = vst [vmem:[%s1256_s20 + $0xf8] sm:$0xff] %v590_v46  ;;  %781 = vst [vmem:[%s1256_s20 + $0x108] sm:$0xff] %v663_v47 }
 0x112   : > { %v593_v48 = vpop.f32.mrb[12].mxu0  ;;  %v666_v49 = vpop.f32.mrb[12].mxu1 }
 0x113   : > { %v594_v50 = vadd.f32 %v593_v48, %v1242_v60  ;;  %v667_v51 = vadd.f32 %v666_v49, %v1245_v61  ;;  %v595_v52 = vpop.f32.mrb[13].mxu0  ;;  %v668_v53 = vpop.f32.mrb[13].mxu1 }
 0x114   : > { %v596_v56 = vadd.f32 %v595_v52, %v1248_v62  ;;  %v669_v58 = vadd.f32 %v668_v53, %v1251_v63  ;;  %v597_v59 = vpop.f32.mrb[14].mxu0  ;;  %v670_v0 = vpop.f32.mrb[14].mxu1 }
 0x115   : > { %784 = vst [vmem:[%s1256_s20 + $0x120] sm:$0xff] %v594_v50  ;;  %786 = vst [vmem:[%s1256_s20 + $0x130] sm:$0xff] %v667_v51  ;;  %v598_v2 = vadd.f32 %v597_v59, %v1242_v60  ;;  %v671_v3 = vadd.f32 %v670_v0, %v1245_v61  ;;  %v599_v4 = vpop.f32.mrb[15].mxu0  ;;  %v672_v5 = vpop.f32.mrb[15].mxu1  ;;  %v258_v60 = vrot.slane %v1236_v57, %v257_v1 }
 0x116   : > { %785 = vst [vmem:[%s1256_s20 + $0x128] sm:$0xff] %v596_v56  ;;  %787 = vst [vmem:[%s1256_s20 + $0x138] sm:$0xff] %v669_v58  ;;  %v600_v6 = vadd.f32 %v599_v4, %v1248_v62  ;;  %v673_v7 = vadd.f32 %v672_v5, %v1251_v63 }
 0x117   : > { %790 = vst [vmem:[%s1256_s20 + $0x150] sm:$0xff] %v598_v2  ;;  %792 = vst [vmem:[%s1256_s20 + $0x160] sm:$0xff] %v671_v3 }
 0x118   : > { %791 = vst [vmem:[%s1256_s20 + $0x158] sm:$0xff] %v600_v6  ;;  %793 = vst [vmem:[%s1256_s20 + $0x168] sm:$0xff] %v673_v7 }
 0x11a   : > { %v709_v8 = vpop.f32.mrb[16].mxu0  ;;  %v729_v61 = vpop.f32.mrb[16].mxu1 }
 0x11b   : > { %v710_v9 = vadd.f32 %v709_v8, %v254_v54  ;;  %v730_v10 = vadd.f32 %v729_v61, %v254_v54  ;;  %v711_v11 = vpop.f32.mrb[17].mxu0  ;;  %v731_v62 = vpop.f32.mrb[17].mxu1 }
 0x11c   : > { %v712_v63 = vadd.f32 %v711_v11, %v258_v60  ;;  %v732_v12 = vadd.f32 %v731_v62, %v258_v60  ;;  %v713_v13 = vpop.f32.mrb[18].mxu0  ;;  %v733_v14 = vpop.f32.mrb[18].mxu1 }
 0x11d   : > { %752 = vst [vmem:[%s1256_s20 + $0x20] sm:$0xff] %v710_v9  ;;  %776 = vst [vmem:[%s1256_s20 + $0xe0] sm:$0xff] %v730_v10  ;;  %v714_v15 = vadd.f32 %v713_v13, %v254_v54  ;;  %v734_v57 = vadd.f32 %v733_v14, %v254_v54  ;;  %v715_v16 = vpop.f32.mrb[19].mxu0  ;;  %v735_v17 = vpop.f32.mrb[19].mxu1 }
 0x11e   : > { %753 = vst [vmem:[%s1256_s20 + $0x28] sm:$0xff] %v712_v63  ;;  %777 = vst [vmem:[%s1256_s20 + $0xe8] sm:$0xff] %v732_v12  ;;  %v716_v18 = vadd.f32 %v715_v16, %v258_v60  ;;  %v736_v19 = vadd.f32 %v735_v17, %v258_v60 }
 0x11f   : > { %758 = vst [vmem:[%s1256_s20 + $0x50] sm:$0xff] %v714_v15  ;;  %782 = vst [vmem:[%s1256_s20 + $0x110] sm:$0xff] %v734_v57 }
 0x120   : > { %759 = vst [vmem:[%s1256_s20 + $0x58] sm:$0xff] %v716_v18  ;;  %783 = vst [vmem:[%s1256_s20 + $0x118] sm:$0xff] %v736_v19 }
 0x122   : > { %v719_v20 = vpop.f32.mrb[20].mxu0  ;;  %v739_v21 = vpop.f32.mrb[20].mxu1 }
 0x123   : > { %v720_v22 = vadd.f32 %v719_v20, %v254_v54  ;;  %v740_v23 = vadd.f32 %v739_v21, %v254_v54  ;;  %v721_v24 = vpop.f32.mrb[21].mxu0  ;;  %v741_v25 = vpop.f32.mrb[21].mxu1 }
 0x124   : > { %v722_v26 = vadd.f32 %v721_v24, %v258_v60  ;;  %v742_v27 = vadd.f32 %v741_v25, %v258_v60  ;;  %v723_v28 = vpop.f32.mrb[22].mxu0  ;;  %v743_v29 = vpop.f32.mrb[22].mxu1 }
 0x125   : > { %764 = vst [vmem:[%s1256_s20 + $0x80] sm:$0xff] %v720_v22  ;;  %788 = vst [vmem:[%s1256_s20 + $0x140] sm:$0xff] %v740_v23  ;;  %v724_v30 = vadd.f32 %v723_v28, %v254_v54  ;;  %v744_v31 = vadd.f32 %v743_v29, %v254_v54  ;;  %v725_v32 = vpop.f32.mrb[23].mxu0  ;;  %v745_v33 = vpop.f32.mrb[23].mxu1 }
 0x126   : > { %765 = vst [vmem:[%s1256_s20 + $0x88] sm:$0xff] %v722_v26  ;;  %789 = vst [vmem:[%s1256_s20 + $0x148] sm:$0xff] %v742_v27  ;;  %v726_v34 = vadd.f32 %v725_v32, %v258_v60  ;;  %v746_v35 = vadd.f32 %v745_v33, %v258_v60 }
 0x127   : > { %770 = vst [vmem:[%s1256_s20 + $0xb0] sm:$0xff] %v724_v30  ;;  %794 = vst [vmem:[%s1256_s20 + $0x170] sm:$0xff] %v744_v31 }
 0x128   : > { %771 = vst [vmem:[%s1256_s20 + $0xb8] sm:$0xff] %v726_v34  ;;  %795 = vst [vmem:[%s1256_s20 + $0x178] sm:$0xff] %v746_v35 }
 0x129 PF: > { %s13_s12 = sadd.s32 1, %s1025_s12  }
 0x12a   : > { %p10_p4 = scmp.ge.s32.totalorder %s13_s12, 4  }
 0x12c   :  { %12 = sbr.rel (!%p10_p4) target bundleno = 1 (0x1), region = 62 }

// kernel: _lambda_.4
= control target key start
LH: loop header
LB: loop body
LE: loop exit
PB: predicated region body
PF: predicated region fallthrough
CT: control target
= control target key end

     0   :  { %s2032_s18 = smov 0   ;;  %s2034_s19 = smov 0   ;;  %s2764_s0 = inlined_call_operand.vmem [shape: s32[8,1], index: 0, kind: input, shape index: {}]   ;;  %s2765_s1 = inlined_call_operand.vmem [shape: f32[128,768], index: 1, kind: input, shape index: {}]   ;;  %s2766_s2 = inlined_call_operand.vmem [shape: bf16[128,384], index: 2, kind: input, shape index: {}]   ;;  %s2767_s3 = inlined_call_operand.vmem [shape: f32[1,384], index: 3, kind: input, shape index: {}]   ;;  %s2768_s4 = inlined_call_operand.vmem [shape: f32[128,128], index: 4, kind: output, shape index: {0}]   ;;  %s2769_s5 = inlined_call_operand.vmem [shape: f32[8,128], index: 5, kind: output, shape index: {1}]  }
   0x1   :  { %s2036_s20 = smov 0  }
   0x2 LB: > { %s1498_s21 = sadd.s32 4294967295, %s1996_s20   ;;  %s2049_s22 = sadd.s32 1, %s1996_s20   ;;  %s1996_s20 = sphi %s2036_s20, %s2772_s20   ;;  %s1992_s19 = sphi %s2034_s19, %s2771_s19   ;;  %s1988_s18 = sphi %s2032_s18, %s2770_s18  }
   0x3   : > { %s41_s23 = ssub.s32 1, %s1996_s20  ;;  %s42_s24 = ssub.s32 1, %s2049_s22 }
   0x4   : > { %s43_s25 = ssub.s32 %s41_s23, %s42_s24  ;;  %s46_s26 = sadd.s32 1, %s1992_s19 }
   0x5   : > { %p44_p0 = scmp.eq.s32.totalorder %s43_s25, 0  ;;  %p53_p1 = scmp.ne.s32.totalorder %s1992_s19, %s1988_s18 }
   0x6   : > { %p54_p2 = scmp.eq.s32.totalorder %s1996_s20, 0  ;;  %p1501_p4 = scmp.ge.s32.totalorder %s1996_s20, 2 }
   0x7   : > { %s2058_s27 = scalar_select %p44_p0, %s1992_s19, %s46_s26  }
   0x8   : > { %p55_p3 = por %p54_p2, %p53_p1  ;;  %179 = sbr.rel (%p1501_p4) target bundleno = 32 (0x20), region = 28 }
   0xf   : > { %182 = sbr.rel (!%p55_p3) target bundleno = 32 (0x20), region = 32  ;;  %s184_s28 = sand.u32 (%p55_p3), 1, %s1992_s19  }
  0x10   : > { %s1502_s29 = smul.u32 (%p55_p3), 384, %s41_s23 }
  0x11   : > { %s1806_s30 = smul.u32 (%p55_p3), 192, %s184_s28 }
  0x12   : > { %s2065_s8 = scalar_lea.vmem (%p55_p3), %s2765_s1, %s1502_s29 }
  0x13   : > { %v1503_v0 = vld [vmem:[%s2065_s8 + $0x18] sm:$0xff] (%p55_p3)  ;;  %v1504_v1 = vld [vmem:[%s2065_s8 + $0x20] sm:$0xff] (%p55_p3)  ;;  %v1505_v2 = vld [vmem:[%s2065_s8 + $0x28] sm:$0xff] (%p55_p3)  ;;  %s2070_s9 = scalar_lea.vmem (%p55_p3), [#allocation2], %s1806_s30 }
  0x14   : > { %206 = vst [vmem:[%s2070_s9] sm:$0xff] (%p55_p3), %v1503_v0  ;;  %208 = vst [vmem:[%s2070_s9 + $0x8] sm:$0xff] (%p55_p3), %v1504_v1  ;;  %v1506_v3 = vld [vmem:[%s2065_s8 + $0x48] sm:$0xff] (%p55_p3)  ;;  %v1507_v4 = vld [vmem:[%s2065_s8 + $0x50] sm:$0xff] (%p55_p3) }
  0x15   : > { %210 = vst [vmem:[%s2070_s9 + $0x10] sm:$0xff] (%p55_p3), %v1505_v2  ;;  %v1508_v5 = vld [vmem:[%s2065_s8 + $0x58] sm:$0xff] (%p55_p3)  ;;  %212 = vst [vmem:[%s2070_s9 + $0x18] sm:$0xff] (%p55_p3), %v1506_v3  ;;  %v1510_v7 = vld [vmem:[%s2065_s8 + $0x80] sm:$0xff] (%p55_p3) }
  0x16   : > { %214 = vst [vmem:[%s2070_s9 + $0x20] sm:$0xff] %v1507_v4  ;;  %216 = vst [vmem:[%s2070_s9 + $0x28] sm:$0xff] %v1508_v5  ;;  %v1509_v6 = vld [vmem:[%s2065_s8 + $0x78] sm:$0xff]  ;;  %v1511_v8 = vld [vmem:[%s2065_s8 + $0x88] sm:$0xff] }
  0x17   : > { %218 = vst [vmem:[%s2070_s9 + $0x30] sm:$0xff] %v1509_v6  ;;  %220 = vst [vmem:[%s2070_s9 + $0x38] sm:$0xff] %v1510_v7  ;;  %v1512_v9 = vld [vmem:[%s2065_s8 + $0xa8] sm:$0xff]  ;;  %v1513_v10 = vld [vmem:[%s2065_s8 + $0xb0] sm:$0xff] }
  0x18   : > { %222 = vst [vmem:[%s2070_s9 + $0x40] sm:$0xff] %v1511_v8  ;;  %v1514_v11 = vld [vmem:[%s2065_s8 + $0xb8] sm:$0xff]  ;;  %224 = vst [vmem:[%s2070_s9 + $0x48] sm:$0xff] %v1512_v9  ;;  %v1516_v13 = vld [vmem:[%s2065_s8 + $0xe0] sm:$0xff] }
  0x19   : > { %226 = vst [vmem:[%s2070_s9 + $0x50] sm:$0xff] %v1513_v10  ;;  %228 = vst [vmem:[%s2070_s9 + $0x58] sm:$0xff] %v1514_v11  ;;  %v1515_v12 = vld [vmem:[%s2065_s8 + $0xd8] sm:$0xff]  ;;  %v1517_v14 = vld [vmem:[%s2065_s8 + $0xe8] sm:$0xff] }
  0x1a   : > { %230 = vst [vmem:[%s2070_s9 + $0x60] sm:$0xff] %v1515_v12  ;;  %232 = vst [vmem:[%s2070_s9 + $0x68] sm:$0xff] %v1516_v13  ;;  %v1518_v15 = vld [vmem:[%s2065_s8 + $0x108] sm:$0xff]  ;;  %v1519_v16 = vld [vmem:[%s2065_s8 + $0x110] sm:$0xff] }
  0x1b   : > { %234 = vst [vmem:[%s2070_s9 + $0x70] sm:$0xff] %v1517_v14  ;;  %v1520_v17 = vld [vmem:[%s2065_s8 + $0x118] sm:$0xff]  ;;  %236 = vst [vmem:[%s2070_s9 + $0x78] sm:$0xff] %v1518_v15  ;;  %v1522_v19 = vld [vmem:[%s2065_s8 + $0x140] sm:$0xff] }
  0x1c   : > { %238 = vst [vmem:[%s2070_s9 + $0x80] sm:$0xff] %v1519_v16  ;;  %240 = vst [vmem:[%s2070_s9 + $0x88] sm:$0xff] %v1520_v17  ;;  %v1521_v18 = vld [vmem:[%s2065_s8 + $0x138] sm:$0xff]  ;;  %v1523_v20 = vld [vmem:[%s2065_s8 + $0x148] sm:$0xff] }
  0x1d   : > { %242 = vst [vmem:[%s2070_s9 + $0x90] sm:$0xff] %v1521_v18  ;;  %244 = vst [vmem:[%s2070_s9 + $0x98] sm:$0xff] %v1522_v19  ;;  %v1524_v21 = vld [vmem:[%s2065_s8 + $0x168] sm:$0xff]  ;;  %v1525_v22 = vld [vmem:[%s2065_s8 + $0x170] sm:$0xff] }
  0x1e   : > { %246 = vst [vmem:[%s2070_s9 + $0xa0] sm:$0xff] %v1523_v20  ;;  %v1526_v23 = vld [vmem:[%s2065_s8 + $0x178] sm:$0xff]  ;;  %248 = vst [vmem:[%s2070_s9 + $0xa8] sm:$0xff] %v1524_v21 }
  0x1f   : > { %250 = vst [vmem:[%s2070_s9 + $0xb0] sm:$0xff] %v1525_v22  ;;  %252 = vst [vmem:[%s2070_s9 + $0xb8] sm:$0xff] %v1526_v23 }
  0x20 PF: > { %p1527_p5 = scmp.ge.s32.totalorder %s1996_s20, 1  ;;  %p257_p6 = scmp.lt.s32.totalorder %s1996_s20, 3 }
  0x22   : > { %p258_p7 = pnand %p1527_p5, %p257_p6 }
  0x23   : > { %s264_s10 = sand.u32 (!%p258_p7), 1, %s1988_s18   ;;  %s294_s11 = ssub.s32 (!%p258_p7), 1, %s1498_s21 }
  0x24   : > { %261 = sbr.rel (%p258_p7) target bundleno = 2196 (0x894), region = 55  ;;  %s2122_s13 = sshll.u32 (!%p258_p7), %s294_s11, 3 }
  0x25   : > { %s1807_s12 = smul.u32 (!%p258_p7), 192, %s264_s10  ;;  %p296_p8 = scmp.lt.s32.totalorder (!%p258_p7), %s2122_s13, 15 }
  0x26   : > { %p1530_p9 = scmp.ne.s32.totalorder (!%p258_p7), %s1498_s21, 0 }
  0x27   : > { %s2131_s24 = scalar_lea.vmem (!%p258_p7), [#allocation2], %s1807_s12 }
  0x2b   : > { %s297_s14 = scalar_select %p296_p8, %s2122_s13, 15 }
  0x2c   : > { %306 = sbr.rel (%p1530_p9) target bundleno = 51 (0x33), region = 63  ;;  %v1998_v24 = vmov (!%p1530_p9), 0.0  }
  0x2d   : > { %s1529_s15 = sshll.u32 %s297_s14, 3  ;;  %307 = vst [vmem:[%s2769_s5] sm:$0xff] (!%p1530_p9), %v1998_v24 }
  0x2e   : > { %s2129_s23 = scalar_lea.vmem %s2768_s4, %s1529_s15 }
  0x33 PF: > { %v2141_v25 = vld [vmem:[%s2766_s2 + $0x4] ss:$12 sps:$4 sm:$0xff]   ;;  %v2146_v26 = vld [vmem:[%s2766_s2] ss:$12 sps:$4 sm:$0xff]   ;;  %v1999_v27 = vmov 0.0   ;;  %v2000_v28 = vmov 0   ;;  %v353_v62 = vlaneseq }
  0x34   : > { %1646 = vmatprep.subr.bf16.mxu1 %v1999_v27  ;;  %528 = vmatprep.mubr.bf16.mxu0 %v2000_v28  ;;  %v2154_v29 = vld [vmem:[%s2766_s2 + $0x1c] ss:$12 sps:$4 sm:$0xff]   ;;  %vm2001_vm0 = vmmov 0   ;;  %v2162_v30 = vld [vmem:[%s2766_s2 + $0x18] ss:$12 sps:$4 sm:$0xff]   ;;  %s345_s30 = sadd.s32 7, %s2122_s13 }
  0x35   : > { %496 = vmatprep.subr.bf16.mxu0 %v2141_v25  ;;  %1662 = vmatprep.mubr.msk.bf16.mxu1 %vm2001_vm0, %v1999_v27  ;;  %v2169_v31 = vld [vmem:[%s2766_s2 + $0x34] ss:$12 sps:$4 sm:$0xff]   ;;  %v2176_v32 = vld [vmem:[%s2766_s2 + $0x30] ss:$12 sps:$4 sm:$0xff]   ;;  %v2182_v33 = vld [vmem:[%s2766_s2 + $0x4c] ss:$12 sps:$4 sm:$0xff]   ;;  %v346_v41 = vstv %s345_s30 }
  0x36   : > { %497 = vmatpush1.bf16.msra.mxu0 %v2146_v26  ;;  %1836 = vset.pattern.permute.xlu0 %v2000_v28  ;;  %v2187_v34 = vld [vmem:[%s2766_s2 + $0x8] ss:$12 sps:$4 sm:$0xff]   ;;  %v2199_v36 = vld [vmem:[%s2766_s2 + $0x64] ss:$12 sps:$4 sm:$0xff]   ;;  %v2205_v37 = vld [vmem:[%s2766_s2 + $0x20] ss:$12 sps:$4 sm:$0xff]  }
  0x37   : > { %498 = vmatprep.subr.bf16.mxu0 %v2154_v29  ;;  %1837 = vset.pattern.permute.xlu1 %v2000_v28  ;;  %v2193_v35 = vld [vmem:[%s2766_s2 + $0x48] ss:$12 sps:$4 sm:$0xff]   ;;  %s606_s20 = sadd.s32 6, %s2122_s13  ;;  %v2213_v38 = vld [vmem:[%s2766_s2 + $0x60] ss:$12 sps:$4 sm:$0xff]   ;;  %s957_s11 = sadd.s32 3, %s2122_s13 }
  0x38   : > { %1647 = vmatpush3.bf16.msra.mxu1 %v2187_v34  ;;  %v2219_v39 = vld [vmem:[%s2766_s2 + $0x7c] ss:$12 sps:$4 sm:$0xff]   ;;  %v2226_v40 = vld [vmem:[%s2766_s2 + $0x38] ss:$12 sps:$4 sm:$0xff]   ;;  %v607_v42 = vstv %s606_s20  ;;  %v2245_v45 = vld [vmem:[%s2766_s2 + $0x94] ss:$12 sps:$4 sm:$0xff]  }
  0x39   : > { %1648 = vmatprep.subr.bf16.mxu1 %v1999_v27  ;;  %v2234_v43 = vld [vmem:[%s2766_s2 + $0x78] ss:$12 sps:$4 sm:$0xff]   ;;  %v2251_v46 = vld [vmem:[%s2766_s2 + $0x50] ss:$12 sps:$4 sm:$0xff]   ;;  %v958_v48 = vstv %s957_s11  ;;  %s1191_s28 = sadd.s32 1, %s2122_s13  ;;  %v354_v63 = vshrl.u32 %v353_v62, 7 }
  0x3a   : > { %499 = vmatpush1.bf16.msra.mxu0 %v2162_v30  ;;  %v2239_v44 = vld [vmem:[%s2764_s0] sm:$0xff]  ;;  %v2262_v49 = vld [vmem:[%s2766_s2 + $0x90] ss:$12 sps:$4 sm:$0xff]   ;;  %v2269_v51 = vld [vmem:[%s2766_s2 + $0xac] ss:$12 sps:$4 sm:$0xff]   ;;  %v1192_v53 = vstv %s1191_s28  ;;  %s723_s28 = sadd.s32 5, %s2122_s13 }
  0x3b   : > { %500 = vmatprep.subr.bf16.mxu0 %v2169_v31  ;;  %vm347_vm1 = vcmp.gt.s32.totalorder %v2239_v44, %v346_v41  ;;  %vm608_vm2 = vcmp.gt.s32.totalorder %v2239_v44, %v607_v42  ;;  %v2275_v52 = vld [vmem:[%s2766_s2 + $0x68] ss:$12 sps:$4 sm:$0xff]   ;;  %vm959_vm3 = vcmp.gt.s32.totalorder %v2239_v44, %v958_v48  ;;  %v2288_v55 = vld [vmem:[%s2769_s5] sm:$0xff]  ;;  %vm1193_vm4 = vcmp.gt.s32.totalorder %v2239_v44, %v1192_v53  ;;  %v2318_v61 = vld [vmem:[%s2766_s2 + $0xb0] ss:$12 sps:$4 sm:$0xff]   ;;  %s840_s29 = sadd.s32 4, %s2122_s13 }
  0x3c   : > { %1649 = vmatpush3.bf16.msra.mxu1 %v2205_v37  ;;  %v598_v47 = vsel %vm347_vm1, 1, %v2000_v28  ;;  %v715_v50 = vsel %vm608_vm2, 1, %v2000_v28  ;;  %v2283_v54 = vld [vmem:[%s2766_s2 + $0xa8] ss:$12 sps:$4 sm:$0xff]   ;;  %v1066_v56 = vsel %vm959_vm3, 1, %v2000_v28  ;;  %v351_v58 = vpack.c.bf16 %v2288_v55, %v2288_v55  ;;  %s1074_s30 = sadd.s32 2, %s2122_s13 }
  0x3d   : > { %1650 = vmatprep.subr.bf16.mxu1 %v1999_v27  ;;  %600 = vperm.xlu0 %1836, %v598_v47   ;;  %v2296_v57 = vld [vmem:[%s2766_s2 + $0x80] ss:$12 sps:$4 sm:$0xff]   ;;  %v1300_v59 = vsel %vm1193_vm4, 1, %v2000_v28  ;;  %v2308_v60 = vld [vmem:[%s2766_s2 + $0x98] ss:$12 sps:$4 sm:$0xff]   ;;  %v355_v0 = vsub.s32 0, %v354_v63 }
  0x3e   : > { %501 = vmatpush1.bf16.msra.mxu0 %v2176_v32  ;;  %v341_v1 = vld [vmem:[%s2767_s3] sm:$0x7]  ;;  %v359_v2 = vsub.s32 1, %v354_v63  ;;  %v348_v5 = vld [vmem:[%s2131_s24 + $0xa8] sm:$0xff]  ;;  %v349_v12 = vld [vmem:[%s2131_s24 + $0xb0] sm:$0xff]  ;;  %v363_v23 = vsub.s32 2, %v354_v63 }
  0x3f   : > { %502 = vmatprep.subr.bf16.mxu0 %v2182_v33  ;;  %v2359_v3 = vrot.slane %v341_v1, %v355_v0 }
  0x40   : > { %1651 = vmatpush3.bf16.msra.mxu1 %v2226_v40  ;;  %v2361_v4 = vrot.slane %v341_v1, %v359_v2  ;;  %v2367_v24 = vrot.slane %v341_v1, %v363_v23 }
  0x41   : > { %1652 = vmatprep.subr.bf16.mxu1 %v1999_v27  ;;  %717 = vperm.xlu0 %1836, %v715_v50   ;;  %v350_v50 = vld [vmem:[%s2131_s24 + $0xb8] sm:$0xff] }
  0x42   : > { %503 = vmatpush1.bf16.msra.mxu0 %v2193_v35 }
  0x43   : > { %504 = vmatprep.subr.bf16.mxu0 %v2199_v36 }
  0x44   : > { %1653 = vmatpush3.bf16.msra.mxu1 %v2251_v46 }
  0x45   : > { %1654 = vmatprep.subr.bf16.mxu1 %v1999_v27  ;;  %1068 = vperm.xlu0 %1836, %v1066_v56  }
  0x46   : > { %505 = vmatpush1.bf16.msra.mxu0 %v2213_v38 }
  0x47   : > { %506 = vmatprep.subr.bf16.mxu0 %v2219_v39 }
  0x48   : > { %1655 = vmatpush3.bf16.msra.mxu1 %v2275_v52 }
  0x49   : > { %1656 = vmatprep.subr.bf16.mxu1 %v1999_v27  ;;  %1302 = vperm.xlu0 %1836, %v1300_v59  }
  0x4a   : > { %507 = vmatpush1.bf16.msra.mxu0 %v2234_v43 }
  0x4b   : > { %508 = vmatprep.subr.bf16.mxu0 %v2245_v45 }
  0x4c   : > { %1657 = vmatpush3.bf16.msra.mxu1 %v2296_v57 }
  0x4d   : > { %1658 = vmatprep.subr.bf16.mxu1 %v1999_v27 }
  0x4e   : > { %509 = vmatpush1.bf16.msra.mxu0 %v2262_v49 }
  0x4f   : > { %510 = vmatprep.subr.bf16.mxu0 %v2269_v51 }
  0x50   : > { %1659 = vmatpush3.bf16.msra.mxu1 %v2308_v60 }
  0x51   : > { %1660 = vmatprep.subr.bf16.mxu1 %v1999_v27 }
  0x52   : > { %511 = vmatpush1.bf16.msra.mxu0 %v2283_v54 }
  0x53   : > { %613 = vmatprep.subr.bf16.mxu0 %v2141_v25 }
  0x54   : > { %1661 = vmatpush3.bf16.msra.mxu1 %v2318_v61 }
  0x55   : > { %529 = vmatmul.mubr.bf16.vlgmr.msra.gmra.mrb[0].mxu0 %v351_v58  ;;  %1666 = vmatprep.subr.bf16.mxu1 %v1999_v27 }
  0x56   : > { %614 = vmatpush1.bf16.msra.mxu0 %v2146_v26  ;;  %645 = vmatprep.mubr.bf16.mxu0 %v2000_v28 }
  0x57   : > { %615 = vmatprep.subr.bf16.mxu0 %v2154_v29  ;;  %1663 = vmatmul.mubr.bf16.vlgmr.msra.gmra.mrb[0].mxu1 %v351_v58 }
  0x58   : > { %1667 = vmatpush3.bf16.msra.mxu1 %v2187_v34  ;;  %1682 = vmatprep.mubr.msk.bf16.mxu1 %vm2001_vm0, %v1999_v27 }
  0x59   : > { %1668 = vmatprep.subr.bf16.mxu1 %v1999_v27 }
  0x5a   : > { %616 = vmatpush1.bf16.msra.mxu0 %v2162_v30 }
  0x5b   : > { %617 = vmatprep.subr.bf16.mxu0 %v2169_v31 }
  0x5c   : > { %1669 = vmatpush3.bf16.msra.mxu1 %v2205_v37 }
  0x5d   : > { %1670 = vmatprep.subr.bf16.mxu1 %v1999_v27 }
  0x5e   : > { %618 = vmatpush1.bf16.msra.mxu0 %v2176_v32 }
  0x5f   : > { %619 = vmatprep.subr.bf16.mxu0 %v2182_v33 }
  0x60   : > { %1671 = vmatpush3.bf16.msra.mxu1 %v2226_v40 }
  0x61   : > { %1672 = vmatprep.subr.bf16.mxu1 %v1999_v27 }
  0x62   : > { %620 = vmatpush1.bf16.msra.mxu0 %v2193_v35 }
  0x63   : > { %621 = vmatprep.subr.bf16.mxu0 %v2199_v36 }
  0x64   : > { %1673 = vmatpush3.bf16.msra.mxu1 %v2251_v46 }
  0x65   : > { %1674 = vmatprep.subr.bf16.mxu1 %v1999_v27 }
  0x66   : > { %622 = vmatpush1.bf16.msra.mxu0 %v2213_v38 }
  0x67   : > { %623 = vmatprep.subr.bf16.mxu0 %v2219_v39 }
  0x68   : > { %1675 = vmatpush3.bf16.msra.mxu1 %v2275_v52 }
  0x69   : > { %1676 = vmatprep.subr.bf16.mxu1 %v1999_v27 }
  0x6a   : > { %624 = vmatpush1.bf16.msra.mxu0 %v2234_v43 }
  0x6b   : > { %625 = vmatprep.subr.bf16.mxu0 %v2245_v45 }
  0x6c   : > { %1677 = vmatpush3.bf16.msra.mxu1 %v2296_v57 }
  0x6d   : > { %1678 = vmatprep.subr.bf16.mxu1 %v1999_v27 }
  0x6e   : > { %626 = vmatpush1.bf16.msra.mxu0 %v2262_v49 }
  0x6f   : > { %627 = vmatprep.subr.bf16.mxu0 %v2269_v51 }
  0x70   : > { %1679 = vmatpush3.bf16.msra.mxu1 %v2308_v60 }
  0x71   : > { %1680 = vmatprep.subr.bf16.mxu1 %v1999_v27 }
  0x72   : > { %628 = vmatpush1.bf16.msra.mxu0 %v2283_v54 }
  0x73   : > { %730 = vmatprep.subr.bf16.mxu0 %v2141_v25 }
  0x74   : > { %1681 = vmatpush3.bf16.msra.mxu1 %v2318_v61 }
  0x75   : > { %1686 = vmatprep.subr.bf16.mxu1 %v1999_v27 }
  0xbc   : > { %v601_v2 = vpop.permute.xlu0 %600 }
  0xbd   : > { %vm602_vm5 = vcmp.eq.s32.totalorder %v601_v2, 1  ;;  %v611_v2 = vld [vmem:[%s2131_s24 + $0xa0] sm:$0xff] }
 0x128   : > { %v530_v6 = vpop.f32.mrb[0].mxu0 }
 0x129   : > { %v531_v7 = vadd.f32 %v530_v6, %v2359_v3  ;;  %v532_v8 = vpop.f32.mrb[1].mxu0 }
 0x12a   : > { %v533_v9 = vadd.f32 %v532_v8, %v2361_v4  ;;  %v534_v10 = vpop.f32.mrb[2].mxu0  ;;  %v571_v16 = vpop.f32.mrb[0].mxu1  ;;  %v841_v8 = vstv %s840_s29 }
 0x12b   : > { %v577_v11 = vadd.f32 %v531_v7, %v348_v5  ;;  %v535_v13 = vpop.f32.mrb[3].mxu0  ;;  %v1664_v18 = vpop.f32.mrb[1].mxu1  ;;  %v572_v47 = vadd.f32 %v571_v16, %v2367_v24  ;;  %vm842_vm7 = vcmp.gt.s32.totalorder %v2239_v44, %v841_v8  ;;  %v1075_v10 = vstv %s1074_s30 }
 0x12c   : > { %v584_v15 = vadd.f32 %v533_v9, %v349_v12  ;;  %v574_v19 = vpop.f32.mrb[2].mxu1  ;;  %vm1076_vm8 = vcmp.gt.s32.totalorder %v2239_v44, %v1075_v10  ;;  %v1308_v12 = vstv %s2122_s13 }
 0x12d   : > { %v1556_v14 = vmul.f32 -1.442695, %v577_v11  ;;  %v1665_v20 = vpop.f32.mrb[3].mxu1  ;;  %v949_v11 = vsel %vm842_vm7, 1, %v2000_v28  ;;  %v1183_v13 = vsel %vm1076_vm8, 1, %v2000_v28  ;;  %vm1309_vm9 = vcmp.gt.s32.totalorder %v2239_v44, %v1308_v12 }
 0x12e   : > { %v1557_v17 = vmul.f32 -1.442695, %v584_v15  ;;  %v609_v15 = vld [vmem:[%s2131_s24 + $0x90] sm:$0xff] }
 0x12f   : > { %1870 = vpow2.f32 %v1556_v14  ;;  %v1416_v14 = vsel %vm1309_vm9, 1, %v2000_v28 }
 0x130   : > { %1872 = vpow2.f32 %v1557_v17 }
 0x139   : > { %v1871_v21 = vpop.eup %1870 }
 0x13a   : > { %v581_v22 = vadd.f32 1.0, %v1871_v21  ;;  %v1873_v41 = vpop.eup %1872 }
 0x13b   : > { %v588_v42 = vadd.f32 1.0, %v1873_v41 }
 0x13c   : > { %1874 = vrcp.f32 %v581_v22 }
 0x13d   : > { %1876 = vrcp.f32 %v588_v42  ;;  %v610_v42 = vld [vmem:[%s2131_s24 + $0x98] sm:$0xff] }
 0x146   : > { %v1875_v48 = vpop.eup %1874 }
 0x147   : > { %v591_v53 = vmul.f32 %v1875_v48, %v572_v47  ;;  %v1877_v58 = vpop.eup %1876 }
 0x148   : > { %v594_v59 = vsub.f32 1.0, %v1877_v58  ;;  %v596_v63 = vmul.f32 %v1877_v58, %v2288_v55 }
 0x149   : > { %v592_v56 = vadd.f32 %v591_v53, %v350_v50 }
 0x14b   : > { %1878 = vtanh.f32 %v592_v56 }
 0x155   : > { %v1879_v62 = vpop.eup %1878 }
 0x156   : > { %v595_v0 = vmul.f32 %v1879_v62, %v594_v59 }
 0x158   : > { %v597_v1 = vadd.f32 %v596_v63, %v595_v0 }
 0x15a   : > { %v2373_v5 = vsel %vm602_vm5, %v597_v1, %v2288_v55  ;;  %v604_v6 = vsel %vm602_vm5, %v597_v1, 0.0  ;;  %v724_v55 = vstv %s723_s28 }
 0x15b   : > { %605 = vst [vmem:[%s2129_s23 + $0x38] sm:$0xff] %v604_v6  ;;  %v612_v7 = vpack.c.bf16 %v2373_v5, %v2373_v5  ;;  %vm725_vm6 = vcmp.gt.s32.totalorder %v2239_v44, %v724_v55 }
 0x15c   : > { %v832_v9 = vsel %vm725_vm6, 1, %v2000_v28 }
 0x15d   : > { %646 = vmatmul.mubr.bf16.vlgmr.msra.gmra.mrb[4].mxu0 %v612_v7  ;;  %1683 = vmatmul.mubr.bf16.vlgmr.msra.gmra.mrb[4].mxu1 %v612_v7 }
 0x15e   : > { %731 = vmatpush1.bf16.msra.mxu0 %v2146_v26  ;;  %1687 = vmatpush3.bf16.msra.mxu1 %v2187_v34 }
 0x15f   : > { %732 = vmatprep.subr.bf16.mxu0 %v2154_v29  ;;  %1688 = vmatprep.subr.bf16.mxu1 %v1999_v27 }
 0x160   : > { %762 = vmatprep.mubr.bf16.mxu0 %v2000_v28  ;;  %1702 = vmatprep.mubr.msk.bf16.mxu1 %vm2001_vm0, %v1999_v27 }
 0x161   : > { %834 = vperm.xlu1 %1837, %v832_v9  }
 0x162   : > { %733 = vmatpush1.bf16.msra.mxu0 %v2162_v30  ;;  %1689 = vmatpush3.bf16.msra.mxu1 %v2205_v37 }
 0x163   : > { %734 = vmatprep.subr.bf16.mxu0 %v2169_v31  ;;  %1690 = vmatprep.subr.bf16.mxu1 %v1999_v27 }
 0x165   : > { %951 = vperm.xlu1 %1837, %v949_v11   ;;  %v718_v11 = vpop.permute.xlu0 %717 }
 0x166   : > { %735 = vmatpush1.bf16.msra.mxu0 %v2176_v32  ;;  %1691 = vmatpush3.bf16.msra.mxu1 %v2226_v40  ;;  %vm719_vm10 = vcmp.eq.s32.totalorder %v718_v11, 1 }
 0x167   : > { %736 = vmatprep.subr.bf16.mxu0 %v2182_v33  ;;  %1692 = vmatprep.subr.bf16.mxu1 %v1999_v27 }
 0x169   : > { %1185 = vperm.xlu1 %1837, %v1183_v13  }
 0x16a   : > { %737 = vmatpush1.bf16.msra.mxu0 %v2193_v35  ;;  %1693 = vmatpush3.bf16.msra.mxu1 %v2251_v46 }
 0x16b   : > { %738 = vmatprep.subr.bf16.mxu0 %v2199_v36  ;;  %1694 = vmatprep.subr.bf16.mxu1 %v1999_v27 }
 0x16d   : > { %1418 = vperm.xlu1 %1837, %v1416_v14  }
 0x16e   : > { %739 = vmatpush1.bf16.msra.mxu0 %v2213_v38  ;;  %1695 = vmatpush3.bf16.msra.mxu1 %v2275_v52 }
 0x16f   : > { %740 = vmatprep.subr.bf16.mxu0 %v2219_v39  ;;  %1696 = vmatprep.subr.bf16.mxu1 %v1999_v27 }
 0x172   : > { %741 = vmatpush1.bf16.msra.mxu0 %v2234_v43  ;;  %1697 = vmatpush3.bf16.msra.mxu1 %v2296_v57 }
 0x173   : > { %742 = vmatprep.subr.bf16.mxu0 %v2245_v45  ;;  %1698 = vmatprep.subr.bf16.mxu1 %v1999_v27 }
 0x176   : > { %743 = vmatpush1.bf16.msra.mxu0 %v2262_v49  ;;  %1699 = vmatpush3.bf16.msra.mxu1 %v2308_v60 }
 0x177   : > { %744 = vmatprep.subr.bf16.mxu0 %v2269_v51  ;;  %1700 = vmatprep.subr.bf16.mxu1 %v1999_v27 }
 0x17a   : > { %745 = vmatpush1.bf16.msra.mxu0 %v2283_v54  ;;  %1701 = vmatpush3.bf16.msra.mxu1 %v2318_v61 }
 0x17b   : > { %847 = vmatprep.subr.bf16.mxu0 %v2141_v25  ;;  %1706 = vmatprep.subr.bf16.mxu1 %v1999_v27 }
 0x230   : > { %v647_v16 = vpop.f32.mrb[4].mxu0  ;;  %v688_v17 = vpop.f32.mrb[4].mxu1 }
 0x231   : > { %v648_v18 = vadd.f32 %v647_v16, %v2359_v3  ;;  %v649_v19 = vpop.f32.mrb[5].mxu0  ;;  %v1684_v20 = vpop.f32.mrb[5].mxu1  ;;  %v689_v0 = vadd.f32 %v688_v17, %v2367_v24 }
 0x232   : > { %v650_v21 = vadd.f32 %v649_v19, %v2361_v4  ;;  %v651_v22 = vpop.f32.mrb[6].mxu0  ;;  %v691_v23 = vpop.f32.mrb[6].mxu1 }
 0x233   : > { %v694_v41 = vadd.f32 %v648_v18, %v609_v15  ;;  %v652_v47 = vpop.f32.mrb[7].mxu0  ;;  %v1685_v44 = vpop.f32.mrb[7].mxu1 }
 0x234   : > { %v701_v50 = vadd.f32 %v650_v21, %v610_v42  ;;  %v727_v42 = vld [vmem:[%s2131_s24 + $0x80] sm:$0xff] }
 0x235   : > { %v1558_v48 = vmul.f32 -1.442695, %v694_v41 }
 0x236   : > { %v1559_v53 = vmul.f32 -1.442695, %v701_v50 }
 0x237   : > { %1880 = vpow2.f32 %v1558_v48 }
 0x238   : > { %1882 = vpow2.f32 %v1559_v53 }
 0x241   : > { %v1881_v56 = vpop.eup %1880 }
 0x242   : > { %v698_v58 = vadd.f32 1.0, %v1881_v56  ;;  %v1883_v59 = vpop.eup %1882 }
 0x243   : > { %v705_v62 = vadd.f32 1.0, %v1883_v59 }
 0x244   : > { %1884 = vrcp.f32 %v698_v58 }
 0x245   : > { %1886 = vrcp.f32 %v705_v62 }
 0x24e   : > { %v1885_v63 = vpop.eup %1884 }
 0x24f   : > { %v708_v1 = vmul.f32 %v1885_v63, %v689_v0  ;;  %v1887_v7 = vpop.eup %1886 }
 0x250   : > { %v711_v55 = vsub.f32 1.0, %v1887_v7  ;;  %v713_v10 = vmul.f32 %v1887_v7, %v2373_v5 }
 0x251   : > { %v709_v6 = vadd.f32 %v708_v1, %v611_v2  ;;  %v728_v2 = vld [vmem:[%s2131_s24 + $0x88] sm:$0xff] }
 0x253   : > { %1888 = vtanh.f32 %v709_v6 }
 0x25d   : > { %v1889_v8 = vpop.eup %1888 }
 0x25e   : > { %v712_v9 = vmul.f32 %v1889_v8, %v711_v55 }
 0x260   : > { %v714_v12 = vadd.f32 %v713_v10, %v712_v9  ;;  %v835_v9 = vpop.permute.xlu1 %834 }
 0x261   : > { %vm836_vm11 = vcmp.eq.s32.totalorder %v835_v9, 1 }
 0x262   : > { %v2433_v13 = vsel %vm719_vm10, %v714_v12, %v2373_v5  ;;  %v721_v14 = vsel %vm719_vm10, %v714_v12, 0.0  ;;  %v726_v5 = vld [vmem:[%s2131_s24 + $0x78] sm:$0xff] }
 0x263   : > { %722 = vst [vmem:[%s2129_s23 + $0x30] sm:$0xff] %v721_v14  ;;  %v729_v15 = vpack.c.bf16 %v2433_v13, %v2433_v13 }
 0x265   : > { %763 = vmatmul.mubr.bf16.vlgmr.msra.gmra.mrb[8].mxu0 %v729_v15  ;;  %1703 = vmatmul.mubr.bf16.vlgmr.msra.gmra.mrb[8].mxu1 %v729_v15 }
 0x266   : > { %848 = vmatpush1.bf16.msra.mxu0 %v2146_v26  ;;  %1707 = vmatpush3.bf16.msra.mxu1 %v2187_v34 }
 0x267   : > { %849 = vmatprep.subr.bf16.mxu0 %v2154_v29  ;;  %1708 = vmatprep.subr.bf16.mxu1 %v1999_v27 }
 0x268   : > { %879 = vmatprep.mubr.bf16.mxu0 %v2000_v28  ;;  %1722 = vmatprep.mubr.msk.bf16.mxu1 %vm2001_vm0, %v1999_v27 }
 0x26a   : > { %850 = vmatpush1.bf16.msra.mxu0 %v2162_v30  ;;  %1709 = vmatpush3.bf16.msra.mxu1 %v2205_v37 }
 0x26b   : > { %851 = vmatprep.subr.bf16.mxu0 %v2169_v31  ;;  %1710 = vmatprep.subr.bf16.mxu1 %v1999_v27 }
 0x26e   : > { %852 = vmatpush1.bf16.msra.mxu0 %v2176_v32  ;;  %1711 = vmatpush3.bf16.msra.mxu1 %v2226_v40 }
 0x26f   : > { %853 = vmatprep.subr.bf16.mxu0 %v2182_v33  ;;  %1712 = vmatprep.subr.bf16.mxu1 %v1999_v27 }
 0x272   : > { %854 = vmatpush1.bf16.msra.mxu0 %v2193_v35  ;;  %1713 = vmatpush3.bf16.msra.mxu1 %v2251_v46 }
 0x273   : > { %855 = vmatprep.subr.bf16.mxu0 %v2199_v36  ;;  %1714 = vmatprep.subr.bf16.mxu1 %v1999_v27 }
 0x276   : > { %856 = vmatpush1.bf16.msra.mxu0 %v2213_v38  ;;  %1715 = vmatpush3.bf16.msra.mxu1 %v2275_v52 }
 0x277   : > { %857 = vmatprep.subr.bf16.mxu0 %v2219_v39  ;;  %1716 = vmatprep.subr.bf16.mxu1 %v1999_v27 }
 0x27a   : > { %858 = vmatpush1.bf16.msra.mxu0 %v2234_v43  ;;  %1717 = vmatpush3.bf16.msra.mxu1 %v2296_v57 }
 0x27b   : > { %859 = vmatprep.subr.bf16.mxu0 %v2245_v45  ;;  %1718 = vmatprep.subr.bf16.mxu1 %v1999_v27 }
 0x27e   : > { %860 = vmatpush1.bf16.msra.mxu0 %v2262_v49  ;;  %1719 = vmatpush3.bf16.msra.mxu1 %v2308_v60 }
 0x27f   : > { %861 = vmatprep.subr.bf16.mxu0 %v2269_v51  ;;  %1720 = vmatprep.subr.bf16.mxu1 %v1999_v27 }
 0x282   : > { %862 = vmatpush1.bf16.msra.mxu0 %v2283_v54  ;;  %1721 = vmatpush3.bf16.msra.mxu1 %v2318_v61 }
 0x283   : > { %964 = vmatprep.subr.bf16.mxu0 %v2141_v25  ;;  %1726 = vmatprep.subr.bf16.mxu1 %v1999_v27 }
 0x338   : > { %v764_v16 = vpop.f32.mrb[8].mxu0  ;;  %v805_v17 = vpop.f32.mrb[8].mxu1 }
 0x339   : > { %v765_v18 = vadd.f32 %v764_v16, %v2359_v3  ;;  %v766_v19 = vpop.f32.mrb[9].mxu0  ;;  %v1704_v20 = vpop.f32.mrb[9].mxu1  ;;  %v806_v0 = vadd.f32 %v805_v17, %v2367_v24 }
 0x33a   : > { %v767_v21 = vadd.f32 %v766_v19, %v2361_v4  ;;  %v768_v22 = vpop.f32.mrb[10].mxu0  ;;  %v808_v23 = vpop.f32.mrb[10].mxu1 }
 0x33b   : > { %v811_v41 = vadd.f32 %v765_v18, %v726_v5  ;;  %v769_v47 = vpop.f32.mrb[11].mxu0  ;;  %v1705_v44 = vpop.f32.mrb[11].mxu1 }
 0x33c   : > { %v818_v50 = vadd.f32 %v767_v21, %v727_v42  ;;  %v844_v42 = vld [vmem:[%s2131_s24 + $0x68] sm:$0xff] }
 0x33d   : > { %v1560_v48 = vmul.f32 -1.442695, %v811_v41 }
 0x33e   : > { %v1561_v53 = vmul.f32 -1.442695, %v818_v50 }
 0x33f   : > { %1890 = vpow2.f32 %v1560_v48 }
 0x340   : > { %1892 = vpow2.f32 %v1561_v53 }
 0x349   : > { %v1891_v56 = vpop.eup %1890 }
 0x34a   : > { %v815_v58 = vadd.f32 1.0, %v1891_v56  ;;  %v1893_v59 = vpop.eup %1892 }
 0x34b   : > { %v822_v62 = vadd.f32 1.0, %v1893_v59 }
 0x34c   : > { %1894 = vrcp.f32 %v815_v58 }
 0x34d   : > { %1896 = vrcp.f32 %v822_v62 }
 0x356   : > { %v1895_v63 = vpop.eup %1894 }
 0x357   : > { %v825_v1 = vmul.f32 %v1895_v63, %v806_v0  ;;  %v1897_v7 = vpop.eup %1896 }
 0x358   : > { %v828_v55 = vsub.f32 1.0, %v1897_v7  ;;  %v830_v11 = vmul.f32 %v1897_v7, %v2433_v13 }
 0x359   : > { %v826_v6 = vadd.f32 %v825_v1, %v728_v2  ;;  %v845_v2 = vld [vmem:[%s2131_s24 + $0x70] sm:$0xff] }
 0x35b   : > { %1898 = vtanh.f32 %v826_v6 }
 0x365   : > { %v1899_v8 = vpop.eup %1898 }
 0x366   : > { %v829_v10 = vmul.f32 %v1899_v8, %v828_v55 }
 0x368   : > { %v831_v12 = vadd.f32 %v830_v11, %v829_v10  ;;  %v952_v11 = vpop.permute.xlu1 %951 }
 0x369   : > { %vm953_vm12 = vcmp.eq.s32.totalorder %v952_v11, 1  ;;  %v2630_v11 = vld [vmem:[%s2766_s2 + $0x48] ss:$12 sps:$4 sm:$0xff]  }
 0x36a   : > { %v2481_v14 = vsel %vm836_vm11, %v831_v12, %v2433_v13  ;;  %v838_v15 = vsel %vm836_vm11, %v831_v12, 0.0  ;;  %v843_v13 = vld [vmem:[%s2131_s24 + $0x60] sm:$0xff] }
 0x36b   : > { %839 = vst [vmem:[%s2129_s23 + $0x28] sm:$0xff] %v838_v15  ;;  %v846_v5 = vpack.c.bf16 %v2481_v14, %v2481_v14 }
 0x36d   : > { %880 = vmatmul.mubr.bf16.vlgmr.msra.gmra.mrb[12].mxu0 %v846_v5  ;;  %1723 = vmatmul.mubr.bf16.vlgmr.msra.gmra.mrb[12].mxu1 %v846_v5 }
 0x36e   : > { %965 = vmatpush1.bf16.msra.mxu0 %v2146_v26  ;;  %1727 = vmatpush3.bf16.msra.mxu1 %v2187_v34 }
 0x36f   : > { %966 = vmatprep.subr.bf16.mxu0 %v2154_v29  ;;  %1728 = vmatprep.subr.bf16.mxu1 %v1999_v27 }
 0x370   : > { %996 = vmatprep.mubr.bf16.mxu0 %v2000_v28  ;;  %1742 = vmatprep.mubr.msk.bf16.mxu1 %vm2001_vm0, %v1999_v27 }
 0x372   : > { %967 = vmatpush1.bf16.msra.mxu0 %v2162_v30  ;;  %1729 = vmatpush3.bf16.msra.mxu1 %v2205_v37 }
 0x373   : > { %968 = vmatprep.subr.bf16.mxu0 %v2169_v31  ;;  %1730 = vmatprep.subr.bf16.mxu1 %v1999_v27 }
 0x376   : > { %969 = vmatpush1.bf16.msra.mxu0 %v2176_v32  ;;  %1731 = vmatpush3.bf16.msra.mxu1 %v2226_v40 }
 0x377   : > { %970 = vmatprep.subr.bf16.mxu0 %v2182_v33  ;;  %1732 = vmatprep.subr.bf16.mxu1 %v1999_v27 }
 0x37a   : > { %971 = vmatpush1.bf16.msra.mxu0 %v2193_v35  ;;  %1733 = vmatpush3.bf16.msra.mxu1 %v2251_v46 }
 0x37b   : > { %972 = vmatprep.subr.bf16.mxu0 %v2199_v36  ;;  %1734 = vmatprep.subr.bf16.mxu1 %v1999_v27 }
 0x37e   : > { %973 = vmatpush1.bf16.msra.mxu0 %v2213_v38  ;;  %1735 = vmatpush3.bf16.msra.mxu1 %v2275_v52 }
 0x37f   : > { %974 = vmatprep.subr.bf16.mxu0 %v2219_v39  ;;  %1736 = vmatprep.subr.bf16.mxu1 %v1999_v27 }
 0x382   : > { %975 = vmatpush1.bf16.msra.mxu0 %v2234_v43  ;;  %1737 = vmatpush3.bf16.msra.mxu1 %v2296_v57 }
 0x383   : > { %976 = vmatprep.subr.bf16.mxu0 %v2245_v45  ;;  %1738 = vmatprep.subr.bf16.mxu1 %v1999_v27 }
 0x386   : > { %977 = vmatpush1.bf16.msra.mxu0 %v2262_v49  ;;  %1739 = vmatpush3.bf16.msra.mxu1 %v2308_v60 }
 0x387   : > { %978 = vmatprep.subr.bf16.mxu0 %v2269_v51  ;;  %1740 = vmatprep.subr.bf16.mxu1 %v1999_v27 }
 0x38a   : > { %979 = vmatpush1.bf16.msra.mxu0 %v2283_v54  ;;  %1741 = vmatpush3.bf16.msra.mxu1 %v2318_v61 }
 0x38b   : > { %1081 = vmatprep.subr.bf16.mxu0 %v2141_v25  ;;  %1746 = vmatprep.subr.bf16.mxu1 %v1999_v27 }
 0x440   : > { %v881_v16 = vpop.f32.mrb[12].mxu0  ;;  %v922_v17 = vpop.f32.mrb[12].mxu1 }
 0x441   : > { %v882_v18 = vadd.f32 %v881_v16, %v2359_v3  ;;  %v883_v19 = vpop.f32.mrb[13].mxu0  ;;  %v1724_v20 = vpop.f32.mrb[13].mxu1  ;;  %v923_v0 = vadd.f32 %v922_v17, %v2367_v24  ;;  %v961_v17 = vld [vmem:[%s2131_s24 + $0x50] sm:$0xff] }
 0x442   : > { %v884_v21 = vadd.f32 %v883_v19, %v2361_v4  ;;  %v885_v22 = vpop.f32.mrb[14].mxu0  ;;  %v925_v23 = vpop.f32.mrb[14].mxu1 }
 0x443   : > { %v928_v41 = vadd.f32 %v882_v18, %v843_v13  ;;  %v886_v47 = vpop.f32.mrb[15].mxu0  ;;  %v1725_v44 = vpop.f32.mrb[15].mxu1 }
 0x444   : > { %v935_v50 = vadd.f32 %v884_v21, %v844_v42 }
 0x445   : > { %v1562_v48 = vmul.f32 -1.442695, %v928_v41 }
 0x446   : > { %v1563_v53 = vmul.f32 -1.442695, %v935_v50 }
 0x447   : > { %1900 = vpow2.f32 %v1562_v48  ;;  %v962_v48 = vld [vmem:[%s2131_s24 + $0x58] sm:$0xff] }
 0x448   : > { %1902 = vpow2.f32 %v1563_v53 }
 0x451   : > { %v1901_v56 = vpop.eup %1900 }
 0x452   : > { %v932_v58 = vadd.f32 1.0, %v1901_v56  ;;  %v1903_v59 = vpop.eup %1902 }
 0x453   : > { %v939_v62 = vadd.f32 1.0, %v1903_v59 }
 0x454   : > { %1904 = vrcp.f32 %v932_v58 }
 0x455   : > { %1906 = vrcp.f32 %v939_v62 }
 0x45e   : > { %v1905_v63 = vpop.eup %1904 }
 0x45f   : > { %v942_v1 = vmul.f32 %v1905_v63, %v923_v0  ;;  %v1907_v7 = vpop.eup %1906  ;;  %v1069_v63 = vpop.permute.xlu0 %1068 }
 0x460   : > { %v945_v55 = vsub.f32 1.0, %v1907_v7  ;;  %v947_v10 = vmul.f32 %v1907_v7, %v2481_v14  ;;  %vm1070_vm13 = vcmp.eq.s32.totalorder %v1069_v63, 1  ;;  %v1970_v63 = vld [vmem:[%s2766_s2 + $0x98] ss:$12 sps:$4 sm:$0xff]  }
 0x461   : > { %v943_v6 = vadd.f32 %v942_v1, %v845_v2 }
 0x463   : > { %1908 = vtanh.f32 %v943_v6 }
 0x46d   : > { %v1909_v8 = vpop.eup %1908 }
 0x46e   : > { %v946_v9 = vmul.f32 %v1909_v8, %v945_v55  ;;  %v2585_v55 = vld [vmem:[%s2766_s2] ss:$12 sps:$4 sm:$0xff]   ;;  %v2592_v8 = vld [vmem:[%s2766_s2 + $0x1c] ss:$12 sps:$4 sm:$0xff]  }
 0x470   : > { %v948_v12 = vadd.f32 %v947_v10, %v946_v9  ;;  %v2602_v9 = vld [vmem:[%s2766_s2 + $0x18] ss:$12 sps:$4 sm:$0xff]   ;;  %v2616_v10 = vld [vmem:[%s2766_s2 + $0x30] ss:$12 sps:$4 sm:$0xff]  }
 0x472   : > { %v2529_v15 = vsel %vm953_vm12, %v948_v12, %v2481_v14  ;;  %v955_v5 = vsel %vm953_vm12, %v948_v12, 0.0 }
 0x473   : > { %956 = vst [vmem:[%s2129_s23 + $0x20] sm:$0xff] %v955_v5  ;;  %v963_v13 = vpack.c.bf16 %v2529_v15, %v2529_v15 }
 0x475   : > { %997 = vmatmul.mubr.bf16.vlgmr.msra.gmra.mrb[16].mxu0 %v963_v13  ;;  %1743 = vmatmul.mubr.bf16.vlgmr.msra.gmra.mrb[16].mxu1 %v963_v13 }
 0x476   : > { %1082 = vmatpush1.bf16.msra.mxu0 %v2146_v26  ;;  %1747 = vmatpush3.bf16.msra.mxu1 %v2187_v34  ;;  %v960_v26 = vld [vmem:[%s2131_s24 + $0x48] sm:$0xff] }
 0x477   : > { %1083 = vmatprep.subr.bf16.mxu0 %v2154_v29  ;;  %1748 = vmatprep.subr.bf16.mxu1 %v1999_v27 }
 0x478   : > { %1113 = vmatprep.mubr.bf16.mxu0 %v2000_v28  ;;  %1762 = vmatprep.mubr.msk.bf16.mxu1 %vm2001_vm0, %v1999_v27 }
 0x47a   : > { %1084 = vmatpush1.bf16.msra.mxu0 %v2162_v30  ;;  %1749 = vmatpush3.bf16.msra.mxu1 %v2205_v37 }
 0x47b   : > { %1085 = vmatprep.subr.bf16.mxu0 %v2169_v31  ;;  %1750 = vmatprep.subr.bf16.mxu1 %v1999_v27 }
 0x47e   : > { %1086 = vmatpush1.bf16.msra.mxu0 %v2176_v32  ;;  %1751 = vmatpush3.bf16.msra.mxu1 %v2226_v40 }
 0x47f   : > { %1087 = vmatprep.subr.bf16.mxu0 %v2182_v33  ;;  %1752 = vmatprep.subr.bf16.mxu1 %v1999_v27 }
 0x482   : > { %1088 = vmatpush1.bf16.msra.mxu0 %v2193_v35  ;;  %1753 = vmatpush3.bf16.msra.mxu1 %v2251_v46 }
 0x483   : > { %1089 = vmatprep.subr.bf16.mxu0 %v2199_v36  ;;  %1754 = vmatprep.subr.bf16.mxu1 %v1999_v27 }
 0x486   : > { %1090 = vmatpush1.bf16.msra.mxu0 %v2213_v38  ;;  %1755 = vmatpush3.bf16.msra.mxu1 %v2275_v52 }
 0x487   : > { %1091 = vmatprep.subr.bf16.mxu0 %v2219_v39  ;;  %1756 = vmatprep.subr.bf16.mxu1 %v1999_v27 }
 0x48a   : > { %1092 = vmatpush1.bf16.msra.mxu0 %v2234_v43  ;;  %1757 = vmatpush3.bf16.msra.mxu1 %v2296_v57 }
 0x48b   : > { %1093 = vmatprep.subr.bf16.mxu0 %v2245_v45  ;;  %1758 = vmatprep.subr.bf16.mxu1 %v1999_v27 }
 0x48e   : > { %1094 = vmatpush1.bf16.msra.mxu0 %v2262_v49  ;;  %1759 = vmatpush3.bf16.msra.mxu1 %v2308_v60 }
 0x48f   : > { %1095 = vmatprep.subr.bf16.mxu0 %v2269_v51  ;;  %1760 = vmatprep.subr.bf16.mxu1 %v1999_v27 }
 0x492   : > { %1096 = vmatpush1.bf16.msra.mxu0 %v2283_v54  ;;  %1761 = vmatpush3.bf16.msra.mxu1 %v2318_v61 }
 0x493   : > { %1198 = vmatprep.subr.bf16.mxu0 %v2141_v25  ;;  %1766 = vmatprep.subr.bf16.mxu1 %v1999_v27 }
 0x548   : > { %v998_v29 = vpop.f32.mrb[16].mxu0  ;;  %v1039_v30 = vpop.f32.mrb[16].mxu1 }
 0x549   : > { %v999_v31 = vadd.f32 %v998_v29, %v2359_v3  ;;  %v1000_v32 = vpop.f32.mrb[17].mxu0  ;;  %v1744_v33 = vpop.f32.mrb[17].mxu1  ;;  %v1040_v47 = vadd.f32 %v1039_v30, %v2367_v24 }
 0x54a   : > { %v1001_v35 = vadd.f32 %v1000_v32, %v2361_v4  ;;  %v1002_v36 = vpop.f32.mrb[18].mxu0  ;;  %v1042_v14 = vpop.f32.mrb[18].mxu1 }
 0x54b   : > { %v1045_v16 = vadd.f32 %v999_v31, %v960_v26  ;;  %v1003_v18 = vpop.f32.mrb[19].mxu0  ;;  %v1745_v19 = vpop.f32.mrb[19].mxu1  ;;  %v1079_v36 = vld [vmem:[%s2131_s24 + $0x40] sm:$0xff] }
 0x54c   : > { %v1052_v25 = vadd.f32 %v1001_v35, %v961_v17 }
 0x54d   : > { %v1564_v20 = vmul.f32 -1.442695, %v1045_v16 }
 0x54e   : > { %v1565_v21 = vmul.f32 -1.442695, %v1052_v25 }
 0x54f   : > { %1910 = vpow2.f32 %v1564_v20 }
 0x550   : > { %1912 = vpow2.f32 %v1565_v21  ;;  %v1186_v21 = vpop.permute.xlu1 %1185 }
 0x551   : > { %vm1187_vm14 = vcmp.eq.s32.totalorder %v1186_v21, 1 }
 0x559   : > { %v1911_v22 = vpop.eup %1910 }
 0x55a   : > { %v1049_v23 = vadd.f32 1.0, %v1911_v22  ;;  %v1913_v41 = vpop.eup %1912 }
 0x55b   : > { %v1056_v42 = vadd.f32 1.0, %v1913_v41 }
 0x55c   : > { %1914 = vrcp.f32 %v1049_v23 }
 0x55d   : > { %1916 = vrcp.f32 %v1056_v42 }
 0x566   : > { %v1915_v44 = vpop.eup %1914 }
 0x567   : > { %v1059_v50 = vmul.f32 %v1915_v44, %v1040_v47  ;;  %v1917_v56 = vpop.eup %1916  ;;  %v1959_v47 = vld [vmem:[%s2766_s2 + $0x8] ss:$12 sps:$4 sm:$0xff]   ;;  %v1960_v44 = vld [vmem:[%s2766_s2 + $0x20] ss:$12 sps:$4 sm:$0xff]  }
 0x568   : > { %v1062_v58 = vsub.f32 1.0, %v1917_v56  ;;  %v1064_v0 = vmul.f32 %v1917_v56, %v2529_v15  ;;  %v1965_v56 = vld [vmem:[%s2766_s2 + $0x7c] ss:$12 sps:$4 sm:$0xff]  }
 0x569   : > { %v1060_v53 = vadd.f32 %v1059_v50, %v962_v48  ;;  %v1962_v48 = vld [vmem:[%s2766_s2 + $0x50] ss:$12 sps:$4 sm:$0xff]   ;;  %v1963_v50 = vld [vmem:[%s2766_s2 + $0x60] ss:$12 sps:$4 sm:$0xff]  }
 0x56b   : > { %1918 = vtanh.f32 %v1060_v53  ;;  %v1964_v53 = vld [vmem:[%s2766_s2 + $0x68] ss:$12 sps:$4 sm:$0xff]  }
 0x575   : > { %v1919_v59 = vpop.eup %1918 }
 0x576   : > { %v1063_v62 = vmul.f32 %v1919_v59, %v1062_v58  ;;  %v1966_v58 = vld [vmem:[%s2766_s2 + $0x78] ss:$12 sps:$4 sm:$0xff]   ;;  %v1967_v59 = vld [vmem:[%s2766_s2 + $0x80] ss:$12 sps:$4 sm:$0xff]  }
 0x578   : > { %v1065_v2 = vadd.f32 %v1064_v0, %v1063_v62  ;;  %v1968_v62 = vld [vmem:[%s2766_s2 + $0x94] ss:$12 sps:$4 sm:$0xff]   ;;  %v1969_v0 = vld [vmem:[%s2766_s2 + $0x90] ss:$12 sps:$4 sm:$0xff]  }
 0x57a   : > { %v2577_v1 = vsel %vm1070_vm13, %v1065_v2, %v2529_v15  ;;  %v1072_v6 = vsel %vm1070_vm13, %v1065_v2, 0.0  ;;  %v1971_v2 = vld [vmem:[%s2766_s2 + $0xac] ss:$12 sps:$4 sm:$0xff]  }
 0x57b   : > { %1073 = vst [vmem:[%s2129_s23 + $0x18] sm:$0xff] %v1072_v6  ;;  %v1080_v7 = vpack.c.bf16 %v2577_v1, %v2577_v1  ;;  %v1973_v6 = vld [vmem:[%s2766_s2 + $0xb0] ss:$12 sps:$4 sm:$0xff]  }
 0x57d   : > { %1114 = vmatmul.mubr.bf16.vlgmr.msra.gmra.mrb[20].mxu0 %v1080_v7  ;;  %1763 = vmatmul.mubr.bf16.vlgmr.msra.gmra.mrb[20].mxu1 %v1080_v7  ;;  %v1194_v7 = vld [vmem:[%s2131_s24 + $0x18] sm:$0xff] }
 0x57e   : > { %1199 = vmatpush1.bf16.msra.mxu0 %v2585_v55  ;;  %1767 = vmatpush3.bf16.msra.mxu1 %v2187_v34  ;;  %v2609_v34 = vld [vmem:[%s2766_s2 + $0x34] ss:$12 sps:$4 sm:$0xff]  }
 0x57f   : > { %1200 = vmatprep.subr.bf16.mxu0 %v2592_v8  ;;  %1768 = vmatprep.subr.bf16.mxu1 %v1999_v27 }
 0x580   : > { %1230 = vmatprep.mubr.bf16.mxu0 %v2000_v28  ;;  %1782 = vmatprep.mubr.msk.bf16.mxu1 %vm2001_vm0, %v1999_v27 }
 0x582   : > { %1201 = vmatpush1.bf16.msra.mxu0 %v2602_v9  ;;  %1769 = vmatpush3.bf16.msra.mxu1 %v2205_v37  ;;  %v2623_v37 = vld [vmem:[%s2766_s2 + $0x4c] ss:$12 sps:$4 sm:$0xff]  }
 0x583   : > { %1202 = vmatprep.subr.bf16.mxu0 %v2609_v34  ;;  %1770 = vmatprep.subr.bf16.mxu1 %v1999_v27 }
 0x586   : > { %1203 = vmatpush1.bf16.msra.mxu0 %v2616_v10  ;;  %1771 = vmatpush3.bf16.msra.mxu1 %v2226_v40  ;;  %v2637_v40 = vld [vmem:[%s2766_s2 + $0x64] ss:$12 sps:$4 sm:$0xff]  }
 0x587   : > { %1204 = vmatprep.subr.bf16.mxu0 %v2623_v37  ;;  %1772 = vmatprep.subr.bf16.mxu1 %v1999_v27 }
 0x58a   : > { %1205 = vmatpush1.bf16.msra.mxu0 %v2630_v11  ;;  %1773 = vmatpush3.bf16.msra.mxu1 %v2251_v46 }
 0x58b   : > { %1206 = vmatprep.subr.bf16.mxu0 %v2637_v40  ;;  %1774 = vmatprep.subr.bf16.mxu1 %v1999_v27 }
 0x58e   : > { %1207 = vmatpush1.bf16.msra.mxu0 %v2213_v38  ;;  %1775 = vmatpush3.bf16.msra.mxu1 %v2275_v52  ;;  %v1958_v38 = vld [vmem:[%s2766_s2 + $0x4] ss:$12 sps:$4 sm:$0xff]  }
 0x58f   : > { %1208 = vmatprep.subr.bf16.mxu0 %v2219_v39  ;;  %1776 = vmatprep.subr.bf16.mxu1 %v1999_v27  ;;  %v1077_v39 = vld [vmem:[%s2131_s24 + $0x30] sm:$0xff] }
 0x592   : > { %1209 = vmatpush1.bf16.msra.mxu0 %v2234_v43  ;;  %1777 = vmatpush3.bf16.msra.mxu1 %v2296_v57 }
 0x593   : > { %1210 = vmatprep.subr.bf16.mxu0 %v2245_v45  ;;  %1778 = vmatprep.subr.bf16.mxu1 %v1999_v27 }
 0x596   : > { %1211 = vmatpush1.bf16.msra.mxu0 %v2262_v49  ;;  %1779 = vmatpush3.bf16.msra.mxu1 %v2308_v60 }
 0x597   : > { %1212 = vmatprep.subr.bf16.mxu0 %v2269_v51  ;;  %1780 = vmatprep.subr.bf16.mxu1 %v1999_v27 }
 0x59a   : > { %1213 = vmatpush1.bf16.msra.mxu0 %v2283_v54  ;;  %1781 = vmatpush3.bf16.msra.mxu1 %v2318_v61  ;;  %v1078_v61 = vld [vmem:[%s2131_s24 + $0x38] sm:$0xff] }
 0x59b   : > { %1314 = vmatprep.subr.bf16.mxu0 %v1958_v38  ;;  %1786 = vmatprep.subr.bf16.mxu1 %v1999_v27  ;;  %v1195_v38 = vld [vmem:[%s2131_s24 + $0x20] sm:$0xff] }
 0x650   : > { %v1115_v43 = vpop.f32.mrb[20].mxu0  ;;  %v1156_v45 = vpop.f32.mrb[20].mxu1 }
 0x651   : > { %v1116_v46 = vadd.f32 %v1115_v43, %v2359_v3  ;;  %v1117_v49 = vpop.f32.mrb[21].mxu0  ;;  %v1764_v51 = vpop.f32.mrb[21].mxu1  ;;  %v1157_v33 = vadd.f32 %v1156_v45, %v2367_v24 }
 0x652   : > { %v1118_v52 = vadd.f32 %v1117_v49, %v2361_v4  ;;  %v1119_v57 = vpop.f32.mrb[22].mxu0  ;;  %v1159_v54 = vpop.f32.mrb[22].mxu1 }
 0x653   : > { %v1162_v60 = vadd.f32 %v1116_v46, %v1077_v39  ;;  %v1120_v12 = vpop.f32.mrb[23].mxu0  ;;  %v1765_v15 = vpop.f32.mrb[23].mxu1 }
 0x654   : > { %v1169_v13 = vadd.f32 %v1118_v52, %v1078_v61  ;;  %v1196_v12 = vld [vmem:[%s2131_s24 + $0x28] sm:$0xff] }
 0x655   : > { %v1566_v5 = vmul.f32 -1.442695, %v1162_v60 }
 0x656   : > { %v1567_v26 = vmul.f32 -1.442695, %v1169_v13 }
 0x657   : > { %1920 = vpow2.f32 %v1566_v5 }
 0x658   : > { %1922 = vpow2.f32 %v1567_v26 }
 0x661   : > { %v1921_v29 = vpop.eup %1920 }
 0x662   : > { %v1166_v30 = vadd.f32 1.0, %v1921_v29  ;;  %v1923_v31 = vpop.eup %1922 }
 0x663   : > { %v1173_v32 = vadd.f32 1.0, %v1923_v31 }
 0x664   : > { %1924 = vrcp.f32 %v1166_v30  ;;  %v1303_v30 = vpop.permute.xlu0 %1302 }
 0x665   : > { %1926 = vrcp.f32 %v1173_v32  ;;  %vm1304_vm15 = vcmp.eq.s32.totalorder %v1303_v30, 1 }
 0x66e   : > { %v1925_v35 = vpop.eup %1924 }
 0x66f   : > { %v1176_v14 = vmul.f32 %v1925_v35, %v1157_v33  ;;  %v1927_v17 = vpop.eup %1926 }
 0x670   : > { %v1179_v18 = vsub.f32 1.0, %v1927_v17  ;;  %v1181_v25 = vmul.f32 %v1927_v17, %v2577_v1 }
 0x671   : > { %v1177_v16 = vadd.f32 %v1176_v14, %v1079_v36 }
 0x673   : > { %1928 = vtanh.f32 %v1177_v16  ;;  %v1310_v16 = vld [vmem:[%s2131_s24] sm:$0xff] }
 0x67d   : > { %v1929_v19 = vpop.eup %1928 }
 0x67e   : > { %v1180_v20 = vmul.f32 %v1929_v19, %v1179_v18 }
 0x680   : > { %v1182_v22 = vadd.f32 %v1181_v25, %v1180_v20 }
 0x682   : > { %v2667_v23 = vsel %vm1187_vm14, %v1182_v22, %v2577_v1  ;;  %v1189_v41 = vsel %vm1187_vm14, %v1182_v22, 0.0  ;;  %v1972_v1 = vld [vmem:[%s2766_s2 + $0xa8] ss:$12 sps:$4 sm:$0xff]  }
 0x683   : > { %1190 = vst [vmem:[%s2129_s23 + $0x10] sm:$0xff] %v1189_v41  ;;  %v1197_v42 = vpack.c.bf16 %v2667_v23, %v2667_v23 }
 0x685   : > { %1231 = vmatmul.mubr.bf16.vlgmr.msra.gmra.mrb[24].mxu0 %v1197_v42  ;;  %1783 = vmatmul.mubr.bf16.vlgmr.msra.gmra.mrb[24].mxu1 %v1197_v42 }
 0x686   : > { %1315 = vmatpush1.bf16.msra.mxu0 %v2585_v55  ;;  %1787 = vmatpush3.bf16.msra.mxu1 %v1959_v47 }
 0x687   : > { %1316 = vmatprep.subr.bf16.mxu0 %v2592_v8  ;;  %1788 = vmatprep.subr.bf16.mxu1 %v1999_v27 }
 0x688   : > { %1346 = vmatprep.mubr.bf16.mxu0 %v2000_v28  ;;  %1802 = vmatprep.mubr.msk.bf16.mxu1 %vm2001_vm0, %v1999_v27  ;;  %v1961_v28 = vld [vmem:[%s2766_s2 + $0x38] ss:$12 sps:$4 sm:$0xff]  }
 0x68a   : > { %1317 = vmatpush1.bf16.msra.mxu0 %v2602_v9  ;;  %1789 = vmatpush3.bf16.msra.mxu1 %v1960_v44 }
 0x68b   : > { %1318 = vmatprep.subr.bf16.mxu0 %v2609_v34  ;;  %1790 = vmatprep.subr.bf16.mxu1 %v1999_v27 }
 0x68e   : > { %1319 = vmatpush1.bf16.msra.mxu0 %v2616_v10  ;;  %1791 = vmatpush3.bf16.msra.mxu1 %v1961_v28 }
 0x68f   : > { %1320 = vmatprep.subr.bf16.mxu0 %v2623_v37  ;;  %1792 = vmatprep.subr.bf16.mxu1 %v1999_v27 }
 0x692   : > { %1321 = vmatpush1.bf16.msra.mxu0 %v2630_v11  ;;  %1793 = vmatpush3.bf16.msra.mxu1 %v1962_v48 }
 0x693   : > { %1322 = vmatprep.subr.bf16.mxu0 %v2637_v40  ;;  %1794 = vmatprep.subr.bf16.mxu1 %v1999_v27 }
 0x696   : > { %1323 = vmatpush1.bf16.msra.mxu0 %v1963_v50  ;;  %1795 = vmatpush3.bf16.msra.mxu1 %v1964_v53 }
 0x697   : > { %1324 = vmatprep.subr.bf16.mxu0 %v1965_v56  ;;  %1796 = vmatprep.subr.bf16.mxu1 %v1999_v27 }
 0x69a   : > { %1325 = vmatpush1.bf16.msra.mxu0 %v1966_v58  ;;  %1797 = vmatpush3.bf16.msra.mxu1 %v1967_v59 }
 0x69b   : > { %1326 = vmatprep.subr.bf16.mxu0 %v1968_v62  ;;  %1798 = vmatprep.subr.bf16.mxu1 %v1999_v27  ;;  %v1312_v62 = vld [vmem:[%s2131_s24 + $0x10] sm:$0xff] }
 0x69e   : > { %1327 = vmatpush1.bf16.msra.mxu0 %v1969_v0  ;;  %1799 = vmatpush3.bf16.msra.mxu1 %v1970_v63 }
 0x69f   : > { %1328 = vmatprep.subr.bf16.mxu0 %v1971_v2  ;;  %1800 = vmatprep.subr.bf16.mxu1 %v1999_v27 }
 0x6a2   : > { %1329 = vmatpush1.bf16.msra.mxu0 %v1972_v1  ;;  %1801 = vmatpush3.bf16.msra.mxu1 %v1973_v6 }
 0x758   : > { %v1232_v55 = vpop.f32.mrb[24].mxu0  ;;  %v1273_v8 = vpop.f32.mrb[24].mxu1 }
 0x759   : > { %v1233_v9 = vadd.f32 %v1232_v55, %v2359_v3  ;;  %v1234_v34 = vpop.f32.mrb[25].mxu0  ;;  %v1784_v10 = vpop.f32.mrb[25].mxu1  ;;  %v1274_v60 = vadd.f32 %v1273_v8, %v2367_v24 }
 0x75a   : > { %v1235_v37 = vadd.f32 %v1234_v34, %v2361_v4  ;;  %v1236_v27 = vpop.f32.mrb[26].mxu0  ;;  %v1276_v11 = vpop.f32.mrb[26].mxu1 }
 0x75b   : > { %v1279_v40 = vadd.f32 %v1233_v9, %v1194_v7  ;;  %v1237_v39 = vpop.f32.mrb[27].mxu0  ;;  %v1785_v43 = vpop.f32.mrb[27].mxu1 }
 0x75c   : > { %v1286_v46 = vadd.f32 %v1235_v37, %v1195_v38  ;;  %v1419_v7 = vpop.permute.xlu1 %1418 }
 0x75d   : > { %v1568_v45 = vmul.f32 -1.442695, %v1279_v40  ;;  %vm1420_vm0 = vcmp.eq.s32.totalorder %v1419_v7, 1 }
 0x75e   : > { %v1569_v49 = vmul.f32 -1.442695, %v1286_v46 }
 0x75f   : > { %1930 = vpow2.f32 %v1568_v45 }
 0x760   : > { %1932 = vpow2.f32 %v1569_v49 }
 0x769   : > { %v1931_v51 = vpop.eup %1930 }
 0x76a   : > { %v1283_v52 = vadd.f32 1.0, %v1931_v51  ;;  %v1933_v57 = vpop.eup %1932 }
 0x76b   : > { %v1290_v54 = vadd.f32 1.0, %v1933_v57 }
 0x76c   : > { %1934 = vrcp.f32 %v1283_v52 }
 0x76d   : > { %1936 = vrcp.f32 %v1290_v54 }
 0x776   : > { %v1935_v61 = vpop.eup %1934 }
 0x777   : > { %v1293_v15 = vmul.f32 %v1935_v61, %v1274_v60  ;;  %v1937_v13 = vpop.eup %1936 }
 0x778   : > { %v1296_v26 = vsub.f32 1.0, %v1937_v13  ;;  %v1298_v32 = vmul.f32 %v1937_v13, %v2667_v23 }
 0x779   : > { %v1294_v5 = vadd.f32 %v1293_v15, %v1196_v12 }
 0x77b   : > { %1938 = vtanh.f32 %v1294_v5 }
 0x785   : > { %v1939_v29 = vpop.eup %1938 }
 0x786   : > { %v1297_v31 = vmul.f32 %v1939_v29, %v1296_v26 }
 0x788   : > { %v1299_v33 = vadd.f32 %v1298_v32, %v1297_v31 }
 0x78a   : > { %v1305_v35 = vsel %vm1304_vm15, %v1299_v33, %v2667_v23  ;;  %v1306_v36 = vsel %vm1304_vm15, %v1299_v33, 0.0  ;;  %v1311_v23 = vld [vmem:[%s2131_s24 + $0x8] sm:$0xff] }
 0x78b   : > { %1307 = vst [vmem:[%s2129_s23 + $0x8] sm:$0xff] %v1306_v36  ;;  %v1313_v14 = vpack.c.bf16 %v1305_v35, %v1305_v35 }
 0x78d   : > { %1347 = vmatmul.mubr.bf16.vlgmr.msra.gmra.mrb[28].mxu0 %v1313_v14  ;;  %1803 = vmatmul.mubr.bf16.vlgmr.msra.gmra.mrb[28].mxu1 %v1313_v14 }
 0x860   : > { %v1348_v17 = vpop.f32.mrb[28].mxu0  ;;  %v1389_v18 = vpop.f32.mrb[28].mxu1 }
 0x861   : > { %v1349_v19 = vadd.f32 %v1348_v17, %v2359_v3  ;;  %v1350_v20 = vpop.f32.mrb[29].mxu0  ;;  %v1804_v25 = vpop.f32.mrb[29].mxu1  ;;  %v1390_v59 = vadd.f32 %v1389_v18, %v2367_v24 }
 0x862   : > { %v1351_v21 = vadd.f32 %v1350_v20, %v2361_v4  ;;  %v1352_v22 = vpop.f32.mrb[30].mxu0  ;;  %v1392_v41 = vpop.f32.mrb[30].mxu1 }
 0x863   : > { %v1395_v42 = vadd.f32 %v1349_v19, %v1310_v16  ;;  %v1353_v47 = vpop.f32.mrb[31].mxu0  ;;  %v1805_v44 = vpop.f32.mrb[31].mxu1 }
 0x864   : > { %v1402_v48 = vadd.f32 %v1351_v21, %v1311_v23 }
 0x865   : > { %v1570_v28 = vmul.f32 -1.442695, %v1395_v42 }
 0x866   : > { %v1571_v50 = vmul.f32 -1.442695, %v1402_v48 }
 0x867   : > { %1940 = vpow2.f32 %v1570_v28 }
 0x868   : > { %1942 = vpow2.f32 %v1571_v50 }
 0x871   : > { %v1941_v53 = vpop.eup %1940 }
 0x872   : > { %v1399_v56 = vadd.f32 1.0, %v1941_v53  ;;  %v1943_v3 = vpop.eup %1942 }
 0x873   : > { %v1406_v58 = vadd.f32 1.0, %v1943_v3 }
 0x874   : > { %1944 = vrcp.f32 %v1399_v56 }
 0x875   : > { %1946 = vrcp.f32 %v1406_v58 }
 0x87e   : > { %v1945_v4 = vpop.eup %1944 }
 0x87f   : > { %v1409_v0 = vmul.f32 %v1945_v4, %v1390_v59  ;;  %v1947_v2 = vpop.eup %1946 }
 0x880   : > { %v1412_v1 = vsub.f32 1.0, %v1947_v2  ;;  %v1414_v8 = vmul.f32 %v1947_v2, %v1305_v35 }
 0x881   : > { %v1410_v63 = vadd.f32 %v1409_v0, %v1312_v62 }
 0x883   : > { %1948 = vtanh.f32 %v1410_v63 }
 0x88d   : > { %v1949_v6 = vpop.eup %1948 }
 0x88e   : > { %v1413_v55 = vmul.f32 %v1949_v6, %v1412_v1 }
 0x890   : > { %v1415_v9 = vadd.f32 %v1414_v8, %v1413_v55 }
 0x892   : > { %v1421_v34 = vsel %vm1420_vm0, %v1415_v9, %v1305_v35  ;;  %v1422_v10 = vsel %vm1420_vm0, %v1415_v9, 0.0 }
 0x893   : > { %1423 = vst [vmem:[%s2129_s23] sm:$0xff] %v1422_v10  ;;  %1424 = vst [vmem:[%s2769_s5] sm:$0xff] %v1421_v34 }
 0x894 PF: > { %p13_p10 = scmp.ge.s32.totalorder %s2049_s22, 4   ;;  %s2770_s18 = smov %s1992_s19 }
 0x895   : > { %s2771_s19 = smov %s2058_s27  ;;  %s2772_s20 = smov %s2049_s22 }
 0x896   :  { %15 = sbr.rel (!%p13_p10) target bundleno = 2 (0x2), region = 106 }

// kernel: _lambda_.5
= control target key start
LH: loop header
LB: loop body
LE: loop exit
PB: predicated region body
PF: predicated region fallthrough
CT: control target
= control target key end

     0   :  { %12 = vsyncpa [#allocation4], 0  ;;  %s2975_s0 = inlined_call_operand.vmem [shape: s32[8,1], index: 0, kind: input, shape index: {}]   ;;  %s2976_s1 = inlined_call_operand.vmem [shape: f32[128,768], index: 1, kind: input, shape index: {}]   ;;  %s2977_s2 = inlined_call_operand.vmem [shape: bf16[128,384], index: 2, kind: input, shape index: {}]   ;;  %s2978_s3 = inlined_call_operand.vmem [shape: f32[1,384], index: 3, kind: input, shape index: {}]   ;;  %s2979_s4 = inlined_call_operand.vmem [shape: f32[128,128], index: 4, kind: input, shape index: {}]   ;;  %s2980_s5 = inlined_call_operand.hbm [shape: f32[128,128], index: 5, kind: output, shape index: {0}]   ;;  %s2981_s6 = inlined_call_operand.vmem [shape: f32[8,128], index: 6, kind: output, shape index: {1}]  }
   0x1   :  { %14 = vsyncpa [#allocation4 + $0x1], 0  ;;  %s2159_s21 = smov 0   ;;  %s2161_s22 = smov 0  }
   0x2   :  { %s2163_s23 = smov 0   ;;  %s2165_s24 = smov 0  }
   0x3 LB: > { %s2180_s25 = sadd.s32 4294967295, %s2115_s24   ;;  %s1577_s26 = sadd.s32 4294967294, %s2115_s24   ;;  %s2115_s24 = sphi %s2165_s24, %s2987_s24   ;;  %s2111_s23 = sphi %s2163_s23, %s2986_s23   ;;  %s2107_s22 = sphi %s2161_s22, %s2985_s22   ;;  %s2103_s21 = sphi %s2159_s21, %s2984_s21  }
   0x4   : > { %s2184_s27 = sadd.s32 1, %s2115_s24   ;;  %s48_s28 = sadd.s32 1, %s2111_s23 }
   0x5   : > { %s45_s29 = ssub.s32 %s2115_s24, %s2184_s27  ;;  %p55_p0 = scmp.ne.s32.totalorder %s2111_s23, %s2107_s22 }
   0x6   : > { %p46_p1 = scmp.eq.s32.totalorder %s45_s29, 0  ;;  %p56_p2 = scmp.eq.s32.totalorder %s2115_s24, 0 }
   0x7   : > { %p153_p3 = scmp.eq.s32.totalorder %s2180_s25, 1  ;;  %p158_p4 = scmp.ne.s32.totalorder %s2107_s22, %s2103_s21 }
   0x8   : > { %s2196_s30 = scalar_select %p46_p1, %s2111_s23, %s48_s28  }
   0x9   : > { %p57_p5 = por %p56_p2, %p55_p0  ;;  %p2198_p6 = por %p153_p3, %p55_p0 }
   0xa   : > { %p159_p7 = scmp.eq.s32.totalorder %s1577_s26, 1  ;;  %p1579_p9 = scmp.ge.s32.totalorder %s2115_s24, 2 }
   0xc   : > { %p2202_p8 = por %p159_p7, %p158_p4  ;;  %205 = sbr.rel (%p1579_p9) target bundleno = 36 (0x24), region = 28 }
  0x13   : > { %208 = sbr.rel (!%p57_p5) target bundleno = 36 (0x24), region = 32  ;;  %s210_s9 = sand.u32 (%p57_p5), 1, %s2111_s23  }
  0x14   : > { %s1868_s10 = smul.u32 (%p57_p5), 384, %s2115_s24 }
  0x15   : > { %s1867_s11 = smul.u32 (%p57_p5), 192, %s210_s9 }
  0x16   : > { %s2214_s14 = scalar_lea.vmem (%p57_p5), %s2976_s1, %s1868_s10 }
  0x17   : > { %v229_v0 = vld [vmem:[%s2214_s14] sm:$0xff] (%p57_p5)  ;;  %v231_v1 = vld [vmem:[%s2214_s14 + $0x8] sm:$0xff] (%p57_p5)  ;;  %v233_v2 = vld [vmem:[%s2214_s14 + $0x10] sm:$0xff] (%p57_p5)  ;;  %s2219_s15 = scalar_lea.vmem (%p57_p5), [#allocation2], %s1867_s11 }
  0x18   : > { %230 = vst [vmem:[%s2219_s15] sm:$0xff] (%p57_p5), %v229_v0  ;;  %232 = vst [vmem:[%s2219_s15 + $0x8] sm:$0xff] (%p57_p5), %v231_v1  ;;  %v235_v3 = vld [vmem:[%s2214_s14 + $0x30] sm:$0xff] (%p57_p5)  ;;  %v237_v4 = vld [vmem:[%s2214_s14 + $0x38] sm:$0xff] (%p57_p5) }
  0x19   : > { %234 = vst [vmem:[%s2219_s15 + $0x10] sm:$0xff] (%p57_p5), %v233_v2  ;;  %v239_v5 = vld [vmem:[%s2214_s14 + $0x40] sm:$0xff] (%p57_p5)  ;;  %236 = vst [vmem:[%s2219_s15 + $0x18] sm:$0xff] (%p57_p5), %v235_v3  ;;  %v243_v7 = vld [vmem:[%s2214_s14 + $0x68] sm:$0xff] (%p57_p5) }
  0x1a   : > { %238 = vst [vmem:[%s2219_s15 + $0x20] sm:$0xff] %v237_v4  ;;  %240 = vst [vmem:[%s2219_s15 + $0x28] sm:$0xff] %v239_v5  ;;  %v241_v6 = vld [vmem:[%s2214_s14 + $0x60] sm:$0xff]  ;;  %v245_v8 = vld [vmem:[%s2214_s14 + $0x70] sm:$0xff] }
  0x1b   : > { %242 = vst [vmem:[%s2219_s15 + $0x30] sm:$0xff] %v241_v6  ;;  %244 = vst [vmem:[%s2219_s15 + $0x38] sm:$0xff] %v243_v7  ;;  %v247_v9 = vld [vmem:[%s2214_s14 + $0x90] sm:$0xff]  ;;  %v249_v10 = vld [vmem:[%s2214_s14 + $0x98] sm:$0xff] }
  0x1c   : > { %246 = vst [vmem:[%s2219_s15 + $0x40] sm:$0xff] %v245_v8  ;;  %v251_v11 = vld [vmem:[%s2214_s14 + $0xa0] sm:$0xff]  ;;  %248 = vst [vmem:[%s2219_s15 + $0x48] sm:$0xff] %v247_v9  ;;  %v255_v13 = vld [vmem:[%s2214_s14 + $0xc8] sm:$0xff] }
  0x1d   : > { %250 = vst [vmem:[%s2219_s15 + $0x50] sm:$0xff] %v249_v10  ;;  %252 = vst [vmem:[%s2219_s15 + $0x58] sm:$0xff] %v251_v11  ;;  %v253_v12 = vld [vmem:[%s2214_s14 + $0xc0] sm:$0xff]  ;;  %v257_v14 = vld [vmem:[%s2214_s14 + $0xd0] sm:$0xff] }
  0x1e   : > { %254 = vst [vmem:[%s2219_s15 + $0x60] sm:$0xff] %v253_v12  ;;  %256 = vst [vmem:[%s2219_s15 + $0x68] sm:$0xff] %v255_v13  ;;  %v259_v15 = vld [vmem:[%s2214_s14 + $0xf0] sm:$0xff]  ;;  %v261_v16 = vld [vmem:[%s2214_s14 + $0xf8] sm:$0xff] }
  0x1f   : > { %258 = vst [vmem:[%s2219_s15 + $0x70] sm:$0xff] %v257_v14  ;;  %v263_v17 = vld [vmem:[%s2214_s14 + $0x100] sm:$0xff]  ;;  %260 = vst [vmem:[%s2219_s15 + $0x78] sm:$0xff] %v259_v15  ;;  %v267_v19 = vld [vmem:[%s2214_s14 + $0x128] sm:$0xff] }
  0x20   : > { %262 = vst [vmem:[%s2219_s15 + $0x80] sm:$0xff] %v261_v16  ;;  %264 = vst [vmem:[%s2219_s15 + $0x88] sm:$0xff] %v263_v17  ;;  %v265_v18 = vld [vmem:[%s2214_s14 + $0x120] sm:$0xff]  ;;  %v269_v20 = vld [vmem:[%s2214_s14 + $0x130] sm:$0xff] }
  0x21   : > { %266 = vst [vmem:[%s2219_s15 + $0x90] sm:$0xff] %v265_v18  ;;  %268 = vst [vmem:[%s2219_s15 + $0x98] sm:$0xff] %v267_v19  ;;  %v271_v21 = vld [vmem:[%s2214_s14 + $0x150] sm:$0xff]  ;;  %v273_v22 = vld [vmem:[%s2214_s14 + $0x158] sm:$0xff] }
  0x22   : > { %270 = vst [vmem:[%s2219_s15 + $0xa0] sm:$0xff] %v269_v20  ;;  %v275_v23 = vld [vmem:[%s2214_s14 + $0x160] sm:$0xff]  ;;  %272 = vst [vmem:[%s2219_s15 + $0xa8] sm:$0xff] %v271_v21 }
  0x23   : > { %274 = vst [vmem:[%s2219_s15 + $0xb0] sm:$0xff] %v273_v22  ;;  %276 = vst [vmem:[%s2219_s15 + $0xb8] sm:$0xff] %v275_v23 }
  0x24 PF: > { %p1583_p10 = scmp.ge.s32.totalorder %s2115_s24, 1  ;;  %p290_p11 = scmp.lt.s32.totalorder %s2115_s24, 3 }
  0x26   : > { %p291_p12 = pnand %p1583_p10, %p290_p11 }
  0x27   : > { %s2269_s16 = sand.u32 (!%p291_p12), 1, %s2107_s22   ;;  %s2272_s17 = sshll.u32 (!%p291_p12), %s2180_s25, 3 }
  0x28   : > { %294 = sbr.rel (%p291_p12) target bundleno = 2216 (0x8a8), region = 59  ;;  %s1584_s19 = sshll.u32 (!%p291_p12), %s2269_s16, 6 }
  0x29   : > { %s1869_s18 = smul.u32 (!%p291_p12), 192, %s2269_s16  ;;  %p333_p13 = scmp.lt.s32.totalorder (!%p291_p12), %s2272_s17, 15 }
  0x2a   : > { %s2285_s11 = scalar_lea.vmem (!%p291_p12), [#allocation3], %s1584_s19  ;;  %p1587_p0 = scmp.ne.s32.totalorder (!%p291_p12), %s2180_s25, 0 }
  0x2b   : > { %s2283_s10 = scalar_lea.vmem (!%p291_p12), [#allocation2], %s1869_s18 }
  0x2f   : > { %s334_s20 = scalar_select %p333_p13, %s2272_s17, 15 }
  0x30   : > { %343 = sbr.rel (%p1587_p0) target bundleno = 55 (0x37), region = 67  ;;  %v2117_v24 = vmov (!%p1587_p0), 0.0  }
  0x31   : > { %s1586_s26 = sshll.u32 %s334_s20, 3  ;;  %344 = vst [vmem:[%s2981_s6] sm:$0xff] (!%p1587_p0), %v2117_v24 }
  0x32   : > { %s2281_s9 = scalar_lea.vmem %s2979_s4, %s1586_s26 }
  0x37 PF: > { %v2294_v25 = vld [vmem:[%s2977_s2 + $0x4] ss:$12 sps:$4 sm:$0xff]   ;;  %v2299_v26 = vld [vmem:[%s2977_s2] ss:$12 sps:$4 sm:$0xff]   ;;  %v2118_v27 = vmov 0.0   ;;  %v2119_v28 = vmov 0   ;;  %v381_v41 = vstv %s2272_s17  ;;  %v388_v62 = vlaneseq }
  0x38   : > { %1707 = vmatprep.subr.bf16.mxu1 %v2118_v27  ;;  %563 = vmatprep.mubr.bf16.mxu0 %v2119_v28  ;;  %v2307_v29 = vld [vmem:[%s2977_s2 + $0x1c] ss:$12 sps:$4 sm:$0xff]   ;;  %vm2120_vm0 = vmmov 0   ;;  %v2315_v30 = vld [vmem:[%s2977_s2 + $0x18] ss:$12 sps:$4 sm:$0xff]   ;;  %s643_s20 = sadd.s32 1, %s2272_s17 }
  0x39   : > { %531 = vmatprep.subr.bf16.mxu0 %v2294_v25  ;;  %1723 = vmatprep.mubr.msk.bf16.mxu1 %vm2120_vm0, %v2118_v27  ;;  %v2322_v31 = vld [vmem:[%s2977_s2 + $0x34] ss:$12 sps:$4 sm:$0xff]   ;;  %v2329_v32 = vld [vmem:[%s2977_s2 + $0x30] ss:$12 sps:$4 sm:$0xff]   ;;  %v2335_v33 = vld [vmem:[%s2977_s2 + $0x4c] ss:$12 sps:$4 sm:$0xff]   ;;  %v644_v42 = vstv %s643_s20 }
  0x3a   : > { %532 = vmatpush1.bf16.msra.mxu0 %v2299_v26  ;;  %1915 = vset.pattern.permute.xlu0 %v2119_v28  ;;  %v2340_v34 = vld [vmem:[%s2977_s2 + $0x8] ss:$12 sps:$4 sm:$0xff]   ;;  %v2352_v36 = vld [vmem:[%s2977_s2 + $0x64] ss:$12 sps:$4 sm:$0xff]   ;;  %v2358_v37 = vld [vmem:[%s2977_s2 + $0x20] ss:$12 sps:$4 sm:$0xff]  }
  0x3b   : > { %533 = vmatprep.subr.bf16.mxu0 %v2307_v29  ;;  %1916 = vset.pattern.permute.xlu1 %v2119_v28  ;;  %v2346_v35 = vld [vmem:[%s2977_s2 + $0x48] ss:$12 sps:$4 sm:$0xff]   ;;  %v2365_v38 = vld [vmem:[%s2977_s2 + $0x60] ss:$12 sps:$4 sm:$0xff]   ;;  %v2378_v40 = vld [vmem:[%s2977_s2 + $0x38] ss:$12 sps:$4 sm:$0xff]  }
  0x3c   : > { %1708 = vmatpush3.bf16.msra.mxu1 %v2340_v34  ;;  %v2371_v39 = vld [vmem:[%s2977_s2 + $0x7c] ss:$12 sps:$4 sm:$0xff]   ;;  %s1000_s13 = sadd.s32 4, %s2272_s17  ;;  %v2387_v43 = vld [vmem:[%s2977_s2 + $0x78] ss:$12 sps:$4 sm:$0xff]   ;;  %s1238_s12 = sadd.s32 6, %s2272_s17 }
  0x3d   : > { %1709 = vmatprep.subr.bf16.mxu1 %v2118_v27  ;;  %v2392_v44 = vld [vmem:[%s2975_s0] sm:$0xff]  ;;  %v2404_v46 = vld [vmem:[%s2977_s2 + $0x50] ss:$12 sps:$4 sm:$0xff]   ;;  %v1001_v48 = vstv %s1000_s13  ;;  %v2422_v51 = vld [vmem:[%s2977_s2 + $0xac] ss:$12 sps:$4 sm:$0xff]   ;;  %v389_v63 = vshrl.u32 %v388_v62, 7 }
  0x3e   : > { %534 = vmatpush1.bf16.msra.mxu0 %v2315_v30  ;;  %v2398_v45 = vld [vmem:[%s2977_s2 + $0x94] ss:$12 sps:$4 sm:$0xff]   ;;  %vm382_vm1 = vcmp.gt.s32.totalorder %v2392_v44, %v381_v41  ;;  %vm645_vm2 = vcmp.gt.s32.totalorder %v2392_v44, %v644_v42  ;;  %v2415_v49 = vld [vmem:[%s2977_s2 + $0x90] ss:$12 sps:$4 sm:$0xff]   ;;  %vm1002_vm3 = vcmp.gt.s32.totalorder %v2392_v44, %v1001_v48  ;;  %v1239_v53 = vstv %s1238_s12  ;;  %v2461_v60 = vld [vmem:[%s2977_s2 + $0x98] ss:$12 sps:$4 sm:$0xff]  }
  0x3f   : > { %535 = vmatprep.subr.bf16.mxu0 %v2322_v31  ;;  %v633_v47 = vsel %vm382_vm1, 1, %v2119_v28  ;;  %v752_v50 = vsel %vm645_vm2, 1, %v2119_v28  ;;  %v2428_v52 = vld [vmem:[%s2977_s2 + $0x68] ss:$12 sps:$4 sm:$0xff]   ;;  %v2441_v55 = vld [vmem:[%s2981_s6] sm:$0xff]  ;;  %v1109_v56 = vsel %vm1002_vm3, 1, %v2119_v28  ;;  %vm1240_vm4 = vcmp.gt.s32.totalorder %v2392_v44, %v1239_v53 }
  0x40   : > { %1710 = vmatpush3.bf16.msra.mxu1 %v2358_v37  ;;  %635 = vperm.xlu0 %1915, %v633_v47   ;;  %v2436_v54 = vld [vmem:[%s2977_s2 + $0xa8] ss:$12 sps:$4 sm:$0xff]   ;;  %v2449_v57 = vld [vmem:[%s2977_s2 + $0x80] ss:$12 sps:$4 sm:$0xff]   ;;  %v386_v58 = vpack.c.bf16 %v2441_v55, %v2441_v55  ;;  %v1347_v59 = vsel %vm1240_vm4, 1, %v2119_v28  ;;  %v390_v0 = vsub.s32 0, %v389_v63 }
  0x41   : > { %1711 = vmatprep.subr.bf16.mxu1 %v2118_v27  ;;  %v2471_v61 = vld [vmem:[%s2977_s2 + $0xb0] ss:$12 sps:$4 sm:$0xff]   ;;  %v378_v1 = vld [vmem:[%s2978_s3] sm:$0x7]  ;;  %v394_v2 = vsub.s32 1, %v389_v63  ;;  %v384_v12 = vld [vmem:[%s2283_s10 + $0x8] sm:$0xff] }
  0x42   : > { %536 = vmatpush1.bf16.msra.mxu0 %v2329_v32  ;;  %v2512_v3 = vrot.slane %v378_v1, %v390_v0  ;;  %v383_v5 = vld [vmem:[%s2283_s10] sm:$0xff]  ;;  %v398_v23 = vsub.s32 2, %v389_v63  ;;  %s762_s29 = sadd.s32 2, %s2272_s17  ;;  %s881_s14 = sadd.s32 3, %s2272_s17 }
  0x43   : > { %537 = vmatprep.subr.bf16.mxu0 %v2335_v33  ;;  %v2514_v4 = vrot.slane %v378_v1, %v394_v2  ;;  %s1119_s12 = sadd.s32 5, %s2272_s17  ;;  %s1357_s15 = sadd.s32 7, %s2272_s17 }
  0x44   : > { %1712 = vmatpush3.bf16.msra.mxu1 %v2378_v40  ;;  %754 = vperm.xlu0 %1915, %v752_v50   ;;  %v2520_v24 = vrot.slane %v378_v1, %v398_v23  ;;  %v385_v50 = vld [vmem:[%s2283_s10 + $0x10] sm:$0xff]  ;;  %s1634_s19 = sshll.u32 %s2180_s25, 10  ;;  %s1491_s28 = sshll.u32 %s2285_s11, 4  ;;  %s2927_s28 = int_to_ptr.vmem [resolvable:$true] %s1491_s28 }
  0x45   : > { %1713 = vmatprep.subr.bf16.mxu1 %v2118_v27  ;;  %s1478_s25 = scalar_lea.sflag [#allocation4], %s2269_s16 }
  0x46   : > { %538 = vmatpush1.bf16.msra.mxu0 %v2346_v35 }
  0x47   : > { %539 = vmatprep.subr.bf16.mxu0 %v2352_v36 }
  0x48   : > { %1714 = vmatpush3.bf16.msra.mxu1 %v2404_v46  ;;  %1111 = vperm.xlu0 %1915, %v1109_v56  }
  0x49   : > { %1715 = vmatprep.subr.bf16.mxu1 %v2118_v27 }
  0x4a   : > { %540 = vmatpush1.bf16.msra.mxu0 %v2365_v38 }
  0x4b   : > { %541 = vmatprep.subr.bf16.mxu0 %v2371_v39 }
  0x4c   : > { %1716 = vmatpush3.bf16.msra.mxu1 %v2428_v52  ;;  %1349 = vperm.xlu0 %1915, %v1347_v59  }
  0x4d   : > { %1717 = vmatprep.subr.bf16.mxu1 %v2118_v27 }
  0x4e   : > { %542 = vmatpush1.bf16.msra.mxu0 %v2387_v43 }
  0x4f   : > { %543 = vmatprep.subr.bf16.mxu0 %v2398_v45 }
  0x50   : > { %1718 = vmatpush3.bf16.msra.mxu1 %v2449_v57 }
  0x51   : > { %1719 = vmatprep.subr.bf16.mxu1 %v2118_v27 }
  0x52   : > { %544 = vmatpush1.bf16.msra.mxu0 %v2415_v49 }
  0x53   : > { %545 = vmatprep.subr.bf16.mxu0 %v2422_v51 }
  0x54   : > { %1720 = vmatpush3.bf16.msra.mxu1 %v2461_v60 }
  0x55   : > { %1721 = vmatprep.subr.bf16.mxu1 %v2118_v27 }
  0x56   : > { %546 = vmatpush1.bf16.msra.mxu0 %v2436_v54 }
  0x57   : > { %650 = vmatprep.subr.bf16.mxu0 %v2294_v25 }
  0x58   : > { %1722 = vmatpush3.bf16.msra.mxu1 %v2471_v61 }
  0x59   : > { %564 = vmatmul.mubr.bf16.vlgmr.msra.gmra.mrb[0].mxu0 %v386_v58  ;;  %1727 = vmatprep.subr.bf16.mxu1 %v2118_v27 }
  0x5a   : > { %651 = vmatpush1.bf16.msra.mxu0 %v2299_v26  ;;  %682 = vmatprep.mubr.bf16.mxu0 %v2119_v28 }
  0x5b   : > { %652 = vmatprep.subr.bf16.mxu0 %v2307_v29  ;;  %1724 = vmatmul.mubr.bf16.vlgmr.msra.gmra.mrb[0].mxu1 %v386_v58 }
  0x5c   : > { %1728 = vmatpush3.bf16.msra.mxu1 %v2340_v34  ;;  %1743 = vmatprep.mubr.msk.bf16.mxu1 %vm2120_vm0, %v2118_v27 }
  0x5d   : > { %1729 = vmatprep.subr.bf16.mxu1 %v2118_v27 }
  0x5e   : > { %653 = vmatpush1.bf16.msra.mxu0 %v2315_v30 }
  0x5f   : > { %654 = vmatprep.subr.bf16.mxu0 %v2322_v31 }
  0x60   : > { %1730 = vmatpush3.bf16.msra.mxu1 %v2358_v37 }
  0x61   : > { %1731 = vmatprep.subr.bf16.mxu1 %v2118_v27 }
  0x62   : > { %655 = vmatpush1.bf16.msra.mxu0 %v2329_v32 }
  0x63   : > { %656 = vmatprep.subr.bf16.mxu0 %v2335_v33 }
  0x64   : > { %1732 = vmatpush3.bf16.msra.mxu1 %v2378_v40 }
  0x65   : > { %1733 = vmatprep.subr.bf16.mxu1 %v2118_v27 }
  0x66   : > { %657 = vmatpush1.bf16.msra.mxu0 %v2346_v35 }
  0x67   : > { %658 = vmatprep.subr.bf16.mxu0 %v2352_v36 }
  0x68   : > { %1734 = vmatpush3.bf16.msra.mxu1 %v2404_v46 }
  0x69   : > { %1735 = vmatprep.subr.bf16.mxu1 %v2118_v27 }
  0x6a   : > { %659 = vmatpush1.bf16.msra.mxu0 %v2365_v38 }
  0x6b   : > { %660 = vmatprep.subr.bf16.mxu0 %v2371_v39 }
  0x6c   : > { %1736 = vmatpush3.bf16.msra.mxu1 %v2428_v52 }
  0x6d   : > { %1737 = vmatprep.subr.bf16.mxu1 %v2118_v27 }
  0x6e   : > { %661 = vmatpush1.bf16.msra.mxu0 %v2387_v43 }
  0x6f   : > { %662 = vmatprep.subr.bf16.mxu0 %v2398_v45 }
  0x70   : > { %1738 = vmatpush3.bf16.msra.mxu1 %v2449_v57 }
  0x71   : > { %1739 = vmatprep.subr.bf16.mxu1 %v2118_v27 }
  0x72   : > { %663 = vmatpush1.bf16.msra.mxu0 %v2415_v49 }
  0x73   : > { %664 = vmatprep.subr.bf16.mxu0 %v2422_v51 }
  0x74   : > { %1740 = vmatpush3.bf16.msra.mxu1 %v2461_v60 }
  0x75   : > { %1741 = vmatprep.subr.bf16.mxu1 %v2118_v27 }
  0x76   : > { %665 = vmatpush1.bf16.msra.mxu0 %v2436_v54 }
  0x77   : > { %769 = vmatprep.subr.bf16.mxu0 %v2294_v25 }
  0x78   : > { %1742 = vmatpush3.bf16.msra.mxu1 %v2471_v61 }
  0x79   : > { %1747 = vmatprep.subr.bf16.mxu1 %v2118_v27 }
  0xbf   : > { %v636_v1 = vpop.permute.xlu0 %635 }
  0xc0   : > { %vm637_vm5 = vcmp.eq.s32.totalorder %v636_v1, 1 }
 0x12c   : > { %v565_v6 = vpop.f32.mrb[0].mxu0 }
 0x12d   : > { %v566_v7 = vadd.f32 %v565_v6, %v2512_v3  ;;  %v567_v8 = vpop.f32.mrb[1].mxu0 }
 0x12e   : > { %v568_v9 = vadd.f32 %v567_v8, %v2514_v4  ;;  %v569_v10 = vpop.f32.mrb[2].mxu0  ;;  %v606_v16 = vpop.f32.mrb[0].mxu1 }
 0x12f   : > { %v612_v11 = vadd.f32 %v566_v7, %v383_v5  ;;  %v570_v13 = vpop.f32.mrb[3].mxu0  ;;  %v1725_v18 = vpop.f32.mrb[1].mxu1  ;;  %v607_v47 = vadd.f32 %v606_v16, %v2520_v24  ;;  %v640_v5 = vld [vmem:[%s2281_s9] sm:$0xff]  ;;  %v882_v10 = vstv %s881_s14 }
 0x130   : > { %v619_v15 = vadd.f32 %v568_v9, %v384_v12  ;;  %v609_v19 = vpop.f32.mrb[2].mxu1  ;;  %vm883_vm7 = vcmp.gt.s32.totalorder %v2392_v44, %v882_v10  ;;  %v1120_v12 = vstv %s1119_s12 }
 0x131   : > { %v1613_v14 = vmul.f32 -1.442695, %v612_v11  ;;  %v1726_v20 = vpop.f32.mrb[3].mxu1  ;;  %v990_v13 = vsel %vm883_vm7, 1, %v2119_v28  ;;  %vm1121_vm8 = vcmp.gt.s32.totalorder %v2392_v44, %v1120_v12 }
 0x132   : > { %v1614_v17 = vmul.f32 -1.442695, %v619_v15  ;;  %v1228_v15 = vsel %vm1121_vm8, 1, %v2119_v28 }
 0x133   : > { %1949 = vpow2.f32 %v1613_v14  ;;  %v1358_v14 = vstv %s1357_s15  ;;  %s2121_s15 = smov [#allocation3]  }
 0x134   : > { %1951 = vpow2.f32 %v1614_v17  ;;  %vm1359_vm9 = vcmp.gt.s32.totalorder %v2392_v44, %v1358_v14  ;;  %v646_v17 = vld [vmem:[%s2283_s10 + $0x18] sm:$0xff]  ;;  %s2057_s17 = sshll.u32 %s2121_s15, 4  ;;  %s2058_s17 = int_to_ptr.vmem [resolvable:$false] %s2057_s17 }
 0x135   : > { %v1466_v16 = vsel %vm1359_vm9, 1, %v2119_v28  ;;  %s2059_s26 = scalar_lea.vmem %s2058_s17, 2048  ;;  %p2060_p4 = scmp.lt.s32.totalorder %s2927_s28, %s2058_s17 }
 0x13d   : > { %v1950_v21 = vpop.eup %1949 }
 0x13e   : > { %v616_v22 = vadd.f32 1.0, %v1950_v21  ;;  %v1952_v41 = vpop.eup %1951 }
 0x13f   : > { %v623_v42 = vadd.f32 1.0, %v1952_v41 }
 0x140   : > { %1953 = vrcp.f32 %v616_v22 }
 0x141   : > { %1955 = vrcp.f32 %v623_v42 }
 0x14a   : > { %v1954_v48 = vpop.eup %1953 }
 0x14b   : > { %v626_v53 = vmul.f32 %v1954_v48, %v607_v47  ;;  %v1956_v58 = vpop.eup %1955  ;;  %v647_v48 = vld [vmem:[%s2283_s10 + $0x20] sm:$0xff] }
 0x14c   : > { %v629_v59 = vsub.f32 1.0, %v1956_v58  ;;  %v631_v63 = vmul.f32 %v1956_v58, %v2441_v55 }
 0x14d   : > { %v627_v56 = vadd.f32 %v626_v53, %v385_v50 }
 0x14f   : > { %1957 = vtanh.f32 %v627_v56 }
 0x159   : > { %v1958_v62 = vpop.eup %1957 }
 0x15a   : > { %v630_v0 = vmul.f32 %v1958_v62, %v629_v59 }
 0x15c   : > { %v632_v2 = vadd.f32 %v631_v63, %v630_v0 }
 0x15e   : > { %v2527_v6 = vsel %vm637_vm5, %v632_v2, %v2441_v55  ;;  %v639_v7 = vsel %vm637_vm5, %v632_v2, 0.0  ;;  %v763_v55 = vstv %s762_s29  ;;  %s2925_s29 = scalar_lea.hbm %s2980_s5, %s1634_s19 }
 0x15f   : > { %v641_v8 = vadd.f32 %v640_v5, %v639_v7  ;;  %v649_v9 = vpack.c.bf16 %v2527_v6, %v2527_v6  ;;  %vm764_vm6 = vcmp.gt.s32.totalorder %v2392_v44, %v763_v55  ;;  %v648_v5 = vld [vmem:[%s2283_s10 + $0x28] sm:$0xff] }
 0x160   : > { %v871_v11 = vsel %vm764_vm6, 1, %v2119_v28 }
 0x161   : > { %642 = vst [vmem:[%s2285_s11] sm:$0xff] %v641_v8  ;;  %683 = vmatmul.mubr.bf16.vlgmr.msra.gmra.mrb[4].mxu0 %v649_v9  ;;  %1744 = vmatmul.mubr.bf16.vlgmr.msra.gmra.mrb[4].mxu1 %v649_v9 }
 0x162   : > { %770 = vmatpush1.bf16.msra.mxu0 %v2299_v26  ;;  %1748 = vmatpush3.bf16.msra.mxu1 %v2340_v34 }
 0x163   : > { %771 = vmatprep.subr.bf16.mxu0 %v2307_v29  ;;  %1749 = vmatprep.subr.bf16.mxu1 %v2118_v27 }
 0x164   : > { %801 = vmatprep.mubr.bf16.mxu0 %v2119_v28  ;;  %1763 = vmatprep.mubr.msk.bf16.mxu1 %vm2120_vm0, %v2118_v27 }
 0x165   : > { %873 = vperm.xlu1 %1916, %v871_v11  }
 0x166   : > { %772 = vmatpush1.bf16.msra.mxu0 %v2315_v30  ;;  %1750 = vmatpush3.bf16.msra.mxu1 %v2358_v37 }
 0x167   : > { %773 = vmatprep.subr.bf16.mxu0 %v2322_v31  ;;  %1751 = vmatprep.subr.bf16.mxu1 %v2118_v27 }
 0x169   : > { %992 = vperm.xlu1 %1916, %v990_v13   ;;  %v755_v13 = vpop.permute.xlu0 %754 }
 0x16a   : > { %774 = vmatpush1.bf16.msra.mxu0 %v2329_v32  ;;  %1752 = vmatpush3.bf16.msra.mxu1 %v2378_v40  ;;  %vm756_vm10 = vcmp.eq.s32.totalorder %v755_v13, 1 }
 0x16b   : > { %775 = vmatprep.subr.bf16.mxu0 %v2335_v33  ;;  %1753 = vmatprep.subr.bf16.mxu1 %v2118_v27 }
 0x16d   : > { %1230 = vperm.xlu1 %1916, %v1228_v15   ;;  %v759_v15 = vld [vmem:[%s2281_s9 + $0x8] sm:$0xff] }
 0x16e   : > { %776 = vmatpush1.bf16.msra.mxu0 %v2346_v35  ;;  %1754 = vmatpush3.bf16.msra.mxu1 %v2404_v46 }
 0x16f   : > { %777 = vmatprep.subr.bf16.mxu0 %v2352_v36  ;;  %1755 = vmatprep.subr.bf16.mxu1 %v2118_v27 }
 0x171   : > { %1468 = vperm.xlu1 %1916, %v1466_v16  }
 0x172   : > { %778 = vmatpush1.bf16.msra.mxu0 %v2365_v38  ;;  %1756 = vmatpush3.bf16.msra.mxu1 %v2428_v52 }
 0x173   : > { %779 = vmatprep.subr.bf16.mxu0 %v2371_v39  ;;  %1757 = vmatprep.subr.bf16.mxu1 %v2118_v27 }
 0x176   : > { %780 = vmatpush1.bf16.msra.mxu0 %v2387_v43  ;;  %1758 = vmatpush3.bf16.msra.mxu1 %v2449_v57 }
 0x177   : > { %781 = vmatprep.subr.bf16.mxu0 %v2398_v45  ;;  %1759 = vmatprep.subr.bf16.mxu1 %v2118_v27 }
 0x17a   : > { %782 = vmatpush1.bf16.msra.mxu0 %v2415_v49  ;;  %1760 = vmatpush3.bf16.msra.mxu1 %v2461_v60 }
 0x17b   : > { %783 = vmatprep.subr.bf16.mxu0 %v2422_v51  ;;  %1761 = vmatprep.subr.bf16.mxu1 %v2118_v27 }
 0x17e   : > { %784 = vmatpush1.bf16.msra.mxu0 %v2436_v54  ;;  %1762 = vmatpush3.bf16.msra.mxu1 %v2471_v61 }
 0x17f   : > { %888 = vmatprep.subr.bf16.mxu0 %v2294_v25  ;;  %1767 = vmatprep.subr.bf16.mxu1 %v2118_v27 }
 0x1e4   : > { %v874_v13 = vpop.permute.xlu1 %873 }
 0x1e5   : > { %vm875_vm11 = vcmp.eq.s32.totalorder %v874_v13, 1 }
 0x234   : > { %v684_v18 = vpop.f32.mrb[4].mxu0  ;;  %v725_v19 = vpop.f32.mrb[4].mxu1 }
 0x235   : > { %v685_v20 = vadd.f32 %v684_v18, %v2512_v3  ;;  %v686_v21 = vpop.f32.mrb[5].mxu0  ;;  %v1745_v22 = vpop.f32.mrb[5].mxu1  ;;  %v726_v1 = vadd.f32 %v725_v19, %v2520_v24 }
 0x236   : > { %v687_v23 = vadd.f32 %v686_v21, %v2514_v4  ;;  %v688_v41 = vpop.f32.mrb[6].mxu0  ;;  %v728_v42 = vpop.f32.mrb[6].mxu1 }
 0x237   : > { %v731_v47 = vadd.f32 %v685_v20, %v646_v17  ;;  %v689_v50 = vpop.f32.mrb[7].mxu0  ;;  %v1746_v44 = vpop.f32.mrb[7].mxu1 }
 0x238   : > { %v738_v56 = vadd.f32 %v687_v23, %v647_v48  ;;  %v766_v44 = vld [vmem:[%s2283_s10 + $0x38] sm:$0xff] }
 0x239   : > { %v1615_v53 = vmul.f32 -1.442695, %v731_v47 }
 0x23a   : > { %v1616_v58 = vmul.f32 -1.442695, %v738_v56 }
 0x23b   : > { %1959 = vpow2.f32 %v1615_v53 }
 0x23c   : > { %1961 = vpow2.f32 %v1616_v58 }
 0x245   : > { %v1960_v59 = vpop.eup %1959 }
 0x246   : > { %v735_v62 = vadd.f32 1.0, %v1960_v59  ;;  %v1962_v0 = vpop.eup %1961 }
 0x247   : > { %v742_v63 = vadd.f32 1.0, %v1962_v0 }
 0x248   : > { %1963 = vrcp.f32 %v735_v62 }
 0x249   : > { %1965 = vrcp.f32 %v742_v63 }
 0x252   : > { %v1964_v2 = vpop.eup %1963 }
 0x253   : > { %v745_v7 = vmul.f32 %v1964_v2, %v726_v1  ;;  %v1966_v9 = vpop.eup %1965 }
 0x254   : > { %v748_v55 = vsub.f32 1.0, %v1966_v9  ;;  %v750_v12 = vmul.f32 %v1966_v9, %v2527_v6 }
 0x255   : > { %v746_v8 = vadd.f32 %v745_v7, %v648_v5 }
 0x257   : > { %1967 = vtanh.f32 %v746_v8  ;;  %v767_v8 = vld [vmem:[%s2283_s10 + $0x40] sm:$0xff] }
 0x261   : > { %v1968_v10 = vpop.eup %1967 }
 0x262   : > { %v749_v11 = vmul.f32 %v1968_v10, %v748_v55 }
 0x264   : > { %v751_v14 = vadd.f32 %v750_v12, %v749_v11 }
 0x266   : > { %v2588_v16 = vsel %vm756_vm10, %v751_v14, %v2527_v6  ;;  %v758_v17 = vsel %vm756_vm10, %v751_v14, 0.0  ;;  %v765_v6 = vld [vmem:[%s2283_s10 + $0x30] sm:$0xff] }
 0x267   : > { %v760_v18 = vadd.f32 %v759_v15, %v758_v17  ;;  %v768_v19 = vpack.c.bf16 %v2588_v16, %v2588_v16  ;;  %v878_v17 = vld [vmem:[%s2281_s9 + $0x10] sm:$0xff] }
 0x269   : > { %761 = vst [vmem:[%s2285_s11 + $0x8] sm:$0xff] %v760_v18  ;;  %802 = vmatmul.mubr.bf16.vlgmr.msra.gmra.mrb[8].mxu0 %v768_v19  ;;  %1764 = vmatmul.mubr.bf16.vlgmr.msra.gmra.mrb[8].mxu1 %v768_v19 }
 0x26a   : > { %889 = vmatpush1.bf16.msra.mxu0 %v2299_v26  ;;  %1768 = vmatpush3.bf16.msra.mxu1 %v2340_v34 }
 0x26b   : > { %890 = vmatprep.subr.bf16.mxu0 %v2307_v29  ;;  %1769 = vmatprep.subr.bf16.mxu1 %v2118_v27 }
 0x26c   : > { %920 = vmatprep.mubr.bf16.mxu0 %v2119_v28  ;;  %1783 = vmatprep.mubr.msk.bf16.mxu1 %vm2120_vm0, %v2118_v27 }
 0x26e   : > { %891 = vmatpush1.bf16.msra.mxu0 %v2315_v30  ;;  %1770 = vmatpush3.bf16.msra.mxu1 %v2358_v37 }
 0x26f   : > { %892 = vmatprep.subr.bf16.mxu0 %v2322_v31  ;;  %1771 = vmatprep.subr.bf16.mxu1 %v2118_v27 }
 0x272   : > { %893 = vmatpush1.bf16.msra.mxu0 %v2329_v32  ;;  %1772 = vmatpush3.bf16.msra.mxu1 %v2378_v40 }
 0x273   : > { %894 = vmatprep.subr.bf16.mxu0 %v2335_v33  ;;  %1773 = vmatprep.subr.bf16.mxu1 %v2118_v27 }
 0x276   : > { %895 = vmatpush1.bf16.msra.mxu0 %v2346_v35  ;;  %1774 = vmatpush3.bf16.msra.mxu1 %v2404_v46 }
 0x277   : > { %896 = vmatprep.subr.bf16.mxu0 %v2352_v36  ;;  %1775 = vmatprep.subr.bf16.mxu1 %v2118_v27 }
 0x27a   : > { %897 = vmatpush1.bf16.msra.mxu0 %v2365_v38  ;;  %1776 = vmatpush3.bf16.msra.mxu1 %v2428_v52 }
 0x27b   : > { %898 = vmatprep.subr.bf16.mxu0 %v2371_v39  ;;  %1777 = vmatprep.subr.bf16.mxu1 %v2118_v27 }
 0x27e   : > { %899 = vmatpush1.bf16.msra.mxu0 %v2387_v43  ;;  %1778 = vmatpush3.bf16.msra.mxu1 %v2449_v57 }
 0x27f   : > { %900 = vmatprep.subr.bf16.mxu0 %v2398_v45  ;;  %1779 = vmatprep.subr.bf16.mxu1 %v2118_v27 }
 0x282   : > { %901 = vmatpush1.bf16.msra.mxu0 %v2415_v49  ;;  %1780 = vmatpush3.bf16.msra.mxu1 %v2461_v60 }
 0x283   : > { %902 = vmatprep.subr.bf16.mxu0 %v2422_v51  ;;  %1781 = vmatprep.subr.bf16.mxu1 %v2118_v27 }
 0x286   : > { %903 = vmatpush1.bf16.msra.mxu0 %v2436_v54  ;;  %1782 = vmatpush3.bf16.msra.mxu1 %v2471_v61 }
 0x287   : > { %1007 = vmatprep.subr.bf16.mxu0 %v2294_v25  ;;  %1787 = vmatprep.subr.bf16.mxu1 %v2118_v27 }
 0x33c   : > { %v803_v20 = vpop.f32.mrb[8].mxu0  ;;  %v844_v21 = vpop.f32.mrb[8].mxu1 }
 0x33d   : > { %v804_v22 = vadd.f32 %v803_v20, %v2512_v3  ;;  %v805_v23 = vpop.f32.mrb[9].mxu0  ;;  %v1765_v41 = vpop.f32.mrb[9].mxu1  ;;  %v845_v5 = vadd.f32 %v844_v21, %v2520_v24 }
 0x33e   : > { %v806_v42 = vadd.f32 %v805_v23, %v2514_v4  ;;  %v807_v47 = vpop.f32.mrb[10].mxu0  ;;  %v847_v48 = vpop.f32.mrb[10].mxu1 }
 0x33f   : > { %v850_v50 = vadd.f32 %v804_v22, %v765_v6  ;;  %v808_v53 = vpop.f32.mrb[11].mxu0  ;;  %v1766_v56 = vpop.f32.mrb[11].mxu1 }
 0x340   : > { %v857_v59 = vadd.f32 %v806_v42, %v766_v44  ;;  %v885_v56 = vld [vmem:[%s2283_s10 + $0x50] sm:$0xff] }
 0x341   : > { %v1617_v58 = vmul.f32 -1.442695, %v850_v50 }
 0x342   : > { %v1618_v62 = vmul.f32 -1.442695, %v857_v59 }
 0x343   : > { %1969 = vpow2.f32 %v1617_v58 }
 0x344   : > { %1971 = vpow2.f32 %v1618_v62 }
 0x34d   : > { %v1970_v0 = vpop.eup %1969 }
 0x34e   : > { %v854_v63 = vadd.f32 1.0, %v1970_v0  ;;  %v1972_v1 = vpop.eup %1971 }
 0x34f   : > { %v861_v2 = vadd.f32 1.0, %v1972_v1 }
 0x350   : > { %1973 = vrcp.f32 %v854_v63 }
 0x351   : > { %1975 = vrcp.f32 %v861_v2 }
 0x35a   : > { %v1974_v7 = vpop.eup %1973 }
 0x35b   : > { %v864_v9 = vmul.f32 %v1974_v7, %v845_v5  ;;  %v1976_v10 = vpop.eup %1975 }
 0x35c   : > { %v867_v11 = vsub.f32 1.0, %v1976_v10  ;;  %v869_v15 = vmul.f32 %v1976_v10, %v2588_v16 }
 0x35d   : > { %v865_v55 = vadd.f32 %v864_v9, %v767_v8 }
 0x35f   : > { %1977 = vtanh.f32 %v865_v55  ;;  %v886_v55 = vld [vmem:[%s2283_s10 + $0x58] sm:$0xff] }
 0x369   : > { %v1978_v12 = vpop.eup %1977 }
 0x36a   : > { %v868_v14 = vmul.f32 %v1978_v12, %v867_v11 }
 0x36c   : > { %v870_v18 = vadd.f32 %v869_v15, %v868_v14 }
 0x36e   : > { %v2637_v19 = vsel %vm875_vm11, %v870_v18, %v2588_v16  ;;  %v877_v6 = vsel %vm875_vm11, %v870_v18, 0.0  ;;  %v884_v16 = vld [vmem:[%s2283_s10 + $0x48] sm:$0xff]  ;;  %v993_v18 = vpop.permute.xlu1 %992 }
 0x36f   : > { %v879_v20 = vadd.f32 %v878_v17, %v877_v6  ;;  %v887_v21 = vpack.c.bf16 %v2637_v19, %v2637_v19  ;;  %vm994_vm12 = vcmp.eq.s32.totalorder %v993_v18, 1  ;;  %v2765_v18 = vld [vmem:[%s2977_s2 + $0x18] ss:$12 sps:$4 sm:$0xff]  }
 0x371   : > { %880 = vst [vmem:[%s2285_s11 + $0x10] sm:$0xff] %v879_v20  ;;  %921 = vmatmul.mubr.bf16.vlgmr.msra.gmra.mrb[12].mxu0 %v887_v21  ;;  %1784 = vmatmul.mubr.bf16.vlgmr.msra.gmra.mrb[12].mxu1 %v887_v21  ;;  %v997_v20 = vld [vmem:[%s2281_s9 + $0x18] sm:$0xff] }
 0x372   : > { %1008 = vmatpush1.bf16.msra.mxu0 %v2299_v26  ;;  %1788 = vmatpush3.bf16.msra.mxu1 %v2340_v34 }
 0x373   : > { %1009 = vmatprep.subr.bf16.mxu0 %v2307_v29  ;;  %1789 = vmatprep.subr.bf16.mxu1 %v2118_v27 }
 0x374   : > { %1039 = vmatprep.mubr.bf16.mxu0 %v2119_v28  ;;  %1803 = vmatprep.mubr.msk.bf16.mxu1 %vm2120_vm0, %v2118_v27 }
 0x376   : > { %1010 = vmatpush1.bf16.msra.mxu0 %v2315_v30  ;;  %1790 = vmatpush3.bf16.msra.mxu1 %v2358_v37 }
 0x377   : > { %1011 = vmatprep.subr.bf16.mxu0 %v2322_v31  ;;  %1791 = vmatprep.subr.bf16.mxu1 %v2118_v27 }
 0x37a   : > { %1012 = vmatpush1.bf16.msra.mxu0 %v2329_v32  ;;  %1792 = vmatpush3.bf16.msra.mxu1 %v2378_v40 }
 0x37b   : > { %1013 = vmatprep.subr.bf16.mxu0 %v2335_v33  ;;  %1793 = vmatprep.subr.bf16.mxu1 %v2118_v27 }
 0x37e   : > { %1014 = vmatpush1.bf16.msra.mxu0 %v2346_v35  ;;  %1794 = vmatpush3.bf16.msra.mxu1 %v2404_v46 }
 0x37f   : > { %1015 = vmatprep.subr.bf16.mxu0 %v2352_v36  ;;  %1795 = vmatprep.subr.bf16.mxu1 %v2118_v27 }
 0x382   : > { %1016 = vmatpush1.bf16.msra.mxu0 %v2365_v38  ;;  %1796 = vmatpush3.bf16.msra.mxu1 %v2428_v52 }
 0x383   : > { %1017 = vmatprep.subr.bf16.mxu0 %v2371_v39  ;;  %1797 = vmatprep.subr.bf16.mxu1 %v2118_v27 }
 0x386   : > { %1018 = vmatpush1.bf16.msra.mxu0 %v2387_v43  ;;  %1798 = vmatpush3.bf16.msra.mxu1 %v2449_v57 }
 0x387   : > { %1019 = vmatprep.subr.bf16.mxu0 %v2398_v45  ;;  %1799 = vmatprep.subr.bf16.mxu1 %v2118_v27 }
 0x38a   : > { %1020 = vmatpush1.bf16.msra.mxu0 %v2415_v49  ;;  %1800 = vmatpush3.bf16.msra.mxu1 %v2461_v60 }
 0x38b   : > { %1021 = vmatprep.subr.bf16.mxu0 %v2422_v51  ;;  %1801 = vmatprep.subr.bf16.mxu1 %v2118_v27 }
 0x38e   : > { %1022 = vmatpush1.bf16.msra.mxu0 %v2436_v54  ;;  %1802 = vmatpush3.bf16.msra.mxu1 %v2471_v61 }
 0x38f   : > { %1126 = vmatprep.subr.bf16.mxu0 %v2294_v25  ;;  %1807 = vmatprep.subr.bf16.mxu1 %v2118_v27 }
 0x444   : > { %v922_v22 = vpop.f32.mrb[12].mxu0  ;;  %v963_v23 = vpop.f32.mrb[12].mxu1 }
 0x445   : > { %v923_v41 = vadd.f32 %v922_v22, %v2512_v3  ;;  %v924_v42 = vpop.f32.mrb[13].mxu0  ;;  %v1785_v47 = vpop.f32.mrb[13].mxu1  ;;  %v964_v8 = vadd.f32 %v963_v23, %v2520_v24 }
 0x446   : > { %v925_v48 = vadd.f32 %v924_v42, %v2514_v4  ;;  %v926_v50 = vpop.f32.mrb[14].mxu0  ;;  %v966_v44 = vpop.f32.mrb[14].mxu1 }
 0x447   : > { %v969_v53 = vadd.f32 %v923_v41, %v884_v16  ;;  %v927_v58 = vpop.f32.mrb[15].mxu0  ;;  %v1786_v59 = vpop.f32.mrb[15].mxu1 }
 0x448   : > { %v976_v0 = vadd.f32 %v925_v48, %v885_v56  ;;  %v1005_v59 = vld [vmem:[%s2283_s10 + $0x70] sm:$0xff] }
 0x449   : > { %v1619_v62 = vmul.f32 -1.442695, %v969_v53 }
 0x44a   : > { %v1620_v63 = vmul.f32 -1.442695, %v976_v0 }
 0x44b   : > { %1979 = vpow2.f32 %v1619_v62 }
 0x44c   : > { %1981 = vpow2.f32 %v1620_v63 }
 0x455   : > { %v1980_v1 = vpop.eup %1979 }
 0x456   : > { %v973_v2 = vadd.f32 1.0, %v1980_v1  ;;  %v1982_v5 = vpop.eup %1981 }
 0x457   : > { %v980_v7 = vadd.f32 1.0, %v1982_v5 }
 0x458   : > { %1983 = vrcp.f32 %v973_v2 }
 0x459   : > { %1985 = vrcp.f32 %v980_v7 }
 0x462   : > { %v1984_v9 = vpop.eup %1983 }
 0x463   : > { %v983_v10 = vmul.f32 %v1984_v9, %v964_v8  ;;  %v1986_v12 = vpop.eup %1985  ;;  %v1112_v8 = vpop.permute.xlu0 %1111 }
 0x464   : > { %v986_v13 = vsub.f32 1.0, %v1986_v12  ;;  %v988_v17 = vmul.f32 %v1986_v12, %v2637_v19  ;;  %vm1113_vm13 = vcmp.eq.s32.totalorder %v1112_v8, 1  ;;  %v2045_v8 = vld [vmem:[%s2977_s2 + $0x78] ss:$12 sps:$4 sm:$0xff]  }
 0x465   : > { %v984_v11 = vadd.f32 %v983_v10, %v886_v55  ;;  %v1116_v55 = vld [vmem:[%s2281_s9 + $0x20] sm:$0xff] }
 0x467   : > { %1987 = vtanh.f32 %v984_v11 }
 0x471   : > { %v1988_v14 = vpop.eup %1987 }
 0x472   : > { %v987_v15 = vmul.f32 %v1988_v14, %v986_v13  ;;  %v2743_v14 = vld [vmem:[%s2977_s2] ss:$12 sps:$4 sm:$0xff]  }
 0x474   : > { %v989_v6 = vadd.f32 %v988_v17, %v987_v15  ;;  %v2749_v15 = vld [vmem:[%s2977_s2 + $0x8] ss:$12 sps:$4 sm:$0xff]  }
 0x475   : > { %v2755_v17 = vld [vmem:[%s2977_s2 + $0x1c] ss:$12 sps:$4 sm:$0xff]  }
 0x476   : > { %v2686_v21 = vsel %vm994_vm12, %v989_v6, %v2637_v19  ;;  %v996_v16 = vsel %vm994_vm12, %v989_v6, 0.0  ;;  %v2772_v6 = vld [vmem:[%s2977_s2 + $0x34] ss:$12 sps:$4 sm:$0xff]  }
 0x477   : > { %v998_v22 = vadd.f32 %v997_v20, %v996_v16  ;;  %v1006_v23 = vpack.c.bf16 %v2686_v21, %v2686_v21  ;;  %v2779_v20 = vld [vmem:[%s2977_s2 + $0x30] ss:$12 sps:$4 sm:$0xff]   ;;  %v2807_v16 = vld [vmem:[%s2977_s2 + $0x60] ss:$12 sps:$4 sm:$0xff]  }
 0x479   : > { %999 = vst [vmem:[%s2285_s11 + $0x18] sm:$0xff] %v998_v22  ;;  %1040 = vmatmul.mubr.bf16.vlgmr.msra.gmra.mrb[16].mxu0 %v1006_v23  ;;  %1804 = vmatmul.mubr.bf16.vlgmr.msra.gmra.mrb[16].mxu1 %v1006_v23 }
 0x47a   : > { %1127 = vmatpush1.bf16.msra.mxu0 %v2299_v26  ;;  %1808 = vmatpush3.bf16.msra.mxu1 %v2340_v34  ;;  %v1003_v26 = vld [vmem:[%s2283_s10 + $0x60] sm:$0xff] }
 0x47b   : > { %1128 = vmatprep.subr.bf16.mxu0 %v2307_v29  ;;  %1809 = vmatprep.subr.bf16.mxu1 %v2118_v27 }
 0x47c   : > { %1158 = vmatprep.mubr.bf16.mxu0 %v2119_v28  ;;  %1823 = vmatprep.mubr.msk.bf16.mxu1 %vm2120_vm0, %v2118_v27 }
 0x47e   : > { %1129 = vmatpush1.bf16.msra.mxu0 %v2315_v30  ;;  %1810 = vmatpush3.bf16.msra.mxu1 %v2358_v37 }
 0x47f   : > { %1130 = vmatprep.subr.bf16.mxu0 %v2322_v31  ;;  %1811 = vmatprep.subr.bf16.mxu1 %v2118_v27 }
 0x482   : > { %1131 = vmatpush1.bf16.msra.mxu0 %v2329_v32  ;;  %1812 = vmatpush3.bf16.msra.mxu1 %v2378_v40 }
 0x483   : > { %1132 = vmatprep.subr.bf16.mxu0 %v2335_v33  ;;  %1813 = vmatprep.subr.bf16.mxu1 %v2118_v27 }
 0x486   : > { %1133 = vmatpush1.bf16.msra.mxu0 %v2346_v35  ;;  %1814 = vmatpush3.bf16.msra.mxu1 %v2404_v46 }
 0x487   : > { %1134 = vmatprep.subr.bf16.mxu0 %v2352_v36  ;;  %1815 = vmatprep.subr.bf16.mxu1 %v2118_v27 }
 0x48a   : > { %1135 = vmatpush1.bf16.msra.mxu0 %v2365_v38  ;;  %1816 = vmatpush3.bf16.msra.mxu1 %v2428_v52 }
 0x48b   : > { %1136 = vmatprep.subr.bf16.mxu0 %v2371_v39  ;;  %1817 = vmatprep.subr.bf16.mxu1 %v2118_v27  ;;  %v1004_v39 = vld [vmem:[%s2283_s10 + $0x68] sm:$0xff] }
 0x48e   : > { %1137 = vmatpush1.bf16.msra.mxu0 %v2387_v43  ;;  %1818 = vmatpush3.bf16.msra.mxu1 %v2449_v57 }
 0x48f   : > { %1138 = vmatprep.subr.bf16.mxu0 %v2398_v45  ;;  %1819 = vmatprep.subr.bf16.mxu1 %v2118_v27 }
 0x492   : > { %1139 = vmatpush1.bf16.msra.mxu0 %v2415_v49  ;;  %1820 = vmatpush3.bf16.msra.mxu1 %v2461_v60 }
 0x493   : > { %1140 = vmatprep.subr.bf16.mxu0 %v2422_v51  ;;  %1821 = vmatprep.subr.bf16.mxu1 %v2118_v27 }
 0x496   : > { %1141 = vmatpush1.bf16.msra.mxu0 %v2436_v54  ;;  %1822 = vmatpush3.bf16.msra.mxu1 %v2471_v61 }
 0x497   : > { %1245 = vmatprep.subr.bf16.mxu0 %v2294_v25  ;;  %1827 = vmatprep.subr.bf16.mxu1 %v2118_v27 }
 0x54c   : > { %v1041_v29 = vpop.f32.mrb[16].mxu0  ;;  %v1082_v30 = vpop.f32.mrb[16].mxu1 }
 0x54d   : > { %v1042_v31 = vadd.f32 %v1041_v29, %v2512_v3  ;;  %v1043_v32 = vpop.f32.mrb[17].mxu0  ;;  %v1805_v33 = vpop.f32.mrb[17].mxu1  ;;  %v1083_v56 = vadd.f32 %v1082_v30, %v2520_v24 }
 0x54e   : > { %v1044_v34 = vadd.f32 %v1043_v32, %v2514_v4  ;;  %v1045_v35 = vpop.f32.mrb[18].mxu0  ;;  %v1085_v36 = vpop.f32.mrb[18].mxu1 }
 0x54f   : > { %v1088_v38 = vadd.f32 %v1042_v31, %v1003_v26  ;;  %v1046_v19 = vpop.f32.mrb[19].mxu0  ;;  %v1806_v41 = vpop.f32.mrb[19].mxu1 }
 0x550   : > { %v1095_v25 = vadd.f32 %v1044_v34, %v1004_v39  ;;  %v1124_v41 = vld [vmem:[%s2283_s10 + $0x88] sm:$0xff] }
 0x551   : > { %v1621_v42 = vmul.f32 -1.442695, %v1088_v38 }
 0x552   : > { %v1622_v47 = vmul.f32 -1.442695, %v1095_v25 }
 0x553   : > { %1989 = vpow2.f32 %v1621_v42 }
 0x554   : > { %1991 = vpow2.f32 %v1622_v47 }
 0x55d   : > { %v1990_v48 = vpop.eup %1989 }
 0x55e   : > { %v1092_v50 = vadd.f32 1.0, %v1990_v48  ;;  %v1992_v44 = vpop.eup %1991 }
 0x55f   : > { %v1099_v53 = vadd.f32 1.0, %v1992_v44 }
 0x560   : > { %1993 = vrcp.f32 %v1092_v50 }
 0x561   : > { %1995 = vrcp.f32 %v1099_v53 }
 0x56a   : > { %v1994_v58 = vpop.eup %1993 }
 0x56b   : > { %v1102_v62 = vmul.f32 %v1994_v58, %v1083_v56  ;;  %v1996_v63 = vpop.eup %1995  ;;  %v1231_v56 = vpop.permute.xlu1 %1230 }
 0x56c   : > { %v1105_v1 = vsub.f32 1.0, %v1996_v63  ;;  %v1107_v7 = vmul.f32 %v1996_v63, %v2686_v21  ;;  %vm1232_vm14 = vcmp.eq.s32.totalorder %v1231_v56, 1 }
 0x56d   : > { %v1103_v0 = vadd.f32 %v1102_v62, %v1005_v59  ;;  %v1235_v59 = vld [vmem:[%s2281_s9 + $0x28] sm:$0xff] }
 0x56f   : > { %1997 = vtanh.f32 %v1103_v0 }
 0x579   : > { %v1998_v2 = vpop.eup %1997 }
 0x57a   : > { %v1106_v5 = vmul.f32 %v1998_v2, %v1105_v1  ;;  %v2041_v2 = vld [vmem:[%s2977_s2 + $0x20] ss:$12 sps:$4 sm:$0xff]  }
 0x57c   : > { %v1108_v9 = vadd.f32 %v1107_v7, %v1106_v5  ;;  %v2043_v5 = vld [vmem:[%s2977_s2 + $0x50] ss:$12 sps:$4 sm:$0xff]   ;;  %v2044_v7 = vld [vmem:[%s2977_s2 + $0x68] ss:$12 sps:$4 sm:$0xff]  }
 0x57e   : > { %v2735_v10 = vsel %vm1113_vm13, %v1108_v9, %v2686_v21  ;;  %v1115_v11 = vsel %vm1113_vm13, %v1108_v9, 0.0  ;;  %v2793_v21 = vld [vmem:[%s2977_s2 + $0x48] ss:$12 sps:$4 sm:$0xff]   ;;  %v2046_v9 = vld [vmem:[%s2977_s2 + $0x80] ss:$12 sps:$4 sm:$0xff]  }
 0x57f   : > { %v1117_v12 = vadd.f32 %v1116_v55, %v1115_v11  ;;  %v1125_v13 = vpack.c.bf16 %v2735_v10, %v2735_v10  ;;  %v2047_v55 = vld [vmem:[%s2977_s2 + $0x94] ss:$12 sps:$4 sm:$0xff]   ;;  %v2049_v11 = vld [vmem:[%s2977_s2 + $0x98] ss:$12 sps:$4 sm:$0xff]  }
 0x581   : > { %1118 = vst [vmem:[%s2285_s11 + $0x20] sm:$0xff] %v1117_v12  ;;  %1159 = vmatmul.mubr.bf16.vlgmr.msra.gmra.mrb[20].mxu0 %v1125_v13  ;;  %1824 = vmatmul.mubr.bf16.vlgmr.msra.gmra.mrb[20].mxu1 %v1125_v13  ;;  %v2050_v12 = vld [vmem:[%s2977_s2 + $0xac] ss:$12 sps:$4 sm:$0xff]   ;;  %v2051_v13 = vld [vmem:[%s2977_s2 + $0xa8] ss:$12 sps:$4 sm:$0xff]  }
 0x582   : > { %1246 = vmatpush1.bf16.msra.mxu0 %v2743_v14  ;;  %1828 = vmatpush3.bf16.msra.mxu1 %v2749_v15 }
 0x583   : > { %1247 = vmatprep.subr.bf16.mxu0 %v2755_v17  ;;  %1829 = vmatprep.subr.bf16.mxu1 %v2118_v27 }
 0x584   : > { %1277 = vmatprep.mubr.bf16.mxu0 %v2119_v28  ;;  %1843 = vmatprep.mubr.msk.bf16.mxu1 %vm2120_vm0, %v2118_v27 }
 0x586   : > { %1248 = vmatpush1.bf16.msra.mxu0 %v2765_v18  ;;  %1830 = vmatpush3.bf16.msra.mxu1 %v2358_v37  ;;  %v2786_v37 = vld [vmem:[%s2977_s2 + $0x4c] ss:$12 sps:$4 sm:$0xff]  }
 0x587   : > { %1249 = vmatprep.subr.bf16.mxu0 %v2772_v6  ;;  %1831 = vmatprep.subr.bf16.mxu1 %v2118_v27 }
 0x58a   : > { %1250 = vmatpush1.bf16.msra.mxu0 %v2779_v20  ;;  %1832 = vmatpush3.bf16.msra.mxu1 %v2378_v40  ;;  %v2800_v40 = vld [vmem:[%s2977_s2 + $0x64] ss:$12 sps:$4 sm:$0xff]  }
 0x58b   : > { %1251 = vmatprep.subr.bf16.mxu0 %v2786_v37  ;;  %1833 = vmatprep.subr.bf16.mxu1 %v2118_v27 }
 0x58e   : > { %1252 = vmatpush1.bf16.msra.mxu0 %v2793_v21  ;;  %1834 = vmatpush3.bf16.msra.mxu1 %v2404_v46  ;;  %v2814_v46 = vld [vmem:[%s2977_s2 + $0x7c] ss:$12 sps:$4 sm:$0xff]  }
 0x58f   : > { %1253 = vmatprep.subr.bf16.mxu0 %v2800_v40  ;;  %1835 = vmatprep.subr.bf16.mxu1 %v2118_v27 }
 0x592   : > { %1254 = vmatpush1.bf16.msra.mxu0 %v2807_v16  ;;  %1836 = vmatpush3.bf16.msra.mxu1 %v2428_v52 }
 0x593   : > { %1255 = vmatprep.subr.bf16.mxu0 %v2814_v46  ;;  %1837 = vmatprep.subr.bf16.mxu1 %v2118_v27 }
 0x596   : > { %1256 = vmatpush1.bf16.msra.mxu0 %v2387_v43  ;;  %1838 = vmatpush3.bf16.msra.mxu1 %v2449_v57  ;;  %v2040_v43 = vld [vmem:[%s2977_s2 + $0x4] ss:$12 sps:$4 sm:$0xff]  }
 0x597   : > { %1257 = vmatprep.subr.bf16.mxu0 %v2398_v45  ;;  %1839 = vmatprep.subr.bf16.mxu1 %v2118_v27  ;;  %v1122_v45 = vld [vmem:[%s2283_s10 + $0x78] sm:$0xff] }
 0x59a   : > { %1258 = vmatpush1.bf16.msra.mxu0 %v2415_v49  ;;  %1840 = vmatpush3.bf16.msra.mxu1 %v2461_v60 }
 0x59b   : > { %1259 = vmatprep.subr.bf16.mxu0 %v2422_v51  ;;  %1841 = vmatprep.subr.bf16.mxu1 %v2118_v27 }
 0x59e   : > { %1260 = vmatpush1.bf16.msra.mxu0 %v2436_v54  ;;  %1842 = vmatpush3.bf16.msra.mxu1 %v2471_v61  ;;  %v1123_v61 = vld [vmem:[%s2283_s10 + $0x80] sm:$0xff] }
 0x59f   : > { %1364 = vmatprep.subr.bf16.mxu0 %v2040_v43  ;;  %1847 = vmatprep.subr.bf16.mxu1 %v2118_v27 }
 0x654   : > { %v1160_v49 = vpop.f32.mrb[20].mxu0  ;;  %v1201_v52 = vpop.f32.mrb[20].mxu1 }
 0x655   : > { %v1161_v57 = vadd.f32 %v1160_v49, %v2512_v3  ;;  %v1162_v51 = vpop.f32.mrb[21].mxu0  ;;  %v1825_v60 = vpop.f32.mrb[21].mxu1  ;;  %v1202_v39 = vadd.f32 %v1201_v52, %v2520_v24 }
 0x656   : > { %v1163_v22 = vadd.f32 %v1162_v51, %v2514_v4  ;;  %v1164_v23 = vpop.f32.mrb[22].mxu0  ;;  %v1204_v54 = vpop.f32.mrb[22].mxu1 }
 0x657   : > { %v1207_v26 = vadd.f32 %v1161_v57, %v1122_v45  ;;  %v1165_v29 = vpop.f32.mrb[23].mxu0  ;;  %v1826_v30 = vpop.f32.mrb[23].mxu1 }
 0x658   : > { %v1214_v32 = vadd.f32 %v1163_v22, %v1123_v61  ;;  %v1243_v61 = vld [vmem:[%s2283_s10 + $0xa0] sm:$0xff] }
 0x659   : > { %v1623_v31 = vmul.f32 -1.442695, %v1207_v26 }
 0x65a   : > { %v1624_v33 = vmul.f32 -1.442695, %v1214_v32 }
 0x65b   : > { %1999 = vpow2.f32 %v1623_v31 }
 0x65c   : > { %2001 = vpow2.f32 %v1624_v33 }
 0x665   : > { %v2000_v34 = vpop.eup %1999 }
 0x666   : > { %v1211_v35 = vadd.f32 1.0, %v2000_v34  ;;  %v2002_v36 = vpop.eup %2001  ;;  %v1350_v34 = vpop.permute.xlu0 %1349 }
 0x667   : > { %v1218_v38 = vadd.f32 1.0, %v2002_v36  ;;  %vm1351_vm15 = vcmp.eq.s32.totalorder %v1350_v34, 1 }
 0x668   : > { %2003 = vrcp.f32 %v1211_v35 }
 0x669   : > { %2005 = vrcp.f32 %v1218_v38 }
 0x672   : > { %v2004_v19 = vpop.eup %2003 }
 0x673   : > { %v1221_v42 = vmul.f32 %v2004_v19, %v1202_v39  ;;  %v2006_v47 = vpop.eup %2005  ;;  %v1354_v39 = vld [vmem:[%s2281_s9 + $0x30] sm:$0xff] }
 0x674   : > { %v1224_v48 = vsub.f32 1.0, %v2006_v47  ;;  %v1226_v53 = vmul.f32 %v2006_v47, %v2735_v10  ;;  %v1360_v47 = vld [vmem:[%s2283_s10 + $0xa8] sm:$0xff] }
 0x675   : > { %v1222_v25 = vadd.f32 %v1221_v42, %v1124_v41 }
 0x677   : > { %2007 = vtanh.f32 %v1222_v25 }
 0x681   : > { %v2008_v50 = vpop.eup %2007 }
 0x682   : > { %v1225_v44 = vmul.f32 %v2008_v50, %v1224_v48 }
 0x684   : > { %v1227_v58 = vadd.f32 %v1226_v53, %v1225_v44 }
 0x686   : > { %v2841_v62 = vsel %vm1232_vm14, %v1227_v58, %v2735_v10  ;;  %v1234_v0 = vsel %vm1232_vm14, %v1227_v58, 0.0  ;;  %v2048_v10 = vld [vmem:[%s2977_s2 + $0x90] ss:$12 sps:$4 sm:$0xff]  }
 0x687   : > { %v1236_v63 = vadd.f32 %v1235_v59, %v1234_v0  ;;  %v1244_v1 = vpack.c.bf16 %v2841_v62, %v2841_v62 }
 0x689   : > { %1237 = vst [vmem:[%s2285_s11 + $0x28] sm:$0xff] %v1236_v63  ;;  %1278 = vmatmul.mubr.bf16.vlgmr.msra.gmra.mrb[24].mxu0 %v1244_v1  ;;  %1844 = vmatmul.mubr.bf16.vlgmr.msra.gmra.mrb[24].mxu1 %v1244_v1 }
 0x68a   : > { %1365 = vmatpush1.bf16.msra.mxu0 %v2743_v14  ;;  %1848 = vmatpush3.bf16.msra.mxu1 %v2749_v15  ;;  %v2052_v14 = vld [vmem:[%s2977_s2 + $0xb0] ss:$12 sps:$4 sm:$0xff]  }
 0x68b   : > { %1366 = vmatprep.subr.bf16.mxu0 %v2755_v17  ;;  %1849 = vmatprep.subr.bf16.mxu1 %v2118_v27  ;;  %v1241_v15 = vld [vmem:[%s2283_s10 + $0x90] sm:$0xff] }
 0x68c   : > { %1396 = vmatprep.mubr.bf16.mxu0 %v2119_v28  ;;  %1863 = vmatprep.mubr.msk.bf16.mxu1 %vm2120_vm0, %v2118_v27  ;;  %v2042_v28 = vld [vmem:[%s2977_s2 + $0x38] ss:$12 sps:$4 sm:$0xff]  }
 0x68e   : > { %1367 = vmatpush1.bf16.msra.mxu0 %v2765_v18  ;;  %1850 = vmatpush3.bf16.msra.mxu1 %v2041_v2 }
 0x68f   : > { %1368 = vmatprep.subr.bf16.mxu0 %v2772_v6  ;;  %1851 = vmatprep.subr.bf16.mxu1 %v2118_v27 }
 0x692   : > { %1369 = vmatpush1.bf16.msra.mxu0 %v2779_v20  ;;  %1852 = vmatpush3.bf16.msra.mxu1 %v2042_v28 }
 0x693   : > { %1370 = vmatprep.subr.bf16.mxu0 %v2786_v37  ;;  %1853 = vmatprep.subr.bf16.mxu1 %v2118_v27 }
 0x696   : > { %1371 = vmatpush1.bf16.msra.mxu0 %v2793_v21  ;;  %1854 = vmatpush3.bf16.msra.mxu1 %v2043_v5 }
 0x697   : > { %1372 = vmatprep.subr.bf16.mxu0 %v2800_v40  ;;  %1855 = vmatprep.subr.bf16.mxu1 %v2118_v27 }
 0x69a   : > { %1373 = vmatpush1.bf16.msra.mxu0 %v2807_v16  ;;  %1856 = vmatpush3.bf16.msra.mxu1 %v2044_v7 }
 0x69b   : > { %1374 = vmatprep.subr.bf16.mxu0 %v2814_v46  ;;  %1857 = vmatprep.subr.bf16.mxu1 %v2118_v27  ;;  %v1242_v46 = vld [vmem:[%s2283_s10 + $0x98] sm:$0xff] }
 0x69e   : > { %1375 = vmatpush1.bf16.msra.mxu0 %v2045_v8  ;;  %1858 = vmatpush3.bf16.msra.mxu1 %v2046_v9 }
 0x69f   : > { %1376 = vmatprep.subr.bf16.mxu0 %v2047_v55  ;;  %1859 = vmatprep.subr.bf16.mxu1 %v2118_v27 }
 0x6a2   : > { %1377 = vmatpush1.bf16.msra.mxu0 %v2048_v10  ;;  %1860 = vmatpush3.bf16.msra.mxu1 %v2049_v11  ;;  %v1362_v11 = vld [vmem:[%s2283_s10 + $0xb8] sm:$0xff] }
 0x6a3   : > { %1378 = vmatprep.subr.bf16.mxu0 %v2050_v12  ;;  %1861 = vmatprep.subr.bf16.mxu1 %v2118_v27 }
 0x6a6   : > { %1379 = vmatpush1.bf16.msra.mxu0 %v2051_v13  ;;  %1862 = vmatpush3.bf16.msra.mxu1 %v2052_v14 }
 0x75c   : > { %v1279_v17 = vpop.f32.mrb[24].mxu0  ;;  %v1320_v18 = vpop.f32.mrb[24].mxu1 }
 0x75d   : > { %v1280_v6 = vadd.f32 %v1279_v17, %v2512_v3  ;;  %v1281_v20 = vpop.f32.mrb[25].mxu0  ;;  %v1845_v37 = vpop.f32.mrb[25].mxu1  ;;  %v1321_v54 = vadd.f32 %v1320_v18, %v2520_v24 }
 0x75e   : > { %v1282_v21 = vadd.f32 %v1281_v20, %v2514_v4  ;;  %v1283_v27 = vpop.f32.mrb[26].mxu0  ;;  %v1323_v40 = vpop.f32.mrb[26].mxu1 }
 0x75f   : > { %v1326_v16 = vadd.f32 %v1280_v6, %v1241_v15  ;;  %v1284_v43 = vpop.f32.mrb[27].mxu0  ;;  %v1846_v45 = vpop.f32.mrb[27].mxu1 }
 0x760   : > { %v1333_v52 = vadd.f32 %v1282_v21, %v1242_v46  ;;  %v1469_v18 = vpop.permute.xlu1 %1468 }
 0x761   : > { %v1625_v49 = vmul.f32 -1.442695, %v1326_v16  ;;  %vm1470_vm0 = vcmp.eq.s32.totalorder %v1469_v18, 1 }
 0x762   : > { %v1626_v57 = vmul.f32 -1.442695, %v1333_v52 }
 0x763   : > { %2009 = vpow2.f32 %v1625_v49 }
 0x764   : > { %2011 = vpow2.f32 %v1626_v57 }
 0x76d   : > { %v2010_v51 = vpop.eup %2009 }
 0x76e   : > { %v1330_v60 = vadd.f32 1.0, %v2010_v51  ;;  %v2012_v22 = vpop.eup %2011 }
 0x76f   : > { %v1337_v23 = vadd.f32 1.0, %v2012_v22 }
 0x770   : > { %2013 = vrcp.f32 %v1330_v60 }
 0x771   : > { %2015 = vrcp.f32 %v1337_v23 }
 0x77a   : > { %v2014_v26 = vpop.eup %2013 }
 0x77b   : > { %v1340_v29 = vmul.f32 %v2014_v26, %v1321_v54  ;;  %v2016_v31 = vpop.eup %2015 }
 0x77c   : > { %v1343_v32 = vsub.f32 1.0, %v2016_v31  ;;  %v1345_v36 = vmul.f32 %v2016_v31, %v2841_v62 }
 0x77d   : > { %v1341_v30 = vadd.f32 %v1340_v29, %v1243_v61 }
 0x77f   : > { %2017 = vtanh.f32 %v1341_v30 }
 0x789   : > { %v2018_v33 = vpop.eup %2017 }
 0x78a   : > { %v1344_v35 = vmul.f32 %v2018_v33, %v1343_v32 }
 0x78c   : > { %v1346_v38 = vadd.f32 %v1345_v36, %v1344_v35 }
 0x78e   : > { %v1352_v19 = vsel %vm1351_vm15, %v1346_v38, %v2841_v62  ;;  %v1353_v41 = vsel %vm1351_vm15, %v1346_v38, 0.0  ;;  %v1361_v62 = vld [vmem:[%s2283_s10 + $0xb0] sm:$0xff] }
 0x78f   : > { %v1355_v42 = vadd.f32 %v1354_v39, %v1353_v41  ;;  %v1363_v25 = vpack.c.bf16 %v1352_v19, %v1352_v19 }
 0x791   : > { %1356 = vst [vmem:[%s2285_s11 + $0x30] sm:$0xff] %v1355_v42  ;;  %1397 = vmatmul.mubr.bf16.vlgmr.msra.gmra.mrb[28].mxu0 %v1363_v25  ;;  %1864 = vmatmul.mubr.bf16.vlgmr.msra.gmra.mrb[28].mxu1 %v1363_v25 }
 0x864   : > { %v1398_v48 = vpop.f32.mrb[28].mxu0  ;;  %v1439_v50 = vpop.f32.mrb[28].mxu1 }
 0x865   : > { %v1399_v44 = vadd.f32 %v1398_v48, %v2512_v3  ;;  %v1400_v53 = vpop.f32.mrb[29].mxu0  ;;  %v1865_v56 = vpop.f32.mrb[29].mxu1 }
 0x866   : > { %v1401_v58 = vadd.f32 %v1400_v53, %v2514_v4  ;;  %v1402_v59 = vpop.f32.mrb[30].mxu0  ;;  %v1442_v0 = vpop.f32.mrb[30].mxu1  ;;  %v1440_v4 = vadd.f32 %v1439_v50, %v2520_v24  ;;  %v1473_v24 = vld [vmem:[%s2281_s9 + $0x38] sm:$0xff]  ;;  %s2053_s9 = scalar_lea.vmem %s2927_s28, 1024 }
 0x867   : > { %v1445_v63 = vadd.f32 %v1399_v44, %v1360_v47  ;;  %v1403_v1 = vpop.f32.mrb[31].mxu0  ;;  %v1866_v2 = vpop.f32.mrb[31].mxu1  ;;  %p2054_p1 = scmp.ne.s32.totalorder %s2927_s28, %s2053_s9  ;;  %p2061_p5 = scmp.lt.s32.totalorder %s2059_s26, %s2053_s9 }
 0x868   : > { %v1452_v5 = vadd.f32 %v1401_v58, %v1361_v62 }
 0x869   : > { %v1627_v28 = vmul.f32 -1.442695, %v1445_v63  ;;  %p2055_p2 = pnand %p2054_p1, %p2198_p6  ;;  %p2062_p7 = por %p2061_p5, %p2060_p4 }
 0x86a   : > { %v1628_v7 = vmul.f32 -1.442695, %v1452_v5 }
 0x86b   : > { %2019 = vpow2.f32 %v1627_v28  ;;  %p2056_p3 = pneg %p2055_p2 }
 0x86c   : > { %2021 = vpow2.f32 %v1628_v7 }
 0x86d   : > { %p2063_p10 = pnand %p2062_p7, %p2056_p3 }
 0x875   : > { %v2020_v8 = vpop.eup %2019 }
 0x876   : > { %v1449_v9 = vadd.f32 1.0, %v2020_v8  ;;  %v2022_v3 = vpop.eup %2021 }
 0x877   : > { %v1456_v55 = vadd.f32 1.0, %v2022_v3 }
 0x878   : > { %2023 = vrcp.f32 %v1449_v9 }
 0x879   : > { %2025 = vrcp.f32 %v1456_v55 }
 0x882   : > { %v2024_v10 = vpop.eup %2023 }
 0x883   : > { %v1459_v12 = vmul.f32 %v2024_v10, %v1440_v4  ;;  %v2026_v14 = vpop.eup %2025 }
 0x884   : > { %v1462_v15 = vsub.f32 1.0, %v2026_v14  ;;  %v1464_v20 = vmul.f32 %v2026_v14, %v1352_v19 }
 0x885   : > { %v1460_v13 = vadd.f32 %v1459_v12, %v1362_v11 }
 0x887   : > { %2027 = vtanh.f32 %v1460_v13 }
 0x891   : > { %v2028_v17 = vpop.eup %2027 }
 0x892   : > { %v1463_v6 = vmul.f32 %v2028_v17, %v1462_v15 }
 0x894   : > { %v1465_v37 = vadd.f32 %v1464_v20, %v1463_v6 }
 0x896   : > { %v1471_v21 = vsel %vm1470_vm0, %v1465_v37, %v1352_v19  ;;  %v1472_v27 = vsel %vm1470_vm0, %v1465_v37, 0.0 }
 0x897   : > { %v1474_v40 = vadd.f32 %v1473_v24, %v1472_v27  ;;  %1476 = vst [vmem:[%s2981_s6] sm:$0xff] %v1471_v21 }
 0x899   : > { %1475 = vst [vmem:[%s2285_s11 + $0x38] sm:$0xff] %v1474_v40 }
 0x89a   : > { %2066 = shalt.err (!%p2063_p10)
}
 0x89b   : > { %s2067_s11 = scalar_lea.hbm %s2925_s29, 1024  ;;  %s2071_s19 = scalar_lea.hbm %s2980_s5, 2048 }
 0x89c   : > { %p2068_p11 = scmp.ne.s32.totalorder %s2925_s29, %s2067_s11  ;;  %p2072_p0 = scmp.lt.u32.totalorder %s2925_s29, %s2980_s5 }
 0x89d   : > { %p2073_p1 = scmp.lt.u32.totalorder %s2071_s19, %s2067_s11  ;;  %p2075_p3 = scmp.lt.u32.totalorder %s2067_s11, %s2925_s29 }
 0x89e   : > { %p2069_p12 = pnand %p2068_p11, %p2198_p6 }
 0x89f   : > { %p2074_p2 = por %p2073_p1, %p2072_p0 }
 0x8a0   : > { %p2070_p13 = pneg %p2069_p12 }
 0x8a1   : > { %p2076_p4 = por %p2075_p3, %p2074_p2 }
 0x8a3   : > { %p2077_p5 = pnand %p2076_p4, %p2070_p13 }
 0x8a5   : > { %2080 = shalt.err (!%p2077_p5)
}
 0x8a6   : > { %s2122_s14 = smov 128   ;;  %s2123_s12 = smov 8  }
 0x8a7   : > { %1870 = dma.vmem_to_hbm [thread:$0]  (%p2198_p6), %s2927_s28, 1024, %s2925_s29, %s1478_s25, %s2122_s14, %s2122_s14, %s2123_s12  }
 0x8a8 PF: > { %s1512_s9 = sand.u32 1, %s2103_s21   ;;  %p1873_p7 = pnand %p1579_p9, %p2202_p8 }
 0x8a9   : > { %s1513_s15 = scalar_lea.sflag [#allocation4], %s1512_s9 }
 0x8aa   : > { %2098 = dma.done.wait (!%p1873_p7), %s1513_s15, 1024  }
 0x8ab   : > { %2100 = vsyncadd (!%p1873_p7), %s1513_s15, 4294966272  ;;  %p17_p10 = scmp.ge.s32.totalorder %s2184_s27, 4   ;;  %s2984_s21 = smov %s2107_s22 }
 0x8ac   : > { %s2985_s22 = smov %s2111_s23  ;;  %s2986_s23 = smov %s2196_s30 }
 0x8ad   : > { %s2987_s24 = smov %s2184_s27  ;;  %19 = sbr.rel (!%p17_p10) target bundleno = 3 (0x3), region = 118 }
 0x8b4   :  { %1518 = vsyncpa [#allocation4], 1 }
 0x8b5   :  { %1520 = vsyncpa [#allocation4 + $0x1], 1 }

// kernel: _lambda_.3
= control target key start
LH: loop header
LB: loop body
LE: loop exit
PB: predicated region body
PF: predicated region fallthrough
CT: control target
= control target key end

     0   :  { %s1048_s12 = smov 0   ;;  %s1345_s0 = inlined_call_operand.vmem [shape: bf16[128,128], index: 0, kind: input, shape index: {}]   ;;  %s1346_s1 = inlined_call_operand.vmem [shape: bf16[128,768], index: 1, kind: input, shape index: {}]   ;;  %s1347_s2 = inlined_call_operand.vmem [shape: f32[1,768], index: 2, kind: input, shape index: {}]   ;;  %s1348_s3 = inlined_call_operand.vmem [shape: f32[128,768], index: 3, kind: output, shape index: {}]  }
   0x1 LB: > { %s854_s13 = sadd.s32 4294967295, %s1025_s12   ;;  %p858_p0 = scmp.ge.s32.totalorder %s1025_s12, 1  ;;  %s1025_s12 = sphi %s1048_s12, %s13_s12  }
   0x2   : > { %p138_p1 = scmp.lt.s32.totalorder %s1025_s12, 3 }
   0x4   : > { %p139_p2 = pnand %p858_p0, %p138_p1 }
   0x5   : > { %v943_v0 = vld [vmem:[%s1346_s1 + $0x4] ss:$24 sps:$4 sm:$0xff] (!%p139_p2)   ;;  %v1027_v2 = vmov (!%p139_p2), 0   ;;  %v947_v3 = vld [vmem:[%s1346_s1] ss:$24 sps:$4 sm:$0xff] (!%p139_p2)   ;;  %s859_s5 = sshll.u32 (!%p139_p2), %s854_s13, 3  ;;  %v235_v53 = vlaneseq (!%p139_p2) }
   0x6   : > { %142 = sbr.rel (%p139_p2) target bundleno = 297 (0x129), region = 32  ;;  %v945_v1 = vld [vmem:[%s1346_s1 + $0xc] ss:$24 sps:$4 sm:$0xff] (!%p139_p2)   ;;  %561 = vmatprep.mubr.bf16.mxu0 (!%p139_p2), %v1027_v2  ;;  %634 = vmatprep.mubr.bf16.mxu1 (!%p139_p2), %v1027_v2  ;;  %v948_v4 = vld [vmem:[%s1346_s1 + $0x8] ss:$24 sps:$4 sm:$0xff] (!%p139_p2)   ;;  %p164_p3 = scmp.lt.s32.totalorder (!%p139_p2), %s859_s5, 15 }
   0x7   : > { %529 = vmatprep.subr.bf16.mxu0 (!%p139_p2), %v943_v0  ;;  %602 = vmatprep.subr.bf16.mxu1 (!%p139_p2), %v945_v1  ;;  %v949_v5 = vld [vmem:[%s1346_s1 + $0x34] ss:$24 sps:$4 sm:$0xff] (!%p139_p2)   ;;  %v953_v7 = vld [vmem:[%s1346_s1 + $0x30] ss:$24 sps:$4 sm:$0xff] (!%p139_p2)   ;;  %v955_v9 = vld [vmem:[%s1346_s1 + $0x64] ss:$24 sps:$4 sm:$0xff] (!%p139_p2)  }
   0x8   : > { %530 = vmatpush1.bf16.msra.mxu0 (!%p139_p2), %v947_v3  ;;  %603 = vmatpush1.bf16.msra.mxu1 (!%p139_p2), %v948_v4  ;;  %v951_v6 = vld [vmem:[%s1346_s1 + $0x3c] ss:$24 sps:$4 sm:$0xff] (!%p139_p2)   ;;  %v954_v8 = vld [vmem:[%s1346_s1 + $0x38] ss:$24 sps:$4 sm:$0xff] (!%p139_p2)   ;;  %v957_v10 = vld [vmem:[%s1346_s1 + $0x6c] ss:$24 sps:$4 sm:$0xff] (!%p139_p2)  }
   0x9   : > { %531 = vmatprep.subr.bf16.mxu0 (!%p139_p2), %v949_v5  ;;  %604 = vmatprep.subr.bf16.mxu1 (!%p139_p2), %v951_v6  ;;  %v959_v11 = vld [vmem:[%s1346_s1 + $0x60] ss:$24 sps:$4 sm:$0xff] (!%p139_p2)   ;;  %v961_v13 = vld [vmem:[%s1346_s1 + $0x94] ss:$24 sps:$4 sm:$0xff] (!%p139_p2)   ;;  %v965_v15 = vld [vmem:[%s1346_s1 + $0x90] ss:$24 sps:$4 sm:$0xff] (!%p139_p2)  }
   0xa   : > { %v960_v12 = vld [vmem:[%s1346_s1 + $0x68] ss:$24 sps:$4 sm:$0xff] (!%p139_p2)   ;;  %v963_v14 = vld [vmem:[%s1346_s1 + $0x9c] ss:$24 sps:$4 sm:$0xff] (!%p139_p2)   ;;  %v966_v16 = vld [vmem:[%s1346_s1 + $0x98] ss:$24 sps:$4 sm:$0xff] (!%p139_p2)  }
   0xb   : > { %v967_v17 = vld [vmem:[%s1346_s1 + $0xc4] ss:$24 sps:$4 sm:$0xff] (!%p139_p2)   ;;  %v971_v19 = vld [vmem:[%s1346_s1 + $0xc0] ss:$24 sps:$4 sm:$0xff] (!%p139_p2)   ;;  %v973_v21 = vld [vmem:[%s1346_s1 + $0xf4] ss:$24 sps:$4 sm:$0xff] (!%p139_p2)  }
   0xc   : > { %532 = vmatpush1.bf16.msra.mxu0 (!%p139_p2), %v953_v7  ;;  %605 = vmatpush1.bf16.msra.mxu1 (!%p139_p2), %v954_v8  ;;  %v969_v18 = vld [vmem:[%s1346_s1 + $0xcc] ss:$24 sps:$4 sm:$0xff] (!%p139_p2)   ;;  %v972_v20 = vld [vmem:[%s1346_s1 + $0xc8] ss:$24 sps:$4 sm:$0xff] (!%p139_p2)   ;;  %v975_v22 = vld [vmem:[%s1346_s1 + $0xfc] ss:$24 sps:$4 sm:$0xff] (!%p139_p2)  }
   0xd   : > { %533 = vmatprep.subr.bf16.mxu0 %v955_v9  ;;  %606 = vmatprep.subr.bf16.mxu1 %v957_v10  ;;  %s1350_s5 = smov (!%p164_p3, %s859_s5), 15  ;;  %v977_v23 = vld [vmem:[%s1346_s1 + $0xf0] ss:$24 sps:$4 sm:$0xff]   ;;  %v979_v25 = vld [vmem:[%s1346_s1 + $0x124] ss:$24 sps:$4 sm:$0xff]   ;;  %v1229_v54 = vshrl.u32 %v235_v53, 7 }
   0xe   : > { %s860_s7 = sshll.u32 %s1350_s5, 2  ;;  %v978_v24 = vld [vmem:[%s1346_s1 + $0xf8] ss:$24 sps:$4 sm:$0xff]   ;;  %v981_v26 = vld [vmem:[%s1346_s1 + $0x12c] ss:$24 sps:$4 sm:$0xff]   ;;  %s933_s16 = smul.u32 48, %s1350_s5 }
   0xf   : > { %s1139_s17 = scalar_lea.vmem %s1345_s0, %s860_s7  ;;  %v983_v27 = vld [vmem:[%s1346_s1 + $0x120] ss:$24 sps:$4 sm:$0xff]   ;;  %v985_v29 = vld [vmem:[%s1346_s1 + $0x154] ss:$24 sps:$4 sm:$0xff]   ;;  %v989_v31 = vld [vmem:[%s1346_s1 + $0x150] ss:$24 sps:$4 sm:$0xff]  }
  0x10   : > { %534 = vmatpush1.bf16.msra.mxu0 %v959_v11  ;;  %607 = vmatpush1.bf16.msra.mxu1 %v960_v12  ;;  %v984_v28 = vld [vmem:[%s1346_s1 + $0x128] ss:$24 sps:$4 sm:$0xff]   ;;  %v987_v30 = vld [vmem:[%s1346_s1 + $0x15c] ss:$24 sps:$4 sm:$0xff]   ;;  %v990_v32 = vld [vmem:[%s1346_s1 + $0x158] ss:$24 sps:$4 sm:$0xff]   ;;  %s1256_s20 = scalar_lea.vmem %s1348_s3, %s933_s16 }
  0x11   : > { %535 = vmatprep.subr.bf16.mxu0 %v961_v13  ;;  %608 = vmatprep.subr.bf16.mxu1 %v963_v14  ;;  %v994_v33 = vld [vmem:[%s1346_s1 + $0x14] ss:$24 sps:$4 sm:$0xff]   ;;  %v1166_v34 = vld [vmem:[%s1139_s17] sm:$0xff]   ;;  %v992_v35 = vld [vmem:[%s1346_s1 + $0x10] ss:$24 sps:$4 sm:$0xff]   ;;  %v237_v55 = vsub.s32 0, %v1229_v54 }
  0x12   : > { %v997_v36 = vld [vmem:[%s1346_s1 + $0x44] ss:$24 sps:$4 sm:$0xff]   ;;  %v995_v37 = vld [vmem:[%s1346_s1 + $0x40] ss:$24 sps:$4 sm:$0xff]   ;;  %v1001_v38 = vld [vmem:[%s1346_s1 + $0x74] ss:$24 sps:$4 sm:$0xff]  }
  0x13   : > { %v998_v39 = vld [vmem:[%s1139_s17 + $0x8] sm:$0xff]   ;;  %v1004_v41 = vld [vmem:[%s1346_s1 + $0xa4] ss:$24 sps:$4 sm:$0xff]   ;;  %v1002_v42 = vld [vmem:[%s1346_s1 + $0xa0] ss:$24 sps:$4 sm:$0xff]   ;;  %v245_v56 = vsub.s32 2, %v1229_v54 }
  0x14   : > { %536 = vmatpush1.bf16.msra.mxu0 %v965_v15  ;;  %609 = vmatpush1.bf16.msra.mxu1 %v966_v16  ;;  %v999_v40 = vld [vmem:[%s1346_s1 + $0x70] ss:$24 sps:$4 sm:$0xff]   ;;  %v1008_v43 = vld [vmem:[%s1346_s1 + $0xd4] ss:$24 sps:$4 sm:$0xff]   ;;  %v1011_v46 = vld [vmem:[%s1346_s1 + $0x104] ss:$24 sps:$4 sm:$0xff]  }
  0x15   : > { %537 = vmatprep.subr.bf16.mxu0 %v967_v17  ;;  %610 = vmatprep.subr.bf16.mxu1 %v969_v18  ;;  %v1005_v44 = vld [vmem:[%s1139_s17 + $0x10] sm:$0xff]   ;;  %v1009_v47 = vld [vmem:[%s1346_s1 + $0x100] ss:$24 sps:$4 sm:$0xff]   ;;  %v1018_v51 = vld [vmem:[%s1346_s1 + $0x164] ss:$24 sps:$4 sm:$0xff]   ;;  %v241_v58 = vsub.s32 1, %v1229_v54 }
  0x16   : > { %v1006_v45 = vld [vmem:[%s1346_s1 + $0xd0] ss:$24 sps:$4 sm:$0xff]   ;;  %v1015_v48 = vld [vmem:[%s1346_s1 + $0x134] ss:$24 sps:$4 sm:$0xff]   ;;  %v1012_v49 = vld [vmem:[%s1139_s17 + $0x18] sm:$0xff]   ;;  %v249_v59 = vsub.s32 3, %v1229_v54 }
  0x17   : > { %v1013_v50 = vld [vmem:[%s1346_s1 + $0x130] ss:$24 sps:$4 sm:$0xff]   ;;  %v1016_v52 = vld [vmem:[%s1346_s1 + $0x160] ss:$24 sps:$4 sm:$0xff]  }
  0x18   : > { %538 = vmatpush1.bf16.msra.mxu0 %v971_v19  ;;  %611 = vmatpush1.bf16.msra.mxu1 %v972_v20  ;;  %v1236_v57 = vld [vmem:[%s1347_s2] sm:$0x3f] }
  0x19   : > { %539 = vmatprep.subr.bf16.mxu0 %v973_v21  ;;  %612 = vmatprep.subr.bf16.mxu1 %v975_v22  ;;  %v1242_v60 = vrot.slane %v1236_v57, %v237_v55  ;;  %v1245_v61 = vrot.slane %v1236_v57, %v245_v56  ;;  %v1248_v62 = vrot.slane %v1236_v57, %v241_v58  ;;  %v253_v55 = vsub.s32 4, %v1229_v54 }
  0x1a   : > { %v1251_v63 = vrot.slane %v1236_v57, %v249_v59 }
  0x1c   : > { %540 = vmatpush1.bf16.msra.mxu0 %v977_v23  ;;  %613 = vmatpush1.bf16.msra.mxu1 %v978_v24 }
  0x1d   : > { %541 = vmatprep.subr.bf16.mxu0 %v979_v25  ;;  %614 = vmatprep.subr.bf16.mxu1 %v981_v26 }
  0x20   : > { %542 = vmatpush1.bf16.msra.mxu0 %v983_v27  ;;  %615 = vmatpush1.bf16.msra.mxu1 %v984_v28 }
  0x21   : > { %543 = vmatprep.subr.bf16.mxu0 %v985_v29  ;;  %616 = vmatprep.subr.bf16.mxu1 %v987_v30 }
  0x24   : > { %544 = vmatpush1.bf16.msra.mxu0 %v989_v31  ;;  %617 = vmatpush1.bf16.msra.mxu1 %v990_v32 }
  0x25   : > { %675 = vmatprep.subr.bf16.mxu0 %v994_v33  ;;  %917 = vmatprep.subr.bf16.mxu1 %v994_v33 }
  0x27   : > { %562 = vmatmul.mubr.bf16.vlgmr.msra.gmra.mrb[0].mxu0 %v1166_v34  ;;  %635 = vmatmul.mubr.bf16.vlgmr.msra.gmra.mrb[0].mxu1 %v1166_v34 }
  0x28   : > { %676 = vmatpush1.bf16.msra.mxu0 %v992_v35  ;;  %925 = vmatpush1.bf16.msra.mxu1 %v992_v35 }
  0x29   : > { %677 = vmatprep.subr.bf16.mxu0 %v997_v36  ;;  %918 = vmatprep.subr.bf16.mxu1 %v997_v36 }
  0x2a   : > { %571 = vmatprep.mubr.bf16.mxu0 %v1027_v2  ;;  %644 = vmatprep.mubr.bf16.mxu1 %v1027_v2 }
  0x2c   : > { %678 = vmatpush1.bf16.msra.mxu0 %v995_v37  ;;  %926 = vmatpush1.bf16.msra.mxu1 %v995_v37 }
  0x2d   : > { %679 = vmatprep.subr.bf16.mxu0 %v1001_v38  ;;  %919 = vmatprep.subr.bf16.mxu1 %v1001_v38 }
  0x2f   : > { %572 = vmatmul.mubr.bf16.gmra.mrb[4].mxu0 %v998_v39  ;;  %645 = vmatmul.mubr.bf16.gmra.mrb[4].mxu1 %v998_v39 }
  0x30   : > { %680 = vmatpush1.bf16.msra.mxu0 %v999_v40  ;;  %927 = vmatpush1.bf16.msra.mxu1 %v999_v40 }
  0x31   : > { %681 = vmatprep.subr.bf16.mxu0 %v1004_v41  ;;  %920 = vmatprep.subr.bf16.mxu1 %v1004_v41 }
  0x32   : > { %581 = vmatprep.mubr.bf16.mxu0 %v1027_v2  ;;  %654 = vmatprep.mubr.bf16.mxu1 %v1027_v2 }
  0x34   : > { %682 = vmatpush1.bf16.msra.mxu0 %v1002_v42  ;;  %928 = vmatpush1.bf16.msra.mxu1 %v1002_v42 }
  0x35   : > { %683 = vmatprep.subr.bf16.mxu0 %v1008_v43  ;;  %921 = vmatprep.subr.bf16.mxu1 %v1008_v43 }
  0x37   : > { %582 = vmatmul.mubr.bf16.gmra.mrb[8].mxu0 %v1005_v44  ;;  %655 = vmatmul.mubr.bf16.gmra.mrb[8].mxu1 %v1005_v44 }
  0x38   : > { %684 = vmatpush1.bf16.msra.mxu0 %v1006_v45  ;;  %929 = vmatpush1.bf16.msra.mxu1 %v1006_v45 }
  0x39   : > { %685 = vmatprep.subr.bf16.mxu0 %v1011_v46  ;;  %922 = vmatprep.subr.bf16.mxu1 %v1011_v46 }
  0x3a   : > { %591 = vmatprep.mubr.bf16.mxu0 %v1027_v2  ;;  %664 = vmatprep.mubr.bf16.mxu1 %v1027_v2 }
  0x3c   : > { %686 = vmatpush1.bf16.msra.mxu0 %v1009_v47  ;;  %930 = vmatpush1.bf16.msra.mxu1 %v1009_v47 }
  0x3d   : > { %687 = vmatprep.subr.bf16.mxu0 %v1015_v48  ;;  %923 = vmatprep.subr.bf16.mxu1 %v1015_v48 }
  0x3f   : > { %592 = vmatmul.mubr.bf16.gmra.mrb[12].mxu0 %v1012_v49  ;;  %665 = vmatmul.mubr.bf16.gmra.mrb[12].mxu1 %v1012_v49 }
  0x40   : > { %688 = vmatpush1.bf16.msra.mxu0 %v1013_v50  ;;  %931 = vmatpush1.bf16.msra.mxu1 %v1013_v50 }
  0x41   : > { %689 = vmatprep.subr.bf16.mxu0 %v1018_v51  ;;  %924 = vmatprep.subr.bf16.mxu1 %v1018_v51 }
  0x42   : > { %707 = vmatprep.mubr.bf16.mxu0 %v1027_v2  ;;  %727 = vmatprep.mubr.bf16.mxu1 %v1027_v2 }
  0x44   : > { %690 = vmatpush1.bf16.msra.mxu0 %v1016_v52  ;;  %932 = vmatpush1.bf16.msra.mxu1 %v1016_v52 }
  0x47   : > { %708 = vmatmul.mubr.bf16.vlgmr.msra.gmra.mrb[16].mxu0 %v1166_v34  ;;  %728 = vmatmul.mubr.bf16.vlgmr.msra.gmra.mrb[16].mxu1 %v1005_v44 }
  0x48   : > { %717 = vmatprep.mubr.bf16.mxu0 %v1027_v2  ;;  %737 = vmatprep.mubr.bf16.mxu1 %v1027_v2 }
  0x4f   : > { %718 = vmatmul.mubr.bf16.gmra.mrb[20].mxu0 %v998_v39  ;;  %738 = vmatmul.mubr.bf16.gmra.mrb[20].mxu1 %v1012_v49 }
  0xfa   : > { %v563_v0 = vpop.f32.mrb[0].mxu0  ;;  %v636_v1 = vpop.f32.mrb[0].mxu1 }
  0xfb   : > { %v564_v2 = vadd.f32 %v563_v0, %v1242_v60  ;;  %v637_v3 = vadd.f32 %v636_v1, %v1245_v61  ;;  %v565_v4 = vpop.f32.mrb[1].mxu0  ;;  %v638_v5 = vpop.f32.mrb[1].mxu1  ;;  %v257_v1 = vsub.s32 5, %v1229_v54  ;;  %v254_v54 = vrot.slane %v1236_v57, %v253_v55 }
  0xfc   : > { %v566_v6 = vadd.f32 %v565_v4, %v1248_v62  ;;  %v639_v7 = vadd.f32 %v638_v5, %v1251_v63  ;;  %v567_v8 = vpop.f32.mrb[2].mxu0  ;;  %v640_v9 = vpop.f32.mrb[2].mxu1 }
  0xfd   : > { %748 = vst [vmem:[%s1256_s20] sm:$0xff] %v564_v2  ;;  %750 = vst [vmem:[%s1256_s20 + $0x10] sm:$0xff] %v637_v3  ;;  %v568_v10 = vadd.f32 %v567_v8, %v1242_v60  ;;  %v641_v11 = vadd.f32 %v640_v9, %v1245_v61  ;;  %v569_v12 = vpop.f32.mrb[3].mxu0  ;;  %v642_v13 = vpop.f32.mrb[3].mxu1 }
  0xfe   : > { %749 = vst [vmem:[%s1256_s20 + $0x8] sm:$0xff] %v566_v6  ;;  %751 = vst [vmem:[%s1256_s20 + $0x18] sm:$0xff] %v639_v7  ;;  %v570_v14 = vadd.f32 %v569_v12, %v1248_v62  ;;  %v643_v15 = vadd.f32 %v642_v13, %v1251_v63 }
  0xff   : > { %754 = vst [vmem:[%s1256_s20 + $0x30] sm:$0xff] %v568_v10  ;;  %756 = vst [vmem:[%s1256_s20 + $0x40] sm:$0xff] %v641_v11 }
 0x100   : > { %755 = vst [vmem:[%s1256_s20 + $0x38] sm:$0xff] %v570_v14  ;;  %757 = vst [vmem:[%s1256_s20 + $0x48] sm:$0xff] %v643_v15 }
 0x102   : > { %v573_v16 = vpop.f32.mrb[4].mxu0  ;;  %v646_v17 = vpop.f32.mrb[4].mxu1 }
 0x103   : > { %v574_v18 = vadd.f32 %v573_v16, %v1242_v60  ;;  %v647_v19 = vadd.f32 %v646_v17, %v1245_v61  ;;  %v575_v20 = vpop.f32.mrb[5].mxu0  ;;  %v648_v21 = vpop.f32.mrb[5].mxu1 }
 0x104   : > { %v576_v22 = vadd.f32 %v575_v20, %v1248_v62  ;;  %v649_v23 = vadd.f32 %v648_v21, %v1251_v63  ;;  %v577_v24 = vpop.f32.mrb[6].mxu0  ;;  %v650_v25 = vpop.f32.mrb[6].mxu1 }
 0x105   : > { %760 = vst [vmem:[%s1256_s20 + $0x60] sm:$0xff] %v574_v18  ;;  %762 = vst [vmem:[%s1256_s20 + $0x70] sm:$0xff] %v647_v19  ;;  %v578_v26 = vadd.f32 %v577_v24, %v1242_v60  ;;  %v651_v27 = vadd.f32 %v650_v25, %v1245_v61  ;;  %v579_v28 = vpop.f32.mrb[7].mxu0  ;;  %v652_v29 = vpop.f32.mrb[7].mxu1 }
 0x106   : > { %761 = vst [vmem:[%s1256_s20 + $0x68] sm:$0xff] %v576_v22  ;;  %763 = vst [vmem:[%s1256_s20 + $0x78] sm:$0xff] %v649_v23  ;;  %v580_v30 = vadd.f32 %v579_v28, %v1248_v62  ;;  %v653_v31 = vadd.f32 %v652_v29, %v1251_v63 }
 0x107   : > { %766 = vst [vmem:[%s1256_s20 + $0x90] sm:$0xff] %v578_v26  ;;  %768 = vst [vmem:[%s1256_s20 + $0xa0] sm:$0xff] %v651_v27 }
 0x108   : > { %767 = vst [vmem:[%s1256_s20 + $0x98] sm:$0xff] %v580_v30  ;;  %769 = vst [vmem:[%s1256_s20 + $0xa8] sm:$0xff] %v653_v31 }
 0x10a   : > { %v583_v32 = vpop.f32.mrb[8].mxu0  ;;  %v656_v33 = vpop.f32.mrb[8].mxu1 }
 0x10b   : > { %v584_v34 = vadd.f32 %v583_v32, %v1242_v60  ;;  %v657_v35 = vadd.f32 %v656_v33, %v1245_v61  ;;  %v585_v36 = vpop.f32.mrb[9].mxu0  ;;  %v658_v37 = vpop.f32.mrb[9].mxu1 }
 0x10c   : > { %v586_v38 = vadd.f32 %v585_v36, %v1248_v62  ;;  %v659_v39 = vadd.f32 %v658_v37, %v1251_v63  ;;  %v587_v40 = vpop.f32.mrb[10].mxu0  ;;  %v660_v41 = vpop.f32.mrb[10].mxu1 }
 0x10d   : > { %772 = vst [vmem:[%s1256_s20 + $0xc0] sm:$0xff] %v584_v34  ;;  %774 = vst [vmem:[%s1256_s20 + $0xd0] sm:$0xff] %v657_v35  ;;  %v588_v42 = vadd.f32 %v587_v40, %v1242_v60  ;;  %v661_v43 = vadd.f32 %v660_v41, %v1245_v61  ;;  %v589_v44 = vpop.f32.mrb[11].mxu0  ;;  %v662_v45 = vpop.f32.mrb[11].mxu1 }
 0x10e   : > { %773 = vst [vmem:[%s1256_s20 + $0xc8] sm:$0xff] %v586_v38  ;;  %775 = vst [vmem:[%s1256_s20 + $0xd8] sm:$0xff] %v659_v39  ;;  %v590_v46 = vadd.f32 %v589_v44, %v1248_v62  ;;  %v663_v47 = vadd.f32 %v662_v45, %v1251_v63 }
 0x10f   : > { %778 = vst [vmem:[%s1256_s20 + $0xf0] sm:$0xff] %v588_v42  ;;  %780 = vst [vmem:[%s1256_s20 + $0x100] sm:$0xff] %v661_v43 }
 0x110   : > { %779 = vst [vmem:[%s1256_s20 + $0xf8] sm:$0xff] %v590_v46  ;;  %781 = vst [vmem:[%s1256_s20 + $0x108] sm:$0xff] %v663_v47 }
 0x112   : > { %v593_v48 = vpop.f32.mrb[12].mxu0  ;;  %v666_v49 = vpop.f32.mrb[12].mxu1 }
 0x113   : > { %v594_v50 = vadd.f32 %v593_v48, %v1242_v60  ;;  %v667_v51 = vadd.f32 %v666_v49, %v1245_v61  ;;  %v595_v52 = vpop.f32.mrb[13].mxu0  ;;  %v668_v53 = vpop.f32.mrb[13].mxu1 }
 0x114   : > { %v596_v56 = vadd.f32 %v595_v52, %v1248_v62  ;;  %v669_v58 = vadd.f32 %v668_v53, %v1251_v63  ;;  %v597_v59 = vpop.f32.mrb[14].mxu0  ;;  %v670_v0 = vpop.f32.mrb[14].mxu1 }
 0x115   : > { %784 = vst [vmem:[%s1256_s20 + $0x120] sm:$0xff] %v594_v50  ;;  %786 = vst [vmem:[%s1256_s20 + $0x130] sm:$0xff] %v667_v51  ;;  %v598_v2 = vadd.f32 %v597_v59, %v1242_v60  ;;  %v671_v3 = vadd.f32 %v670_v0, %v1245_v61  ;;  %v599_v4 = vpop.f32.mrb[15].mxu0  ;;  %v672_v5 = vpop.f32.mrb[15].mxu1  ;;  %v258_v60 = vrot.slane %v1236_v57, %v257_v1 }
 0x116   : > { %785 = vst [vmem:[%s1256_s20 + $0x128] sm:$0xff] %v596_v56  ;;  %787 = vst [vmem:[%s1256_s20 + $0x138] sm:$0xff] %v669_v58  ;;  %v600_v6 = vadd.f32 %v599_v4, %v1248_v62  ;;  %v673_v7 = vadd.f32 %v672_v5, %v1251_v63 }
 0x117   : > { %790 = vst [vmem:[%s1256_s20 + $0x150] sm:$0xff] %v598_v2  ;;  %792 = vst [vmem:[%s1256_s20 + $0x160] sm:$0xff] %v671_v3 }
 0x118   : > { %791 = vst [vmem:[%s1256_s20 + $0x158] sm:$0xff] %v600_v6  ;;  %793 = vst [vmem:[%s1256_s20 + $0x168] sm:$0xff] %v673_v7 }
 0x11a   : > { %v709_v8 = vpop.f32.mrb[16].mxu0  ;;  %v729_v61 = vpop.f32.mrb[16].mxu1 }
 0x11b   : > { %v710_v9 = vadd.f32 %v709_v8, %v254_v54  ;;  %v730_v10 = vadd.f32 %v729_v61, %v254_v54  ;;  %v711_v11 = vpop.f32.mrb[17].mxu0  ;;  %v731_v62 = vpop.f32.mrb[17].mxu1 }
 0x11c   : > { %v712_v63 = vadd.f32 %v711_v11, %v258_v60  ;;  %v732_v12 = vadd.f32 %v731_v62, %v258_v60  ;;  %v713_v13 = vpop.f32.mrb[18].mxu0  ;;  %v733_v14 = vpop.f32.mrb[18].mxu1 }
 0x11d   : > { %752 = vst [vmem:[%s1256_s20 + $0x20] sm:$0xff] %v710_v9  ;;  %776 = vst [vmem:[%s1256_s20 + $0xe0] sm:$0xff] %v730_v10  ;;  %v714_v15 = vadd.f32 %v713_v13, %v254_v54  ;;  %v734_v57 = vadd.f32 %v733_v14, %v254_v54  ;;  %v715_v16 = vpop.f32.mrb[19].mxu0  ;;  %v735_v17 = vpop.f32.mrb[19].mxu1 }
 0x11e   : > { %753 = vst [vmem:[%s1256_s20 + $0x28] sm:$0xff] %v712_v63  ;;  %777 = vst [vmem:[%s1256_s20 + $0xe8] sm:$0xff] %v732_v12  ;;  %v716_v18 = vadd.f32 %v715_v16, %v258_v60  ;;  %v736_v19 = vadd.f32 %v735_v17, %v258_v60 }
 0x11f   : > { %758 = vst [vmem:[%s1256_s20 + $0x50] sm:$0xff] %v714_v15  ;;  %782 = vst [vmem:[%s1256_s20 + $0x110] sm:$0xff] %v734_v57 }
 0x120   : > { %759 = vst [vmem:[%s1256_s20 + $0x58] sm:$0xff] %v716_v18  ;;  %783 = vst [vmem:[%s1256_s20 + $0x118] sm:$0xff] %v736_v19 }
 0x122   : > { %v719_v20 = vpop.f32.mrb[20].mxu0  ;;  %v739_v21 = vpop.f32.mrb[20].mxu1 }
 0x123   : > { %v720_v22 = vadd.f32 %v719_v20, %v254_v54  ;;  %v740_v23 = vadd.f32 %v739_v21, %v254_v54  ;;  %v721_v24 = vpop.f32.mrb[21].mxu0  ;;  %v741_v25 = vpop.f32.mrb[21].mxu1 }
 0x124   : > { %v722_v26 = vadd.f32 %v721_v24, %v258_v60  ;;  %v742_v27 = vadd.f32 %v741_v25, %v258_v60  ;;  %v723_v28 = vpop.f32.mrb[22].mxu0  ;;  %v743_v29 = vpop.f32.mrb[22].mxu1 }
 0x125   : > { %764 = vst [vmem:[%s1256_s20 + $0x80] sm:$0xff] %v720_v22  ;;  %788 = vst [vmem:[%s1256_s20 + $0x140] sm:$0xff] %v740_v23  ;;  %v724_v30 = vadd.f32 %v723_v28, %v254_v54  ;;  %v744_v31 = vadd.f32 %v743_v29, %v254_v54  ;;  %v725_v32 = vpop.f32.mrb[23].mxu0  ;;  %v745_v33 = vpop.f32.mrb[23].mxu1 }
 0x126   : > { %765 = vst [vmem:[%s1256_s20 + $0x88] sm:$0xff] %v722_v26  ;;  %789 = vst [vmem:[%s1256_s20 + $0x148] sm:$0xff] %v742_v27  ;;  %v726_v34 = vadd.f32 %v725_v32, %v258_v60  ;;  %v746_v35 = vadd.f32 %v745_v33, %v258_v60 }
 0x127   : > { %770 = vst [vmem:[%s1256_s20 + $0xb0] sm:$0xff] %v724_v30  ;;  %794 = vst [vmem:[%s1256_s20 + $0x170] sm:$0xff] %v744_v31 }
 0x128   : > { %771 = vst [vmem:[%s1256_s20 + $0xb8] sm:$0xff] %v726_v34  ;;  %795 = vst [vmem:[%s1256_s20 + $0x178] sm:$0xff] %v746_v35 }
 0x129 PF: > { %s13_s12 = sadd.s32 1, %s1025_s12  }
 0x12a   : > { %p10_p4 = scmp.ge.s32.totalorder %s13_s12, 4  }
 0x12c   :  { %12 = sbr.rel (!%p10_p4) target bundleno = 1 (0x1), region = 62 }

// kernel: _lambda_.4
= control target key start
LH: loop header
LB: loop body
LE: loop exit
PB: predicated region body
PF: predicated region fallthrough
CT: control target
= control target key end

     0   :  { %s2032_s18 = smov 0   ;;  %s2034_s19 = smov 0   ;;  %s2764_s0 = inlined_call_operand.vmem [shape: s32[8,1], index: 0, kind: input, shape index: {}]   ;;  %s2765_s1 = inlined_call_operand.vmem [shape: f32[128,768], index: 1, kind: input, shape index: {}]   ;;  %s2766_s2 = inlined_call_operand.vmem [shape: bf16[128,384], index: 2, kind: input, shape index: {}]   ;;  %s2767_s3 = inlined_call_operand.vmem [shape: f32[1,384], index: 3, kind: input, shape index: {}]   ;;  %s2768_s4 = inlined_call_operand.vmem [shape: f32[128,128], index: 4, kind: output, shape index: {0}]   ;;  %s2769_s5 = inlined_call_operand.vmem [shape: f32[8,128], index: 5, kind: output, shape index: {1}]  }
   0x1   :  { %s2036_s20 = smov 0  }
   0x2 LB: > { %s1498_s21 = sadd.s32 4294967295, %s1996_s20   ;;  %s2049_s22 = sadd.s32 1, %s1996_s20   ;;  %s1996_s20 = sphi %s2036_s20, %s2772_s20   ;;  %s1992_s19 = sphi %s2034_s19, %s2771_s19   ;;  %s1988_s18 = sphi %s2032_s18, %s2770_s18  }
   0x3   : > { %s41_s23 = ssub.s32 1, %s1996_s20  ;;  %s42_s24 = ssub.s32 1, %s2049_s22 }
   0x4   : > { %s43_s25 = ssub.s32 %s41_s23, %s42_s24  ;;  %s46_s26 = sadd.s32 1, %s1992_s19 }
   0x5   : > { %p44_p0 = scmp.eq.s32.totalorder %s43_s25, 0  ;;  %p53_p1 = scmp.ne.s32.totalorder %s1992_s19, %s1988_s18 }
   0x6   : > { %p54_p2 = scmp.eq.s32.totalorder %s1996_s20, 0  ;;  %p1501_p4 = scmp.ge.s32.totalorder %s1996_s20, 2 }
   0x7   : > { %s2058_s27 = scalar_select %p44_p0, %s1992_s19, %s46_s26  }
   0x8   : > { %p55_p3 = por %p54_p2, %p53_p1  ;;  %179 = sbr.rel (%p1501_p4) target bundleno = 32 (0x20), region = 28 }
   0xf   : > { %182 = sbr.rel (!%p55_p3) target bundleno = 32 (0x20), region = 32  ;;  %s184_s28 = sand.u32 (%p55_p3), 1, %s1992_s19  }
  0x10   : > { %s1502_s29 = smul.u32 (%p55_p3), 384, %s41_s23 }
  0x11   : > { %s1806_s30 = smul.u32 (%p55_p3), 192, %s184_s28 }
  0x12   : > { %s2065_s8 = scalar_lea.vmem (%p55_p3), %s2765_s1, %s1502_s29 }
  0x13   : > { %v1503_v0 = vld [vmem:[%s2065_s8 + $0x18] sm:$0xff] (%p55_p3)  ;;  %v1504_v1 = vld [vmem:[%s2065_s8 + $0x20] sm:$0xff] (%p55_p3)  ;;  %v1505_v2 = vld [vmem:[%s2065_s8 + $0x28] sm:$0xff] (%p55_p3)  ;;  %s2070_s9 = scalar_lea.vmem (%p55_p3), [#allocation2], %s1806_s30 }
  0x14   : > { %206 = vst [vmem:[%s2070_s9] sm:$0xff] (%p55_p3), %v1503_v0  ;;  %208 = vst [vmem:[%s2070_s9 + $0x8] sm:$0xff] (%p55_p3), %v1504_v1  ;;  %v1506_v3 = vld [vmem:[%s2065_s8 + $0x48] sm:$0xff] (%p55_p3)  ;;  %v1507_v4 = vld [vmem:[%s2065_s8 + $0x50] sm:$0xff] (%p55_p3) }
  0x15   : > { %210 = vst [vmem:[%s2070_s9 + $0x10] sm:$0xff] (%p55_p3), %v1505_v2  ;;  %v1508_v5 = vld [vmem:[%s2065_s8 + $0x58] sm:$0xff] (%p55_p3)  ;;  %212 = vst [vmem:[%s2070_s9 + $0x18] sm:$0xff] (%p55_p3), %v1506_v3  ;;  %v1510_v7 = vld [vmem:[%s2065_s8 + $0x80] sm:$0xff] (%p55_p3) }
  0x16   : > { %214 = vst [vmem:[%s2070_s9 + $0x20] sm:$0xff] %v1507_v4  ;;  %216 = vst [vmem:[%s2070_s9 + $0x28] sm:$0xff] %v1508_v5  ;;  %v1509_v6 = vld [vmem:[%s2065_s8 + $0x78] sm:$0xff]  ;;  %v1511_v8 = vld [vmem:[%s2065_s8 + $0x88] sm:$0xff] }
  0x17   : > { %218 = vst [vmem:[%s2070_s9 + $0x30] sm:$0xff] %v1509_v6  ;;  %220 = vst [vmem:[%s2070_s9 + $0x38] sm:$0xff] %v1510_v7  ;;  %v1512_v9 = vld [vmem:[%s2065_s8 + $0xa8] sm:$0xff]  ;;  %v1513_v10 = vld [vmem:[%s2065_s8 + $0xb0] sm:$0xff] }
  0x18   : > { %222 = vst [vmem:[%s2070_s9 + $0x40] sm:$0xff] %v1511_v8  ;;  %v1514_v11 = vld [vmem:[%s2065_s8 + $0xb8] sm:$0xff]  ;;  %224 = vst [vmem:[%s2070_s9 + $0x48] sm:$0xff] %v1512_v9  ;;  %v1516_v13 = vld [vmem:[%s2065_s8 + $0xe0] sm:$0xff] }
  0x19   : > { %226 = vst [vmem:[%s2070_s9 + $0x50] sm:$0xff] %v1513_v10  ;;  %228 = vst [vmem:[%s2070_s9 + $0x58] sm:$0xff] %v1514_v11  ;;  %v1515_v12 = vld [vmem:[%s2065_s8 + $0xd8] sm:$0xff]  ;;  %v1517_v14 = vld [vmem:[%s2065_s8 + $0xe8] sm:$0xff] }
  0x1a   : > { %230 = vst [vmem:[%s2070_s9 + $0x60] sm:$0xff] %v1515_v12  ;;  %232 = vst [vmem:[%s2070_s9 + $0x68] sm:$0xff] %v1516_v13  ;;  %v1518_v15 = vld [vmem:[%s2065_s8 + $0x108] sm:$0xff]  ;;  %v1519_v16 = vld [vmem:[%s2065_s8 + $0x110] sm:$0xff] }
  0x1b   : > { %234 = vst [vmem:[%s2070_s9 + $0x70] sm:$0xff] %v1517_v14  ;;  %v1520_v17 = vld [vmem:[%s2065_s8 + $0x118] sm:$0xff]  ;;  %236 = vst [vmem:[%s2070_s9 + $0x78] sm:$0xff] %v1518_v15  ;;  %v1522_v19 = vld [vmem:[%s2065_s8 + $0x140] sm:$0xff] }
  0x1c   : > { %238 = vst [vmem:[%s2070_s9 + $0x80] sm:$0xff] %v1519_v16  ;;  %240 = vst [vmem:[%s2070_s9 + $0x88] sm:$0xff] %v1520_v17  ;;  %v1521_v18 = vld [vmem:[%s2065_s8 + $0x138] sm:$0xff]  ;;  %v1523_v20 = vld [vmem:[%s2065_s8 + $0x148] sm:$0xff] }
  0x1d   : > { %242 = vst [vmem:[%s2070_s9 + $0x90] sm:$0xff] %v1521_v18  ;;  %244 = vst [vmem:[%s2070_s9 + $0x98] sm:$0xff] %v1522_v19  ;;  %v1524_v21 = vld [vmem:[%s2065_s8 + $0x168] sm:$0xff]  ;;  %v1525_v22 = vld [vmem:[%s2065_s8 + $0x170] sm:$0xff] }
  0x1e   : > { %246 = vst [vmem:[%s2070_s9 + $0xa0] sm:$0xff] %v1523_v20  ;;  %v1526_v23 = vld [vmem:[%s2065_s8 + $0x178] sm:$0xff]  ;;  %248 = vst [vmem:[%s2070_s9 + $0xa8] sm:$0xff] %v1524_v21 }
  0x1f   : > { %250 = vst [vmem:[%s2070_s9 + $0xb0] sm:$0xff] %v1525_v22  ;;  %252 = vst [vmem:[%s2070_s9 + $0xb8] sm:$0xff] %v1526_v23 }
  0x20 PF: > { %p1527_p5 = scmp.ge.s32.totalorder %s1996_s20, 1  ;;  %p257_p6 = scmp.lt.s32.totalorder %s1996_s20, 3 }
  0x22   : > { %p258_p7 = pnand %p1527_p5, %p257_p6 }
  0x23   : > { %s264_s10 = sand.u32 (!%p258_p7), 1, %s1988_s18   ;;  %s294_s11 = ssub.s32 (!%p258_p7), 1, %s1498_s21 }
  0x24   : > { %261 = sbr.rel (%p258_p7) target bundleno = 2196 (0x894), region = 55  ;;  %s2122_s13 = sshll.u32 (!%p258_p7), %s294_s11, 3 }
  0x25   : > { %s1807_s12 = smul.u32 (!%p258_p7), 192, %s264_s10  ;;  %p296_p8 = scmp.lt.s32.totalorder (!%p258_p7), %s2122_s13, 15 }
  0x26   : > { %p1530_p9 = scmp.ne.s32.totalorder (!%p258_p7), %s1498_s21, 0 }
  0x27   : > { %s2131_s24 = scalar_lea.vmem (!%p258_p7), [#allocation2], %s1807_s12 }
  0x2b   : > { %s297_s14 = scalar_select %p296_p8, %s2122_s13, 15 }
  0x2c   : > { %306 = sbr.rel (%p1530_p9) target bundleno = 51 (0x33), region = 63  ;;  %v1998_v24 = vmov (!%p1530_p9), 0.0  }
  0x2d   : > { %s1529_s15 = sshll.u32 %s297_s14, 3  ;;  %307 = vst [vmem:[%s2769_s5] sm:$0xff] (!%p1530_p9), %v1998_v24 }
  0x2e   : > { %s2129_s23 = scalar_lea.vmem %s2768_s4, %s1529_s15 }
  0x33 PF: > { %v2141_v25 = vld [vmem:[%s2766_s2 + $0x4] ss:$12 sps:$4 sm:$0xff]   ;;  %v2146_v26 = vld [vmem:[%s2766_s2] ss:$12 sps:$4 sm:$0xff]   ;;  %v1999_v27 = vmov 0.0   ;;  %v2000_v28 = vmov 0   ;;  %v353_v62 = vlaneseq }
  0x34   : > { %1646 = vmatprep.subr.bf16.mxu1 %v1999_v27  ;;  %528 = vmatprep.mubr.bf16.mxu0 %v2000_v28  ;;  %v2154_v29 = vld [vmem:[%s2766_s2 + $0x1c] ss:$12 sps:$4 sm:$0xff]   ;;  %vm2001_vm0 = vmmov 0   ;;  %v2162_v30 = vld [vmem:[%s2766_s2 + $0x18] ss:$12 sps:$4 sm:$0xff]   ;;  %s345_s30 = sadd.s32 7, %s2122_s13 }
  0x35   : > { %496 = vmatprep.subr.bf16.mxu0 %v2141_v25  ;;  %1662 = vmatprep.mubr.msk.bf16.mxu1 %vm2001_vm0, %v1999_v27  ;;  %v2169_v31 = vld [vmem:[%s2766_s2 + $0x34] ss:$12 sps:$4 sm:$0xff]   ;;  %v2176_v32 = vld [vmem:[%s2766_s2 + $0x30] ss:$12 sps:$4 sm:$0xff]   ;;  %v2182_v33 = vld [vmem:[%s2766_s2 + $0x4c] ss:$12 sps:$4 sm:$0xff]   ;;  %v346_v41 = vstv %s345_s30 }
  0x36   : > { %497 = vmatpush1.bf16.msra.mxu0 %v2146_v26  ;;  %1836 = vset.pattern.permute.xlu0 %v2000_v28  ;;  %v2187_v34 = vld [vmem:[%s2766_s2 + $0x8] ss:$12 sps:$4 sm:$0xff]   ;;  %v2199_v36 = vld [vmem:[%s2766_s2 + $0x64] ss:$12 sps:$4 sm:$0xff]   ;;  %v2205_v37 = vld [vmem:[%s2766_s2 + $0x20] ss:$12 sps:$4 sm:$0xff]  }
  0x37   : > { %498 = vmatprep.subr.bf16.mxu0 %v2154_v29  ;;  %1837 = vset.pattern.permute.xlu1 %v2000_v28  ;;  %v2193_v35 = vld [vmem:[%s2766_s2 + $0x48] ss:$12 sps:$4 sm:$0xff]   ;;  %s606_s20 = sadd.s32 6, %s2122_s13  ;;  %v2213_v38 = vld [vmem:[%s2766_s2 + $0x60] ss:$12 sps:$4 sm:$0xff]   ;;  %s957_s11 = sadd.s32 3, %s2122_s13 }
  0x38   : > { %1647 = vmatpush3.bf16.msra.mxu1 %v2187_v34  ;;  %v2219_v39 = vld [vmem:[%s2766_s2 + $0x7c] ss:$12 sps:$4 sm:$0xff]   ;;  %v2226_v40 = vld [vmem:[%s2766_s2 + $0x38] ss:$12 sps:$4 sm:$0xff]   ;;  %v607_v42 = vstv %s606_s20  ;;  %v2245_v45 = vld [vmem:[%s2766_s2 + $0x94] ss:$12 sps:$4 sm:$0xff]  }
  0x39   : > { %1648 = vmatprep.subr.bf16.mxu1 %v1999_v27  ;;  %v2234_v43 = vld [vmem:[%s2766_s2 + $0x78] ss:$12 sps:$4 sm:$0xff]   ;;  %v2251_v46 = vld [vmem:[%s2766_s2 + $0x50] ss:$12 sps:$4 sm:$0xff]   ;;  %v958_v48 = vstv %s957_s11  ;;  %s1191_s28 = sadd.s32 1, %s2122_s13  ;;  %v354_v63 = vshrl.u32 %v353_v62, 7 }
  0x3a   : > { %499 = vmatpush1.bf16.msra.mxu0 %v2162_v30  ;;  %v2239_v44 = vld [vmem:[%s2764_s0] sm:$0xff]  ;;  %v2262_v49 = vld [vmem:[%s2766_s2 + $0x90] ss:$12 sps:$4 sm:$0xff]   ;;  %v2269_v51 = vld [vmem:[%s2766_s2 + $0xac] ss:$12 sps:$4 sm:$0xff]   ;;  %v1192_v53 = vstv %s1191_s28  ;;  %s723_s28 = sadd.s32 5, %s2122_s13 }
  0x3b   : > { %500 = vmatprep.subr.bf16.mxu0 %v2169_v31  ;;  %vm347_vm1 = vcmp.gt.s32.totalorder %v2239_v44, %v346_v41  ;;  %vm608_vm2 = vcmp.gt.s32.totalorder %v2239_v44, %v607_v42  ;;  %v2275_v52 = vld [vmem:[%s2766_s2 + $0x68] ss:$12 sps:$4 sm:$0xff]   ;;  %vm959_vm3 = vcmp.gt.s32.totalorder %v2239_v44, %v958_v48  ;;  %v2288_v55 = vld [vmem:[%s2769_s5] sm:$0xff]  ;;  %vm1193_vm4 = vcmp.gt.s32.totalorder %v2239_v44, %v1192_v53  ;;  %v2318_v61 = vld [vmem:[%s2766_s2 + $0xb0] ss:$12 sps:$4 sm:$0xff]   ;;  %s840_s29 = sadd.s32 4, %s2122_s13 }
  0x3c   : > { %1649 = vmatpush3.bf16.msra.mxu1 %v2205_v37  ;;  %v598_v47 = vsel %vm347_vm1, 1, %v2000_v28  ;;  %v715_v50 = vsel %vm608_vm2, 1, %v2000_v28  ;;  %v2283_v54 = vld [vmem:[%s2766_s2 + $0xa8] ss:$12 sps:$4 sm:$0xff]   ;;  %v1066_v56 = vsel %vm959_vm3, 1, %v2000_v28  ;;  %v351_v58 = vpack.c.bf16 %v2288_v55, %v2288_v55  ;;  %s1074_s30 = sadd.s32 2, %s2122_s13 }
  0x3d   : > { %1650 = vmatprep.subr.bf16.mxu1 %v1999_v27  ;;  %600 = vperm.xlu0 %1836, %v598_v47   ;;  %v2296_v57 = vld [vmem:[%s2766_s2 + $0x80] ss:$12 sps:$4 sm:$0xff]   ;;  %v1300_v59 = vsel %vm1193_vm4, 1, %v2000_v28  ;;  %v2308_v60 = vld [vmem:[%s2766_s2 + $0x98] ss:$12 sps:$4 sm:$0xff]   ;;  %v355_v0 = vsub.s32 0, %v354_v63 }
  0x3e   : > { %501 = vmatpush1.bf16.msra.mxu0 %v2176_v32  ;;  %v341_v1 = vld [vmem:[%s2767_s3] sm:$0x7]  ;;  %v359_v2 = vsub.s32 1, %v354_v63  ;;  %v348_v5 = vld [vmem:[%s2131_s24 + $0xa8] sm:$0xff]  ;;  %v349_v12 = vld [vmem:[%s2131_s24 + $0xb0] sm:$0xff]  ;;  %v363_v23 = vsub.s32 2, %v354_v63 }
  0x3f   : > { %502 = vmatprep.subr.bf16.mxu0 %v2182_v33  ;;  %v2359_v3 = vrot.slane %v341_v1, %v355_v0 }
  0x40   : > { %1651 = vmatpush3.bf16.msra.mxu1 %v2226_v40  ;;  %v2361_v4 = vrot.slane %v341_v1, %v359_v2  ;;  %v2367_v24 = vrot.slane %v341_v1, %v363_v23 }
  0x41   : > { %1652 = vmatprep.subr.bf16.mxu1 %v1999_v27  ;;  %717 = vperm.xlu0 %1836, %v715_v50   ;;  %v350_v50 = vld [vmem:[%s2131_s24 + $0xb8] sm:$0xff] }
  0x42   : > { %503 = vmatpush1.bf16.msra.mxu0 %v2193_v35 }
  0x43   : > { %504 = vmatprep.subr.bf16.mxu0 %v2199_v36 }
  0x44   : > { %1653 = vmatpush3.bf16.msra.mxu1 %v2251_v46 }
  0x45   : > { %1654 = vmatprep.subr.bf16.mxu1 %v1999_v27  ;;  %1068 = vperm.xlu0 %1836, %v1066_v56  }
  0x46   : > { %505 = vmatpush1.bf16.msra.mxu0 %v2213_v38 }
  0x47   : > { %506 = vmatprep.subr.bf16.mxu0 %v2219_v39 }
  0x48   : > { %1655 = vmatpush3.bf16.msra.mxu1 %v2275_v52 }
  0x49   : > { %1656 = vmatprep.subr.bf16.mxu1 %v1999_v27  ;;  %1302 = vperm.xlu0 %1836, %v1300_v59  }
  0x4a   : > { %507 = vmatpush1.bf16.msra.mxu0 %v2234_v43 }
  0x4b   : > { %508 = vmatprep.subr.bf16.mxu0 %v2245_v45 }
  0x4c   : > { %1657 = vmatpush3.bf16.msra.mxu1 %v2296_v57 }
  0x4d   : > { %1658 = vmatprep.subr.bf16.mxu1 %v1999_v27 }
  0x4e   : > { %509 = vmatpush1.bf16.msra.mxu0 %v2262_v49 }
  0x4f   : > { %510 = vmatprep.subr.bf16.mxu0 %v2269_v51 }
  0x50   : > { %1659 = vmatpush3.bf16.msra.mxu1 %v2308_v60 }
  0x51   : > { %1660 = vmatprep.subr.bf16.mxu1 %v1999_v27 }
  0x52   : > { %511 = vmatpush1.bf16.msra.mxu0 %v2283_v54 }
  0x53   : > { %613 = vmatprep.subr.bf16.mxu0 %v2141_v25 }
  0x54   : > { %1661 = vmatpush3.bf16.msra.mxu1 %v2318_v61 }
  0x55   : > { %529 = vmatmul.mubr.bf16.vlgmr.msra.gmra.mrb[0].mxu0 %v351_v58  ;;  %1666 = vmatprep.subr.bf16.mxu1 %v1999_v27 }
  0x56   : > { %614 = vmatpush1.bf16.msra.mxu0 %v2146_v26  ;;  %645 = vmatprep.mubr.bf16.mxu0 %v2000_v28 }
  0x57   : > { %615 = vmatprep.subr.bf16.mxu0 %v2154_v29  ;;  %1663 = vmatmul.mubr.bf16.vlgmr.msra.gmra.mrb[0].mxu1 %v351_v58 }
  0x58   : > { %1667 = vmatpush3.bf16.msra.mxu1 %v2187_v34  ;;  %1682 = vmatprep.mubr.msk.bf16.mxu1 %vm2001_vm0, %v1999_v27 }
  0x59   : > { %1668 = vmatprep.subr.bf16.mxu1 %v1999_v27 }
  0x5a   : > { %616 = vmatpush1.bf16.msra.mxu0 %v2162_v30 }
  0x5b   : > { %617 = vmatprep.subr.bf16.mxu0 %v2169_v31 }
  0x5c   : > { %1669 = vmatpush3.bf16.msra.mxu1 %v2205_v37 }
  0x5d   : > { %1670 = vmatprep.subr.bf16.mxu1 %v1999_v27 }
  0x5e   : > { %618 = vmatpush1.bf16.msra.mxu0 %v2176_v32 }
  0x5f   : > { %619 = vmatprep.subr.bf16.mxu0 %v2182_v33 }
  0x60   : > { %1671 = vmatpush3.bf16.msra.mxu1 %v2226_v40 }
  0x61   : > { %1672 = vmatprep.subr.bf16.mxu1 %v1999_v27 }
  0x62   : > { %620 = vmatpush1.bf16.msra.mxu0 %v2193_v35 }
  0x63   : > { %621 = vmatprep.subr.bf16.mxu0 %v2199_v36 }
  0x64   : > { %1673 = vmatpush3.bf16.msra.mxu1 %v2251_v46 }
  0x65   : > { %1674 = vmatprep.subr.bf16.mxu1 %v1999_v27 }
  0x66   : > { %622 = vmatpush1.bf16.msra.mxu0 %v2213_v38 }
  0x67   : > { %623 = vmatprep.subr.bf16.mxu0 %v2219_v39 }
  0x68   : > { %1675 = vmatpush3.bf16.msra.mxu1 %v2275_v52 }
  0x69   : > { %1676 = vmatprep.subr.bf16.mxu1 %v1999_v27 }
  0x6a   : > { %624 = vmatpush1.bf16.msra.mxu0 %v2234_v43 }
  0x6b   : > { %625 = vmatprep.subr.bf16.mxu0 %v2245_v45 }
  0x6c   : > { %1677 = vmatpush3.bf16.msra.mxu1 %v2296_v57 }
  0x6d   : > { %1678 = vmatprep.subr.bf16.mxu1 %v1999_v27 }
  0x6e   : > { %626 = vmatpush1.bf16.msra.mxu0 %v2262_v49 }
  0x6f   : > { %627 = vmatprep.subr.bf16.mxu0 %v2269_v51 }
  0x70   : > { %1679 = vmatpush3.bf16.msra.mxu1 %v2308_v60 }
  0x71   : > { %1680 = vmatprep.subr.bf16.mxu1 %v1999_v27 }
  0x72   : > { %628 = vmatpush1.bf16.msra.mxu0 %v2283_v54 }
  0x73   : > { %730 = vmatprep.subr.bf16.mxu0 %v2141_v25 }
  0x74   : > { %1681 = vmatpush3.bf16.msra.mxu1 %v2318_v61 }
  0x75   : > { %1686 = vmatprep.subr.bf16.mxu1 %v1999_v27 }
  0xbc   : > { %v601_v2 = vpop.permute.xlu0 %600 }
  0xbd   : > { %vm602_vm5 = vcmp.eq.s32.totalorder %v601_v2, 1  ;;  %v611_v2 = vld [vmem:[%s2131_s24 + $0xa0] sm:$0xff] }
 0x128   : > { %v530_v6 = vpop.f32.mrb[0].mxu0 }
 0x129   : > { %v531_v7 = vadd.f32 %v530_v6, %v2359_v3  ;;  %v532_v8 = vpop.f32.mrb[1].mxu0 }
 0x12a   : > { %v533_v9 = vadd.f32 %v532_v8, %v2361_v4  ;;  %v534_v10 = vpop.f32.mrb[2].mxu0  ;;  %v571_v16 = vpop.f32.mrb[0].mxu1  ;;  %v841_v8 = vstv %s840_s29 }
 0x12b   : > { %v577_v11 = vadd.f32 %v531_v7, %v348_v5  ;;  %v535_v13 = vpop.f32.mrb[3].mxu0  ;;  %v1664_v18 = vpop.f32.mrb[1].mxu1  ;;  %v572_v47 = vadd.f32 %v571_v16, %v2367_v24  ;;  %vm842_vm7 = vcmp.gt.s32.totalorder %v2239_v44, %v841_v8  ;;  %v1075_v10 = vstv %s1074_s30 }
 0x12c   : > { %v584_v15 = vadd.f32 %v533_v9, %v349_v12  ;;  %v574_v19 = vpop.f32.mrb[2].mxu1  ;;  %vm1076_vm8 = vcmp.gt.s32.totalorder %v2239_v44, %v1075_v10  ;;  %v1308_v12 = vstv %s2122_s13 }
 0x12d   : > { %v1556_v14 = vmul.f32 -1.442695, %v577_v11  ;;  %v1665_v20 = vpop.f32.mrb[3].mxu1  ;;  %v949_v11 = vsel %vm842_vm7, 1, %v2000_v28  ;;  %v1183_v13 = vsel %vm1076_vm8, 1, %v2000_v28  ;;  %vm1309_vm9 = vcmp.gt.s32.totalorder %v2239_v44, %v1308_v12 }
 0x12e   : > { %v1557_v17 = vmul.f32 -1.442695, %v584_v15  ;;  %v609_v15 = vld [vmem:[%s2131_s24 + $0x90] sm:$0xff] }
 0x12f   : > { %1870 = vpow2.f32 %v1556_v14  ;;  %v1416_v14 = vsel %vm1309_vm9, 1, %v2000_v28 }
 0x130   : > { %1872 = vpow2.f32 %v1557_v17 }
 0x139   : > { %v1871_v21 = vpop.eup %1870 }
 0x13a   : > { %v581_v22 = vadd.f32 1.0, %v1871_v21  ;;  %v1873_v41 = vpop.eup %1872 }
 0x13b   : > { %v588_v42 = vadd.f32 1.0, %v1873_v41 }
 0x13c   : > { %1874 = vrcp.f32 %v581_v22 }
 0x13d   : > { %1876 = vrcp.f32 %v588_v42  ;;  %v610_v42 = vld [vmem:[%s2131_s24 + $0x98] sm:$0xff] }
 0x146   : > { %v1875_v48 = vpop.eup %1874 }
 0x147   : > { %v591_v53 = vmul.f32 %v1875_v48, %v572_v47  ;;  %v1877_v58 = vpop.eup %1876 }
 0x148   : > { %v594_v59 = vsub.f32 1.0, %v1877_v58  ;;  %v596_v63 = vmul.f32 %v1877_v58, %v2288_v55 }
 0x149   : > { %v592_v56 = vadd.f32 %v591_v53, %v350_v50 }
 0x14b   : > { %1878 = vtanh.f32 %v592_v56 }
 0x155   : > { %v1879_v62 = vpop.eup %1878 }
 0x156   : > { %v595_v0 = vmul.f32 %v1879_v62, %v594_v59 }
 0x158   : > { %v597_v1 = vadd.f32 %v596_v63, %v595_v0 }
 0x15a   : > { %v2373_v5 = vsel %vm602_vm5, %v597_v1, %v2288_v55  ;;  %v604_v6 = vsel %vm602_vm5, %v597_v1, 0.0  ;;  %v724_v55 = vstv %s723_s28 }
 0x15b   : > { %605 = vst [vmem:[%s2129_s23 + $0x38] sm:$0xff] %v604_v6  ;;  %v612_v7 = vpack.c.bf16 %v2373_v5, %v2373_v5  ;;  %vm725_vm6 = vcmp.gt.s32.totalorder %v2239_v44, %v724_v55 }
 0x15c   : > { %v832_v9 = vsel %vm725_vm6, 1, %v2000_v28 }
 0x15d   : > { %646 = vmatmul.mubr.bf16.vlgmr.msra.gmra.mrb[4].mxu0 %v612_v7  ;;  %1683 = vmatmul.mubr.bf16.vlgmr.msra.gmra.mrb[4].mxu1 %v612_v7 }
 0x15e   : > { %731 = vmatpush1.bf16.msra.mxu0 %v2146_v26  ;;  %1687 = vmatpush3.bf16.msra.mxu1 %v2187_v34 }
 0x15f   : > { %732 = vmatprep.subr.bf16.mxu0 %v2154_v29  ;;  %1688 = vmatprep.subr.bf16.mxu1 %v1999_v27 }
 0x160   : > { %762 = vmatprep.mubr.bf16.mxu0 %v2000_v28  ;;  %1702 = vmatprep.mubr.msk.bf16.mxu1 %vm2001_vm0, %v1999_v27 }
 0x161   : > { %834 = vperm.xlu1 %1837, %v832_v9  }
 0x162   : > { %733 = vmatpush1.bf16.msra.mxu0 %v2162_v30  ;;  %1689 = vmatpush3.bf16.msra.mxu1 %v2205_v37 }
 0x163   : > { %734 = vmatprep.subr.bf16.mxu0 %v2169_v31  ;;  %1690 = vmatprep.subr.bf16.mxu1 %v1999_v27 }
 0x165   : > { %951 = vperm.xlu1 %1837, %v949_v11   ;;  %v718_v11 = vpop.permute.xlu0 %717 }
 0x166   : > { %735 = vmatpush1.bf16.msra.mxu0 %v2176_v32  ;;  %1691 = vmatpush3.bf16.msra.mxu1 %v2226_v40  ;;  %vm719_vm10 = vcmp.eq.s32.totalorder %v718_v11, 1 }
 0x167   : > { %736 = vmatprep.subr.bf16.mxu0 %v2182_v33  ;;  %1692 = vmatprep.subr.bf16.mxu1 %v1999_v27 }
 0x169   : > { %1185 = vperm.xlu1 %1837, %v1183_v13  }
 0x16a   : > { %737 = vmatpush1.bf16.msra.mxu0 %v2193_v35  ;;  %1693 = vmatpush3.bf16.msra.mxu1 %v2251_v46 }
 0x16b   : > { %738 = vmatprep.subr.bf16.mxu0 %v2199_v36  ;;  %1694 = vmatprep.subr.bf16.mxu1 %v1999_v27 }
 0x16d   : > { %1418 = vperm.xlu1 %1837, %v1416_v14  }
 0x16e   : > { %739 = vmatpush1.bf16.msra.mxu0 %v2213_v38  ;;  %1695 = vmatpush3.bf16.msra.mxu1 %v2275_v52 }
 0x16f   : > { %740 = vmatprep.subr.bf16.mxu0 %v2219_v39  ;;  %1696 = vmatprep.subr.bf16.mxu1 %v1999_v27 }
 0x172   : > { %741 = vmatpush1.bf16.msra.mxu0 %v2234_v43  ;;  %1697 = vmatpush3.bf16.msra.mxu1 %v2296_v57 }
 0x173   : > { %742 = vmatprep.subr.bf16.mxu0 %v2245_v45  ;;  %1698 = vmatprep.subr.bf16.mxu1 %v1999_v27 }
 0x176   : > { %743 = vmatpush1.bf16.msra.mxu0 %v2262_v49  ;;  %1699 = vmatpush3.bf16.msra.mxu1 %v2308_v60 }
 0x177   : > { %744 = vmatprep.subr.bf16.mxu0 %v2269_v51  ;;  %1700 = vmatprep.subr.bf16.mxu1 %v1999_v27 }
 0x17a   : > { %745 = vmatpush1.bf16.msra.mxu0 %v2283_v54  ;;  %1701 = vmatpush3.bf16.msra.mxu1 %v2318_v61 }
 0x17b   : > { %847 = vmatprep.subr.bf16.mxu0 %v2141_v25  ;;  %1706 = vmatprep.subr.bf16.mxu1 %v1999_v27 }
 0x230   : > { %v647_v16 = vpop.f32.mrb[4].mxu0  ;;  %v688_v17 = vpop.f32.mrb[4].mxu1 }
 0x231   : > { %v648_v18 = vadd.f32 %v647_v16, %v2359_v3  ;;  %v649_v19 = vpop.f32.mrb[5].mxu0  ;;  %v1684_v20 = vpop.f32.mrb[5].mxu1  ;;  %v689_v0 = vadd.f32 %v688_v17, %v2367_v24 }
 0x232   : > { %v650_v21 = vadd.f32 %v649_v19, %v2361_v4  ;;  %v651_v22 = vpop.f32.mrb[6].mxu0  ;;  %v691_v23 = vpop.f32.mrb[6].mxu1 }
 0x233   : > { %v694_v41 = vadd.f32 %v648_v18, %v609_v15  ;;  %v652_v47 = vpop.f32.mrb[7].mxu0  ;;  %v1685_v44 = vpop.f32.mrb[7].mxu1 }
 0x234   : > { %v701_v50 = vadd.f32 %v650_v21, %v610_v42  ;;  %v727_v42 = vld [vmem:[%s2131_s24 + $0x80] sm:$0xff] }
 0x235   : > { %v1558_v48 = vmul.f32 -1.442695, %v694_v41 }
 0x236   : > { %v1559_v53 = vmul.f32 -1.442695, %v701_v50 }
 0x237   : > { %1880 = vpow2.f32 %v1558_v48 }
 0x238   : > { %1882 = vpow2.f32 %v1559_v53 }
 0x241   : > { %v1881_v56 = vpop.eup %1880 }
 0x242   : > { %v698_v58 = vadd.f32 1.0, %v1881_v56  ;;  %v1883_v59 = vpop.eup %1882 }
 0x243   : > { %v705_v62 = vadd.f32 1.0, %v1883_v59 }
 0x244   : > { %1884 = vrcp.f32 %v698_v58 }
 0x245   : > { %1886 = vrcp.f32 %v705_v62 }
 0x24e   : > { %v1885_v63 = vpop.eup %1884 }
 0x24f   : > { %v708_v1 = vmul.f32 %v1885_v63, %v689_v0  ;;  %v1887_v7 = vpop.eup %1886 }
 0x250   : > { %v711_v55 = vsub.f32 1.0, %v1887_v7  ;;  %v713_v10 = vmul.f32 %v1887_v7, %v2373_v5 }
 0x251   : > { %v709_v6 = vadd.f32 %v708_v1, %v611_v2  ;;  %v728_v2 = vld [vmem:[%s2131_s24 + $0x88] sm:$0xff] }
 0x253   : > { %1888 = vtanh.f32 %v709_v6 }
 0x25d   : > { %v1889_v8 = vpop.eup %1888 }
 0x25e   : > { %v712_v9 = vmul.f32 %v1889_v8, %v711_v55 }
 0x260   : > { %v714_v12 = vadd.f32 %v713_v10, %v712_v9  ;;  %v835_v9 = vpop.permute.xlu1 %834 }
 0x261   : > { %vm836_vm11 = vcmp.eq.s32.totalorder %v835_v9, 1 }
 0x262   : > { %v2433_v13 = vsel %vm719_vm10, %v714_v12, %v2373_v5  ;;  %v721_v14 = vsel %vm719_vm10, %v714_v12, 0.0  ;;  %v726_v5 = vld [vmem:[%s2131_s24 + $0x78] sm:$0xff] }
 0x263   : > { %722 = vst [vmem:[%s2129_s23 + $0x30] sm:$0xff] %v721_v14  ;;  %v729_v15 = vpack.c.bf16 %v2433_v13, %v2433_v13 }
 0x265   : > { %763 = vmatmul.mubr.bf16.vlgmr.msra.gmra.mrb[8].mxu0 %v729_v15  ;;  %1703 = vmatmul.mubr.bf16.vlgmr.msra.gmra.mrb[8].mxu1 %v729_v15 }
 0x266   : > { %848 = vmatpush1.bf16.msra.mxu0 %v2146_v26  ;;  %1707 = vmatpush3.bf16.msra.mxu1 %v2187_v34 }
 0x267   : > { %849 = vmatprep.subr.bf16.mxu0 %v2154_v29  ;;  %1708 = vmatprep.subr.bf16.mxu1 %v1999_v27 }
 0x268   : > { %879 = vmatprep.mubr.bf16.mxu0 %v2000_v28  ;;  %1722 = vmatprep.mubr.msk.bf16.mxu1 %vm2001_vm0, %v1999_v27 }
 0x26a   : > { %850 = vmatpush1.bf16.msra.mxu0 %v2162_v30  ;;  %1709 = vmatpush3.bf16.msra.mxu1 %v2205_v37 }
 0x26b   : > { %851 = vmatprep.subr.bf16.mxu0 %v2169_v31  ;;  %1710 = vmatprep.subr.bf16.mxu1 %v1999_v27 }
 0x26e   : > { %852 = vmatpush1.bf16.msra.mxu0 %v2176_v32  ;;  %1711 = vmatpush3.bf16.msra.mxu1 %v2226_v40 }
 0x26f   : > { %853 = vmatprep.subr.bf16.mxu0 %v2182_v33  ;;  %1712 = vmatprep.subr.bf16.mxu1 %v1999_v27 }
 0x272   : > { %854 = vmatpush1.bf16.msra.mxu0 %v2193_v35  ;;  %1713 = vmatpush3.bf16.msra.mxu1 %v2251_v46 }
 0x273   : > { %855 = vmatprep.subr.bf16.mxu0 %v2199_v36  ;;  %1714 = vmatprep.subr.bf16.mxu1 %v1999_v27 }
 0x276   : > { %856 = vmatpush1.bf16.msra.mxu0 %v2213_v38  ;;  %1715 = vmatpush3.bf16.msra.mxu1 %v2275_v52 }
 0x277   : > { %857 = vmatprep.subr.bf16.mxu0 %v2219_v39  ;;  %1716 = vmatprep.subr.bf16.mxu1 %v1999_v27 }
 0x27a   : > { %858 = vmatpush1.bf16.msra.mxu0 %v2234_v43  ;;  %1717 = vmatpush3.bf16.msra.mxu1 %v2296_v57 }
 0x27b   : > { %859 = vmatprep.subr.bf16.mxu0 %v2245_v45  ;;  %1718 = vmatprep.subr.bf16.mxu1 %v1999_v27 }
 0x27e   : > { %860 = vmatpush1.bf16.msra.mxu0 %v2262_v49  ;;  %1719 = vmatpush3.bf16.msra.mxu1 %v2308_v60 }
 0x27f   : > { %861 = vmatprep.subr.bf16.mxu0 %v2269_v51  ;;  %1720 = vmatprep.subr.bf16.mxu1 %v1999_v27 }
 0x282   : > { %862 = vmatpush1.bf16.msra.mxu0 %v2283_v54  ;;  %1721 = vmatpush3.bf16.msra.mxu1 %v2318_v61 }
 0x283   : > { %964 = vmatprep.subr.bf16.mxu0 %v2141_v25  ;;  %1726 = vmatprep.subr.bf16.mxu1 %v1999_v27 }
 0x338   : > { %v764_v16 = vpop.f32.mrb[8].mxu0  ;;  %v805_v17 = vpop.f32.mrb[8].mxu1 }
 0x339   : > { %v765_v18 = vadd.f32 %v764_v16, %v2359_v3  ;;  %v766_v19 = vpop.f32.mrb[9].mxu0  ;;  %v1704_v20 = vpop.f32.mrb[9].mxu1  ;;  %v806_v0 = vadd.f32 %v805_v17, %v2367_v24 }
 0x33a   : > { %v767_v21 = vadd.f32 %v766_v19, %v2361_v4  ;;  %v768_v22 = vpop.f32.mrb[10].mxu0  ;;  %v808_v23 = vpop.f32.mrb[10].mxu1 }
 0x33b   : > { %v811_v41 = vadd.f32 %v765_v18, %v726_v5  ;;  %v769_v47 = vpop.f32.mrb[11].mxu0  ;;  %v1705_v44 = vpop.f32.mrb[11].mxu1 }
 0x33c   : > { %v818_v50 = vadd.f32 %v767_v21, %v727_v42  ;;  %v844_v42 = vld [vmem:[%s2131_s24 + $0x68] sm:$0xff] }
 0x33d   : > { %v1560_v48 = vmul.f32 -1.442695, %v811_v41 }
 0x33e   : > { %v1561_v53 = vmul.f32 -1.442695, %v818_v50 }
 0x33f   : > { %1890 = vpow2.f32 %v1560_v48 }
 0x340   : > { %1892 = vpow2.f32 %v1561_v53 }
 0x349   : > { %v1891_v56 = vpop.eup %1890 }
 0x34a   : > { %v815_v58 = vadd.f32 1.0, %v1891_v56  ;;  %v1893_v59 = vpop.eup %1892 }
 0x34b   : > { %v822_v62 = vadd.f32 1.0, %v1893_v59 }
 0x34c   : > { %1894 = vrcp.f32 %v815_v58 }
 0x34d   : > { %1896 = vrcp.f32 %v822_v62 }
 0x356   : > { %v1895_v63 = vpop.eup %1894 }
 0x357   : > { %v825_v1 = vmul.f32 %v1895_v63, %v806_v0  ;;  %v1897_v7 = vpop.eup %1896 }
 0x358   : > { %v828_v55 = vsub.f32 1.0, %v1897_v7  ;;  %v830_v11 = vmul.f32 %v1897_v7, %v2433_v13 }
 0x359   : > { %v826_v6 = vadd.f32 %v825_v1, %v728_v2  ;;  %v845_v2 = vld [vmem:[%s2131_s24 + $0x70] sm:$0xff] }
 0x35b   : > { %1898 = vtanh.f32 %v826_v6 }
 0x365   : > { %v1899_v8 = vpop.eup %1898 }
 0x366   : > { %v829_v10 = vmul.f32 %v1899_v8, %v828_v55 }
 0x368   : > { %v831_v12 = vadd.f32 %v830_v11, %v829_v10  ;;  %v952_v11 = vpop.permute.xlu1 %951 }
 0x369   : > { %vm953_vm12 = vcmp.eq.s32.totalorder %v952_v11, 1  ;;  %v2630_v11 = vld [vmem:[%s2766_s2 + $0x48] ss:$12 sps:$4 sm:$0xff]  }
 0x36a   : > { %v2481_v14 = vsel %vm836_vm11, %v831_v12, %v2433_v13  ;;  %v838_v15 = vsel %vm836_vm11, %v831_v12, 0.0  ;;  %v843_v13 = vld [vmem:[%s2131_s24 + $0x60] sm:$0xff] }
 0x36b   : > { %839 = vst [vmem:[%s2129_s23 + $0x28] sm:$0xff] %v838_v15  ;;  %v846_v5 = vpack.c.bf16 %v2481_v14, %v2481_v14 }
 0x36d   : > { %880 = vmatmul.mubr.bf16.vlgmr.msra.gmra.mrb[12].mxu0 %v846_v5  ;;  %1723 = vmatmul.mubr.bf16.vlgmr.msra.gmra.mrb[12].mxu1 %v846_v5 }
 0x36e   : > { %965 = vmatpush1.bf16.msra.mxu0 %v2146_v26  ;;  %1727 = vmatpush3.bf16.msra.mxu1 %v2187_v34 }
 0x36f   : > { %966 = vmatprep.subr.bf16.mxu0 %v2154_v29  ;;  %1728 = vmatprep.subr.bf16.mxu1 %v1999_v27 }
 0x370   : > { %996 = vmatprep.mubr.bf16.mxu0 %v2000_v28  ;;  %1742 = vmatprep.mubr.msk.bf16.mxu1 %vm2001_vm0, %v1999_v27 }
 0x372   : > { %967 = vmatpush1.bf16.msra.mxu0 %v2162_v30  ;;  %1729 = vmatpush3.bf16.msra.mxu1 %v2205_v37 }
 0x373   : > { %968 = vmatprep.subr.bf16.mxu0 %v2169_v31  ;;  %1730 = vmatprep.subr.bf16.mxu1 %v1999_v27 }
 0x376   : > { %969 = vmatpush1.bf16.msra.mxu0 %v2176_v32  ;;  %1731 = vmatpush3.bf16.msra.mxu1 %v2226_v40 }
 0x377   : > { %970 = vmatprep.subr.bf16.mxu0 %v2182_v33  ;;  %1732 = vmatprep.subr.bf16.mxu1 %v1999_v27 }
 0x37a   : > { %971 = vmatpush1.bf16.msra.mxu0 %v2193_v35  ;;  %1733 = vmatpush3.bf16.msra.mxu1 %v2251_v46 }
 0x37b   : > { %972 = vmatprep.subr.bf16.mxu0 %v2199_v36  ;;  %1734 = vmatprep.subr.bf16.mxu1 %v1999_v27 }
 0x37e   : > { %973 = vmatpush1.bf16.msra.mxu0 %v2213_v38  ;;  %1735 = vmatpush3.bf16.msra.mxu1 %v2275_v52 }
 0x37f   : > { %974 = vmatprep.subr.bf16.mxu0 %v2219_v39  ;;  %1736 = vmatprep.subr.bf16.mxu1 %v1999_v27 }
 0x382   : > { %975 = vmatpush1.bf16.msra.mxu0 %v2234_v43  ;;  %1737 = vmatpush3.bf16.msra.mxu1 %v2296_v57 }
 0x383   : > { %976 = vmatprep.subr.bf16.mxu0 %v2245_v45  ;;  %1738 = vmatprep.subr.bf16.mxu1 %v1999_v27 }
 0x386   : > { %977 = vmatpush1.bf16.msra.mxu0 %v2262_v49  ;;  %1739 = vmatpush3.bf16.msra.mxu1 %v2308_v60 }
 0x387   : > { %978 = vmatprep.subr.bf16.mxu0 %v2269_v51  ;;  %1740 = vmatprep.subr.bf16.mxu1 %v1999_v27 }
 0x38a   : > { %979 = vmatpush1.bf16.msra.mxu0 %v2283_v54  ;;  %1741 = vmatpush3.bf16.msra.mxu1 %v2318_v61 }
 0x38b   : > { %1081 = vmatprep.subr.bf16.mxu0 %v2141_v25  ;;  %1746 = vmatprep.subr.bf16.mxu1 %v1999_v27 }
 0x440   : > { %v881_v16 = vpop.f32.mrb[12].mxu0  ;;  %v922_v17 = vpop.f32.mrb[12].mxu1 }
 0x441   : > { %v882_v18 = vadd.f32 %v881_v16, %v2359_v3  ;;  %v883_v19 = vpop.f32.mrb[13].mxu0  ;;  %v1724_v20 = vpop.f32.mrb[13].mxu1  ;;  %v923_v0 = vadd.f32 %v922_v17, %v2367_v24  ;;  %v961_v17 = vld [vmem:[%s2131_s24 + $0x50] sm:$0xff] }
 0x442   : > { %v884_v21 = vadd.f32 %v883_v19, %v2361_v4  ;;  %v885_v22 = vpop.f32.mrb[14].mxu0  ;;  %v925_v23 = vpop.f32.mrb[14].mxu1 }
 0x443   : > { %v928_v41 = vadd.f32 %v882_v18, %v843_v13  ;;  %v886_v47 = vpop.f32.mrb[15].mxu0  ;;  %v1725_v44 = vpop.f32.mrb[15].mxu1 }
 0x444   : > { %v935_v50 = vadd.f32 %v884_v21, %v844_v42 }
 0x445   : > { %v1562_v48 = vmul.f32 -1.442695, %v928_v41 }
 0x446   : > { %v1563_v53 = vmul.f32 -1.442695, %v935_v50 }
 0x447   : > { %1900 = vpow2.f32 %v1562_v48  ;;  %v962_v48 = vld [vmem:[%s2131_s24 + $0x58] sm:$0xff] }
 0x448   : > { %1902 = vpow2.f32 %v1563_v53 }
 0x451   : > { %v1901_v56 = vpop.eup %1900 }
 0x452   : > { %v932_v58 = vadd.f32 1.0, %v1901_v56  ;;  %v1903_v59 = vpop.eup %1902 }
 0x453   : > { %v939_v62 = vadd.f32 1.0, %v1903_v59 }
 0x454   : > { %1904 = vrcp.f32 %v932_v58 }
 0x455   : > { %1906 = vrcp.f32 %v939_v62 }
 0x45e   : > { %v1905_v63 = vpop.eup %1904 }
 0x45f   : > { %v942_v1 = vmul.f32 %v1905_v63, %v923_v0  ;;  %v1907_v7 = vpop.eup %1906  ;;  %v1069_v63 = vpop.permute.xlu0 %1068 }
 0x460   : > { %v945_v55 = vsub.f32 1.0, %v1907_v7  ;;  %v947_v10 = vmul.f32 %v1907_v7, %v2481_v14  ;;  %vm1070_vm13 = vcmp.eq.s32.totalorder %v1069_v63, 1  ;;  %v1970_v63 = vld [vmem:[%s2766_s2 + $0x98] ss:$12 sps:$4 sm:$0xff]  }
 0x461   : > { %v943_v6 = vadd.f32 %v942_v1, %v845_v2 }
 0x463   : > { %1908 = vtanh.f32 %v943_v6 }
 0x46d   : > { %v1909_v8 = vpop.eup %1908 }
 0x46e   : > { %v946_v9 = vmul.f32 %v1909_v8, %v945_v55  ;;  %v2585_v55 = vld [vmem:[%s2766_s2] ss:$12 sps:$4 sm:$0xff]   ;;  %v2592_v8 = vld [vmem:[%s2766_s2 + $0x1c] ss:$12 sps:$4 sm:$0xff]  }
 0x470   : > { %v948_v12 = vadd.f32 %v947_v10, %v946_v9  ;;  %v2602_v9 = vld [vmem:[%s2766_s2 + $0x18] ss:$12 sps:$4 sm:$0xff]   ;;  %v2616_v10 = vld [vmem:[%s2766_s2 + $0x30] ss:$12 sps:$4 sm:$0xff]  }
 0x472   : > { %v2529_v15 = vsel %vm953_vm12, %v948_v12, %v2481_v14  ;;  %v955_v5 = vsel %vm953_vm12, %v948_v12, 0.0 }
 0x473   : > { %956 = vst [vmem:[%s2129_s23 + $0x20] sm:$0xff] %v955_v5  ;;  %v963_v13 = vpack.c.bf16 %v2529_v15, %v2529_v15 }
 0x475   : > { %997 = vmatmul.mubr.bf16.vlgmr.msra.gmra.mrb[16].mxu0 %v963_v13  ;;  %1743 = vmatmul.mubr.bf16.vlgmr.msra.gmra.mrb[16].mxu1 %v963_v13 }
 0x476   : > { %1082 = vmatpush1.bf16.msra.mxu0 %v2146_v26  ;;  %1747 = vmatpush3.bf16.msra.mxu1 %v2187_v34  ;;  %v960_v26 = vld [vmem:[%s2131_s24 + $0x48] sm:$0xff] }
 0x477   : > { %1083 = vmatprep.subr.bf16.mxu0 %v2154_v29  ;;  %1748 = vmatprep.subr.bf16.mxu1 %v1999_v27 }
 0x478   : > { %1113 = vmatprep.mubr.bf16.mxu0 %v2000_v28  ;;  %1762 = vmatprep.mubr.msk.bf16.mxu1 %vm2001_vm0, %v1999_v27 }
 0x47a   : > { %1084 = vmatpush1.bf16.msra.mxu0 %v2162_v30  ;;  %1749 = vmatpush3.bf16.msra.mxu1 %v2205_v37 }
 0x47b   : > { %1085 = vmatprep.subr.bf16.mxu0 %v2169_v31  ;;  %1750 = vmatprep.subr.bf16.mxu1 %v1999_v27 }
 0x47e   : > { %1086 = vmatpush1.bf16.msra.mxu0 %v2176_v32  ;;  %1751 = vmatpush3.bf16.msra.mxu1 %v2226_v40 }
 0x47f   : > { %1087 = vmatprep.subr.bf16.mxu0 %v2182_v33  ;;  %1752 = vmatprep.subr.bf16.mxu1 %v1999_v27 }
 0x482   : > { %1088 = vmatpush1.bf16.msra.mxu0 %v2193_v35  ;;  %1753 = vmatpush3.bf16.msra.mxu1 %v2251_v46 }
 0x483   : > { %1089 = vmatprep.subr.bf16.mxu0 %v2199_v36  ;;  %1754 = vmatprep.subr.bf16.mxu1 %v1999_v27 }
 0x486   : > { %1090 = vmatpush1.bf16.msra.mxu0 %v2213_v38  ;;  %1755 = vmatpush3.bf16.msra.mxu1 %v2275_v52 }
 0x487   : > { %1091 = vmatprep.subr.bf16.mxu0 %v2219_v39  ;;  %1756 = vmatprep.subr.bf16.mxu1 %v1999_v27 }
 0x48a   : > { %1092 = vmatpush1.bf16.msra.mxu0 %v2234_v43  ;;  %1757 = vmatpush3.bf16.msra.mxu1 %v2296_v57 }
 0x48b   : > { %1093 = vmatprep.subr.bf16.mxu0 %v2245_v45  ;;  %1758 = vmatprep.subr.bf16.mxu1 %v1999_v27 }
 0x48e   : > { %1094 = vmatpush1.bf16.msra.mxu0 %v2262_v49  ;;  %1759 = vmatpush3.bf16.msra.mxu1 %v2308_v60 }
 0x48f   : > { %1095 = vmatprep.subr.bf16.mxu0 %v2269_v51  ;;  %1760 = vmatprep.subr.bf16.mxu1 %v1999_v27 }
 0x492   : > { %1096 = vmatpush1.bf16.msra.mxu0 %v2283_v54  ;;  %1761 = vmatpush3.bf16.msra.mxu1 %v2318_v61 }
 0x493   : > { %1198 = vmatprep.subr.bf16.mxu0 %v2141_v25  ;;  %1766 = vmatprep.subr.bf16.mxu1 %v1999_v27 }
 0x548   : > { %v998_v29 = vpop.f32.mrb[16].mxu0  ;;  %v1039_v30 = vpop.f32.mrb[16].mxu1 }
 0x549   : > { %v999_v31 = vadd.f32 %v998_v29, %v2359_v3  ;;  %v1000_v32 = vpop.f32.mrb[17].mxu0  ;;  %v1744_v33 = vpop.f32.mrb[17].mxu1  ;;  %v1040_v47 = vadd.f32 %v1039_v30, %v2367_v24 }
 0x54a   : > { %v1001_v35 = vadd.f32 %v1000_v32, %v2361_v4  ;;  %v1002_v36 = vpop.f32.mrb[18].mxu0  ;;  %v1042_v14 = vpop.f32.mrb[18].mxu1 }
 0x54b   : > { %v1045_v16 = vadd.f32 %v999_v31, %v960_v26  ;;  %v1003_v18 = vpop.f32.mrb[19].mxu0  ;;  %v1745_v19 = vpop.f32.mrb[19].mxu1  ;;  %v1079_v36 = vld [vmem:[%s2131_s24 + $0x40] sm:$0xff] }
 0x54c   : > { %v1052_v25 = vadd.f32 %v1001_v35, %v961_v17 }
 0x54d   : > { %v1564_v20 = vmul.f32 -1.442695, %v1045_v16 }
 0x54e   : > { %v1565_v21 = vmul.f32 -1.442695, %v1052_v25 }
 0x54f   : > { %1910 = vpow2.f32 %v1564_v20 }
 0x550   : > { %1912 = vpow2.f32 %v1565_v21  ;;  %v1186_v21 = vpop.permute.xlu1 %1185 }
 0x551   : > { %vm1187_vm14 = vcmp.eq.s32.totalorder %v1186_v21, 1 }
 0x559   : > { %v1911_v22 = vpop.eup %1910 }
 0x55a   : > { %v1049_v23 = vadd.f32 1.0, %v1911_v22  ;;  %v1913_v41 = vpop.eup %1912 }
 0x55b   : > { %v1056_v42 = vadd.f32 1.0, %v1913_v41 }
 0x55c   : > { %1914 = vrcp.f32 %v1049_v23 }
 0x55d   : > { %1916 = vrcp.f32 %v1056_v42 }
 0x566   : > { %v1915_v44 = vpop.eup %1914 }
 0x567   : > { %v1059_v50 = vmul.f32 %v1915_v44, %v1040_v47  ;;  %v1917_v56 = vpop.eup %1916  ;;  %v1959_v47 = vld [vmem:[%s2766_s2 + $0x8] ss:$12 sps:$4 sm:$0xff]   ;;  %v1960_v44 = vld [vmem:[%s2766_s2 + $0x20] ss:$12 sps:$4 sm:$0xff]  }
 0x568   : > { %v1062_v58 = vsub.f32 1.0, %v1917_v56  ;;  %v1064_v0 = vmul.f32 %v1917_v56, %v2529_v15  ;;  %v1965_v56 = vld [vmem:[%s2766_s2 + $0x7c] ss:$12 sps:$4 sm:$0xff]  }
 0x569   : > { %v1060_v53 = vadd.f32 %v1059_v50, %v962_v48  ;;  %v1962_v48 = vld [vmem:[%s2766_s2 + $0x50] ss:$12 sps:$4 sm:$0xff]   ;;  %v1963_v50 = vld [vmem:[%s2766_s2 + $0x60] ss:$12 sps:$4 sm:$0xff]  }
 0x56b   : > { %1918 = vtanh.f32 %v1060_v53  ;;  %v1964_v53 = vld [vmem:[%s2766_s2 + $0x68] ss:$12 sps:$4 sm:$0xff]  }
 0x575   : > { %v1919_v59 = vpop.eup %1918 }
 0x576   : > { %v1063_v62 = vmul.f32 %v1919_v59, %v1062_v58  ;;  %v1966_v58 = vld [vmem:[%s2766_s2 + $0x78] ss:$12 sps:$4 sm:$0xff]   ;;  %v1967_v59 = vld [vmem:[%s2766_s2 + $0x80] ss:$12 sps:$4 sm:$0xff]  }
 0x578   : > { %v1065_v2 = vadd.f32 %v1064_v0, %v1063_v62  ;;  %v1968_v62 = vld [vmem:[%s2766_s2 + $0x94] ss:$12 sps:$4 sm:$0xff]   ;;  %v1969_v0 = vld [vmem:[%s2766_s2 + $0x90] ss:$12 sps:$4 sm:$0xff]  }
 0x57a   : > { %v2577_v1 = vsel %vm1070_vm13, %v1065_v2, %v2529_v15  ;;  %v1072_v6 = vsel %vm1070_vm13, %v1065_v2, 0.0  ;;  %v1971_v2 = vld [vmem:[%s2766_s2 + $0xac] ss:$12 sps:$4 sm:$0xff]  }
 0x57b   : > { %1073 = vst [vmem:[%s2129_s23 + $0x18] sm:$0xff] %v1072_v6  ;;  %v1080_v7 = vpack.c.bf16 %v2577_v1, %v2577_v1  ;;  %v1973_v6 = vld [vmem:[%s2766_s2 + $0xb0] ss:$12 sps:$4 sm:$0xff]  }
 0x57d   : > { %1114 = vmatmul.mubr.bf16.vlgmr.msra.gmra.mrb[20].mxu0 %v1080_v7  ;;  %1763 = vmatmul.mubr.bf16.vlgmr.msra.gmra.mrb[20].mxu1 %v1080_v7  ;;  %v1194_v7 = vld [vmem:[%s2131_s24 + $0x18] sm:$0xff] }
 0x57e   : > { %1199 = vmatpush1.bf16.msra.mxu0 %v2585_v55  ;;  %1767 = vmatpush3.bf16.msra.mxu1 %v2187_v34  ;;  %v2609_v34 = vld [vmem:[%s2766_s2 + $0x34] ss:$12 sps:$4 sm:$0xff]  }
 0x57f   : > { %1200 = vmatprep.subr.bf16.mxu0 %v2592_v8  ;;  %1768 = vmatprep.subr.bf16.mxu1 %v1999_v27 }
 0x580   : > { %1230 = vmatprep.mubr.bf16.mxu0 %v2000_v28  ;;  %1782 = vmatprep.mubr.msk.bf16.mxu1 %vm2001_vm0, %v1999_v27 }
 0x582   : > { %1201 = vmatpush1.bf16.msra.mxu0 %v2602_v9  ;;  %1769 = vmatpush3.bf16.msra.mxu1 %v2205_v37  ;;  %v2623_v37 = vld [vmem:[%s2766_s2 + $0x4c] ss:$12 sps:$4 sm:$0xff]  }
 0x583   : > { %1202 = vmatprep.subr.bf16.mxu0 %v2609_v34  ;;  %1770 = vmatprep.subr.bf16.mxu1 %v1999_v27 }
 0x586   : > { %1203 = vmatpush1.bf16.msra.mxu0 %v2616_v10  ;;  %1771 = vmatpush3.bf16.msra.mxu1 %v2226_v40  ;;  %v2637_v40 = vld [vmem:[%s2766_s2 + $0x64] ss:$12 sps:$4 sm:$0xff]  }
 0x587   : > { %1204 = vmatprep.subr.bf16.mxu0 %v2623_v37  ;;  %1772 = vmatprep.subr.bf16.mxu1 %v1999_v27 }
 0x58a   : > { %1205 = vmatpush1.bf16.msra.mxu0 %v2630_v11  ;;  %1773 = vmatpush3.bf16.msra.mxu1 %v2251_v46 }
 0x58b   : > { %1206 = vmatprep.subr.bf16.mxu0 %v2637_v40  ;;  %1774 = vmatprep.subr.bf16.mxu1 %v1999_v27 }
 0x58e   : > { %1207 = vmatpush1.bf16.msra.mxu0 %v2213_v38  ;;  %1775 = vmatpush3.bf16.msra.mxu1 %v2275_v52  ;;  %v1958_v38 = vld [vmem:[%s2766_s2 + $0x4] ss:$12 sps:$4 sm:$0xff]  }
 0x58f   : > { %1208 = vmatprep.subr.bf16.mxu0 %v2219_v39  ;;  %1776 = vmatprep.subr.bf16.mxu1 %v1999_v27  ;;  %v1077_v39 = vld [vmem:[%s2131_s24 + $0x30] sm:$0xff] }
 0x592   : > { %1209 = vmatpush1.bf16.msra.mxu0 %v2234_v43  ;;  %1777 = vmatpush3.bf16.msra.mxu1 %v2296_v57 }
 0x593   : > { %1210 = vmatprep.subr.bf16.mxu0 %v2245_v45  ;;  %1778 = vmatprep.subr.bf16.mxu1 %v1999_v27 }
 0x596   : > { %1211 = vmatpush1.bf16.msra.mxu0 %v2262_v49  ;;  %1779 = vmatpush3.bf16.msra.mxu1 %v2308_v60 }
 0x597   : > { %1212 = vmatprep.subr.bf16.mxu0 %v2269_v51  ;;  %1780 = vmatprep.subr.bf16.mxu1 %v1999_v27 }
 0x59a   : > { %1213 = vmatpush1.bf16.msra.mxu0 %v2283_v54  ;;  %1781 = vmatpush3.bf16.msra.mxu1 %v2318_v61  ;;  %v1078_v61 = vld [vmem:[%s2131_s24 + $0x38] sm:$0xff] }
 0x59b   : > { %1314 = vmatprep.subr.bf16.mxu0 %v1958_v38  ;;  %1786 = vmatprep.subr.bf16.mxu1 %v1999_v27  ;;  %v1195_v38 = vld [vmem:[%s2131_s24 + $0x20] sm:$0xff] }
 0x650   : > { %v1115_v43 = vpop.f32.mrb[20].mxu0  ;;  %v1156_v45 = vpop.f32.mrb[20].mxu1 }
 0x651   : > { %v1116_v46 = vadd.f32 %v1115_v43, %v2359_v3  ;;  %v1117_v49 = vpop.f32.mrb[21].mxu0  ;;  %v1764_v51 = vpop.f32.mrb[21].mxu1  ;;  %v1157_v33 = vadd.f32 %v1156_v45, %v2367_v24 }
 0x652   : > { %v1118_v52 = vadd.f32 %v1117_v49, %v2361_v4  ;;  %v1119_v57 = vpop.f32.mrb[22].mxu0  ;;  %v1159_v54 = vpop.f32.mrb[22].mxu1 }
 0x653   : > { %v1162_v60 = vadd.f32 %v1116_v46, %v1077_v39  ;;  %v1120_v12 = vpop.f32.mrb[23].mxu0  ;;  %v1765_v15 = vpop.f32.mrb[23].mxu1 }
 0x654   : > { %v1169_v13 = vadd.f32 %v1118_v52, %v1078_v61  ;;  %v1196_v12 = vld [vmem:[%s2131_s24 + $0x28] sm:$0xff] }
 0x655   : > { %v1566_v5 = vmul.f32 -1.442695, %v1162_v60 }
 0x656   : > { %v1567_v26 = vmul.f32 -1.442695, %v1169_v13 }
 0x657   : > { %1920 = vpow2.f32 %v1566_v5 }
 0x658   : > { %1922 = vpow2.f32 %v1567_v26 }
 0x661   : > { %v1921_v29 = vpop.eup %1920 }
 0x662   : > { %v1166_v30 = vadd.f32 1.0, %v1921_v29  ;;  %v1923_v31 = vpop.eup %1922 }
 0x663   : > { %v1173_v32 = vadd.f32 1.0, %v1923_v31 }
 0x664   : > { %1924 = vrcp.f32 %v1166_v30  ;;  %v1303_v30 = vpop.permute.xlu0 %1302 }
 0x665   : > { %1926 = vrcp.f32 %v1173_v32  ;;  %vm1304_vm15 = vcmp.eq.s32.totalorder %v1303_v30, 1 }
 0x66e   : > { %v1925_v35 = vpop.eup %1924 }
 0x66f   : > { %v1176_v14 = vmul.f32 %v1925_v35, %v1157_v33  ;;  %v1927_v17 = vpop.eup %1926 }
 0x670   : > { %v1179_v18 = vsub.f32 1.0, %v1927_v17  ;;  %v1181_v25 = vmul.f32 %v1927_v17, %v2577_v1 }
 0x671   : > { %v1177_v16 = vadd.f32 %v1176_v14, %v1079_v36 }
 0x673   : > { %1928 = vtanh.f32 %v1177_v16  ;;  %v1310_v16 = vld [vmem:[%s2131_s24] sm:$0xff] }
 0x67d   : > { %v1929_v19 = vpop.eup %1928 }
 0x67e   : > { %v1180_v20 = vmul.f32 %v1929_v19, %v1179_v18 }
 0x680   : > { %v1182_v22 = vadd.f32 %v1181_v25, %v1180_v20 }
 0x682   : > { %v2667_v23 = vsel %vm1187_vm14, %v1182_v22, %v2577_v1  ;;  %v1189_v41 = vsel %vm1187_vm14, %v1182_v22, 0.0  ;;  %v1972_v1 = vld [vmem:[%s2766_s2 + $0xa8] ss:$12 sps:$4 sm:$0xff]  }
 0x683   : > { %1190 = vst [vmem:[%s2129_s23 + $0x10] sm:$0xff] %v1189_v41  ;;  %v1197_v42 = vpack.c.bf16 %v2667_v23, %v2667_v23 }
 0x685   : > { %1231 = vmatmul.mubr.bf16.vlgmr.msra.gmra.mrb[24].mxu0 %v1197_v42  ;;  %1783 = vmatmul.mubr.bf16.vlgmr.msra.gmra.mrb[24].mxu1 %v1197_v42 }
 0x686   : > { %1315 = vmatpush1.bf16.msra.mxu0 %v2585_v55  ;;  %1787 = vmatpush3.bf16.msra.mxu1 %v1959_v47 }
 0x687   : > { %1316 = vmatprep.subr.bf16.mxu0 %v2592_v8  ;;  %1788 = vmatprep.subr.bf16.mxu1 %v1999_v27 }
 0x688   : > { %1346 = vmatprep.mubr.bf16.mxu0 %v2000_v28  ;;  %1802 = vmatprep.mubr.msk.bf16.mxu1 %vm2001_vm0, %v1999_v27  ;;  %v1961_v28 = vld [vmem:[%s2766_s2 + $0x38] ss:$12 sps:$4 sm:$0xff]  }
 0x68a   : > { %1317 = vmatpush1.bf16.msra.mxu0 %v2602_v9  ;;  %1789 = vmatpush3.bf16.msra.mxu1 %v1960_v44 }
 0x68b   : > { %1318 = vmatprep.subr.bf16.mxu0 %v2609_v34  ;;  %1790 = vmatprep.subr.bf16.mxu1 %v1999_v27 }
 0x68e   : > { %1319 = vmatpush1.bf16.msra.mxu0 %v2616_v10  ;;  %1791 = vmatpush3.bf16.msra.mxu1 %v1961_v28 }
 0x68f   : > { %1320 = vmatprep.subr.bf16.mxu0 %v2623_v37  ;;  %1792 = vmatprep.subr.bf16.mxu1 %v1999_v27 }
 0x692   : > { %1321 = vmatpush1.bf16.msra.mxu0 %v2630_v11  ;;  %1793 = vmatpush3.bf16.msra.mxu1 %v1962_v48 }
 0x693   : > { %1322 = vmatprep.subr.bf16.mxu0 %v2637_v40  ;;  %1794 = vmatprep.subr.bf16.mxu1 %v1999_v27 }
 0x696   : > { %1323 = vmatpush1.bf16.msra.mxu0 %v1963_v50  ;;  %1795 = vmatpush3.bf16.msra.mxu1 %v1964_v53 }
 0x697   : > { %1324 = vmatprep.subr.bf16.mxu0 %v1965_v56  ;;  %1796 = vmatprep.subr.bf16.mxu1 %v1999_v27 }
 0x69a   : > { %1325 = vmatpush1.bf16.msra.mxu0 %v1966_v58  ;;  %1797 = vmatpush3.bf16.msra.mxu1 %v1967_v59 }
 0x69b   : > { %1326 = vmatprep.subr.bf16.mxu0 %v1968_v62  ;;  %1798 = vmatprep.subr.bf16.mxu1 %v1999_v27  ;;  %v1312_v62 = vld [vmem:[%s2131_s24 + $0x10] sm:$0xff] }
 0x69e   : > { %1327 = vmatpush1.bf16.msra.mxu0 %v1969_v0  ;;  %1799 = vmatpush3.bf16.msra.mxu1 %v1970_v63 }
 0x69f   : > { %1328 = vmatprep.subr.bf16.mxu0 %v1971_v2  ;;  %1800 = vmatprep.subr.bf16.mxu1 %v1999_v27 }
 0x6a2   : > { %1329 = vmatpush1.bf16.msra.mxu0 %v1972_v1  ;;  %1801 = vmatpush3.bf16.msra.mxu1 %v1973_v6 }
 0x758   : > { %v1232_v55 = vpop.f32.mrb[24].mxu0  ;;  %v1273_v8 = vpop.f32.mrb[24].mxu1 }
 0x759   : > { %v1233_v9 = vadd.f32 %v1232_v55, %v2359_v3  ;;  %v1234_v34 = vpop.f32.mrb[25].mxu0  ;;  %v1784_v10 = vpop.f32.mrb[25].mxu1  ;;  %v1274_v60 = vadd.f32 %v1273_v8, %v2367_v24 }
 0x75a   : > { %v1235_v37 = vadd.f32 %v1234_v34, %v2361_v4  ;;  %v1236_v27 = vpop.f32.mrb[26].mxu0  ;;  %v1276_v11 = vpop.f32.mrb[26].mxu1 }
 0x75b   : > { %v1279_v40 = vadd.f32 %v1233_v9, %v1194_v7  ;;  %v1237_v39 = vpop.f32.mrb[27].mxu0  ;;  %v1785_v43 = vpop.f32.mrb[27].mxu1 }
 0x75c   : > { %v1286_v46 = vadd.f32 %v1235_v37, %v1195_v38  ;;  %v1419_v7 = vpop.permute.xlu1 %1418 }
 0x75d   : > { %v1568_v45 = vmul.f32 -1.442695, %v1279_v40  ;;  %vm1420_vm0 = vcmp.eq.s32.totalorder %v1419_v7, 1 }
 0x75e   : > { %v1569_v49 = vmul.f32 -1.442695, %v1286_v46 }
 0x75f   : > { %1930 = vpow2.f32 %v1568_v45 }
 0x760   : > { %1932 = vpow2.f32 %v1569_v49 }
 0x769   : > { %v1931_v51 = vpop.eup %1930 }
 0x76a   : > { %v1283_v52 = vadd.f32 1.0, %v1931_v51  ;;  %v1933_v57 = vpop.eup %1932 }
 0x76b   : > { %v1290_v54 = vadd.f32 1.0, %v1933_v57 }
 0x76c   : > { %1934 = vrcp.f32 %v1283_v52 }
 0x76d   : > { %1936 = vrcp.f32 %v1290_v54 }
 0x776   : > { %v1935_v61 = vpop.eup %1934 }
 0x777   : > { %v1293_v15 = vmul.f32 %v1935_v61, %v1274_v60  ;;  %v1937_v13 = vpop.eup %1936 }
 0x778   : > { %v1296_v26 = vsub.f32 1.0, %v1937_v13  ;;  %v1298_v32 = vmul.f32 %v1937_v13, %v2667_v23 }
 0x779   : > { %v1294_v5 = vadd.f32 %v1293_v15, %v1196_v12 }
 0x77b   : > { %1938 = vtanh.f32 %v1294_v5 }
 0x785   : > { %v1939_v29 = vpop.eup %1938 }
 0x786   : > { %v1297_v31 = vmul.f32 %v1939_v29, %v1296_v26 }
 0x788   : > { %v1299_v33 = vadd.f32 %v1298_v32, %v1297_v31 }
 0x78a   : > { %v1305_v35 = vsel %vm1304_vm15, %v1299_v33, %v2667_v23  ;;  %v1306_v36 = vsel %vm1304_vm15, %v1299_v33, 0.0  ;;  %v1311_v23 = vld [vmem:[%s2131_s24 + $0x8] sm:$0xff] }
 0x78b   : > { %1307 = vst [vmem:[%s2129_s23 + $0x8] sm:$0xff] %v1306_v36  ;;  %v1313_v14 = vpack.c.bf16 %v1305_v35, %v1305_v35 }
 0x78d   : > { %1347 = vmatmul.mubr.bf16.vlgmr.msra.gmra.mrb[28].mxu0 %v1313_v14  ;;  %1803 = vmatmul.mubr.bf16.vlgmr.msra.gmra.mrb[28].mxu1 %v1313_v14 }
 0x860   : > { %v1348_v17 = vpop.f32.mrb[28].mxu0  ;;  %v1389_v18 = vpop.f32.mrb[28].mxu1 }
 0x861   : > { %v1349_v19 = vadd.f32 %v1348_v17, %v2359_v3  ;;  %v1350_v20 = vpop.f32.mrb[29].mxu0  ;;  %v1804_v25 = vpop.f32.mrb[29].mxu1  ;;  %v1390_v59 = vadd.f32 %v1389_v18, %v2367_v24 }
 0x862   : > { %v1351_v21 = vadd.f32 %v1350_v20, %v2361_v4  ;;  %v1352_v22 = vpop.f32.mrb[30].mxu0  ;;  %v1392_v41 = vpop.f32.mrb[30].mxu1 }
 0x863   : > { %v1395_v42 = vadd.f32 %v1349_v19, %v1310_v16  ;;  %v1353_v47 = vpop.f32.mrb[31].mxu0  ;;  %v1805_v44 = vpop.f32.mrb[31].mxu1 }
 0x864   : > { %v1402_v48 = vadd.f32 %v1351_v21, %v1311_v23 }
 0x865   : > { %v1570_v28 = vmul.f32 -1.442695, %v1395_v42 }
 0x866   : > { %v1571_v50 = vmul.f32 -1.442695, %v1402_v48 }
 0x867   : > { %1940 = vpow2.f32 %v1570_v28 }
 0x868   : > { %1942 = vpow2.f32 %v1571_v50 }
 0x871   : > { %v1941_v53 = vpop.eup %1940 }
 0x872   : > { %v1399_v56 = vadd.f32 1.0, %v1941_v53  ;;  %v1943_v3 = vpop.eup %1942 }
 0x873   : > { %v1406_v58 = vadd.f32 1.0, %v1943_v3 }
 0x874   : > { %1944 = vrcp.f32 %v1399_v56 }
 0x875   : > { %1946 = vrcp.f32 %v1406_v58 }
 0x87e   : > { %v1945_v4 = vpop.eup %1944 }
 0x87f   : > { %v1409_v0 = vmul.f32 %v1945_v4, %v1390_v59  ;;  %v1947_v2 = vpop.eup %1946 }
 0x880   : > { %v1412_v1 = vsub.f32 1.0, %v1947_v2  ;;  %v1414_v8 = vmul.f32 %v1947_v2, %v1305_v35 }
 0x881   : > { %v1410_v63 = vadd.f32 %v1409_v0, %v1312_v62 }
 0x883   : > { %1948 = vtanh.f32 %v1410_v63 }
 0x88d   : > { %v1949_v6 = vpop.eup %1948 }
 0x88e   : > { %v1413_v55 = vmul.f32 %v1949_v6, %v1412_v1 }
 0x890   : > { %v1415_v9 = vadd.f32 %v1414_v8, %v1413_v55 }
 0x892   : > { %v1421_v34 = vsel %vm1420_vm0, %v1415_v9, %v1305_v35  ;;  %v1422_v10 = vsel %vm1420_vm0, %v1415_v9, 0.0 }
 0x893   : > { %1423 = vst [vmem:[%s2129_s23] sm:$0xff] %v1422_v10  ;;  %1424 = vst [vmem:[%s2769_s5] sm:$0xff] %v1421_v34 }
 0x894 PF: > { %p13_p10 = scmp.ge.s32.totalorder %s2049_s22, 4   ;;  %s2770_s18 = smov %s1992_s19 }
 0x895   : > { %s2771_s19 = smov %s2058_s27  ;;  %s2772_s20 = smov %s2049_s22 }
 0x896   :  { %15 = sbr.rel (!%p13_p10) target bundleno = 2 (0x2), region = 106 }

// kernel: _lambda_.5
= control target key start
LH: loop header
LB: loop body
LE: loop exit
PB: predicated region body
PF: predicated region fallthrough
CT: control target
= control target key end

     0   :  { %12 = vsyncpa [#allocation4], 0  ;;  %s2975_s0 = inlined_call_operand.vmem [shape: s32[8,1], index: 0, kind: input, shape index: {}]   ;;  %s2976_s1 = inlined_call_operand.vmem [shape: f32[128,768], index: 1, kind: input, shape index: {}]   ;;  %s2977_s2 = inlined_call_operand.vmem [shape: bf16[128,384], index: 2, kind: input, shape index: {}]   ;;  %s2978_s3 = inlined_call_operand.vmem [shape: f32[1,384], index: 3, kind: input, shape index: {}]   ;;  %s2979_s4 = inlined_call_operand.vmem [shape: f32[128,128], index: 4, kind: input, shape index: {}]   ;;  %s2980_s5 = inlined_call_operand.hbm [shape: f32[128,128], index: 5, kind: output, shape index: {0}]   ;;  %s2981_s6 = inlined_call_operand.vmem [shape: f32[8,128], index: 6, kind: output, shape index: {1}]  }
   0x1   :  { %14 = vsyncpa [#allocation4 + $0x1], 0  ;;  %s2159_s21 = smov 0   ;;  %s2161_s22 = smov 0  }
   0x2   :  { %s2163_s23 = smov 0   ;;  %s2165_s24 = smov 0  }
   0x3 LB: > { %s2180_s25 = sadd.s32 4294967295, %s2115_s24   ;;  %s1577_s26 = sadd.s32 4294967294, %s2115_s24   ;;  %s2115_s24 = sphi %s2165_s24, %s2987_s24   ;;  %s2111_s23 = sphi %s2163_s23, %s2986_s23   ;;  %s2107_s22 = sphi %s2161_s22, %s2985_s22   ;;  %s2103_s21 = sphi %s2159_s21, %s2984_s21  }
   0x4   : > { %s2184_s27 = sadd.s32 1, %s2115_s24   ;;  %s48_s28 = sadd.s32 1, %s2111_s23 }
   0x5   : > { %s45_s29 = ssub.s32 %s2115_s24, %s2184_s27  ;;  %p55_p0 = scmp.ne.s32.totalorder %s2111_s23, %s2107_s22 }
   0x6   : > { %p46_p1 = scmp.eq.s32.totalorder %s45_s29, 0  ;;  %p56_p2 = scmp.eq.s32.totalorder %s2115_s24, 0 }
   0x7   : > { %p153_p3 = scmp.eq.s32.totalorder %s2180_s25, 1  ;;  %p158_p4 = scmp.ne.s32.totalorder %s2107_s22, %s2103_s21 }
   0x8   : > { %s2196_s30 = scalar_select %p46_p1, %s2111_s23, %s48_s28  }
   0x9   : > { %p57_p5 = por %p56_p2, %p55_p0  ;;  %p2198_p6 = por %p153_p3, %p55_p0 }
   0xa   : > { %p159_p7 = scmp.eq.s32.totalorder %s1577_s26, 1  ;;  %p1579_p9 = scmp.ge.s32.totalorder %s2115_s24, 2 }
   0xc   : > { %p2202_p8 = por %p159_p7, %p158_p4  ;;  %205 = sbr.rel (%p1579_p9) target bundleno = 36 (0x24), region = 28 }
  0x13   : > { %208 = sbr.rel (!%p57_p5) target bundleno = 36 (0x24), region = 32  ;;  %s210_s9 = sand.u32 (%p57_p5), 1, %s2111_s23  }
  0x14   : > { %s1868_s10 = smul.u32 (%p57_p5), 384, %s2115_s24 }
  0x15   : > { %s1867_s11 = smul.u32 (%p57_p5), 192, %s210_s9 }
  0x16   : > { %s2214_s14 = scalar_lea.vmem (%p57_p5), %s2976_s1, %s1868_s10 }
  0x17   : > { %v229_v0 = vld [vmem:[%s2214_s14] sm:$0xff] (%p57_p5)  ;;  %v231_v1 = vld [vmem:[%s2214_s14 + $0x8] sm:$0xff] (%p57_p5)  ;;  %v233_v2 = vld [vmem:[%s2214_s14 + $0x10] sm:$0xff] (%p57_p5)  ;;  %s2219_s15 = scalar_lea.vmem (%p57_p5), [#allocation2], %s1867_s11 }
  0x18   : > { %230 = vst [vmem:[%s2219_s15] sm:$0xff] (%p57_p5), %v229_v0  ;;  %232 = vst [vmem:[%s2219_s15 + $0x8] sm:$0xff] (%p57_p5), %v231_v1  ;;  %v235_v3 = vld [vmem:[%s2214_s14 + $0x30] sm:$0xff] (%p57_p5)  ;;  %v237_v4 = vld [vmem:[%s2214_s14 + $0x38] sm:$0xff] (%p57_p5) }
  0x19   : > { %234 = vst [vmem:[%s2219_s15 + $0x10] sm:$0xff] (%p57_p5), %v233_v2  ;;  %v239_v5 = vld [vmem:[%s2214_s14 + $0x40] sm:$0xff] (%p57_p5)  ;;  %236 = vst [vmem:[%s2219_s15 + $0x18] sm:$0xff] (%p57_p5), %v235_v3  ;;  %v243_v7 = vld [vmem:[%s2214_s14 + $0x68] sm:$0xff] (%p57_p5) }
  0x1a   : > { %238 = vst [vmem:[%s2219_s15 + $0x20] sm:$0xff] %v237_v4  ;;  %240 = vst [vmem:[%s2219_s15 + $0x28] sm:$0xff] %v239_v5  ;;  %v241_v6 = vld [vmem:[%s2214_s14 + $0x60] sm:$0xff]  ;;  %v245_v8 = vld [vmem:[%s2214_s14 + $0x70] sm:$0xff] }
  0x1b   : > { %242 = vst [vmem:[%s2219_s15 + $0x30] sm:$0xff] %v241_v6  ;;  %244 = vst [vmem:[%s2219_s15 + $0x38] sm:$0xff] %v243_v7  ;;  %v247_v9 = vld [vmem:[%s2214_s14 + $0x90] sm:$0xff]  ;;  %v249_v10 = vld [vmem:[%s2214_s14 + $0x98] sm:$0xff] }
  0x1c   : > { %246 = vst [vmem:[%s2219_s15 + $0x40] sm:$0xff] %v245_v8  ;;  %v251_v11 = vld [vmem:[%s2214_s14 + $0xa0] sm:$0xff]  ;;  %248 = vst [vmem:[%s2219_s15 + $0x48] sm:$0xff] %v247_v9  ;;  %v255_v13 = vld [vmem:[%s2214_s14 + $0xc8] sm:$0xff] }
  0x1d   : > { %250 = vst [vmem:[%s2219_s15 + $0x50] sm:$0xff] %v249_v10  ;;  %252 = vst [vmem:[%s2219_s15 + $0x58] sm:$0xff] %v251_v11  ;;  %v253_v12 = vld [vmem:[%s2214_s14 + $0xc0] sm:$0xff]  ;;  %v257_v14 = vld [vmem:[%s2214_s14 + $0xd0] sm:$0xff] }
  0x1e   : > { %254 = vst [vmem:[%s2219_s15 + $0x60] sm:$0xff] %v253_v12  ;;  %256 = vst [vmem:[%s2219_s15 + $0x68] sm:$0xff] %v255_v13  ;;  %v259_v15 = vld [vmem:[%s2214_s14 + $0xf0] sm:$0xff]  ;;  %v261_v16 = vld [vmem:[%s2214_s14 + $0xf8] sm:$0xff] }
  0x1f   : > { %258 = vst [vmem:[%s2219_s15 + $0x70] sm:$0xff] %v257_v14  ;;  %v263_v17 = vld [vmem:[%s2214_s14 + $0x100] sm:$0xff]  ;;  %260 = vst [vmem:[%s2219_s15 + $0x78] sm:$0xff] %v259_v15  ;;  %v267_v19 = vld [vmem:[%s2214_s14 + $0x128] sm:$0xff] }
  0x20   : > { %262 = vst [vmem:[%s2219_s15 + $0x80] sm:$0xff] %v261_v16  ;;  %264 = vst [vmem:[%s2219_s15 + $0x88] sm:$0xff] %v263_v17  ;;  %v265_v18 = vld [vmem:[%s2214_s14 + $0x120] sm:$0xff]  ;;  %v269_v20 = vld [vmem:[%s2214_s14 + $0x130] sm:$0xff] }
  0x21   : > { %266 = vst [vmem:[%s2219_s15 + $0x90] sm:$0xff] %v265_v18  ;;  %268 = vst [vmem:[%s2219_s15 + $0x98] sm:$0xff] %v267_v19  ;;  %v271_v21 = vld [vmem:[%s2214_s14 + $0x150] sm:$0xff]  ;;  %v273_v22 = vld [vmem:[%s2214_s14 + $0x158] sm:$0xff] }
  0x22   : > { %270 = vst [vmem:[%s2219_s15 + $0xa0] sm:$0xff] %v269_v20  ;;  %v275_v23 = vld [vmem:[%s2214_s14 + $0x160] sm:$0xff]  ;;  %272 = vst [vmem:[%s2219_s15 + $0xa8] sm:$0xff] %v271_v21 }
  0x23   : > { %274 = vst [vmem:[%s2219_s15 + $0xb0] sm:$0xff] %v273_v22  ;;  %276 = vst [vmem:[%s2219_s15 + $0xb8] sm:$0xff] %v275_v23 }
  0x24 PF: > { %p1583_p10 = scmp.ge.s32.totalorder %s2115_s24, 1  ;;  %p290_p11 = scmp.lt.s32.totalorder %s2115_s24, 3 }
  0x26   : > { %p291_p12 = pnand %p1583_p10, %p290_p11 }
  0x27   : > { %s2269_s16 = sand.u32 (!%p291_p12), 1, %s2107_s22   ;;  %s2272_s17 = sshll.u32 (!%p291_p12), %s2180_s25, 3 }
  0x28   : > { %294 = sbr.rel (%p291_p12) target bundleno = 2216 (0x8a8), region = 59  ;;  %s1584_s19 = sshll.u32 (!%p291_p12), %s2269_s16, 6 }
  0x29   : > { %s1869_s18 = smul.u32 (!%p291_p12), 192, %s2269_s16  ;;  %p333_p13 = scmp.lt.s32.totalorder (!%p291_p12), %s2272_s17, 15 }
  0x2a   : > { %s2285_s11 = scalar_lea.vmem (!%p291_p12), [#allocation3], %s1584_s19  ;;  %p1587_p0 = scmp.ne.s32.totalorder (!%p291_p12), %s2180_s25, 0 }
  0x2b   : > { %s2283_s10 = scalar_lea.vmem (!%p291_p12), [#allocation2], %s1869_s18 }
  0x2f   : > { %s334_s20 = scalar_select %p333_p13, %s2272_s17, 15 }
  0x30   : > { %343 = sbr.rel (%p1587_p0) target bundleno = 55 (0x37), region = 67  ;;  %v2117_v24 = vmov (!%p1587_p0), 0.0  }
  0x31   : > { %s1586_s26 = sshll.u32 %s334_s20, 3  ;;  %344 = vst [vmem:[%s2981_s6] sm:$0xff] (!%p1587_p0), %v2117_v24 }
  0x32   : > { %s2281_s9 = scalar_lea.vmem %s2979_s4, %s1586_s26 }
  0x37 PF: > { %v2294_v25 = vld [vmem:[%s2977_s2 + $0x4] ss:$12 sps:$4 sm:$0xff]   ;;  %v2299_v26 = vld [vmem:[%s2977_s2] ss:$12 sps:$4 sm:$0xff]   ;;  %v2118_v27 = vmov 0.0   ;;  %v2119_v28 = vmov 0   ;;  %v381_v41 = vstv %s2272_s17  ;;  %v388_v62 = vlaneseq }
  0x38   : > { %1707 = vmatprep.subr.bf16.mxu1 %v2118_v27  ;;  %563 = vmatprep.mubr.bf16.mxu0 %v2119_v28  ;;  %v2307_v29 = vld [vmem:[%s2977_s2 + $0x1c] ss:$12 sps:$4 sm:$0xff]   ;;  %vm2120_vm0 = vmmov 0   ;;  %v2315_v30 = vld [vmem:[%s2977_s2 + $0x18] ss:$12 sps:$4 sm:$0xff]   ;;  %s643_s20 = sadd.s32 1, %s2272_s17 }
  0x39   : > { %531 = vmatprep.subr.bf16.mxu0 %v2294_v25  ;;  %1723 = vmatprep.mubr.msk.bf16.mxu1 %vm2120_vm0, %v2118_v27  ;;  %v2322_v31 = vld [vmem:[%s2977_s2 + $0x34] ss:$12 sps:$4 sm:$0xff]   ;;  %v2329_v32 = vld [vmem:[%s2977_s2 + $0x30] ss:$12 sps:$4 sm:$0xff]   ;;  %v2335_v33 = vld [vmem:[%s2977_s2 + $0x4c] ss:$12 sps:$4 sm:$0xff]   ;;  %v644_v42 = vstv %s643_s20 }
  0x3a   : > { %532 = vmatpush1.bf16.msra.mxu0 %v2299_v26  ;;  %1915 = vset.pattern.permute.xlu0 %v2119_v28  ;;  %v2340_v34 = vld [vmem:[%s2977_s2 + $0x8] ss:$12 sps:$4 sm:$0xff]   ;;  %v2352_v36 = vld [vmem:[%s2977_s2 + $0x64] ss:$12 sps:$4 sm:$0xff]   ;;  %v2358_v37 = vld [vmem:[%s2977_s2 + $0x20] ss:$12 sps:$4 sm:$0xff]  }
  0x3b   : > { %533 = vmatprep.subr.bf16.mxu0 %v2307_v29  ;;  %1916 = vset.pattern.permute.xlu1 %v2119_v28  ;;  %v2346_v35 = vld [vmem:[%s2977_s2 + $0x48] ss:$12 sps:$4 sm:$0xff]   ;;  %v2365_v38 = vld [vmem:[%s2977_s2 + $0x60] ss:$12 sps:$4 sm:$0xff]   ;;  %v2378_v40 = vld [vmem:[%s2977_s2 + $0x38] ss:$12 sps:$4 sm:$0xff]  }
  0x3c   : > { %1708 = vmatpush3.bf16.msra.mxu1 %v2340_v34  ;;  %v2371_v39 = vld [vmem:[%s2977_s2 + $0x7c] ss:$12 sps:$4 sm:$0xff]   ;;  %s1000_s13 = sadd.s32 4, %s2272_s17  ;;  %v2387_v43 = vld [vmem:[%s2977_s2 + $0x78] ss:$12 sps:$4 sm:$0xff]   ;;  %s1238_s12 = sadd.s32 6, %s2272_s17 }
  0x3d   : > { %1709 = vmatprep.subr.bf16.mxu1 %v2118_v27  ;;  %v2392_v44 = vld [vmem:[%s2975_s0] sm:$0xff]  ;;  %v2404_v46 = vld [vmem:[%s2977_s2 + $0x50] ss:$12 sps:$4 sm:$0xff]   ;;  %v1001_v48 = vstv %s1000_s13  ;;  %v2422_v51 = vld [vmem:[%s2977_s2 + $0xac] ss:$12 sps:$4 sm:$0xff]   ;;  %v389_v63 = vshrl.u32 %v388_v62, 7 }
  0x3e   : > { %534 = vmatpush1.bf16.msra.mxu0 %v2315_v30  ;;  %v2398_v45 = vld [vmem:[%s2977_s2 + $0x94] ss:$12 sps:$4 sm:$0xff]   ;;  %vm382_vm1 = vcmp.gt.s32.totalorder %v2392_v44, %v381_v41  ;;  %vm645_vm2 = vcmp.gt.s32.totalorder %v2392_v44, %v644_v42  ;;  %v2415_v49 = vld [vmem:[%s2977_s2 + $0x90] ss:$12 sps:$4 sm:$0xff]   ;;  %vm1002_vm3 = vcmp.gt.s32.totalorder %v2392_v44, %v1001_v48  ;;  %v1239_v53 = vstv %s1238_s12  ;;  %v2461_v60 = vld [vmem:[%s2977_s2 + $0x98] ss:$12 sps:$4 sm:$0xff]  }
  0x3f   : > { %535 = vmatprep.subr.bf16.mxu0 %v2322_v31  ;;  %v633_v47 = vsel %vm382_vm1, 1, %v2119_v28  ;;  %v752_v50 = vsel %vm645_vm2, 1, %v2119_v28  ;;  %v2428_v52 = vld [vmem:[%s2977_s2 + $0x68] ss:$12 sps:$4 sm:$0xff]   ;;  %v2441_v55 = vld [vmem:[%s2981_s6] sm:$0xff]  ;;  %v1109_v56 = vsel %vm1002_vm3, 1, %v2119_v28  ;;  %vm1240_vm4 = vcmp.gt.s32.totalorder %v2392_v44, %v1239_v53 }
  0x40   : > { %1710 = vmatpush3.bf16.msra.mxu1 %v2358_v37  ;;  %635 = vperm.xlu0 %1915, %v633_v47   ;;  %v2436_v54 = vld [vmem:[%s2977_s2 + $0xa8] ss:$12 sps:$4 sm:$0xff]   ;;  %v2449_v57 = vld [vmem:[%s2977_s2 + $0x80] ss:$12 sps:$4 sm:$0xff]   ;;  %v386_v58 = vpack.c.bf16 %v2441_v55, %v2441_v55  ;;  %v1347_v59 = vsel %vm1240_vm4, 1, %v2119_v28  ;;  %v390_v0 = vsub.s32 0, %v389_v63 }
  0x41   : > { %1711 = vmatprep.subr.bf16.mxu1 %v2118_v27  ;;  %v2471_v61 = vld [vmem:[%s2977_s2 + $0xb0] ss:$12 sps:$4 sm:$0xff]   ;;  %v378_v1 = vld [vmem:[%s2978_s3] sm:$0x7]  ;;  %v394_v2 = vsub.s32 1, %v389_v63  ;;  %v384_v12 = vld [vmem:[%s2283_s10 + $0x8] sm:$0xff] }
  0x42   : > { %536 = vmatpush1.bf16.msra.mxu0 %v2329_v32  ;;  %v2512_v3 = vrot.slane %v378_v1, %v390_v0  ;;  %v383_v5 = vld [vmem:[%s2283_s10] sm:$0xff]  ;;  %v398_v23 = vsub.s32 2, %v389_v63  ;;  %s762_s29 = sadd.s32 2, %s2272_s17  ;;  %s881_s14 = sadd.s32 3, %s2272_s17 }
  0x43   : > { %537 = vmatprep.subr.bf16.mxu0 %v2335_v33  ;;  %v2514_v4 = vrot.slane %v378_v1, %v394_v2  ;;  %s1119_s12 = sadd.s32 5, %s2272_s17  ;;  %s1357_s15 = sadd.s32 7, %s2272_s17 }
  0x44   : > { %1712 = vmatpush3.bf16.msra.mxu1 %v2378_v40  ;;  %754 = vperm.xlu0 %1915, %v752_v50   ;;  %v2520_v24 = vrot.slane %v378_v1, %v398_v23  ;;  %v385_v50 = vld [vmem:[%s2283_s10 + $0x10] sm:$0xff]  ;;  %s1634_s19 = sshll.u32 %s2180_s25, 10  ;;  %s1491_s28 = sshll.u32 %s2285_s11, 4  ;;  %s2927_s28 = int_to_ptr.vmem [resolvable:$true] %s1491_s28 }
  0x45   : > { %1713 = vmatprep.subr.bf16.mxu1 %v2118_v27  ;;  %s1478_s25 = scalar_lea.sflag [#allocation4], %s2269_s16 }
  0x46   : > { %538 = vmatpush1.bf16.msra.mxu0 %v2346_v35 }
  0x47   : > { %539 = vmatprep.subr.bf16.mxu0 %v2352_v36 }
  0x48   : > { %1714 = vmatpush3.bf16.msra.mxu1 %v2404_v46  ;;  %1111 = vperm.xlu0 %1915, %v1109_v56  }
  0x49   : > { %1715 = vmatprep.subr.bf16.mxu1 %v2118_v27 }
  0x4a   : > { %540 = vmatpush1.bf16.msra.mxu0 %v2365_v38 }
  0x4b   : > { %541 = vmatprep.subr.bf16.mxu0 %v2371_v39 }
  0x4c   : > { %1716 = vmatpush3.bf16.msra.mxu1 %v2428_v52  ;;  %1349 = vperm.xlu0 %1915, %v1347_v59  }
  0x4d   : > { %1717 = vmatprep.subr.bf16.mxu1 %v2118_v27 }
  0x4e   : > { %542 = vmatpush1.bf16.msra.mxu0 %v2387_v43 }
  0x4f   : > { %543 = vmatprep.subr.bf16.mxu0 %v2398_v45 }
  0x50   : > { %1718 = vmatpush3.bf16.msra.mxu1 %v2449_v57 }
  0x51   : > { %1719 = vmatprep.subr.bf16.mxu1 %v2118_v27 }
  0x52   : > { %544 = vmatpush1.bf16.msra.mxu0 %v2415_v49 }
  0x53   : > { %545 = vmatprep.subr.bf16.mxu0 %v2422_v51 }
  0x54   : > { %1720 = vmatpush3.bf16.msra.mxu1 %v2461_v60 }
  0x55   : > { %1721 = vmatprep.subr.bf16.mxu1 %v2118_v27 }
  0x56   : > { %546 = vmatpush1.bf16.msra.mxu0 %v2436_v54 }
  0x57   : > { %650 = vmatprep.subr.bf16.mxu0 %v2294_v25 }
  0x58   : > { %1722 = vmatpush3.bf16.msra.mxu1 %v2471_v61 }
  0x59   : > { %564 = vmatmul.mubr.bf16.vlgmr.msra.gmra.mrb[0].mxu0 %v386_v58  ;;  %1727 = vmatprep.subr.bf16.mxu1 %v2118_v27 }
  0x5a   : > { %651 = vmatpush1.bf16.msra.mxu0 %v2299_v26  ;;  %682 = vmatprep.mubr.bf16.mxu0 %v2119_v28 }
  0x5b   : > { %652 = vmatprep.subr.bf16.mxu0 %v2307_v29  ;;  %1724 = vmatmul.mubr.bf16.vlgmr.msra.gmra.mrb[0].mxu1 %v386_v58 }
  0x5c   : > { %1728 = vmatpush3.bf16.msra.mxu1 %v2340_v34  ;;  %1743 = vmatprep.mubr.msk.bf16.mxu1 %vm2120_vm0, %v2118_v27 }
  0x5d   : > { %1729 = vmatprep.subr.bf16.mxu1 %v2118_v27 }
  0x5e   : > { %653 = vmatpush1.bf16.msra.mxu0 %v2315_v30 }
  0x5f   : > { %654 = vmatprep.subr.bf16.mxu0 %v2322_v31 }
  0x60   : > { %1730 = vmatpush3.bf16.msra.mxu1 %v2358_v37 }
  0x61   : > { %1731 = vmatprep.subr.bf16.mxu1 %v2118_v27 }
  0x62   : > { %655 = vmatpush1.bf16.msra.mxu0 %v2329_v32 }
  0x63   : > { %656 = vmatprep.subr.bf16.mxu0 %v2335_v33 }
  0x64   : > { %1732 = vmatpush3.bf16.msra.mxu1 %v2378_v40 }
  0x65   : > { %1733 = vmatprep.subr.bf16.mxu1 %v2118_v27 }
  0x66   : > { %657 = vmatpush1.bf16.msra.mxu0 %v2346_v35 }
  0x67   : > { %658 = vmatprep.subr.bf16.mxu0 %v2352_v36 }
  0x68   : > { %1734 = vmatpush3.bf16.msra.mxu1 %v2404_v46 }
  0x69   : > { %1735 = vmatprep.subr.bf16.mxu1 %v2118_v27 }
  0x6a   : > { %659 = vmatpush1.bf16.msra.mxu0 %v2365_v38 }
  0x6b   : > { %660 = vmatprep.subr.bf16.mxu0 %v2371_v39 }
  0x6c   : > { %1736 = vmatpush3.bf16.msra.mxu1 %v2428_v52 }
  0x6d   : > { %1737 = vmatprep.subr.bf16.mxu1 %v2118_v27 }
  0x6e   : > { %661 = vmatpush1.bf16.msra.mxu0 %v2387_v43 }
  0x6f   : > { %662 = vmatprep.subr.bf16.mxu0 %v2398_v45 }
  0x70   : > { %1738 = vmatpush3.bf16.msra.mxu1 %v2449_v57 }
  0x71   : > { %1739 = vmatprep.subr.bf16.mxu1 %v2118_v27 }
  0x72   : > { %663 = vmatpush1.bf16.msra.mxu0 %v2415_v49 }
  0x73   : > { %664 = vmatprep.subr.bf16.mxu0 %v2422_v51 }
  0x74   : > { %1740 = vmatpush3.bf16.msra.mxu1 %v2461_v60 }
  0x75   : > { %1741 = vmatprep.subr.bf16.mxu1 %v2118_v27 }
  0x76   : > { %665 = vmatpush1.bf16.msra.mxu0 %v2436_v54 }
  0x77   : > { %769 = vmatprep.subr.bf16.mxu0 %v2294_v25 }
  0x78   : > { %1742 = vmatpush3.bf16.msra.mxu1 %v2471_v61 }
  0x79   : > { %1747 = vmatprep.subr.bf16.mxu1 %v2118_v27 }
  0xbf   : > { %v636_v1 = vpop.permute.xlu0 %635 }
  0xc0   : > { %vm637_vm5 = vcmp.eq.s32.totalorder %v636_v1, 1 }
 0x12c   : > { %v565_v6 = vpop.f32.mrb[0].mxu0 }
 0x12d   : > { %v566_v7 = vadd.f32 %v565_v6, %v2512_v3  ;;  %v567_v8 = vpop.f32.mrb[1].mxu0 }
 0x12e   : > { %v568_v9 = vadd.f32 %v567_v8, %v2514_v4  ;;  %v569_v10 = vpop.f32.mrb[2].mxu0  ;;  %v606_v16 = vpop.f32.mrb[0].mxu1 }
 0x12f   : > { %v612_v11 = vadd.f32 %v566_v7, %v383_v5  ;;  %v570_v13 = vpop.f32.mrb[3].mxu0  ;;  %v1725_v18 = vpop.f32.mrb[1].mxu1  ;;  %v607_v47 = vadd.f32 %v606_v16, %v2520_v24  ;;  %v640_v5 = vld [vmem:[%s2281_s9] sm:$0xff]  ;;  %v882_v10 = vstv %s881_s14 }
 0x130   : > { %v619_v15 = vadd.f32 %v568_v9, %v384_v12  ;;  %v609_v19 = vpop.f32.mrb[2].mxu1  ;;  %vm883_vm7 = vcmp.gt.s32.totalorder %v2392_v44, %v882_v10  ;;  %v1120_v12 = vstv %s1119_s12 }
 0x131   : > { %v1613_v14 = vmul.f32 -1.442695, %v612_v11  ;;  %v1726_v20 = vpop.f32.mrb[3].mxu1  ;;  %v990_v13 = vsel %vm883_vm7, 1, %v2119_v28  ;;  %vm1121_vm8 = vcmp.gt.s32.totalorder %v2392_v44, %v1120_v12 }
 0x132   : > { %v1614_v17 = vmul.f32 -1.442695, %v619_v15  ;;  %v1228_v15 = vsel %vm1121_vm8, 1, %v2119_v28 }
 0x133   : > { %1949 = vpow2.f32 %v1613_v14  ;;  %v1358_v14 = vstv %s1357_s15  ;;  %s2121_s15 = smov [#allocation3]  }
 0x134   : > { %1951 = vpow2.f32 %v1614_v17  ;;  %vm1359_vm9 = vcmp.gt.s32.totalorder %v2392_v44, %v1358_v14  ;;  %v646_v17 = vld [vmem:[%s2283_s10 + $0x18] sm:$0xff]  ;;  %s2057_s17 = sshll.u32 %s2121_s15, 4  ;;  %s2058_s17 = int_to_ptr.vmem [resolvable:$false] %s2057_s17 }
 0x135   : > { %v1466_v16 = vsel %vm1359_vm9, 1, %v2119_v28  ;;  %s2059_s26 = scalar_lea.vmem %s2058_s17, 2048  ;;  %p2060_p4 = scmp.lt.s32.totalorder %s2927_s28, %s2058_s17 }
 0x13d   : > { %v1950_v21 = vpop.eup %1949 }
 0x13e   : > { %v616_v22 = vadd.f32 1.0, %v1950_v21  ;;  %v1952_v41 = vpop.eup %1951 }
 0x13f   : > { %v623_v42 = vadd.f32 1.0, %v1952_v41 }
 0x140   : > { %1953 = vrcp.f32 %v616_v22 }
 0x141   : > { %1955 = vrcp.f32 %v623_v42 }
 0x14a   : > { %v1954_v48 = vpop.eup %1953 }
 0x14b   : > { %v626_v53 = vmul.f32 %v1954_v48, %v607_v47  ;;  %v1956_v58 = vpop.eup %1955  ;;  %v647_v48 = vld [vmem:[%s2283_s10 + $0x20] sm:$0xff] }
 0x14c   : > { %v629_v59 = vsub.f32 1.0, %v1956_v58  ;;  %v631_v63 = vmul.f32 %v1956_v58, %v2441_v55 }
 0x14d   : > { %v627_v56 = vadd.f32 %v626_v53, %v385_v50 }
 0x14f   : > { %1957 = vtanh.f32 %v627_v56 }
 0x159   : > { %v1958_v62 = vpop.eup %1957 }
 0x15a   : > { %v630_v0 = vmul.f32 %v1958_v62, %v629_v59 }
 0x15c   : > { %v632_v2 = vadd.f32 %v631_v63, %v630_v0 }
 0x15e   : > { %v2527_v6 = vsel %vm637_vm5, %v632_v2, %v2441_v55  ;;  %v639_v7 = vsel %vm637_vm5, %v632_v2, 0.0  ;;  %v763_v55 = vstv %s762_s29  ;;  %s2925_s29 = scalar_lea.hbm %s2980_s5, %s1634_s19 }
 0x15f   : > { %v641_v8 = vadd.f32 %v640_v5, %v639_v7  ;;  %v649_v9 = vpack.c.bf16 %v2527_v6, %v2527_v6  ;;  %vm764_vm6 = vcmp.gt.s32.totalorder %v2392_v44, %v763_v55  ;;  %v648_v5 = vld [vmem:[%s2283_s10 + $0x28] sm:$0xff] }
 0x160   : > { %v871_v11 = vsel %vm764_vm6, 1, %v2119_v28 }
 0x161   : > { %642 = vst [vmem:[%s2285_s11] sm:$0xff] %v641_v8  ;;  %683 = vmatmul.mubr.bf16.vlgmr.msra.gmra.mrb[4].mxu0 %v649_v9  ;;  %1744 = vmatmul.mubr.bf16.vlgmr.msra.gmra.mrb[4].mxu1 %v649_v9 }
 0x162   : > { %770 = vmatpush1.bf16.msra.mxu0 %v2299_v26  ;;  %1748 = vmatpush3.bf16.msra.mxu1 %v2340_v34 }
 0x163   : > { %771 = vmatprep.subr.bf16.mxu0 %v2307_v29  ;;  %1749 = vmatprep.subr.bf16.mxu1 %v2118_v27 }
 0x164   : > { %801 = vmatprep.mubr.bf16.mxu0 %v2119_v28  ;;  %1763 = vmatprep.mubr.msk.bf16.mxu1 %vm2120_vm0, %v2118_v27 }
 0x165   : > { %873 = vperm.xlu1 %1916, %v871_v11  }
 0x166   : > { %772 = vmatpush1.bf16.msra.mxu0 %v2315_v30  ;;  %1750 = vmatpush3.bf16.msra.mxu1 %v2358_v37 }
 0x167   : > { %773 = vmatprep.subr.bf16.mxu0 %v2322_v31  ;;  %1751 = vmatprep.subr.bf16.mxu1 %v2118_v27 }
 0x169   : > { %992 = vperm.xlu1 %1916, %v990_v13   ;;  %v755_v13 = vpop.permute.xlu0 %754 }
 0x16a   : > { %774 = vmatpush1.bf16.msra.mxu0 %v2329_v32  ;;  %1752 = vmatpush3.bf16.msra.mxu1 %v2378_v40  ;;  %vm756_vm10 = vcmp.eq.s32.totalorder %v755_v13, 1 }
 0x16b   : > { %775 = vmatprep.subr.bf16.mxu0 %v2335_v33  ;;  %1753 = vmatprep.subr.bf16.mxu1 %v2118_v27 }
 0x16d   : > { %1230 = vperm.xlu1 %1916, %v1228_v15   ;;  %v759_v15 = vld [vmem:[%s2281_s9 + $0x8] sm:$0xff] }
 0x16e   : > { %776 = vmatpush1.bf16.msra.mxu0 %v2346_v35  ;;  %1754 = vmatpush3.bf16.msra.mxu1 %v2404_v46 }
 0x16f   : > { %777 = vmatprep.subr.bf16.mxu0 %v2352_v36  ;;  %1755 = vmatprep.subr.bf16.mxu1 %v2118_v27 }
 0x171   : > { %1468 = vperm.xlu1 %1916, %v1466_v16  }
 0x172   : > { %778 = vmatpush1.bf16.msra.mxu0 %v2365_v38  ;;  %1756 = vmatpush3.bf16.msra.mxu1 %v2428_v52 }
 0x173   : > { %779 = vmatprep.subr.bf16.mxu0 %v2371_v39  ;;  %1757 = vmatprep.subr.bf16.mxu1 %v2118_v27 }
 0x176   : > { %780 = vmatpush1.bf16.msra.mxu0 %v2387_v43  ;;  %1758 = vmatpush3.bf16.msra.mxu1 %v2449_v57 }
 0x177   : > { %781 = vmatprep.subr.bf16.mxu0 %v2398_v45  ;;  %1759 = vmatprep.subr.bf16.mxu1 %v2118_v27 }
 0x17a   : > { %782 = vmatpush1.bf16.msra.mxu0 %v2415_v49  ;;  %1760 = vmatpush3.bf16.msra.mxu1 %v2461_v60 }
 0x17b   : > { %783 = vmatprep.subr.bf16.mxu0 %v2422_v51  ;;  %1761 = vmatprep.subr.bf16.mxu1 %v2118_v27 }
 0x17e   : > { %784 = vmatpush1.bf16.msra.mxu0 %v2436_v54  ;;  %1762 = vmatpush3.bf16.msra.mxu1 %v2471_v61 }
 0x17f   : > { %888 = vmatprep.subr.bf16.mxu0 %v2294_v25  ;;  %1767 = vmatprep.subr.bf16.mxu1 %v2118_v27 }
 0x1e4   : > { %v874_v13 = vpop.permute.xlu1 %873 }
 0x1e5   : > { %vm875_vm11 = vcmp.eq.s32.totalorder %v874_v13, 1 }
 0x234   : > { %v684_v18 = vpop.f32.mrb[4].mxu0  ;;  %v725_v19 = vpop.f32.mrb[4].mxu1 }
 0x235   : > { %v685_v20 = vadd.f32 %v684_v18, %v2512_v3  ;;  %v686_v21 = vpop.f32.mrb[5].mxu0  ;;  %v1745_v22 = vpop.f32.mrb[5].mxu1  ;;  %v726_v1 = vadd.f32 %v725_v19, %v2520_v24 }
 0x236   : > { %v687_v23 = vadd.f32 %v686_v21, %v2514_v4  ;;  %v688_v41 = vpop.f32.mrb[6].mxu0  ;;  %v728_v42 = vpop.f32.mrb[6].mxu1 }
 0x237   : > { %v731_v47 = vadd.f32 %v685_v20, %v646_v17  ;;  %v689_v50 = vpop.f32.mrb[7].mxu0  ;;  %v1746_v44 = vpop.f32.mrb[7].mxu1 }
 0x238   : > { %v738_v56 = vadd.f32 %v687_v23, %v647_v48  ;;  %v766_v44 = vld [vmem:[%s2283_s10 + $0x38] sm:$0xff] }
 0x239   : > { %v1615_v53 = vmul.f32 -1.442695, %v731_v47 }
 0x23a   : > { %v1616_v58 = vmul.f32 -1.442695, %v738_v56 }
 0x23b   : > { %1959 = vpow2.f32 %v1615_v53 }
 0x23c   : > { %1961 = vpow2.f32 %v1616_v58 }
 0x245   : > { %v1960_v59 = vpop.eup %1959 }
 0x246   : > { %v735_v62 = vadd.f32 1.0, %v1960_v59  ;;  %v1962_v0 = vpop.eup %1961 }
 0x247   : > { %v742_v63 = vadd.f32 1.0, %v1962_v0 }
 0x248   : > { %1963 = vrcp.f32 %v735_v62 }
 0x249   : > { %1965 = vrcp.f32 %v742_v63 }
 0x252   : > { %v1964_v2 = vpop.eup %1963 }
 0x253   : > { %v745_v7 = vmul.f32 %v1964_v2, %v726_v1  ;;  %v1966_v9 = vpop.eup %1965 }
 0x254   : > { %v748_v55 = vsub.f32 1.0, %v1966_v9  ;;  %v750_v12 = vmul.f32 %v1966_v9, %v2527_v6 }
 0x255   : > { %v746_v8 = vadd.f32 %v745_v7, %v648_v5 }
 0x257   : > { %1967 = vtanh.f32 %v746_v8  ;;  %v767_v8 = vld [vmem:[%s2283_s10 + $0x40] sm:$0xff] }
 0x261   : > { %v1968_v10 = vpop.eup %1967 }
 0x262   : > { %v749_v11 = vmul.f32 %v1968_v10, %v748_v55 }
 0x264   : > { %v751_v14 = vadd.f32 %v750_v12, %v749_v11 }
 0x266   : > { %v2588_v16 = vsel %vm756_vm10, %v751_v14, %v2527_v6  ;;  %v758_v17 = vsel %vm756_vm10, %v751_v14, 0.0  ;;  %v765_v6 = vld [vmem:[%s2283_s10 + $0x30] sm:$0xff] }
 0x267   : > { %v760_v18 = vadd.f32 %v759_v15, %v758_v17  ;;  %v768_v19 = vpack.c.bf16 %v2588_v16, %v2588_v16  ;;  %v878_v17 = vld [vmem:[%s2281_s9 + $0x10] sm:$0xff] }
 0x269   : > { %761 = vst [vmem:[%s2285_s11 + $0x8] sm:$0xff] %v760_v18  ;;  %802 = vmatmul.mubr.bf16.vlgmr.msra.gmra.mrb[8].mxu0 %v768_v19  ;;  %1764 = vmatmul.mubr.bf16.vlgmr.msra.gmra.mrb[8].mxu1 %v768_v19 }
 0x26a   : > { %889 = vmatpush1.bf16.msra.mxu0 %v2299_v26  ;;  %1768 = vmatpush3.bf16.msra.mxu1 %v2340_v34 }
 0x26b   : > { %890 = vmatprep.subr.bf16.mxu0 %v2307_v29  ;;  %1769 = vmatprep.subr.bf16.mxu1 %v2118_v27 }
 0x26c   : > { %920 = vmatprep.mubr.bf16.mxu0 %v2119_v28  ;;  %1783 = vmatprep.mubr.msk.bf16.mxu1 %vm2120_vm0, %v2118_v27 }
 0x26e   : > { %891 = vmatpush1.bf16.msra.mxu0 %v2315_v30  ;;  %1770 = vmatpush3.bf16.msra.mxu1 %v2358_v37 }
 0x26f   : > { %892 = vmatprep.subr.bf16.mxu0 %v2322_v31  ;;  %1771 = vmatprep.subr.bf16.mxu1 %v2118_v27 }
 0x272   : > { %893 = vmatpush1.bf16.msra.mxu0 %v2329_v32  ;;  %1772 = vmatpush3.bf16.msra.mxu1 %v2378_v40 }
 0x273   : > { %894 = vmatprep.subr.bf16.mxu0 %v2335_v33  ;;  %1773 = vmatprep.subr.bf16.mxu1 %v2118_v27 }
 0x276   : > { %895 = vmatpush1.bf16.msra.mxu0 %v2346_v35  ;;  %1774 = vmatpush3.bf16.msra.mxu1 %v2404_v46 }
 0x277   : > { %896 = vmatprep.subr.bf16.mxu0 %v2352_v36  ;;  %1775 = vmatprep.subr.bf16.mxu1 %v2118_v27 }
 0x27a   : > { %897 = vmatpush1.bf16.msra.mxu0 %v2365_v38  ;;  %1776 = vmatpush3.bf16.msra.mxu1 %v2428_v52 }
 0x27b   : > { %898 = vmatprep.subr.bf16.mxu0 %v2371_v39  ;;  %1777 = vmatprep.subr.bf16.mxu1 %v2118_v27 }
 0x27e   : > { %899 = vmatpush1.bf16.msra.mxu0 %v2387_v43  ;;  %1778 = vmatpush3.bf16.msra.mxu1 %v2449_v57 }
 0x27f   : > { %900 = vmatprep.subr.bf16.mxu0 %v2398_v45  ;;  %1779 = vmatprep.subr.bf16.mxu1 %v2118_v27 }
 0x282   : > { %901 = vmatpush1.bf16.msra.mxu0 %v2415_v49  ;;  %1780 = vmatpush3.bf16.msra.mxu1 %v2461_v60 }
 0x283   : > { %902 = vmatprep.subr.bf16.mxu0 %v2422_v51  ;;  %1781 = vmatprep.subr.bf16.mxu1 %v2118_v27 }
 0x286   : > { %903 = vmatpush1.bf16.msra.mxu0 %v2436_v54  ;;  %1782 = vmatpush3.bf16.msra.mxu1 %v2471_v61 }
 0x287   : > { %1007 = vmatprep.subr.bf16.mxu0 %v2294_v25  ;;  %1787 = vmatprep.subr.bf16.mxu1 %v2118_v27 }
 0x33c   : > { %v803_v20 = vpop.f32.mrb[8].mxu0  ;;  %v844_v21 = vpop.f32.mrb[8].mxu1 }
 0x33d   : > { %v804_v22 = vadd.f32 %v803_v20, %v2512_v3  ;;  %v805_v23 = vpop.f32.mrb[9].mxu0  ;;  %v1765_v41 = vpop.f32.mrb[9].mxu1  ;;  %v845_v5 = vadd.f32 %v844_v21, %v2520_v24 }
 0x33e   : > { %v806_v42 = vadd.f32 %v805_v23, %v2514_v4  ;;  %v807_v47 = vpop.f32.mrb[10].mxu0  ;;  %v847_v48 = vpop.f32.mrb[10].mxu1 }
 0x33f   : > { %v850_v50 = vadd.f32 %v804_v22, %v765_v6  ;;  %v808_v53 = vpop.f32.mrb[11].mxu0  ;;  %v1766_v56 = vpop.f32.mrb[11].mxu1 }
 0x340   : > { %v857_v59 = vadd.f32 %v806_v42, %v766_v44  ;;  %v885_v56 = vld [vmem:[%s2283_s10 + $0x50] sm:$0xff] }
 0x341   : > { %v1617_v58 = vmul.f32 -1.442695, %v850_v50 }
 0x342   : > { %v1618_v62 = vmul.f32 -1.442695, %v857_v59 }
 0x343   : > { %1969 = vpow2.f32 %v1617_v58 }
 0x344   : > { %1971 = vpow2.f32 %v1618_v62 }
 0x34d   : > { %v1970_v0 = vpop.eup %1969 }
 0x34e   : > { %v854_v63 = vadd.f32 1.0, %v1970_v0  ;;  %v1972_v1 = vpop.eup %1971 }
 0x34f   : > { %v861_v2 = vadd.f32 1.0, %v1972_v1 }
 0x350   : > { %1973 = vrcp.f32 %v854_v63 }
 0x351   : > { %1975 = vrcp.f32 %v861_v2 }
 0x35a   : > { %v1974_v7 = vpop.eup %1973 }
 0x35b   : > { %v864_v9 = vmul.f32 %v1974_v7, %v845_v5  ;;  %v1976_v10 = vpop.eup %1975 }
 0x35c   : > { %v867_v11 = vsub.f32 1.0, %v1976_v10  ;;  %v869_v15 = vmul.f32 %v1976_v10, %v2588_v16 }
 0x35d   : > { %v865_v55 = vadd.f32 %v864_v9, %v767_v8 }
 0x35f   : > { %1977 = vtanh.f32 %v865_v55  ;;  %v886_v55 = vld [vmem:[%s2283_s10 + $0x58] sm:$0xff] }
 0x369   : > { %v1978_v12 = vpop.eup %1977 }
 0x36a   : > { %v868_v14 = vmul.f32 %v1978_v12, %v867_v11 }
 0x36c   : > { %v870_v18 = vadd.f32 %v869_v15, %v868_v14 }
 0x36e   : > { %v2637_v19 = vsel %vm875_vm11, %v870_v18, %v2588_v16  ;;  %v877_v6 = vsel %vm875_vm11, %v870_v18, 0.0  ;;  %v884_v16 = vld [vmem:[%s2283_s10 + $0x48] sm:$0xff]  ;;  %v993_v18 = vpop.permute.xlu1 %992 }
 0x36f   : > { %v879_v20 = vadd.f32 %v878_v17, %v877_v6  ;;  %v887_v21 = vpack.c.bf16 %v2637_v19, %v2637_v19  ;;  %vm994_vm12 = vcmp.eq.s32.totalorder %v993_v18, 1  ;;  %v2765_v18 = vld [vmem:[%s2977_s2 + $0x18] ss:$12 sps:$4 sm:$0xff]  }
 0x371   : > { %880 = vst [vmem:[%s2285_s11 + $0x10] sm:$0xff] %v879_v20  ;;  %921 = vmatmul.mubr.bf16.vlgmr.msra.gmra.mrb[12].mxu0 %v887_v21  ;;  %1784 = vmatmul.mubr.bf16.vlgmr.msra.gmra.mrb[12].mxu1 %v887_v21  ;;  %v997_v20 = vld [vmem:[%s2281_s9 + $0x18] sm:$0xff] }
 0x372   : > { %1008 = vmatpush1.bf16.msra.mxu0 %v2299_v26  ;;  %1788 = vmatpush3.bf16.msra.mxu1 %v2340_v34 }
 0x373   : > { %1009 = vmatprep.subr.bf16.mxu0 %v2307_v29  ;;  %1789 = vmatprep.subr.bf16.mxu1 %v2118_v27 }
 0x374   : > { %1039 = vmatprep.mubr.bf16.mxu0 %v2119_v28  ;;  %1803 = vmatprep.mubr.msk.bf16.mxu1 %vm2120_vm0, %v2118_v27 }
 0x376   : > { %1010 = vmatpush1.bf16.msra.mxu0 %v2315_v30  ;;  %1790 = vmatpush3.bf16.msra.mxu1 %v2358_v37 }
 0x377   : > { %1011 = vmatprep.subr.bf16.mxu0 %v2322_v31  ;;  %1791 = vmatprep.subr.bf16.mxu1 %v2118_v27 }
 0x37a   : > { %1012 = vmatpush1.bf16.msra.mxu0 %v2329_v32  ;;  %1792 = vmatpush3.bf16.msra.mxu1 %v2378_v40 }
 0x37b   : > { %1013 = vmatprep.subr.bf16.mxu0 %v2335_v33  ;;  %1793 = vmatprep.subr.bf16.mxu1 %v2118_v27 }
 0x37e   : > { %1014 = vmatpush1.bf16.msra.mxu0 %v2346_v35  ;;  %1794 = vmatpush3.bf16.msra.mxu1 %v2404_v46 }
 0x37f   : > { %1015 = vmatprep.subr.bf16.mxu0 %v2352_v36  ;;  %1795 = vmatprep.subr.bf16.mxu1 %v2118_v27 }
 0x382   : > { %1016 = vmatpush1.bf16.msra.mxu0 %v2365_v38  ;;  %1796 = vmatpush3.bf16.msra.mxu1 %v2428_v52 }
 0x383   : > { %1017 = vmatprep.subr.bf16.mxu0 %v2371_v39  ;;  %1797 = vmatprep.subr.bf16.mxu1 %v2118_v27 }
 0x386   : > { %1018 = vmatpush1.bf16.msra.mxu0 %v2387_v43  ;;  %1798 = vmatpush3.bf16.msra.mxu1 %v2449_v57 }
 0x387   : > { %1019 = vmatprep.subr.bf16.mxu0 %v2398_v45  ;;  %1799 = vmatprep.subr.bf16.mxu1 %v2118_v27 }
 0x38a   : > { %1020 = vmatpush1.bf16.msra.mxu0 %v2415_v49  ;;  %1800 = vmatpush3.bf16.msra.mxu1 %v2461_v60 }
 0x38b   : > { %1021 = vmatprep.subr.bf16.mxu0 %v2422_v51  ;;  %1801 = vmatprep.subr.bf16.mxu1 %v2118_v27 }
 0x38e   : > { %1022 = vmatpush1.bf16.msra.mxu0 %v2436_v54  ;;  %1802 = vmatpush3.bf16.msra.mxu1 %v2471_v61 }
 0x38f   : > { %1126 = vmatprep.subr.bf16.mxu0 %v2294_v25  ;;  %1807 = vmatprep.subr.bf16.mxu1 %v2118_v27 }
 0x444   : > { %v922_v22 = vpop.f32.mrb[12].mxu0  ;;  %v963_v23 = vpop.f32.mrb[12].mxu1 }
 0x445   : > { %v923_v41 = vadd.f32 %v922_v22, %v2512_v3  ;;  %v924_v42 = vpop.f32.mrb[13].mxu0  ;;  %v1785_v47 = vpop.f32.mrb[13].mxu1  ;;  %v964_v8 = vadd.f32 %v963_v23, %v2520_v24 }
 0x446   : > { %v925_v48 = vadd.f32 %v924_v42, %v2514_v4  ;;  %v926_v50 = vpop.f32.mrb[14].mxu0  ;;  %v966_v44 = vpop.f32.mrb[14].mxu1 }
 0x447   : > { %v969_v53 = vadd.f32 %v923_v41, %v884_v16  ;;  %v927_v58 = vpop.f32.mrb[15].mxu0  ;;  %v1786_v59 = vpop.f32.mrb[15].mxu1 }
 0x448   : > { %v976_v0 = vadd.f32 %v925_v48, %v885_v56  ;;  %v1005_v59 = vld [vmem:[%s2283_s10 + $0x70] sm:$0xff] }
 0x449   : > { %v1619_v62 = vmul.f32 -1.442695, %v969_v53 }
 0x44a   : > { %v1620_v63 = vmul.f32 -1.442695, %v976_v0 }
 0x44b   : > { %1979 = vpow2.f32 %v1619_v62 }
 0x44c   : > { %1981 = vpow2.f32 %v1620_v63 }
 0x455   : > { %v1980_v1 = vpop.eup %1979 }
 0x456   : > { %v973_v2 = vadd.f32 1.0, %v1980_v1  ;;  %v1982_v5 = vpop.eup %1981 }
 0x457   : > { %v980_v7 = vadd.f32 1.0, %v1982_v5 }
 0x458   : > { %1983 = vrcp.f32 %v973_v2 }
 0x459   : > { %1985 = vrcp.f32 %v980_v7 }
 0x462   : > { %v1984_v9 = vpop.eup %1983 }
 0x463   : > { %v983_v10 = vmul.f32 %v1984_v9, %v964_v8  ;;  %v1986_v12 = vpop.eup %1985  ;;  %v1112_v8 = vpop.permute.xlu0 %1111 }
 0x464   : > { %v986_v13 = vsub.f32 1.0, %v1986_v12  ;;  %v988_v17 = vmul.f32 %v1986_v12, %v2637_v19  ;;  %vm1113_vm13 = vcmp.eq.s32.totalorder %v1112_v8, 1  ;;  %v2045_v8 = vld [vmem:[%s2977_s2 + $0x78] ss:$12 sps:$4 sm:$0xff]  }
 0x465   : > { %v984_v11 = vadd.f32 %v983_v10, %v886_v55  ;;  %v1116_v55 = vld [vmem:[%s2281_s9 + $0x20] sm:$0xff] }
 0x467   : > { %1987 = vtanh.f32 %v984_v11 }
 0x471   : > { %v1988_v14 = vpop.eup %1987 }
 0x472   : > { %v987_v15 = vmul.f32 %v1988_v14, %v986_v13  ;;  %v2743_v14 = vld [vmem:[%s2977_s2] ss:$12 sps:$4 sm:$0xff]  }
 0x474   : > { %v989_v6 = vadd.f32 %v988_v17, %v987_v15  ;;  %v2749_v15 = vld [vmem:[%s2977_s2 + $0x8] ss:$12 sps:$4 sm:$0xff]  }
 0x475   : > { %v2755_v17 = vld [vmem:[%s2977_s2 + $0x1c] ss:$12 sps:$4 sm:$0xff]  }
 0x476   : > { %v2686_v21 = vsel %vm994_vm12, %v989_v6, %v2637_v19  ;;  %v996_v16 = vsel %vm994_vm12, %v989_v6, 0.0  ;;  %v2772_v6 = vld [vmem:[%s2977_s2 + $0x34] ss:$12 sps:$4 sm:$0xff]  }
 0x477   : > { %v998_v22 = vadd.f32 %v997_v20, %v996_v16  ;;  %v1006_v23 = vpack.c.bf16 %v2686_v21, %v2686_v21  ;;  %v2779_v20 = vld [vmem:[%s2977_s2 + $0x30] ss:$12 sps:$4 sm:$0xff]   ;;  %v2807_v16 = vld [vmem:[%s2977_s2 + $0x60] ss:$12 sps:$4 sm:$0xff]  }
 0x479   : > { %999 = vst [vmem:[%s2285_s11 + $0x18] sm:$0xff] %v998_v22  ;;  %1040 = vmatmul.mubr.bf16.vlgmr.msra.gmra.mrb[16].mxu0 %v1006_v23  ;;  %1804 = vmatmul.mubr.bf16.vlgmr.msra.gmra.mrb[16].mxu1 %v1006_v23 }
 0x47a   : > { %1127 = vmatpush1.bf16.msra.mxu0 %v2299_v26  ;;  %1808 = vmatpush3.bf16.msra.mxu1 %v2340_v34  ;;  %v1003_v26 = vld [vmem:[%s2283_s10 + $0x60] sm:$0xff] }
 0x47b   : > { %1128 = vmatprep.subr.bf16.mxu0 %v2307_v29  ;;  %1809 = vmatprep.subr.bf16.mxu1 %v2118_v27 }
 0x47c   : > { %1158 = vmatprep.mubr.bf16.mxu0 %v2119_v28  ;;  %1823 = vmatprep.mubr.msk.bf16.mxu1 %vm2120_vm0, %v2118_v27 }
 0x47e   : > { %1129 = vmatpush1.bf16.msra.mxu0 %v2315_v30  ;;  %1810 = vmatpush3.bf16.msra.mxu1 %v2358_v37 }
 0x47f   : > { %1130 = vmatprep.subr.bf16.mxu0 %v2322_v31  ;;  %1811 = vmatprep.subr.bf16.mxu1 %v2118_v27 }
 0x482   : > { %1131 = vmatpush1.bf16.msra.mxu0 %v2329_v32  ;;  %1812 = vmatpush3.bf16.msra.mxu1 %v2378_v40 }
 0x483   : > { %1132 = vmatprep.subr.bf16.mxu0 %v2335_v33  ;;  %1813 = vmatprep.subr.bf16.mxu1 %v2118_v27 }
 0x486   : > { %1133 = vmatpush1.bf16.msra.mxu0 %v2346_v35  ;;  %1814 = vmatpush3.bf16.msra.mxu1 %v2404_v46 }
 0x487   : > { %1134 = vmatprep.subr.bf16.mxu0 %v2352_v36  ;;  %1815 = vmatprep.subr.bf16.mxu1 %v2118_v27 }
 0x48a   : > { %1135 = vmatpush1.bf16.msra.mxu0 %v2365_v38  ;;  %1816 = vmatpush3.bf16.msra.mxu1 %v2428_v52 }
 0x48b   : > { %1136 = vmatprep.subr.bf16.mxu0 %v2371_v39  ;;  %1817 = vmatprep.subr.bf16.mxu1 %v2118_v27  ;;  %v1004_v39 = vld [vmem:[%s2283_s10 + $0x68] sm:$0xff] }
 0x48e   : > { %1137 = vmatpush1.bf16.msra.mxu0 %v2387_v43  ;;  %1818 = vmatpush3.bf16.msra.mxu1 %v2449_v57 }
 0x48f   : > { %1138 = vmatprep.subr.bf16.mxu0 %v2398_v45  ;;  %1819 = vmatprep.subr.bf16.mxu1 %v2118_v27 }
 0x492   : > { %1139 = vmatpush1.bf16.msra.mxu0 %v2415_v49  ;;  %1820 = vmatpush3.bf16.msra.mxu1 %v2461_v60 }
 0x493   : > { %1140 = vmatprep.subr.bf16.mxu0 %v2422_v51  ;;  %1821 = vmatprep.subr.bf16.mxu1 %v2118_v27 }
 0x496   : > { %1141 = vmatpush1.bf16.msra.mxu0 %v2436_v54  ;;  %1822 = vmatpush3.bf16.msra.mxu1 %v2471_v61 }
 0x497   : > { %1245 = vmatprep.subr.bf16.mxu0 %v2294_v25  ;;  %1827 = vmatprep.subr.bf16.mxu1 %v2118_v27 }
 0x54c   : > { %v1041_v29 = vpop.f32.mrb[16].mxu0  ;;  %v1082_v30 = vpop.f32.mrb[16].mxu1 }
 0x54d   : > { %v1042_v31 = vadd.f32 %v1041_v29, %v2512_v3  ;;  %v1043_v32 = vpop.f32.mrb[17].mxu0  ;;  %v1805_v33 = vpop.f32.mrb[17].mxu1  ;;  %v1083_v56 = vadd.f32 %v1082_v30, %v2520_v24 }
 0x54e   : > { %v1044_v34 = vadd.f32 %v1043_v32, %v2514_v4  ;;  %v1045_v35 = vpop.f32.mrb[18].mxu0  ;;  %v1085_v36 = vpop.f32.mrb[18].mxu1 }
 0x54f   : > { %v1088_v38 = vadd.f32 %v1042_v31, %v1003_v26  ;;  %v1046_v19 = vpop.f32.mrb[19].mxu0  ;;  %v1806_v41 = vpop.f32.mrb[19].mxu1 }
 0x550   : > { %v1095_v25 = vadd.f32 %v1044_v34, %v1004_v39  ;;  %v1124_v41 = vld [vmem:[%s2283_s10 + $0x88] sm:$0xff] }
 0x551   : > { %v1621_v42 = vmul.f32 -1.442695, %v1088_v38 }
 0x552   : > { %v1622_v47 = vmul.f32 -1.442695, %v1095_v25 }
 0x553   : > { %1989 = vpow2.f32 %v1621_v42 }
 0x554   : > { %1991 = vpow2.f32 %v1622_v47 }
 0x55d   : > { %v1990_v48 = vpop.eup %1989 }
 0x55e   : > { %v1092_v50 = vadd.f32 1.0, %v1990_v48  ;;  %v1992_v44 = vpop.eup %1991 }
 0x55f   : > { %v1099_v53 = vadd.f32 1.0, %v1992_v44 }
 0x560   : > { %1993 = vrcp.f32 %v1092_v50 }
 0x561   : > { %1995 = vrcp.f32 %v1099_v53 }
 0x56a   : > { %v1994_v58 = vpop.eup %1993 }
 0x56b   : > { %v1102_v62 = vmul.f32 %v1994_v58, %v1083_v56  ;;  %v1996_v63 = vpop.eup %1995  ;;  %v1231_v56 = vpop.permute.xlu1 %1230 }
 0x56c   : > { %v1105_v1 = vsub.f32 1.0, %v1996_v63  ;;  %v1107_v7 = vmul.f32 %v1996_v63, %v2686_v21  ;;  %vm1232_vm14 = vcmp.eq.s32.totalorder %v1231_v56, 1 }
 0x56d   : > { %v1103_v0 = vadd.f32 %v1102_v62, %v1005_v59  ;;  %v1235_v59 = vld [vmem:[%s2281_s9 + $0x28] sm:$0xff] }
 0x56f   : > { %1997 = vtanh.f32 %v1103_v0 }
 0x579   : > { %v1998_v2 = vpop.eup %1997 }
 0x57a   : > { %v1106_v5 = vmul.f32 %v1998_v2, %v1105_v1  ;;  %v2041_v2 = vld [vmem:[%s2977_s2 + $0x20] ss:$12 sps:$4 sm:$0xff]  }
 0x57c   : > { %v1108_v9 = vadd.f32 %v1107_v7, %v1106_v5  ;;  %v2043_v5 = vld [vmem:[%s2977_s2 + $0x50] ss:$12 sps:$4 sm:$0xff]   ;;  %v2044_v7 = vld [vmem:[%s2977_s2 + $0x68] ss:$12 sps:$4 sm:$0xff]  }
 0x57e   : > { %v2735_v10 = vsel %vm1113_vm13, %v1108_v9, %v2686_v21  ;;  %v1115_v11 = vsel %vm1113_vm13, %v1108_v9, 0.0  ;;  %v2793_v21 = vld [vmem:[%s2977_s2 + $0x48] ss:$12 sps:$4 sm:$0xff]   ;;  %v2046_v9 = vld [vmem:[%s2977_s2 + $0x80] ss:$12 sps:$4 sm:$0xff]  }
 0x57f   : > { %v1117_v12 = vadd.f32 %v1116_v55, %v1115_v11  ;;  %v1125_v13 = vpack.c.bf16 %v2735_v10, %v2735_v10  ;;  %v2047_v55 = vld [vmem:[%s2977_s2 + $0x94] ss:$12 sps:$4 sm:$0xff]   ;;  %v2049_v11 = vld [vmem:[%s2977_s2 + $0x98] ss:$12 sps:$4 sm:$0xff]  }
 0x581   : > { %1118 = vst [vmem:[%s2285_s11 + $0x20] sm:$0xff] %v1117_v12  ;;  %1159 = vmatmul.mubr.bf16.vlgmr.msra.gmra.mrb[20].mxu0 %v1125_v13  ;;  %1824 = vmatmul.mubr.bf16.vlgmr.msra.gmra.mrb[20].mxu1 %v1125_v13  ;;  %v2050_v12 = vld [vmem:[%s2977_s2 + $0xac] ss:$12 sps:$4 sm:$0xff]   ;;  %v2051_v13 = vld [vmem:[%s2977_s2 + $0xa8] ss:$12 sps:$4 sm:$0xff]  }
 0x582   : > { %1246 = vmatpush1.bf16.msra.mxu0 %v2743_v14  ;;  %1828 = vmatpush3.bf16.msra.mxu1 %v2749_v15 }
 0x583   : > { %1247 = vmatprep.subr.bf16.mxu0 %v2755_v17  ;;  %1829 = vmatprep.subr.bf16.mxu1 %v2118_v27 }
 0x584   : > { %1277 = vmatprep.mubr.bf16.mxu0 %v2119_v28  ;;  %1843 = vmatprep.mubr.msk.bf16.mxu1 %vm2120_vm0, %v2118_v27 }
 0x586   : > { %1248 = vmatpush1.bf16.msra.mxu0 %v2765_v18  ;;  %1830 = vmatpush3.bf16.msra.mxu1 %v2358_v37  ;;  %v2786_v37 = vld [vmem:[%s2977_s2 + $0x4c] ss:$12 sps:$4 sm:$0xff]  }
 0x587   : > { %1249 = vmatprep.subr.bf16.mxu0 %v2772_v6  ;;  %1831 = vmatprep.subr.bf16.mxu1 %v2118_v27 }
 0x58a   : > { %1250 = vmatpush1.bf16.msra.mxu0 %v2779_v20  ;;  %1832 = vmatpush3.bf16.msra.mxu1 %v2378_v40  ;;  %v2800_v40 = vld [vmem:[%s2977_s2 + $0x64] ss:$12 sps:$4 sm:$0xff]  }
 0x58b   : > { %1251 = vmatprep.subr.bf16.mxu0 %v2786_v37  ;;  %1833 = vmatprep.subr.bf16.mxu1 %v2118_v27 }
 0x58e   : > { %1252 = vmatpush1.bf16.msra.mxu0 %v2793_v21  ;;  %1834 = vmatpush3.bf16.msra.mxu1 %v2404_v46  ;;  %v2814_v46 = vld [vmem:[%s2977_s2 + $0x7c] ss:$12 sps:$4 sm:$0xff]  }
 0x58f   : > { %1253 = vmatprep.subr.bf16.mxu0 %v2800_v40  ;;  %1835 = vmatprep.subr.bf16.mxu1 %v2118_v27 }
 0x592   : > { %1254 = vmatpush1.bf16.msra.mxu0 %v2807_v16  ;;  %1836 = vmatpush3.bf16.msra.mxu1 %v2428_v52 }
 0x593   : > { %1255 = vmatprep.subr.bf16.mxu0 %v2814_v46  ;;  %1837 = vmatprep.subr.bf16.mxu1 %v2118_v27 }
 0x596   : > { %1256 = vmatpush1.bf16.msra.mxu0 %v2387_v43  ;;  %1838 = vmatpush3.bf16.msra.mxu1 %v2449_v57  ;;  %v2040_v43 = vld [vmem:[%s2977_s2 + $0x4] ss:$12 sps:$4 sm:$0xff]  }
 0x597   : > { %1257 = vmatprep.subr.bf16.mxu0 %v2398_v45  ;;  %1839 = vmatprep.subr.bf16.mxu1 %v2118_v27  ;;  %v1122_v45 = vld [vmem:[%s2283_s10 + $0x78] sm:$0xff] }
 0x59a   : > { %1258 = vmatpush1.bf16.msra.mxu0 %v2415_v49  ;;  %1840 = vmatpush3.bf16.msra.mxu1 %v2461_v60 }
 0x59b   : > { %1259 = vmatprep.subr.bf16.mxu0 %v2422_v51  ;;  %1841 = vmatprep.subr.bf16.mxu1 %v2118_v27 }
 0x59e   : > { %1260 = vmatpush1.bf16.msra.mxu0 %v2436_v54  ;;  %1842 = vmatpush3.bf16.msra.mxu1 %v2471_v61  ;;  %v1123_v61 = vld [vmem:[%s2283_s10 + $0x80] sm:$0xff] }
 0x59f   : > { %1364 = vmatprep.subr.bf16.mxu0 %v2040_v43  ;;  %1847 = vmatprep.subr.bf16.mxu1 %v2118_v27 }
 0x654   : > { %v1160_v49 = vpop.f32.mrb[20].mxu0  ;;  %v1201_v52 = vpop.f32.mrb[20].mxu1 }
 0x655   : > { %v1161_v57 = vadd.f32 %v1160_v49, %v2512_v3  ;;  %v1162_v51 = vpop.f32.mrb[21].mxu0  ;;  %v1825_v60 = vpop.f32.mrb[21].mxu1  ;;  %v1202_v39 = vadd.f32 %v1201_v52, %v2520_v24 }
 0x656   : > { %v1163_v22 = vadd.f32 %v1162_v51, %v2514_v4  ;;  %v1164_v23 = vpop.f32.mrb[22].mxu0  ;;  %v1204_v54 = vpop.f32.mrb[22].mxu1 }
 0x657   : > { %v1207_v26 = vadd.f32 %v1161_v57, %v1122_v45  ;;  %v1165_v29 = vpop.f32.mrb[23].mxu0  ;;  %v1826_v30 = vpop.f32.mrb[23].mxu1 }
 0x658   : > { %v1214_v32 = vadd.f32 %v1163_v22, %v1123_v61  ;;  %v1243_v61 = vld [vmem:[%s2283_s10 + $0xa0] sm:$0xff] }
 0x659   : > { %v1623_v31 = vmul.f32 -1.442695, %v1207_v26 }
 0x65a   : > { %v1624_v33 = vmul.f32 -1.442695, %v1214_v32 }
 0x65b   : > { %1999 = vpow2.f32 %v1623_v31 }
 0x65c   : > { %2001 = vpow2.f32 %v1624_v33 }
 0x665   : > { %v2000_v34 = vpop.eup %1999 }
 0x666   : > { %v1211_v35 = vadd.f32 1.0, %v2000_v34  ;;  %v2002_v36 = vpop.eup %2001  ;;  %v1350_v34 = vpop.permute.xlu0 %1349 }
 0x667   : > { %v1218_v38 = vadd.f32 1.0, %v2002_v36  ;;  %vm1351_vm15 = vcmp.eq.s32.totalorder %v1350_v34, 1 }
 0x668   : > { %2003 = vrcp.f32 %v1211_v35 }
 0x669   : > { %2005 = vrcp.f32 %v1218_v38 }
 0x672   : > { %v2004_v19 = vpop.eup %2003 }
 0x673   : > { %v1221_v42 = vmul.f32 %v2004_v19, %v1202_v39  ;;  %v2006_v47 = vpop.eup %2005  ;;  %v1354_v39 = vld [vmem:[%s2281_s9 + $0x30] sm:$0xff] }
 0x674   : > { %v1224_v48 = vsub.f32 1.0, %v2006_v47  ;;  %v1226_v53 = vmul.f32 %v2006_v47, %v2735_v10  ;;  %v1360_v47 = vld [vmem:[%s2283_s10 + $0xa8] sm:$0xff] }
 0x675   : > { %v1222_v25 = vadd.f32 %v1221_v42, %v1124_v41 }
 0x677   : > { %2007 = vtanh.f32 %v1222_v25 }
 0x681   : > { %v2008_v50 = vpop.eup %2007 }
 0x682   : > { %v1225_v44 = vmul.f32 %v2008_v50, %v1224_v48 }
 0x684   : > { %v1227_v58 = vadd.f32 %v1226_v53, %v1225_v44 }
 0x686   : > { %v2841_v62 = vsel %vm1232_vm14, %v1227_v58, %v2735_v10  ;;  %v1234_v0 = vsel %vm1232_vm14, %v1227_v58, 0.0  ;;  %v2048_v10 = vld [vmem:[%s2977_s2 + $0x90] ss:$12 sps:$4 sm:$0xff]  }
 0x687   : > { %v1236_v63 = vadd.f32 %v1235_v59, %v1234_v0  ;;  %v1244_v1 = vpack.c.bf16 %v2841_v62, %v2841_v62 }
 0x689   : > { %1237 = vst [vmem:[%s2285_s11 + $0x28] sm:$0xff] %v1236_v63  ;;  %1278 = vmatmul.mubr.bf16.vlgmr.msra.gmra.mrb[24].mxu0 %v1244_v1  ;;  %1844 = vmatmul.mubr.bf16.vlgmr.msra.gmra.mrb[24].mxu1 %v1244_v1 }
 0x68a   : > { %1365 = vmatpush1.bf16.msra.mxu0 %v2743_v14  ;;  %1848 = vmatpush3.bf16.msra.mxu1 %v2749_v15  ;;  %v2052_v14 = vld [vmem:[%s2977_s2 + $0xb0] ss:$12 sps:$4 sm:$0xff]  }
 0x68b   : > { %1366 = vmatprep.subr.bf16.mxu0 %v2755_v17  ;;  %1849 = vmatprep.subr.bf16.mxu1 %v2118_v27  ;;  %v1241_v15 = vld [vmem:[%s2283_s10 + $0x90] sm:$0xff] }
 0x68c   : > { %1396 = vmatprep.mubr.bf16.mxu0 %v2119_v28  ;;  %1863 = vmatprep.mubr.msk.bf16.mxu1 %vm2120_vm0, %v2118_v27  ;;  %v2042_v28 = vld [vmem:[%s2977_s2 + $0x38] ss:$12 sps:$4 sm:$0xff]  }
 0x68e   : > { %1367 = vmatpush1.bf16.msra.mxu0 %v2765_v18  ;;  %1850 = vmatpush3.bf16.msra.mxu1 %v2041_v2 }
 0x68f   : > { %1368 = vmatprep.subr.bf16.mxu0 %v2772_v6  ;;  %1851 = vmatprep.subr.bf16.mxu1 %v2118_v27 }
 0x692   : > { %1369 = vmatpush1.bf16.msra.mxu0 %v2779_v20  ;;  %1852 = vmatpush3.bf16.msra.mxu1 %v2042_v28 }
 0x693   : > { %1370 = vmatprep.subr.bf16.mxu0 %v2786_v37  ;;  %1853 = vmatprep.subr.bf16.mxu1 %v2118_v27 }
 0x696   : > { %1371 = vmatpush1.bf16.msra.mxu0 %v2793_v21  ;;  %1854 = vmatpush3.bf16.msra.mxu1 %v2043_v5 }
 0x697   : > { %1372 = vmatprep.subr.bf16.mxu0 %v2800_v40  ;;  %1855 = vmatprep.subr.bf16.mxu1 %v2118_v27 }
 0x69a   : > { %1373 = vmatpush1.bf16.msra.mxu0 %v2807_v16  ;;  %1856 = vmatpush3.bf16.msra.mxu1 %v2044_v7 }
 0x69b   : > { %1374 = vmatprep.subr.bf16.mxu0 %v2814_v46  ;;  %1857 = vmatprep.subr.bf16.mxu1 %v2118_v27  ;;  %v1242_v46 = vld [vmem:[%s2283_s10 + $0x98] sm:$0xff] }
 0x69e   : > { %1375 = vmatpush1.bf16.msra.mxu0 %v2045_v8  ;;  %1858 = vmatpush3.bf16.msra.mxu1 %v2046_v9 }
 0x69f   : > { %1376 = vmatprep.subr.bf16.mxu0 %v2047_v55  ;;  %1859 = vmatprep.subr.bf16.mxu1 %v2118_v27 }
 0x6a2   : > { %1377 = vmatpush1.bf16.msra.mxu0 %v2048_v10  ;;  %1860 = vmatpush3.bf16.msra.mxu1 %v2049_v11  ;;  %v1362_v11 = vld [vmem:[%s2283_s10 + $0xb8] sm:$0xff] }
 0x6a3   : > { %1378 = vmatprep.subr.bf16.mxu0 %v2050_v12  ;;  %1861 = vmatprep.subr.bf16.mxu1 %v2118_v27 }
 0x6a6   : > { %1379 = vmatpush1.bf16.msra.mxu0 %v2051_v13  ;;  %1862 = vmatpush3.bf16.msra.mxu1 %v2052_v14 }
 0x75c   : > { %v1279_v17 = vpop.f32.mrb[24].mxu0  ;;  %v1320_v18 = vpop.f32.mrb[24].mxu1 }
 0x75d   : > { %v1280_v6 = vadd.f32 %v1279_v17, %v2512_v3  ;;  %v1281_v20 = vpop.f32.mrb[25].mxu0  ;;  %v1845_v37 = vpop.f32.mrb[25].mxu1  ;;  %v1321_v54 = vadd.f32 %v1320_v18, %v2520_v24 }
 0x75e   : > { %v1282_v21 = vadd.f32 %v1281_v20, %v2514_v4  ;;  %v1283_v27 = vpop.f32.mrb[26].mxu0  ;;  %v1323_v40 = vpop.f32.mrb[26].mxu1 }
 0x75f   : > { %v1326_v16 = vadd.f32 %v1280_v6, %v1241_v15  ;;  %v1284_v43 = vpop.f32.mrb[27].mxu0  ;;  %v1846_v45 = vpop.f32.mrb[27].mxu1 }
 0x760   : > { %v1333_v52 = vadd.f32 %v1282_v21, %v1242_v46  ;;  %v1469_v18 = vpop.permute.xlu1 %1468 }
 0x761   : > { %v1625_v49 = vmul.f32 -1.442695, %v1326_v16  ;;  %vm1470_vm0 = vcmp.eq.s32.totalorder %v1469_v18, 1 }
 0x762   : > { %v1626_v57 = vmul.f32 -1.442695, %v1333_v52 }
 0x763   : > { %2009 = vpow2.f32 %v1625_v49 }
 0x764   : > { %2011 = vpow2.f32 %v1626_v57 }
 0x76d   : > { %v2010_v51 = vpop.eup %2009 }
 0x76e   : > { %v1330_v60 = vadd.f32 1.0, %v2010_v51  ;;  %v2012_v22 = vpop.eup %2011 }
 0x76f   : > { %v1337_v23 = vadd.f32 1.0, %v2012_v22 }
 0x770   : > { %2013 = vrcp.f32 %v1330_v60 }
 0x771   : > { %2015 = vrcp.f32 %v1337_v23 }
 0x77a   : > { %v2014_v26 = vpop.eup %2013 }
 0x77b   : > { %v1340_v29 = vmul.f32 %v2014_v26, %v1321_v54  ;;  %v2016_v31 = vpop.eup %2015 }
 0x77c   : > { %v1343_v32 = vsub.f32 1.0, %v2016_v31  ;;  %v1345_v36 = vmul.f32 %v2016_v31, %v2841_v62 }
 0x77d   : > { %v1341_v30 = vadd.f32 %v1340_v29, %v1243_v61 }
 0x77f   : > { %2017 = vtanh.f32 %v1341_v30 }
 0x789   : > { %v2018_v33 = vpop.eup %2017 }
 0x78a   : > { %v1344_v35 = vmul.f32 %v2018_v33, %v1343_v32 }
 0x78c   : > { %v1346_v38 = vadd.f32 %v1345_v36, %v1344_v35 }
 0x78e   : > { %v1352_v19 = vsel %vm1351_vm15, %v1346_v38, %v2841_v62  ;;  %v1353_v41 = vsel %vm1351_vm15, %v1346_v38, 0.0  ;;  %v1361_v62 = vld [vmem:[%s2283_s10 + $0xb0] sm:$0xff] }
 0x78f   : > { %v1355_v42 = vadd.f32 %v1354_v39, %v1353_v41  ;;  %v1363_v25 = vpack.c.bf16 %v1352_v19, %v1352_v19 }
 0x791   : > { %1356 = vst [vmem:[%s2285_s11 + $0x30] sm:$0xff] %v1355_v42  ;;  %1397 = vmatmul.mubr.bf16.vlgmr.msra.gmra.mrb[28].mxu0 %v1363_v25  ;;  %1864 = vmatmul.mubr.bf16.vlgmr.msra.gmra.mrb[28].mxu1 %v1363_v25 }
 0x864   : > { %v1398_v48 = vpop.f32.mrb[28].mxu0  ;;  %v1439_v50 = vpop.f32.mrb[28].mxu1 }
 0x865   : > { %v1399_v44 = vadd.f32 %v1398_v48, %v2512_v3  ;;  %v1400_v53 = vpop.f32.mrb[29].mxu0  ;;  %v1865_v56 = vpop.f32.mrb[29].mxu1 }
 0x866   : > { %v1401_v58 = vadd.f32 %v1400_v53, %v2514_v4  ;;  %v1402_v59 = vpop.f32.mrb[30].mxu0  ;;  %v1442_v0 = vpop.f32.mrb[30].mxu1  ;;  %v1440_v4 = vadd.f32 %v1439_v50, %v2520_v24  ;;  %v1473_v24 = vld [vmem:[%s2281_s9 + $0x38] sm:$0xff]  ;;  %s2053_s9 = scalar_lea.vmem %s2927_s28, 1024 }
 0x867   : > { %v1445_v63 = vadd.f32 %v1399_v44, %v1360_v47  ;;  %v1403_v1 = vpop.f32.mrb[31].mxu0  ;;  %v1866_v2 = vpop.f32.mrb[31].mxu1  ;;  %p2054_p1 = scmp.ne.s32.totalorder %s2927_s28, %s2053_s9  ;;  %p2061_p5 = scmp.lt.s32.totalorder %s2059_s26, %s2053_s9 }
 0x868   : > { %v1452_v5 = vadd.f32 %v1401_v58, %v1361_v62 }
 0x869   : > { %v1627_v28 = vmul.f32 -1.442695, %v1445_v63  ;;  %p2055_p2 = pnand %p2054_p1, %p2198_p6  ;;  %p2062_p7 = por %p2061_p5, %p2060_p4 }
 0x86a   : > { %v1628_v7 = vmul.f32 -1.442695, %v1452_v5 }
 0x86b   : > { %2019 = vpow2.f32 %v1627_v28  ;;  %p2056_p3 = pneg %p2055_p2 }
 0x86c   : > { %2021 = vpow2.f32 %v1628_v7 }
 0x86d   : > { %p2063_p10 = pnand %p2062_p7, %p2056_p3 }
 0x875   : > { %v2020_v8 = vpop.eup %2019 }
 0x876   : > { %v1449_v9 = vadd.f32 1.0, %v2020_v8  ;;  %v2022_v3 = vpop.eup %2021 }
 0x877   : > { %v1456_v55 = vadd.f32 1.0, %v2022_v3 }
 0x878   : > { %2023 = vrcp.f32 %v1449_v9 }
 0x879   : > { %2025 = vrcp.f32 %v1456_v55 }
 0x882   : > { %v2024_v10 = vpop.eup %2023 }
 0x883   : > { %v1459_v12 = vmul.f32 %v2024_v10, %v1440_v4  ;;  %v2026_v14 = vpop.eup %2025 }
 0x884   : > { %v1462_v15 = vsub.f32 1.0, %v2026_v14  ;;  %v1464_v20 = vmul.f32 %v2026_v14, %v1352_v19 }
 0x885   : > { %v1460_v13 = vadd.f32 %v1459_v12, %v1362_v11 }
 0x887   : > { %2027 = vtanh.f32 %v1460_v13 }
 0x891   : > { %v2028_v17 = vpop.eup %2027 }
 0x892   : > { %v1463_v6 = vmul.f32 %v2028_v17, %v1462_v15 }
 0x894   : > { %v1465_v37 = vadd.f32 %v1464_v20, %v1463_v6 }
 0x896   : > { %v1471_v21 = vsel %vm1470_vm0, %v1465_v37, %v1352_v19  ;;  %v1472_v27 = vsel %vm1470_vm0, %v1465_v37, 0.0 }
 0x897   : > { %v1474_v40 = vadd.f32 %v1473_v24, %v1472_v27  ;;  %1476 = vst [vmem:[%s2981_s6] sm:$0xff] %v1471_v21 }
 0x899   : > { %1475 = vst [vmem:[%s2285_s11 + $0x38] sm:$0xff] %v1474_v40 }
 0x89a   : > { %2066 = shalt.err (!%p2063_p10)
}
 0x89b   : > { %s2067_s11 = scalar_lea.hbm %s2925_s29, 1024  ;;  %s2071_s19 = scalar_lea.hbm %s2980_s5, 2048 }
 0x89c   : > { %p2068_p11 = scmp.ne.s32.totalorder %s2925_s29, %s2067_s11  ;;  %p2072_p0 = scmp.lt.u32.totalorder %s2925_s29, %s2980_s5 }
 0x89d   : > { %p2073_p1 = scmp.lt.u32.totalorder %s2071_s19, %s2067_s11  ;;  %p2075_p3 = scmp.lt.u32.totalorder %s2067_s11, %s2925_s29 }
 0x89e   : > { %p2069_p12 = pnand %p2068_p11, %p2198_p6 }
 0x89f   : > { %p2074_p2 = por %p2073_p1, %p2072_p0 }
 0x8a0   : > { %p2070_p13 = pneg %p2069_p12 }
 0x8a1   : > { %p2076_p4 = por %p2075_p3, %p2074_p2 }
 0x8a3   : > { %p2077_p5 = pnand %p2076_p4, %p2070_p13 }
 0x8a5   : > { %2080 = shalt.err (!%p2077_p5)
}
 0x8a6   : > { %s2122_s14 = smov 128   ;;  %s2123_s12 = smov 8  }
 0x8a7   : > { %1870 = dma.vmem_to_hbm [thread:$0]  (%p2198_p6), %s2927_s28, 1024, %s2925_s29, %s1478_s25, %s2122_s14, %s2122_s14, %s2123_s12  }
 0x8a8 PF: > { %s1512_s9 = sand.u32 1, %s2103_s21   ;;  %p1873_p7 = pnand %p1579_p9, %p2202_p8 }
 0x8a9   : > { %s1513_s15 = scalar_lea.sflag [#allocation4], %s1512_s9 }
 0x8aa   : > { %2098 = dma.done.wait (!%p1873_p7), %s1513_s15, 1024  }
 0x8ab   : > { %2100 = vsyncadd (!%p1873_p7), %s1513_s15, 4294966272  ;;  %p17_p10 = scmp.ge.s32.totalorder %s2184_s27, 4   ;;  %s2984_s21 = smov %s2107_s22 }
 0x8ac   : > { %s2985_s22 = smov %s2111_s23  ;;  %s2986_s23 = smov %s2196_s30 }
 0x8ad   : > { %s2987_s24 = smov %s2184_s27  ;;  %19 = sbr.rel (!%p17_p10) target bundleno = 3 (0x3), region = 118 }
 0x8b4   :  { %1518 = vsyncpa [#allocation4], 1 }
 0x8b5   :  { %1520 = vsyncpa [#allocation4 + $0x1], 1 }

</bundles_post_ra>
